<compile_context>
chip_gen: v6e
topology: v6e:2x2x1
jax: 0.10.0
libtpu: 0.0.40
codegen_flags: <defaults>
</compile_context>

<pallas_src>
import math
import numpy as np
import jax
import jax.numpy as jnp
from jax.experimental import pallas as pl
from jax.experimental.pallas import tpu as pltpu  # noqa: F401  (TPU backend)

# ----------------------------- model config ---------------------------------
D_MODEL = 32
N_HEADS = 4
D_K = D_MODEL // N_HEADS
D_FF = 64
N_LAYERS = 2
VOCAB = 16
EPS = 1e-6
NEG_INF = -1e9
INV_SQRT_DK = 1.0 / math.sqrt(D_K)

# TODO(synk): dropout layers are identity (eval-mode semantics); the
# `generator` submodule is never invoked by EncoderDecoder.forward so it is
# not implemented.  Embedding gather + positional-encoding add are plain-JAX
# glue (a single XLA gather) feeding the one fused Pallas kernel.


# --------------------------- in-kernel helpers -------------------------------
def _layer_norm(x, g, b):
    # Annotated-Transformer LayerNorm: unbiased std (divide by d-1), (std+eps).
    mean = jnp.mean(x, axis=-1, keepdims=True)
    diff = x - mean
    var_unb = jnp.sum(diff * diff, axis=-1, keepdims=True) * (1.0 / (D_MODEL - 1))
    std = jnp.sqrt(var_unb)
    return g * diff * pl.reciprocal(std + EPS, approx=True) + b


def _mha(q2d, k2d, v2d, mask, wo, bo):
    """Multi-head attention + output projection, fully 2-D / in-VMEM.

    q2d: (B*Sq, D), k2d/v2d: (B*Sk, D), mask: (B, Sq, Sk) float {0,1},
    wo: (D, D), bo: (1, D).  Returns (B*Sq, D).
    The head loop is unrolled; per-head Wo row-blocks are accumulated so no
    lane-concatenation / transpose is ever needed.
    """
    B, Sq, Sk = mask.shape
    rows = []
    for b in range(B):
        qb = q2d[b * Sq:(b + 1) * Sq, :]       # (Sq, D)
        kb = k2d[b * Sk:(b + 1) * Sk, :]       # (Sk, D)
        vb = v2d[b * Sk:(b + 1) * Sk, :]       # (Sk, D)
        mb = mask[b]                           # (Sq, Sk)
        acc = None
        for h in range(N_HEADS):
            sl = slice(h * D_K, (h + 1) * D_K)
            s = jnp.dot(qb[:, sl], kb[:, sl].T,
                        preferred_element_type=jnp.float32) * INV_SQRT_DK
            s = jnp.where(mb == 0.0, NEG_INF, s)
            s = s - jnp.max(s, axis=-1, keepdims=True)
            p = jnp.exp(s)
            p = p * pl.reciprocal(jnp.sum(p, axis=-1, keepdims=True), approx=True)
            oh = jnp.dot(p, vb[:, sl], preferred_element_type=jnp.float32)   # (Sq, dk)
            contrib = jnp.dot(oh, wo[sl, :], preferred_element_type=jnp.float32)
            acc = contrib if acc is None else acc + contrib
        rows.append(acc)
    out = rows[0] if len(rows) == 1 else jnp.concatenate(rows, axis=0)
    return out + bo


def _ffn(x, w1, b1, w2, b2):
    h = jnp.maximum(jnp.dot(x, w1, preferred_element_type=jnp.float32) + b1, 0.0)
    return jnp.dot(h, w2, preferred_element_type=jnp.float32) + b2


# --------------------------- the single fused kernel -------------------------
def _encdec_kernel(
    src_x_ref, tgt_x_ref,
    enc_m_ref, self_m_ref, cross_m_ref,
    # encoder layer stacks (leading dim = N_LAYERS)
    e_wqkv_ref, e_bqkv_ref, e_wo_ref, e_bo_ref,
    e_w1_ref, e_b1_ref, e_w2_ref, e_b2_ref,
    e_ln1g_ref, e_ln1b_ref, e_ln2g_ref, e_ln2b_ref,
    # decoder layer stacks
    d_wqkv_ref, d_bqkv_ref, d_wos_ref, d_bos_ref,
    d_wq_ref, d_bq_ref, d_wkv_ref, d_bkv_ref, d_woc_ref, d_boc_ref,
    d_w1_ref, d_b1_ref, d_w2_ref, d_b2_ref,
    d_ln1g_ref, d_ln1b_ref, d_ln2g_ref, d_ln2b_ref, d_ln3g_ref, d_ln3b_ref,
    # final norms
    efng_ref, efnb_ref, dfng_ref, dfnb_ref,
    # output
    o_ref,
):
    enc_mask = enc_m_ref[...]
    self_mask = self_m_ref[...]
    cross_mask = cross_m_ref[...]

    # -------------------------- encoder --------------------------
    x = src_x_ref[...]                                   # (B*Ss, D)
    for l in range(N_LAYERS):
        n1 = _layer_norm(x, e_ln1g_ref[l], e_ln1b_ref[l])
        qkv = jnp.dot(n1, e_wqkv_ref[l],
                      preferred_element_type=jnp.float32) + e_bqkv_ref[l]
        x = x + _mha(qkv[:, :D_MODEL], qkv[:, D_MODEL:2 * D_MODEL],
                     qkv[:, 2 * D_MODEL:], enc_mask, e_wo_ref[l], e_bo_ref[l])
        n2 = _layer_norm(x, e_ln2g_ref[l], e_ln2b_ref[l])
        x = x + _ffn(n2, e_w1_ref[l], e_b1_ref[l], e_w2_ref[l], e_b2_ref[l])
    memory = _layer_norm(x, efng_ref[...], efnb_ref[...])   # (B*Ss, D)

    # -------------------------- decoder --------------------------
    y = tgt_x_ref[...]                                   # (B*St, D)
    for l in range(N_LAYERS):
        # masked self-attention
        n1 = _layer_norm(y, d_ln1g_ref[l], d_ln1b_ref[l])
        qkv = jnp.dot(n1, d_wqkv_ref[l],
                      preferred_element_type=jnp.float32) + d_bqkv_ref[l]
        y = y + _mha(qkv[:, :D_MODEL], qkv[:, D_MODEL:2 * D_MODEL],
                     qkv[:, 2 * D_MODEL:], self_mask, d_wos_ref[l], d_bos_ref[l])
        # cross-attention over encoder memory (fused K|V projection)
        n2 = _layer_norm(y, d_ln2g_ref[l], d_ln2b_ref[l])
        q = jnp.dot(n2, d_wq_ref[l],
                    preferred_element_type=jnp.float32) + d_bq_ref[l]
        kv = jnp.dot(memory, d_wkv_ref[l],
                     preferred_element_type=jnp.float32) + d_bkv_ref[l]
        y = y + _mha(q, kv[:, :D_MODEL], kv[:, D_MODEL:],
                     cross_mask, d_woc_ref[l], d_boc_ref[l])
        # position-wise FFN
        n3 = _layer_norm(y, d_ln3g_ref[l], d_ln3b_ref[l])
        y = y + _ffn(n3, d_w1_ref[l], d_b1_ref[l], d_w2_ref[l], d_b2_ref[l])

    o_ref[...] = _layer_norm(y, dfng_ref[...], dfnb_ref[...])


# ------------------------------ forward (glue) --------------------------------
def positional_encoding(max_len, d_model):
    pos = np.arange(max_len)[:, None].astype(np.float32)
    div = np.exp(np.arange(0, d_model, 2).astype(np.float32)
                 * -(math.log(10000.0) / d_model))
    pe = np.zeros((max_len, d_model), dtype=np.float32)
    pe[:, 0::2] = np.sin(pos * div)
    pe[:, 1::2] = np.cos(pos * div)
    return jnp.asarray(pe)


@jax.jit
def forward(params, tgt, src, src_mask, tgt_mask):
    B, Ss = src.shape
    _, St = tgt.shape
    scale = math.sqrt(D_MODEL)

    # Embeddings(d_model, vocab): lut(x) * sqrt(d_model) + positional encoding.
    src_x = (params["src_emb"][src] * scale
             + params["pe"][None, :Ss]).reshape(B * Ss, D_MODEL)
    tgt_x = (params["tgt_emb"][tgt] * scale
             + params["pe"][None, :St]).reshape(B * St, D_MODEL)

    # Masks broadcast exactly once per forward (not per attention call).
    enc_mask = jnp.broadcast_to(src_mask, (B, Ss, Ss)).astype(jnp.float32)
    self_mask = jnp.broadcast_to(tgt_mask, (B, St, St)).astype(jnp.float32)
    cross_mask = jnp.broadcast_to(src_mask, (B, St, Ss)).astype(jnp.float32)

    e, d = params["enc"], params["dec"]
    args = (
        src_x, tgt_x, enc_mask, self_mask, cross_mask,
        e["wqkv"], e["bqkv"], e["wo"], e["bo"],
        e["w1"], e["b1"], e["w2"], e["b2"],
        e["ln1g"], e["ln1b"], e["ln2g"], e["ln2b"],
        d["wqkv"], d["bqkv"], d["wo_self"], d["bo_self"],
        d["wq"], d["bq"], d["wkv"], d["bkv"], d["wo_cross"], d["bo_cross"],
        d["w1"], d["b1"], d["w2"], d["b2"],
        d["ln1g"], d["ln1b"], d["ln2g"], d["ln2b"], d["ln3g"], d["ln3b"],
        params["enc_norm_g"], params["enc_norm_b"],
        params["dec_norm_g"], params["dec_norm_b"],
    )
    # Single fused kernel; no grid — every input is mapped whole into VMEM
    # (total weights + activations << 1 MiB on any TPU generation).
    out = pl.pallas_call(
        _encdec_kernel,
        out_shape=jax.ShapeDtypeStruct((B * St, D_MODEL), jnp.float32),
    )(*args)
    return out.reshape(B, St, D_MODEL)


# ----------------------------- params init ----------------------------------
def init_params(key):
    keys = iter(jax.random.split(key, 64))
    L = N_LAYERS

    def w(*shape):
        return jax.random.normal(next(keys), shape, jnp.float32) * 0.02

    def zeros(*shape):
        return jnp.zeros(shape, jnp.float32)

    def ones(*shape):
        return jnp.ones(shape, jnp.float32)

    enc = dict(
        wqkv=w(L, D_MODEL, 3 * D_MODEL), bqkv=zeros(L, 1, 3 * D_MODEL),
        wo=w(L, D_MODEL, D_MODEL), bo=zeros(L, 1, D_MODEL),
        w1=w(L, D_MODEL, D_FF), b1=zeros(L, 1, D_FF),
        w2=w(L, D_FF, D_MODEL), b2=zeros(L, 1, D_MODEL),
        ln1g=ones(L, 1, D_MODEL), ln1b=zeros(L, 1, D_MODEL),
        ln2g=ones(L, 1, D_MODEL), ln2b=zeros(L, 1, D_MODEL),
    )
    dec = dict(
        wqkv=w(L, D_MODEL, 3 * D_MODEL), bqkv=zeros(L, 1, 3 * D_MODEL),
        wo_self=w(L, D_MODEL, D_MODEL), bo_self=zeros(L, 1, D_MODEL),
        wq=w(L, D_MODEL, D_MODEL), bq=zeros(L, 1, D_MODEL),
        wkv=w(L, D_MODEL, 2 * D_MODEL), bkv=zeros(L, 1, 2 * D_MODEL),
        wo_cross=w(L, D_MODEL, D_MODEL), bo_cross=zeros(L, 1, D_MODEL),
        w1=w(L, D_MODEL, D_FF), b1=zeros(L, 1, D_FF),
        w2=w(L, D_FF, D_MODEL), b2=zeros(L, 1, D_MODEL),
        ln1g=ones(L, 1, D_MODEL), ln1b=zeros(L, 1, D_MODEL),
        ln2g=ones(L, 1, D_MODEL), ln2b=zeros(L, 1, D_MODEL),
        ln3g=ones(L, 1, D_MODEL), ln3b=zeros(L, 1, D_MODEL),
    )
    return dict(
        src_emb=w(VOCAB, D_MODEL),
        tgt_emb=w(VOCAB, D_MODEL),
        pe=positional_encoding(64, D_MODEL),
        enc=enc,
        dec=dec,
        enc_norm_g=ones(1, D_MODEL), enc_norm_b=zeros(1, D_MODEL),
        dec_norm_g=ones(1, D_MODEL), dec_norm_b=zeros(1, D_MODEL),
    )


# --------------------------------- main --------------------------------------
if __name__ == "__main__":
    root = jax.random.PRNGKey(0)
    k_params, k_src, k_tgt = jax.random.split(root, 3)
    params = init_params(k_params)

    B, S_SRC, S_TGT = 2, 8, 8
    src = jax.random.randint(k_src, (B, S_SRC), 0, VOCAB, dtype=jnp.int32)
    tgt = jax.random.randint(k_tgt, (B, S_TGT), 0, VOCAB, dtype=jnp.int32)
    # src_mask: (B, 1, S_src) of ones; tgt_mask: (B, S_tgt, S_tgt) causal.
    src_mask = jnp.ones((B, 1, S_SRC), jnp.float32)
    tgt_mask = jnp.broadcast_to(
        jnp.tril(jnp.ones((S_TGT, S_TGT), jnp.float32))[None], (B, S_TGT, S_TGT)
    )

    out = forward(params, tgt, src, src_mask, tgt_mask)
    out = jax.block_until_ready(out)
    assert out.shape == (B, S_TGT, D_MODEL) and out.dtype == jnp.float32
    assert bool(jnp.all(jnp.isfinite(out)))
    print("KERNEL_OK")
</pallas_src>

<mosaic_0001>
module attributes {stable_mosaic.version = 11 : i64} {
  func.func @_encdec_kernel(%arg0: memref<16x32xf32, #tpu.memory_space<vmem>>, %arg1: memref<16x32xf32, #tpu.memory_space<vmem>>, %arg2: memref<2x8x8xf32, #tpu.memory_space<vmem>>, %arg3: memref<2x8x8xf32, #tpu.memory_space<vmem>>, %arg4: memref<2x8x8xf32, #tpu.memory_space<vmem>>, %arg5: memref<2x32x96xf32, #tpu.memory_space<vmem>>, %arg6: memref<2x1x96xf32, #tpu.memory_space<vmem>>, %arg7: memref<2x32x32xf32, #tpu.memory_space<vmem>>, %arg8: memref<2x1x32xf32, #tpu.memory_space<vmem>>, %arg9: memref<2x32x64xf32, #tpu.memory_space<vmem>>, %arg10: memref<2x1x64xf32, #tpu.memory_space<vmem>>, %arg11: memref<2x64x32xf32, #tpu.memory_space<vmem>>, %arg12: memref<2x1x32xf32, #tpu.memory_space<vmem>>, %arg13: memref<2x1x32xf32, #tpu.memory_space<vmem>>, %arg14: memref<2x1x32xf32, #tpu.memory_space<vmem>>, %arg15: memref<2x1x32xf32, #tpu.memory_space<vmem>>, %arg16: memref<2x1x32xf32, #tpu.memory_space<vmem>>, %arg17: memref<2x32x96xf32, #tpu.memory_space<vmem>>, %arg18: memref<2x1x96xf32, #tpu.memory_space<vmem>>, %arg19: memref<2x32x32xf32, #tpu.memory_space<vmem>>, %arg20: memref<2x1x32xf32, #tpu.memory_space<vmem>>, %arg21: memref<2x32x32xf32, #tpu.memory_space<vmem>>, %arg22: memref<2x1x32xf32, #tpu.memory_space<vmem>>, %arg23: memref<2x32x64xf32, #tpu.memory_space<vmem>>, %arg24: memref<2x1x64xf32, #tpu.memory_space<vmem>>, %arg25: memref<2x32x32xf32, #tpu.memory_space<vmem>>, %arg26: memref<2x1x32xf32, #tpu.memory_space<vmem>>, %arg27: memref<2x32x64xf32, #tpu.memory_space<vmem>>, %arg28: memref<2x1x64xf32, #tpu.memory_space<vmem>>, %arg29: memref<2x64x32xf32, #tpu.memory_space<vmem>>, %arg30: memref<2x1x32xf32, #tpu.memory_space<vmem>>, %arg31: memref<2x1x32xf32, #tpu.memory_space<vmem>>, %arg32: memref<2x1x32xf32, #tpu.memory_space<vmem>>, %arg33: memref<2x1x32xf32, #tpu.memory_space<vmem>>, %arg34: memref<2x1x32xf32, #tpu.memory_space<vmem>>, %arg35: memref<2x1x32xf32, #tpu.memory_space<vmem>>, %arg36: memref<2x1x32xf32, #tpu.memory_space<vmem>>, %arg37: memref<1x32xf32, #tpu.memory_space<vmem>>, %arg38: memref<1x32xf32, #tpu.memory_space<vmem>>, %arg39: memref<1x32xf32, #tpu.memory_space<vmem>>, %arg40: memref<1x32xf32, #tpu.memory_space<vmem>>, %arg41: memref<16x32xf32, #tpu.memory_space<vmem>>) attributes {dimension_semantics = [], scalar_prefetch = 0 : i64, scratch_operands = 0 : i64, tpu.core_type = #tpu.core_type<tc>} {
    %c0 = arith.constant 0 : index
    %c0_0 = arith.constant 0 : index
    %c0_1 = arith.constant 0 : index
    %0 = vector.load %arg2[%c0, %c0_0, %c0_1] : memref<2x8x8xf32, #tpu.memory_space<vmem>>, vector<2x8x8xf32>
    %c0_2 = arith.constant 0 : index
    %c0_3 = arith.constant 0 : index
    %c0_4 = arith.constant 0 : index
    %1 = vector.load %arg3[%c0_2, %c0_3, %c0_4] : memref<2x8x8xf32, #tpu.memory_space<vmem>>, vector<2x8x8xf32>
    %c0_5 = arith.constant 0 : index
    %c0_6 = arith.constant 0 : index
    %c0_7 = arith.constant 0 : index
    %2 = vector.load %arg4[%c0_5, %c0_6, %c0_7] : memref<2x8x8xf32, #tpu.memory_space<vmem>>, vector<2x8x8xf32>
    %c0_8 = arith.constant 0 : index
    %c0_9 = arith.constant 0 : index
    %3 = vector.load %arg0[%c0_8, %c0_9] : memref<16x32xf32, #tpu.memory_space<vmem>>, vector<16x32xf32>
    %c0_10 = arith.constant 0 : index
    %c0_11 = arith.constant 0 : index
    %c0_12 = arith.constant 0 : index
    %4 = vector.load %arg13[%c0_10, %c0_11, %c0_12] : memref<2x1x32xf32, #tpu.memory_space<vmem>>, vector<1x1x32xf32>
    %5 = vector.shape_cast %4 : vector<1x1x32xf32> to vector<1x32xf32>
    %c0_13 = arith.constant 0 : index
    %c0_14 = arith.constant 0 : index
    %c0_15 = arith.constant 0 : index
    %6 = vector.load %arg14[%c0_13, %c0_14, %c0_15] : memref<2x1x32xf32, #tpu.memory_space<vmem>>, vector<1x1x32xf32>
    %7 = vector.shape_cast %6 : vector<1x1x32xf32> to vector<1x32xf32>
    %cst = arith.constant dense<0.000000e+00> : vector<16xf32>
    %8 = vector.multi_reduction <add>, %3, %cst [1] : vector<16x32xf32> to vector<16xf32>
    %9 = vector.shape_cast %8 : vector<16xf32> to vector<16x1xf32>
    %cst_16 = arith.constant 3.200000e+01 : f32
    %10 = vector.broadcast %cst_16 : f32 to vector<16x1xf32>
    %11 = arith.divf %9, %10 : vector<16x1xf32>
    %12 = vector.broadcast %11 : vector<16x1xf32> to vector<16x32xf32>
    %13 = arith.subf %3, %12 : vector<16x32xf32>
    %14 = arith.mulf %13, %13 : vector<16x32xf32>
    %cst_17 = arith.constant dense<0.000000e+00> : vector<16xf32>
    %15 = vector.multi_reduction <add>, %14, %cst_17 [1] : vector<16x32xf32> to vector<16xf32>
    %16 = vector.shape_cast %15 : vector<16xf32> to vector<16x1xf32>
    %cst_18 = arith.constant 0.0322580636 : f32
    %17 = vector.broadcast %cst_18 : f32 to vector<16x1xf32>
    %18 = arith.mulf %16, %17 : vector<16x1xf32>
    %19 = math.sqrt %18 : vector<16x1xf32>
    %20 = vector.broadcast %5 : vector<1x32xf32> to vector<16x32xf32>
    %21 = arith.mulf %20, %13 : vector<16x32xf32>
    %cst_19 = arith.constant 9.99999997E-7 : f32
    %22 = vector.broadcast %cst_19 : f32 to vector<16x1xf32>
    %23 = arith.addf %19, %22 : vector<16x1xf32>
    %24 = tpu.reciprocal %23 {approx = true} : vector<16x1xf32> -> vector<16x1xf32>
    %25 = vector.broadcast %24 : vector<16x1xf32> to vector<16x32xf32>
    %26 = arith.mulf %21, %25 : vector<16x32xf32>
    %27 = vector.broadcast %7 : vector<1x32xf32> to vector<16x32xf32>
    %28 = arith.addf %26, %27 : vector<16x32xf32>
    %c0_20 = arith.constant 0 : index
    %c0_21 = arith.constant 0 : index
    %c0_22 = arith.constant 0 : index
    %29 = vector.load %arg5[%c0_20, %c0_21, %c0_22] : memref<2x32x96xf32, #tpu.memory_space<vmem>>, vector<1x32x96xf32>
    %30 = vector.shape_cast %29 : vector<1x32x96xf32> to vector<32x96xf32>
    %cst_23 = arith.constant dense<0.000000e+00> : vector<16x96xf32>
    %31 = tpu.matmul %28, %30, %cst_23 {dimension_numbers = #tpu.dot_dimension_numbers<[1], [0], [0], [1], [0, 0, 1, 1], [], []>} : vector<16x32xf32>, vector<32x96xf32>, vector<16x96xf32> -> vector<16x96xf32>
    %c0_24 = arith.constant 0 : index
    %c0_25 = arith.constant 0 : index
    %c0_26 = arith.constant 0 : index
    %32 = vector.load %arg6[%c0_24, %c0_25, %c0_26] : memref<2x1x96xf32, #tpu.memory_space<vmem>>, vector<1x1x96xf32>
    %33 = vector.shape_cast %32 : vector<1x1x96xf32> to vector<1x96xf32>
    %34 = vector.broadcast %33 : vector<1x96xf32> to vector<16x96xf32>
    %35 = arith.addf %31, %34 : vector<16x96xf32>
    %36 = vector.extract_strided_slice %35 {offsets = [0, 0], sizes = [16, 32], strides = [1, 1]} : vector<16x96xf32> to vector<16x32xf32>
    %37 = vector.extract_strided_slice %35 {offsets = [0, 32], sizes = [16, 32], strides = [1, 1]} : vector<16x96xf32> to vector<16x32xf32>
    %38 = vector.extract_strided_slice %35 {offsets = [0, 64], sizes = [16, 32], strides = [1, 1]} : vector<16x96xf32> to vector<16x32xf32>
    %c0_27 = arith.constant 0 : index
    %c0_28 = arith.constant 0 : index
    %c0_29 = arith.constant 0 : index
    %39 = vector.load %arg7[%c0_27, %c0_28, %c0_29] : memref<2x32x32xf32, #tpu.memory_space<vmem>>, vector<1x32x32xf32>
    %40 = vector.shape_cast %39 : vector<1x32x32xf32> to vector<32x32xf32>
    %c0_30 = arith.constant 0 : index
    %c0_31 = arith.constant 0 : index
    %c0_32 = arith.constant 0 : index
    %41 = vector.load %arg8[%c0_30, %c0_31, %c0_32] : memref<2x1x32xf32, #tpu.memory_space<vmem>>, vector<1x1x32xf32>
    %42 = vector.shape_cast %41 : vector<1x1x32xf32> to vector<1x32xf32>
    %43 = vector.extract_strided_slice %36 {offsets = [0, 0], sizes = [8, 32], strides = [1, 1]} : vector<16x32xf32> to vector<8x32xf32>
    %44 = vector.extract_strided_slice %37 {offsets = [0, 0], sizes = [8, 32], strides = [1, 1]} : vector<16x32xf32> to vector<8x32xf32>
    %45 = vector.extract_strided_slice %38 {offsets = [0, 0], sizes = [8, 32], strides = [1, 1]} : vector<16x32xf32> to vector<8x32xf32>
    %46 = vector.extract_strided_slice %0 {offsets = [0, 0, 0], sizes = [1, 8, 8], strides = [1, 1, 1]} : vector<2x8x8xf32> to vector<1x8x8xf32>
    %47 = vector.shape_cast %46 : vector<1x8x8xf32> to vector<8x8xf32>
    %48 = vector.extract_strided_slice %43 {offsets = [0, 0], sizes = [8, 8], strides = [1, 1]} : vector<8x32xf32> to vector<8x8xf32>
    %49 = vector.extract_strided_slice %44 {offsets = [0, 0], sizes = [8, 8], strides = [1, 1]} : vector<8x32xf32> to vector<8x8xf32>
    %50 = tpu.transpose %49, [1, 0] : vector<8x8xf32> -> vector<8x8xf32>
    %cst_33 = arith.constant dense<0.000000e+00> : vector<8x8xf32>
    %51 = tpu.matmul %48, %50, %cst_33 {dimension_numbers = #tpu.dot_dimension_numbers<[1], [0], [0], [1], [0, 0, 1, 1], [], []>} : vector<8x8xf32>, vector<8x8xf32>, vector<8x8xf32> -> vector<8x8xf32>
    %cst_34 = arith.constant 0.353553385 : f32
    %52 = vector.broadcast %cst_34 : f32 to vector<8x8xf32>
    %53 = arith.mulf %51, %52 : vector<8x8xf32>
    %cst_35 = arith.constant 0.000000e+00 : f32
    %54 = vector.broadcast %cst_35 : f32 to vector<8x8xf32>
    %55 = arith.cmpf oeq, %47, %54 : vector<8x8xf32>
    %cst_36 = arith.constant -1.000000e+09 : f32
    %56 = vector.broadcast %cst_36 : f32 to vector<8x8xf32>
    %57 = arith.select %55, %56, %53 : vector<8x8xi1>, vector<8x8xf32>
    %cst_37 = arith.constant dense<0xFF800000> : vector<8xf32>
    %58 = vector.multi_reduction <maximumf>, %57, %cst_37 [1] : vector<8x8xf32> to vector<8xf32>
    %59 = vector.shape_cast %58 : vector<8xf32> to vector<8x1xf32>
    %60 = vector.broadcast %59 : vector<8x1xf32> to vector<8x8xf32>
    %61 = arith.subf %57, %60 : vector<8x8xf32>
    %62 = math.exp %61 : vector<8x8xf32>
    %cst_38 = arith.constant dense<0.000000e+00> : vector<8xf32>
    %63 = vector.multi_reduction <add>, %62, %cst_38 [1] : vector<8x8xf32> to vector<8xf32>
    %64 = vector.shape_cast %63 : vector<8xf32> to vector<8x1xf32>
    %65 = tpu.reciprocal %64 {approx = true} : vector<8x1xf32> -> vector<8x1xf32>
    %66 = vector.broadcast %65 : vector<8x1xf32> to vector<8x8xf32>
    %67 = arith.mulf %62, %66 : vector<8x8xf32>
    %68 = vector.extract_strided_slice %45 {offsets = [0, 0], sizes = [8, 8], strides = [1, 1]} : vector<8x32xf32> to vector<8x8xf32>
    %cst_39 = arith.constant dense<0.000000e+00> : vector<8x8xf32>
    %69 = tpu.matmul %67, %68, %cst_39 {dimension_numbers = #tpu.dot_dimension_numbers<[1], [0], [0], [1], [0, 0, 1, 1], [], []>} : vector<8x8xf32>, vector<8x8xf32>, vector<8x8xf32> -> vector<8x8xf32>
    %70 = vector.extract_strided_slice %40 {offsets = [0, 0], sizes = [8, 32], strides = [1, 1]} : vector<32x32xf32> to vector<8x32xf32>
    %cst_40 = arith.constant dense<0.000000e+00> : vector<8x32xf32>
    %71 = tpu.matmul %69, %70, %cst_40 {dimension_numbers = #tpu.dot_dimension_numbers<[1], [0], [0], [1], [0, 0, 1, 1], [], []>} : vector<8x8xf32>, vector<8x32xf32>, vector<8x32xf32> -> vector<8x32xf32>
    %72 = vector.extract_strided_slice %43 {offsets = [0, 8], sizes = [8, 8], strides = [1, 1]} : vector<8x32xf32> to vector<8x8xf32>
    %73 = vector.extract_strided_slice %44 {offsets = [0, 8], sizes = [8, 8], strides = [1, 1]} : vector<8x32xf32> to vector<8x8xf32>
    %74 = tpu.transpose %73, [1, 0] : vector<8x8xf32> -> vector<8x8xf32>
    %cst_41 = arith.constant dense<0.000000e+00> : vector<8x8xf32>
    %75 = tpu.matmul %72, %74, %cst_41 {dimension_numbers = #tpu.dot_dimension_numbers<[1], [0], [0], [1], [0, 0, 1, 1], [], []>} : vector<8x8xf32>, vector<8x8xf32>, vector<8x8xf32> -> vector<8x8xf32>
    %cst_42 = arith.constant 0.353553385 : f32
    %76 = vector.broadcast %cst_42 : f32 to vector<8x8xf32>
    %77 = arith.mulf %75, %76 : vector<8x8xf32>
    %cst_43 = arith.constant 0.000000e+00 : f32
    %78 = vector.broadcast %cst_43 : f32 to vector<8x8xf32>
    %79 = arith.cmpf oeq, %47, %78 : vector<8x8xf32>
    %cst_44 = arith.constant -1.000000e+09 : f32
    %80 = vector.broadcast %cst_44 : f32 to vector<8x8xf32>
    %81 = arith.select %79, %80, %77 : vector<8x8xi1>, vector<8x8xf32>
    %cst_45 = arith.constant dense<0xFF800000> : vector<8xf32>
    %82 = vector.multi_reduction <maximumf>, %81, %cst_45 [1] : vector<8x8xf32> to vector<8xf32>
    %83 = vector.shape_cast %82 : vector<8xf32> to vector<8x1xf32>
    %84 = vector.broadcast %83 : vector<8x1xf32> to vector<8x8xf32>
    %85 = arith.subf %81, %84 : vector<8x8xf32>
    %86 = math.exp %85 : vector<8x8xf32>
    %cst_46 = arith.constant dense<0.000000e+00> : vector<8xf32>
    %87 = vector.multi_reduction <add>, %86, %cst_46 [1] : vector<8x8xf32> to vector<8xf32>
    %88 = vector.shape_cast %87 : vector<8xf32> to vector<8x1xf32>
    %89 = tpu.reciprocal %88 {approx = true} : vector<8x1xf32> -> vector<8x1xf32>
    %90 = vector.broadcast %89 : vector<8x1xf32> to vector<8x8xf32>
    %91 = arith.mulf %86, %90 : vector<8x8xf32>
    %92 = vector.extract_strided_slice %45 {offsets = [0, 8], sizes = [8, 8], strides = [1, 1]} : vector<8x32xf32> to vector<8x8xf32>
    %cst_47 = arith.constant dense<0.000000e+00> : vector<8x8xf32>
    %93 = tpu.matmul %91, %92, %cst_47 {dimension_numbers = #tpu.dot_dimension_numbers<[1], [0], [0], [1], [0, 0, 1, 1], [], []>} : vector<8x8xf32>, vector<8x8xf32>, vector<8x8xf32> -> vector<8x8xf32>
    %94 = vector.extract_strided_slice %40 {offsets = [8, 0], sizes = [8, 32], strides = [1, 1]} : vector<32x32xf32> to vector<8x32xf32>
    %cst_48 = arith.constant dense<0.000000e+00> : vector<8x32xf32>
    %95 = tpu.matmul %93, %94, %cst_48 {dimension_numbers = #tpu.dot_dimension_numbers<[1], [0], [0], [1], [0, 0, 1, 1], [], []>} : vector<8x8xf32>, vector<8x32xf32>, vector<8x32xf32> -> vector<8x32xf32>
    %96 = arith.addf %71, %95 : vector<8x32xf32>
    %97 = vector.extract_strided_slice %43 {offsets = [0, 16], sizes = [8, 8], strides = [1, 1]} : vector<8x32xf32> to vector<8x8xf32>
    %98 = vector.extract_strided_slice %44 {offsets = [0, 16], sizes = [8, 8], strides = [1, 1]} : vector<8x32xf32> to vector<8x8xf32>
    %99 = tpu.transpose %98, [1, 0] : vector<8x8xf32> -> vector<8x8xf32>
    %cst_49 = arith.constant dense<0.000000e+00> : vector<8x8xf32>
    %100 = tpu.matmul %97, %99, %cst_49 {dimension_numbers = #tpu.dot_dimension_numbers<[1], [0], [0], [1], [0, 0, 1, 1], [], []>} : vector<8x8xf32>, vector<8x8xf32>, vector<8x8xf32> -> vector<8x8xf32>
    %cst_50 = arith.constant 0.353553385 : f32
    %101 = vector.broadcast %cst_50 : f32 to vector<8x8xf32>
    %102 = arith.mulf %100, %101 : vector<8x8xf32>
    %cst_51 = arith.constant 0.000000e+00 : f32
    %103 = vector.broadcast %cst_51 : f32 to vector<8x8xf32>
    %104 = arith.cmpf oeq, %47, %103 : vector<8x8xf32>
    %cst_52 = arith.constant -1.000000e+09 : f32
    %105 = vector.broadcast %cst_52 : f32 to vector<8x8xf32>
    %106 = arith.select %104, %105, %102 : vector<8x8xi1>, vector<8x8xf32>
    %cst_53 = arith.constant dense<0xFF800000> : vector<8xf32>
    %107 = vector.multi_reduction <maximumf>, %106, %cst_53 [1] : vector<8x8xf32> to vector<8xf32>
    %108 = vector.shape_cast %107 : vector<8xf32> to vector<8x1xf32>
    %109 = vector.broadcast %108 : vector<8x1xf32> to vector<8x8xf32>
    %110 = arith.subf %106, %109 : vector<8x8xf32>
    %111 = math.exp %110 : vector<8x8xf32>
    %cst_54 = arith.constant dense<0.000000e+00> : vector<8xf32>
    %112 = vector.multi_reduction <add>, %111, %cst_54 [1] : vector<8x8xf32> to vector<8xf32>
    %113 = vector.shape_cast %112 : vector<8xf32> to vector<8x1xf32>
    %114 = tpu.reciprocal %113 {approx = true} : vector<8x1xf32> -> vector<8x1xf32>
    %115 = vector.broadcast %114 : vector<8x1xf32> to vector<8x8xf32>
    %116 = arith.mulf %111, %115 : vector<8x8xf32>
    %117 = vector.extract_strided_slice %45 {offsets = [0, 16], sizes = [8, 8], strides = [1, 1]} : vector<8x32xf32> to vector<8x8xf32>
    %cst_55 = arith.constant dense<0.000000e+00> : vector<8x8xf32>
    %118 = tpu.matmul %116, %117, %cst_55 {dimension_numbers = #tpu.dot_dimension_numbers<[1], [0], [0], [1], [0, 0, 1, 1], [], []>} : vector<8x8xf32>, vector<8x8xf32>, vector<8x8xf32> -> vector<8x8xf32>
    %119 = vector.extract_strided_slice %40 {offsets = [16, 0], sizes = [8, 32], strides = [1, 1]} : vector<32x32xf32> to vector<8x32xf32>
    %cst_56 = arith.constant dense<0.000000e+00> : vector<8x32xf32>
    %120 = tpu.matmul %118, %119, %cst_56 {dimension_numbers = #tpu.dot_dimension_numbers<[1], [0], [0], [1], [0, 0, 1, 1], [], []>} : vector<8x8xf32>, vector<8x32xf32>, vector<8x32xf32> -> vector<8x32xf32>
    %121 = arith.addf %96, %120 : vector<8x32xf32>
    %122 = vector.extract_strided_slice %43 {offsets = [0, 24], sizes = [8, 8], strides = [1, 1]} : vector<8x32xf32> to vector<8x8xf32>
    %123 = vector.extract_strided_slice %44 {offsets = [0, 24], sizes = [8, 8], strides = [1, 1]} : vector<8x32xf32> to vector<8x8xf32>
    %124 = tpu.transpose %123, [1, 0] : vector<8x8xf32> -> vector<8x8xf32>
    %cst_57 = arith.constant dense<0.000000e+00> : vector<8x8xf32>
    %125 = tpu.matmul %122, %124, %cst_57 {dimension_numbers = #tpu.dot_dimension_numbers<[1], [0], [0], [1], [0, 0, 1, 1], [], []>} : vector<8x8xf32>, vector<8x8xf32>, vector<8x8xf32> -> vector<8x8xf32>
    %cst_58 = arith.constant 0.353553385 : f32
    %126 = vector.broadcast %cst_58 : f32 to vector<8x8xf32>
    %127 = arith.mulf %125, %126 : vector<8x8xf32>
    %cst_59 = arith.constant 0.000000e+00 : f32
    %128 = vector.broadcast %cst_59 : f32 to vector<8x8xf32>
    %129 = arith.cmpf oeq, %47, %128 : vector<8x8xf32>
    %cst_60 = arith.constant -1.000000e+09 : f32
    %130 = vector.broadcast %cst_60 : f32 to vector<8x8xf32>
    %131 = arith.select %129, %130, %127 : vector<8x8xi1>, vector<8x8xf32>
    %cst_61 = arith.constant dense<0xFF800000> : vector<8xf32>
    %132 = vector.multi_reduction <maximumf>, %131, %cst_61 [1] : vector<8x8xf32> to vector<8xf32>
    %133 = vector.shape_cast %132 : vector<8xf32> to vector<8x1xf32>
    %134 = vector.broadcast %133 : vector<8x1xf32> to vector<8x8xf32>
    %135 = arith.subf %131, %134 : vector<8x8xf32>
    %136 = math.exp %135 : vector<8x8xf32>
    %cst_62 = arith.constant dense<0.000000e+00> : vector<8xf32>
    %137 = vector.multi_reduction <add>, %136, %cst_62 [1] : vector<8x8xf32> to vector<8xf32>
    %138 = vector.shape_cast %137 : vector<8xf32> to vector<8x1xf32>
    %139 = tpu.reciprocal %138 {approx = true} : vector<8x1xf32> -> vector<8x1xf32>
    %140 = vector.broadcast %139 : vector<8x1xf32> to vector<8x8xf32>
    %141 = arith.mulf %136, %140 : vector<8x8xf32>
    %142 = vector.extract_strided_slice %45 {offsets = [0, 24], sizes = [8, 8], strides = [1, 1]} : vector<8x32xf32> to vector<8x8xf32>
    %cst_63 = arith.constant dense<0.000000e+00> : vector<8x8xf32>
    %143 = tpu.matmul %141, %142, %cst_63 {dimension_numbers = #tpu.dot_dimension_numbers<[1], [0], [0], [1], [0, 0, 1, 1], [], []>} : vector<8x8xf32>, vector<8x8xf32>, vector<8x8xf32> -> vector<8x8xf32>
    %144 = vector.extract_strided_slice %40 {offsets = [24, 0], sizes = [8, 32], strides = [1, 1]} : vector<32x32xf32> to vector<8x32xf32>
    %cst_64 = arith.constant dense<0.000000e+00> : vector<8x32xf32>
    %145 = tpu.matmul %143, %144, %cst_64 {dimension_numbers = #tpu.dot_dimension_numbers<[1], [0], [0], [1], [0, 0, 1, 1], [], []>} : vector<8x8xf32>, vector<8x32xf32>, vector<8x32xf32> -> vector<8x32xf32>
    %146 = arith.addf %121, %145 : vector<8x32xf32>
    %147 = vector.extract_strided_slice %36 {offsets = [8, 0], sizes = [8, 32], strides = [1, 1]} : vector<16x32xf32> to vector<8x32xf32>
    %148 = vector.extract_strided_slice %37 {offsets = [8, 0], sizes = [8, 32], strides = [1, 1]} : vector<16x32xf32> to vector<8x32xf32>
    %149 = vector.extract_strided_slice %38 {offsets = [8, 0], sizes = [8, 32], strides = [1, 1]} : vector<16x32xf32> to vector<8x32xf32>
    %150 = vector.extract_strided_slice %0 {offsets = [1, 0, 0], sizes = [1, 8, 8], strides = [1, 1, 1]} : vector<2x8x8xf32> to vector<1x8x8xf32>
    %151 = vector.shape_cast %150 : vector<1x8x8xf32> to vector<8x8xf32>
    %152 = vector.extract_strided_slice %147 {offsets = [0, 0], sizes = [8, 8], strides = [1, 1]} : vector<8x32xf32> to vector<8x8xf32>
    %153 = vector.extract_strided_slice %148 {offsets = [0, 0], sizes = [8, 8], strides = [1, 1]} : vector<8x32xf32> to vector<8x8xf32>
    %154 = tpu.transpose %153, [1, 0] : vector<8x8xf32> -> vector<8x8xf32>
    %cst_65 = arith.constant dense<0.000000e+00> : vector<8x8xf32>
    %155 = tpu.matmul %152, %154, %cst_65 {dimension_numbers = #tpu.dot_dimension_numbers<[1], [0], [0], [1], [0, 0, 1, 1], [], []>} : vector<8x8xf32>, vector<8x8xf32>, vector<8x8xf32> -> vector<8x8xf32>
    %cst_66 = arith.constant 0.353553385 : f32
    %156 = vector.broadcast %cst_66 : f32 to vector<8x8xf32>
    %157 = arith.mulf %155, %156 : vector<8x8xf32>
    %cst_67 = arith.constant 0.000000e+00 : f32
    %158 = vector.broadcast %cst_67 : f32 to vector<8x8xf32>
    %159 = arith.cmpf oeq, %151, %158 : vector<8x8xf32>
    %cst_68 = arith.constant -1.000000e+09 : f32
    %160 = vector.broadcast %cst_68 : f32 to vector<8x8xf32>
    %161 = arith.select %159, %160, %157 : vector<8x8xi1>, vector<8x8xf32>
    %cst_69 = arith.constant dense<0xFF800000> : vector<8xf32>
    %162 = vector.multi_reduction <maximumf>, %161, %cst_69 [1] : vector<8x8xf32> to vector<8xf32>
    %163 = vector.shape_cast %162 : vector<8xf32> to vector<8x1xf32>
    %164 = vector.broadcast %163 : vector<8x1xf32> to vector<8x8xf32>
    %165 = arith.subf %161, %164 : vector<8x8xf32>
    %166 = math.exp %165 : vector<8x8xf32>
    %cst_70 = arith.constant dense<0.000000e+00> : vector<8xf32>
    %167 = vector.multi_reduction <add>, %166, %cst_70 [1] : vector<8x8xf32> to vector<8xf32>
    %168 = vector.shape_cast %167 : vector<8xf32> to vector<8x1xf32>
    %169 = tpu.reciprocal %168 {approx = true} : vector<8x1xf32> -> vector<8x1xf32>
    %170 = vector.broadcast %169 : vector<8x1xf32> to vector<8x8xf32>
    %171 = arith.mulf %166, %170 : vector<8x8xf32>
    %172 = vector.extract_strided_slice %149 {offsets = [0, 0], sizes = [8, 8], strides = [1, 1]} : vector<8x32xf32> to vector<8x8xf32>
    %cst_71 = arith.constant dense<0.000000e+00> : vector<8x8xf32>
    %173 = tpu.matmul %171, %172, %cst_71 {dimension_numbers = #tpu.dot_dimension_numbers<[1], [0], [0], [1], [0, 0, 1, 1], [], []>} : vector<8x8xf32>, vector<8x8xf32>, vector<8x8xf32> -> vector<8x8xf32>
    %174 = vector.extract_strided_slice %40 {offsets = [0, 0], sizes = [8, 32], strides = [1, 1]} : vector<32x32xf32> to vector<8x32xf32>
    %cst_72 = arith.constant dense<0.000000e+00> : vector<8x32xf32>
    %175 = tpu.matmul %173, %174, %cst_72 {dimension_numbers = #tpu.dot_dimension_numbers<[1], [0], [0], [1], [0, 0, 1, 1], [], []>} : vector<8x8xf32>, vector<8x32xf32>, vector<8x32xf32> -> vector<8x32xf32>
    %176 = vector.extract_strided_slice %147 {offsets = [0, 8], sizes = [8, 8], strides = [1, 1]} : vector<8x32xf32> to vector<8x8xf32>
    %177 = vector.extract_strided_slice %148 {offsets = [0, 8], sizes = [8, 8], strides = [1, 1]} : vector<8x32xf32> to vector<8x8xf32>
    %178 = tpu.transpose %177, [1, 0] : vector<8x8xf32> -> vector<8x8xf32>
    %cst_73 = arith.constant dense<0.000000e+00> : vector<8x8xf32>
    %179 = tpu.matmul %176, %178, %cst_73 {dimension_numbers = #tpu.dot_dimension_numbers<[1], [0], [0], [1], [0, 0, 1, 1], [], []>} : vector<8x8xf32>, vector<8x8xf32>, vector<8x8xf32> -> vector<8x8xf32>
    %cst_74 = arith.constant 0.353553385 : f32
    %180 = vector.broadcast %cst_74 : f32 to vector<8x8xf32>
    %181 = arith.mulf %179, %180 : vector<8x8xf32>
    %cst_75 = arith.constant 0.000000e+00 : f32
    %182 = vector.broadcast %cst_75 : f32 to vector<8x8xf32>
    %183 = arith.cmpf oeq, %151, %182 : vector<8x8xf32>
    %cst_76 = arith.constant -1.000000e+09 : f32
    %184 = vector.broadcast %cst_76 : f32 to vector<8x8xf32>
    %185 = arith.select %183, %184, %181 : vector<8x8xi1>, vector<8x8xf32>
    %cst_77 = arith.constant dense<0xFF800000> : vector<8xf32>
    %186 = vector.multi_reduction <maximumf>, %185, %cst_77 [1] : vector<8x8xf32> to vector<8xf32>
    %187 = vector.shape_cast %186 : vector<8xf32> to vector<8x1xf32>
    %188 = vector.broadcast %187 : vector<8x1xf32> to vector<8x8xf32>
    %189 = arith.subf %185, %188 : vector<8x8xf32>
    %190 = math.exp %189 : vector<8x8xf32>
    %cst_78 = arith.constant dense<0.000000e+00> : vector<8xf32>
    %191 = vector.multi_reduction <add>, %190, %cst_78 [1] : vector<8x8xf32> to vector<8xf32>
    %192 = vector.shape_cast %191 : vector<8xf32> to vector<8x1xf32>
    %193 = tpu.reciprocal %192 {approx = true} : vector<8x1xf32> -> vector<8x1xf32>
    %194 = vector.broadcast %193 : vector<8x1xf32> to vector<8x8xf32>
    %195 = arith.mulf %190, %194 : vector<8x8xf32>
    %196 = vector.extract_strided_slice %149 {offsets = [0, 8], sizes = [8, 8], strides = [1, 1]} : vector<8x32xf32> to vector<8x8xf32>
    %cst_79 = arith.constant dense<0.000000e+00> : vector<8x8xf32>
    %197 = tpu.matmul %195, %196, %cst_79 {dimension_numbers = #tpu.dot_dimension_numbers<[1], [0], [0], [1], [0, 0, 1, 1], [], []>} : vector<8x8xf32>, vector<8x8xf32>, vector<8x8xf32> -> vector<8x8xf32>
    %198 = vector.extract_strided_slice %40 {offsets = [8, 0], sizes = [8, 32], strides = [1, 1]} : vector<32x32xf32> to vector<8x32xf32>
    %cst_80 = arith.constant dense<0.000000e+00> : vector<8x32xf32>
    %199 = tpu.matmul %197, %198, %cst_80 {dimension_numbers = #tpu.dot_dimension_numbers<[1], [0], [0], [1], [0, 0, 1, 1], [], []>} : vector<8x8xf32>, vector<8x32xf32>, vector<8x32xf32> -> vector<8x32xf32>
    %200 = arith.addf %175, %199 : vector<8x32xf32>
    %201 = vector.extract_strided_slice %147 {offsets = [0, 16], sizes = [8, 8], strides = [1, 1]} : vector<8x32xf32> to vector<8x8xf32>
    %202 = vector.extract_strided_slice %148 {offsets = [0, 16], sizes = [8, 8], strides = [1, 1]} : vector<8x32xf32> to vector<8x8xf32>
    %203 = tpu.transpose %202, [1, 0] : vector<8x8xf32> -> vector<8x8xf32>
    %cst_81 = arith.constant dense<0.000000e+00> : vector<8x8xf32>
    %204 = tpu.matmul %201, %203, %cst_81 {dimension_numbers = #tpu.dot_dimension_numbers<[1], [0], [0], [1], [0, 0, 1, 1], [], []>} : vector<8x8xf32>, vector<8x8xf32>, vector<8x8xf32> -> vector<8x8xf32>
    %cst_82 = arith.constant 0.353553385 : f32
    %205 = vector.broadcast %cst_82 : f32 to vector<8x8xf32>
    %206 = arith.mulf %204, %205 : vector<8x8xf32>
    %cst_83 = arith.constant 0.000000e+00 : f32
    %207 = vector.broadcast %cst_83 : f32 to vector<8x8xf32>
    %208 = arith.cmpf oeq, %151, %207 : vector<8x8xf32>
    %cst_84 = arith.constant -1.000000e+09 : f32
    %209 = vector.broadcast %cst_84 : f32 to vector<8x8xf32>
    %210 = arith.select %208, %209, %206 : vector<8x8xi1>, vector<8x8xf32>
    %cst_85 = arith.constant dense<0xFF800000> : vector<8xf32>
    %211 = vector.multi_reduction <maximumf>, %210, %cst_85 [1] : vector<8x8xf32> to vector<8xf32>
    %212 = vector.shape_cast %211 : vector<8xf32> to vector<8x1xf32>
    %213 = vector.broadcast %212 : vector<8x1xf32> to vector<8x8xf32>
    %214 = arith.subf %210, %213 : vector<8x8xf32>
    %215 = math.exp %214 : vector<8x8xf32>
    %cst_86 = arith.constant dense<0.000000e+00> : vector<8xf32>
    %216 = vector.multi_reduction <add>, %215, %cst_86 [1] : vector<8x8xf32> to vector<8xf32>
    %217 = vector.shape_cast %216 : vector<8xf32> to vector<8x1xf32>
    %218 = tpu.reciprocal %217 {approx = true} : vector<8x1xf32> -> vector<8x1xf32>
    %219 = vector.broadcast %218 : vector<8x1xf32> to vector<8x8xf32>
    %220 = arith.mulf %215, %219 : vector<8x8xf32>
    %221 = vector.extract_strided_slice %149 {offsets = [0, 16], sizes = [8, 8], strides = [1, 1]} : vector<8x32xf32> to vector<8x8xf32>
    %cst_87 = arith.constant dense<0.000000e+00> : vector<8x8xf32>
    %222 = tpu.matmul %220, %221, %cst_87 {dimension_numbers = #tpu.dot_dimension_numbers<[1], [0], [0], [1], [0, 0, 1, 1], [], []>} : vector<8x8xf32>, vector<8x8xf32>, vector<8x8xf32> -> vector<8x8xf32>
    %223 = vector.extract_strided_slice %40 {offsets = [16, 0], sizes = [8, 32], strides = [1, 1]} : vector<32x32xf32> to vector<8x32xf32>
    %cst_88 = arith.constant dense<0.000000e+00> : vector<8x32xf32>
    %224 = tpu.matmul %222, %223, %cst_88 {dimension_numbers = #tpu.dot_dimension_numbers<[1], [0], [0], [1], [0, 0, 1, 1], [], []>} : vector<8x8xf32>, vector<8x32xf32>, vector<8x32xf32> -> vector<8x32xf32>
    %225 = arith.addf %200, %224 : vector<8x32xf32>
    %226 = vector.extract_strided_slice %147 {offsets = [0, 24], sizes = [8, 8], strides = [1, 1]} : vector<8x32xf32> to vector<8x8xf32>
    %227 = vector.extract_strided_slice %148 {offsets = [0, 24], sizes = [8, 8], strides = [1, 1]} : vector<8x32xf32> to vector<8x8xf32>
    %228 = tpu.transpose %227, [1, 0] : vector<8x8xf32> -> vector<8x8xf32>
    %cst_89 = arith.constant dense<0.000000e+00> : vector<8x8xf32>
    %229 = tpu.matmul %226, %228, %cst_89 {dimension_numbers = #tpu.dot_dimension_numbers<[1], [0], [0], [1], [0, 0, 1, 1], [], []>} : vector<8x8xf32>, vector<8x8xf32>, vector<8x8xf32> -> vector<8x8xf32>
    %cst_90 = arith.constant 0.353553385 : f32
    %230 = vector.broadcast %cst_90 : f32 to vector<8x8xf32>
    %231 = arith.mulf %229, %230 : vector<8x8xf32>
    %cst_91 = arith.constant 0.000000e+00 : f32
    %232 = vector.broadcast %cst_91 : f32 to vector<8x8xf32>
    %233 = arith.cmpf oeq, %151, %232 : vector<8x8xf32>
    %cst_92 = arith.constant -1.000000e+09 : f32
    %234 = vector.broadcast %cst_92 : f32 to vector<8x8xf32>
    %235 = arith.select %233, %234, %231 : vector<8x8xi1>, vector<8x8xf32>
    %cst_93 = arith.constant dense<0xFF800000> : vector<8xf32>
    %236 = vector.multi_reduction <maximumf>, %235, %cst_93 [1] : vector<8x8xf32> to vector<8xf32>
    %237 = vector.shape_cast %236 : vector<8xf32> to vector<8x1xf32>
    %238 = vector.broadcast %237 : vector<8x1xf32> to vector<8x8xf32>
    %239 = arith.subf %235, %238 : vector<8x8xf32>
    %240 = math.exp %239 : vector<8x8xf32>
    %cst_94 = arith.constant dense<0.000000e+00> : vector<8xf32>
    %241 = vector.multi_reduction <add>, %240, %cst_94 [1] : vector<8x8xf32> to vector<8xf32>
    %242 = vector.shape_cast %241 : vector<8xf32> to vector<8x1xf32>
    %243 = tpu.reciprocal %242 {approx = true} : vector<8x1xf32> -> vector<8x1xf32>
    %244 = vector.broadcast %243 : vector<8x1xf32> to vector<8x8xf32>
    %245 = arith.mulf %240, %244 : vector<8x8xf32>
    %246 = vector.extract_strided_slice %149 {offsets = [0, 24], sizes = [8, 8], strides = [1, 1]} : vector<8x32xf32> to vector<8x8xf32>
    %cst_95 = arith.constant dense<0.000000e+00> : vector<8x8xf32>
    %247 = tpu.matmul %245, %246, %cst_95 {dimension_numbers = #tpu.dot_dimension_numbers<[1], [0], [0], [1], [0, 0, 1, 1], [], []>} : vector<8x8xf32>, vector<8x8xf32>, vector<8x8xf32> -> vector<8x8xf32>
    %248 = vector.extract_strided_slice %40 {offsets = [24, 0], sizes = [8, 32], strides = [1, 1]} : vector<32x32xf32> to vector<8x32xf32>
    %cst_96 = arith.constant dense<0.000000e+00> : vector<8x32xf32>
    %249 = tpu.matmul %247, %248, %cst_96 {dimension_numbers = #tpu.dot_dimension_numbers<[1], [0], [0], [1], [0, 0, 1, 1], [], []>} : vector<8x8xf32>, vector<8x32xf32>, vector<8x32xf32> -> vector<8x32xf32>
    %250 = arith.addf %225, %249 : vector<8x32xf32>
    %251 = tpu.concatenate %146, %250 in 0 : vector<8x32xf32>, vector<8x32xf32> -> vector<16x32xf32>
    %252 = vector.broadcast %42 : vector<1x32xf32> to vector<16x32xf32>
    %253 = arith.addf %251, %252 : vector<16x32xf32>
    %254 = arith.addf %3, %253 : vector<16x32xf32>
    %c0_97 = arith.constant 0 : index
    %c0_98 = arith.constant 0 : index
    %c0_99 = arith.constant 0 : index
    %255 = vector.load %arg15[%c0_97, %c0_98, %c0_99] : memref<2x1x32xf32, #tpu.memory_space<vmem>>, vector<1x1x32xf32>
    %256 = vector.shape_cast %255 : vector<1x1x32xf32> to vector<1x32xf32>
    %c0_100 = arith.constant 0 : index
    %c0_101 = arith.constant 0 : index
    %c0_102 = arith.constant 0 : index
    %257 = vector.load %arg16[%c0_100, %c0_101, %c0_102] : memref<2x1x32xf32, #tpu.memory_space<vmem>>, vector<1x1x32xf32>
    %258 = vector.shape_cast %257 : vector<1x1x32xf32> to vector<1x32xf32>
    %cst_103 = arith.constant dense<0.000000e+00> : vector<16xf32>
    %259 = vector.multi_reduction <add>, %254, %cst_103 [1] : vector<16x32xf32> to vector<16xf32>
    %260 = vector.shape_cast %259 : vector<16xf32> to vector<16x1xf32>
    %cst_104 = arith.constant 3.200000e+01 : f32
    %261 = vector.broadcast %cst_104 : f32 to vector<16x1xf32>
    %262 = arith.divf %260, %261 : vector<16x1xf32>
    %263 = vector.broadcast %262 : vector<16x1xf32> to vector<16x32xf32>
    %264 = arith.subf %254, %263 : vector<16x32xf32>
    %265 = arith.mulf %264, %264 : vector<16x32xf32>
    %cst_105 = arith.constant dense<0.000000e+00> : vector<16xf32>
    %266 = vector.multi_reduction <add>, %265, %cst_105 [1] : vector<16x32xf32> to vector<16xf32>
    %267 = vector.shape_cast %266 : vector<16xf32> to vector<16x1xf32>
    %cst_106 = arith.constant 0.0322580636 : f32
    %268 = vector.broadcast %cst_106 : f32 to vector<16x1xf32>
    %269 = arith.mulf %267, %268 : vector<16x1xf32>
    %270 = math.sqrt %269 : vector<16x1xf32>
    %271 = vector.broadcast %256 : vector<1x32xf32> to vector<16x32xf32>
    %272 = arith.mulf %271, %264 : vector<16x32xf32>
    %cst_107 = arith.constant 9.99999997E-7 : f32
    %273 = vector.broadcast %cst_107 : f32 to vector<16x1xf32>
    %274 = arith.addf %270, %273 : vector<16x1xf32>
    %275 = tpu.reciprocal %274 {approx = true} : vector<16x1xf32> -> vector<16x1xf32>
    %276 = vector.broadcast %275 : vector<16x1xf32> to vector<16x32xf32>
    %277 = arith.mulf %272, %276 : vector<16x32xf32>
    %278 = vector.broadcast %258 : vector<1x32xf32> to vector<16x32xf32>
    %279 = arith.addf %277, %278 : vector<16x32xf32>
    %c0_108 = arith.constant 0 : index
    %c0_109 = arith.constant 0 : index
    %c0_110 = arith.constant 0 : index
    %280 = vector.load %arg9[%c0_108, %c0_109, %c0_110] : memref<2x32x64xf32, #tpu.memory_space<vmem>>, vector<1x32x64xf32>
    %281 = vector.shape_cast %280 : vector<1x32x64xf32> to vector<32x64xf32>
    %c0_111 = arith.constant 0 : index
    %c0_112 = arith.constant 0 : index
    %c0_113 = arith.constant 0 : index
    %282 = vector.load %arg10[%c0_111, %c0_112, %c0_113] : memref<2x1x64xf32, #tpu.memory_space<vmem>>, vector<1x1x64xf32>
    %283 = vector.shape_cast %282 : vector<1x1x64xf32> to vector<1x64xf32>
    %c0_114 = arith.constant 0 : index
    %c0_115 = arith.constant 0 : index
    %c0_116 = arith.constant 0 : index
    %284 = vector.load %arg11[%c0_114, %c0_115, %c0_116] : memref<2x64x32xf32, #tpu.memory_space<vmem>>, vector<1x64x32xf32>
    %285 = vector.shape_cast %284 : vector<1x64x32xf32> to vector<64x32xf32>
    %c0_117 = arith.constant 0 : index
    %c0_118 = arith.constant 0 : index
    %c0_119 = arith.constant 0 : index
    %286 = vector.load %arg12[%c0_117, %c0_118, %c0_119] : memref<2x1x32xf32, #tpu.memory_space<vmem>>, vector<1x1x32xf32>
    %287 = vector.shape_cast %286 : vector<1x1x32xf32> to vector<1x32xf32>
    %cst_120 = arith.constant dense<0.000000e+00> : vector<16x64xf32>
    %288 = tpu.matmul %279, %281, %cst_120 {dimension_numbers = #tpu.dot_dimension_numbers<[1], [0], [0], [1], [0, 0, 1, 1], [], []>} : vector<16x32xf32>, vector<32x64xf32>, vector<16x64xf32> -> vector<16x64xf32>
    %289 = vector.broadcast %283 : vector<1x64xf32> to vector<16x64xf32>
    %290 = arith.addf %288, %289 : vector<16x64xf32>
    %cst_121 = arith.constant 0.000000e+00 : f32
    %291 = vector.broadcast %cst_121 : f32 to vector<16x64xf32>
    %292 = arith.maximumf %290, %291 : vector<16x64xf32>
    %cst_122 = arith.constant dense<0.000000e+00> : vector<16x32xf32>
    %293 = tpu.matmul %292, %285, %cst_122 {dimension_numbers = #tpu.dot_dimension_numbers<[1], [0], [0], [1], [0, 0, 1, 1], [], []>} : vector<16x64xf32>, vector<64x32xf32>, vector<16x32xf32> -> vector<16x32xf32>
    %294 = vector.broadcast %287 : vector<1x32xf32> to vector<16x32xf32>
    %295 = arith.addf %293, %294 : vector<16x32xf32>
    %296 = arith.addf %254, %295 : vector<16x32xf32>
    %c1 = arith.constant 1 : index
    %c0_123 = arith.constant 0 : index
    %c0_124 = arith.constant 0 : index
    %297 = vector.load %arg13[%c1, %c0_123, %c0_124] : memref<2x1x32xf32, #tpu.memory_space<vmem>>, vector<1x1x32xf32>
    %298 = vector.shape_cast %297 : vector<1x1x32xf32> to vector<1x32xf32>
    %c1_125 = arith.constant 1 : index
    %c0_126 = arith.constant 0 : index
    %c0_127 = arith.constant 0 : index
    %299 = vector.load %arg14[%c1_125, %c0_126, %c0_127] : memref<2x1x32xf32, #tpu.memory_space<vmem>>, vector<1x1x32xf32>
    %300 = vector.shape_cast %299 : vector<1x1x32xf32> to vector<1x32xf32>
    %cst_128 = arith.constant dense<0.000000e+00> : vector<16xf32>
    %301 = vector.multi_reduction <add>, %296, %cst_128 [1] : vector<16x32xf32> to vector<16xf32>
    %302 = vector.shape_cast %301 : vector<16xf32> to vector<16x1xf32>
    %cst_129 = arith.constant 3.200000e+01 : f32
    %303 = vector.broadcast %cst_129 : f32 to vector<16x1xf32>
    %304 = arith.divf %302, %303 : vector<16x1xf32>
    %305 = vector.broadcast %304 : vector<16x1xf32> to vector<16x32xf32>
    %306 = arith.subf %296, %305 : vector<16x32xf32>
    %307 = arith.mulf %306, %306 : vector<16x32xf32>
    %cst_130 = arith.constant dense<0.000000e+00> : vector<16xf32>
    %308 = vector.multi_reduction <add>, %307, %cst_130 [1] : vector<16x32xf32> to vector<16xf32>
    %309 = vector.shape_cast %308 : vector<16xf32> to vector<16x1xf32>
    %cst_131 = arith.constant 0.0322580636 : f32
    %310 = vector.broadcast %cst_131 : f32 to vector<16x1xf32>
    %311 = arith.mulf %309, %310 : vector<16x1xf32>
    %312 = math.sqrt %311 : vector<16x1xf32>
    %313 = vector.broadcast %298 : vector<1x32xf32> to vector<16x32xf32>
    %314 = arith.mulf %313, %306 : vector<16x32xf32>
    %cst_132 = arith.constant 9.99999997E-7 : f32
    %315 = vector.broadcast %cst_132 : f32 to vector<16x1xf32>
    %316 = arith.addf %312, %315 : vector<16x1xf32>
    %317 = tpu.reciprocal %316 {approx = true} : vector<16x1xf32> -> vector<16x1xf32>
    %318 = vector.broadcast %317 : vector<16x1xf32> to vector<16x32xf32>
    %319 = arith.mulf %314, %318 : vector<16x32xf32>
    %320 = vector.broadcast %300 : vector<1x32xf32> to vector<16x32xf32>
    %321 = arith.addf %319, %320 : vector<16x32xf32>
    %c1_133 = arith.constant 1 : index
    %c0_134 = arith.constant 0 : index
    %c0_135 = arith.constant 0 : index
    %322 = vector.load %arg5[%c1_133, %c0_134, %c0_135] : memref<2x32x96xf32, #tpu.memory_space<vmem>>, vector<1x32x96xf32>
    %323 = vector.shape_cast %322 : vector<1x32x96xf32> to vector<32x96xf32>
    %cst_136 = arith.constant dense<0.000000e+00> : vector<16x96xf32>
    %324 = tpu.matmul %321, %323, %cst_136 {dimension_numbers = #tpu.dot_dimension_numbers<[1], [0], [0], [1], [0, 0, 1, 1], [], []>} : vector<16x32xf32>, vector<32x96xf32>, vector<16x96xf32> -> vector<16x96xf32>
    %c1_137 = arith.constant 1 : index
    %c0_138 = arith.constant 0 : index
    %c0_139 = arith.constant 0 : index
    %325 = vector.load %arg6[%c1_137, %c0_138, %c0_139] : memref<2x1x96xf32, #tpu.memory_space<vmem>>, vector<1x1x96xf32>
    %326 = vector.shape_cast %325 : vector<1x1x96xf32> to vector<1x96xf32>
    %327 = vector.broadcast %326 : vector<1x96xf32> to vector<16x96xf32>
    %328 = arith.addf %324, %327 : vector<16x96xf32>
    %329 = vector.extract_strided_slice %328 {offsets = [0, 0], sizes = [16, 32], strides = [1, 1]} : vector<16x96xf32> to vector<16x32xf32>
    %330 = vector.extract_strided_slice %328 {offsets = [0, 32], sizes = [16, 32], strides = [1, 1]} : vector<16x96xf32> to vector<16x32xf32>
    %331 = vector.extract_strided_slice %328 {offsets = [0, 64], sizes = [16, 32], strides = [1, 1]} : vector<16x96xf32> to vector<16x32xf32>
    %c1_140 = arith.constant 1 : index
    %c0_141 = arith.constant 0 : index
    %c0_142 = arith.constant 0 : index
    %332 = vector.load %arg7[%c1_140, %c0_141, %c0_142] : memref<2x32x32xf32, #tpu.memory_space<vmem>>, vector<1x32x32xf32>
    %333 = vector.shape_cast %332 : vector<1x32x32xf32> to vector<32x32xf32>
    %c1_143 = arith.constant 1 : index
    %c0_144 = arith.constant 0 : index
    %c0_145 = arith.constant 0 : index
    %334 = vector.load %arg8[%c1_143, %c0_144, %c0_145] : memref<2x1x32xf32, #tpu.memory_space<vmem>>, vector<1x1x32xf32>
    %335 = vector.shape_cast %334 : vector<1x1x32xf32> to vector<1x32xf32>
    %336 = vector.extract_strided_slice %329 {offsets = [0, 0], sizes = [8, 32], strides = [1, 1]} : vector<16x32xf32> to vector<8x32xf32>
    %337 = vector.extract_strided_slice %330 {offsets = [0, 0], sizes = [8, 32], strides = [1, 1]} : vector<16x32xf32> to vector<8x32xf32>
    %338 = vector.extract_strided_slice %331 {offsets = [0, 0], sizes = [8, 32], strides = [1, 1]} : vector<16x32xf32> to vector<8x32xf32>
    %339 = vector.extract_strided_slice %0 {offsets = [0, 0, 0], sizes = [1, 8, 8], strides = [1, 1, 1]} : vector<2x8x8xf32> to vector<1x8x8xf32>
    %340 = vector.shape_cast %339 : vector<1x8x8xf32> to vector<8x8xf32>
    %341 = vector.extract_strided_slice %336 {offsets = [0, 0], sizes = [8, 8], strides = [1, 1]} : vector<8x32xf32> to vector<8x8xf32>
    %342 = vector.extract_strided_slice %337 {offsets = [0, 0], sizes = [8, 8], strides = [1, 1]} : vector<8x32xf32> to vector<8x8xf32>
    %343 = tpu.transpose %342, [1, 0] : vector<8x8xf32> -> vector<8x8xf32>
    %cst_146 = arith.constant dense<0.000000e+00> : vector<8x8xf32>
    %344 = tpu.matmul %341, %343, %cst_146 {dimension_numbers = #tpu.dot_dimension_numbers<[1], [0], [0], [1], [0, 0, 1, 1], [], []>} : vector<8x8xf32>, vector<8x8xf32>, vector<8x8xf32> -> vector<8x8xf32>
    %cst_147 = arith.constant 0.353553385 : f32
    %345 = vector.broadcast %cst_147 : f32 to vector<8x8xf32>
    %346 = arith.mulf %344, %345 : vector<8x8xf32>
    %cst_148 = arith.constant 0.000000e+00 : f32
    %347 = vector.broadcast %cst_148 : f32 to vector<8x8xf32>
    %348 = arith.cmpf oeq, %340, %347 : vector<8x8xf32>
    %cst_149 = arith.constant -1.000000e+09 : f32
    %349 = vector.broadcast %cst_149 : f32 to vector<8x8xf32>
    %350 = arith.select %348, %349, %346 : vector<8x8xi1>, vector<8x8xf32>
    %cst_150 = arith.constant dense<0xFF800000> : vector<8xf32>
    %351 = vector.multi_reduction <maximumf>, %350, %cst_150 [1] : vector<8x8xf32> to vector<8xf32>
    %352 = vector.shape_cast %351 : vector<8xf32> to vector<8x1xf32>
    %353 = vector.broadcast %352 : vector<8x1xf32> to vector<8x8xf32>
    %354 = arith.subf %350, %353 : vector<8x8xf32>
    %355 = math.exp %354 : vector<8x8xf32>
    %cst_151 = arith.constant dense<0.000000e+00> : vector<8xf32>
    %356 = vector.multi_reduction <add>, %355, %cst_151 [1] : vector<8x8xf32> to vector<8xf32>
    %357 = vector.shape_cast %356 : vector<8xf32> to vector<8x1xf32>
    %358 = tpu.reciprocal %357 {approx = true} : vector<8x1xf32> -> vector<8x1xf32>
    %359 = vector.broadcast %358 : vector<8x1xf32> to vector<8x8xf32>
    %360 = arith.mulf %355, %359 : vector<8x8xf32>
    %361 = vector.extract_strided_slice %338 {offsets = [0, 0], sizes = [8, 8], strides = [1, 1]} : vector<8x32xf32> to vector<8x8xf32>
    %cst_152 = arith.constant dense<0.000000e+00> : vector<8x8xf32>
    %362 = tpu.matmul %360, %361, %cst_152 {dimension_numbers = #tpu.dot_dimension_numbers<[1], [0], [0], [1], [0, 0, 1, 1], [], []>} : vector<8x8xf32>, vector<8x8xf32>, vector<8x8xf32> -> vector<8x8xf32>
    %363 = vector.extract_strided_slice %333 {offsets = [0, 0], sizes = [8, 32], strides = [1, 1]} : vector<32x32xf32> to vector<8x32xf32>
    %cst_153 = arith.constant dense<0.000000e+00> : vector<8x32xf32>
    %364 = tpu.matmul %362, %363, %cst_153 {dimension_numbers = #tpu.dot_dimension_numbers<[1], [0], [0], [1], [0, 0, 1, 1], [], []>} : vector<8x8xf32>, vector<8x32xf32>, vector<8x32xf32> -> vector<8x32xf32>
    %365 = vector.extract_strided_slice %336 {offsets = [0, 8], sizes = [8, 8], strides = [1, 1]} : vector<8x32xf32> to vector<8x8xf32>
    %366 = vector.extract_strided_slice %337 {offsets = [0, 8], sizes = [8, 8], strides = [1, 1]} : vector<8x32xf32> to vector<8x8xf32>
    %367 = tpu.transpose %366, [1, 0] : vector<8x8xf32> -> vector<8x8xf32>
    %cst_154 = arith.constant dense<0.000000e+00> : vector<8x8xf32>
    %368 = tpu.matmul %365, %367, %cst_154 {dimension_numbers = #tpu.dot_dimension_numbers<[1], [0], [0], [1], [0, 0, 1, 1], [], []>} : vector<8x8xf32>, vector<8x8xf32>, vector<8x8xf32> -> vector<8x8xf32>
    %cst_155 = arith.constant 0.353553385 : f32
    %369 = vector.broadcast %cst_155 : f32 to vector<8x8xf32>
    %370 = arith.mulf %368, %369 : vector<8x8xf32>
    %cst_156 = arith.constant 0.000000e+00 : f32
    %371 = vector.broadcast %cst_156 : f32 to vector<8x8xf32>
    %372 = arith.cmpf oeq, %340, %371 : vector<8x8xf32>
    %cst_157 = arith.constant -1.000000e+09 : f32
    %373 = vector.broadcast %cst_157 : f32 to vector<8x8xf32>
    %374 = arith.select %372, %373, %370 : vector<8x8xi1>, vector<8x8xf32>
    %cst_158 = arith.constant dense<0xFF800000> : vector<8xf32>
    %375 = vector.multi_reduction <maximumf>, %374, %cst_158 [1] : vector<8x8xf32> to vector<8xf32>
    %376 = vector.shape_cast %375 : vector<8xf32> to vector<8x1xf32>
    %377 = vector.broadcast %376 : vector<8x1xf32> to vector<8x8xf32>
    %378 = arith.subf %374, %377 : vector<8x8xf32>
    %379 = math.exp %378 : vector<8x8xf32>
    %cst_159 = arith.constant dense<0.000000e+00> : vector<8xf32>
    %380 = vector.multi_reduction <add>, %379, %cst_159 [1] : vector<8x8xf32> to vector<8xf32>
    %381 = vector.shape_cast %380 : vector<8xf32> to vector<8x1xf32>
    %382 = tpu.reciprocal %381 {approx = true} : vector<8x1xf32> -> vector<8x1xf32>
    %383 = vector.broadcast %382 : vector<8x1xf32> to vector<8x8xf32>
    %384 = arith.mulf %379, %383 : vector<8x8xf32>
    %385 = vector.extract_strided_slice %338 {offsets = [0, 8], sizes = [8, 8], strides = [1, 1]} : vector<8x32xf32> to vector<8x8xf32>
    %cst_160 = arith.constant dense<0.000000e+00> : vector<8x8xf32>
    %386 = tpu.matmul %384, %385, %cst_160 {dimension_numbers = #tpu.dot_dimension_numbers<[1], [0], [0], [1], [0, 0, 1, 1], [], []>} : vector<8x8xf32>, vector<8x8xf32>, vector<8x8xf32> -> vector<8x8xf32>
    %387 = vector.extract_strided_slice %333 {offsets = [8, 0], sizes = [8, 32], strides = [1, 1]} : vector<32x32xf32> to vector<8x32xf32>
    %cst_161 = arith.constant dense<0.000000e+00> : vector<8x32xf32>
    %388 = tpu.matmul %386, %387, %cst_161 {dimension_numbers = #tpu.dot_dimension_numbers<[1], [0], [0], [1], [0, 0, 1, 1], [], []>} : vector<8x8xf32>, vector<8x32xf32>, vector<8x32xf32> -> vector<8x32xf32>
    %389 = arith.addf %364, %388 : vector<8x32xf32>
    %390 = vector.extract_strided_slice %336 {offsets = [0, 16], sizes = [8, 8], strides = [1, 1]} : vector<8x32xf32> to vector<8x8xf32>
    %391 = vector.extract_strided_slice %337 {offsets = [0, 16], sizes = [8, 8], strides = [1, 1]} : vector<8x32xf32> to vector<8x8xf32>
    %392 = tpu.transpose %391, [1, 0] : vector<8x8xf32> -> vector<8x8xf32>
    %cst_162 = arith.constant dense<0.000000e+00> : vector<8x8xf32>
    %393 = tpu.matmul %390, %392, %cst_162 {dimension_numbers = #tpu.dot_dimension_numbers<[1], [0], [0], [1], [0, 0, 1, 1], [], []>} : vector<8x8xf32>, vector<8x8xf32>, vector<8x8xf32> -> vector<8x8xf32>
    %cst_163 = arith.constant 0.353553385 : f32
    %394 = vector.broadcast %cst_163 : f32 to vector<8x8xf32>
    %395 = arith.mulf %393, %394 : vector<8x8xf32>
    %cst_164 = arith.constant 0.000000e+00 : f32
    %396 = vector.broadcast %cst_164 : f32 to vector<8x8xf32>
    %397 = arith.cmpf oeq, %340, %396 : vector<8x8xf32>
    %cst_165 = arith.constant -1.000000e+09 : f32
    %398 = vector.broadcast %cst_165 : f32 to vector<8x8xf32>
    %399 = arith.select %397, %398, %395 : vector<8x8xi1>, vector<8x8xf32>
    %cst_166 = arith.constant dense<0xFF800000> : vector<8xf32>
    %400 = vector.multi_reduction <maximumf>, %399, %cst_166 [1] : vector<8x8xf32> to vector<8xf32>
    %401 = vector.shape_cast %400 : vector<8xf32> to vector<8x1xf32>
    %402 = vector.broadcast %401 : vector<8x1xf32> to vector<8x8xf32>
    %403 = arith.subf %399, %402 : vector<8x8xf32>
    %404 = math.exp %403 : vector<8x8xf32>
    %cst_167 = arith.constant dense<0.000000e+00> : vector<8xf32>
    %405 = vector.multi_reduction <add>, %404, %cst_167 [1] : vector<8x8xf32> to vector<8xf32>
    %406 = vector.shape_cast %405 : vector<8xf32> to vector<8x1xf32>
    %407 = tpu.reciprocal %406 {approx = true} : vector<8x1xf32> -> vector<8x1xf32>
    %408 = vector.broadcast %407 : vector<8x1xf32> to vector<8x8xf32>
    %409 = arith.mulf %404, %408 : vector<8x8xf32>
    %410 = vector.extract_strided_slice %338 {offsets = [0, 16], sizes = [8, 8], strides = [1, 1]} : vector<8x32xf32> to vector<8x8xf32>
    %cst_168 = arith.constant dense<0.000000e+00> : vector<8x8xf32>
    %411 = tpu.matmul %409, %410, %cst_168 {dimension_numbers = #tpu.dot_dimension_numbers<[1], [0], [0], [1], [0, 0, 1, 1], [], []>} : vector<8x8xf32>, vector<8x8xf32>, vector<8x8xf32> -> vector<8x8xf32>
    %412 = vector.extract_strided_slice %333 {offsets = [16, 0], sizes = [8, 32], strides = [1, 1]} : vector<32x32xf32> to vector<8x32xf32>
    %cst_169 = arith.constant dense<0.000000e+00> : vector<8x32xf32>
    %413 = tpu.matmul %411, %412, %cst_169 {dimension_numbers = #tpu.dot_dimension_numbers<[1], [0], [0], [1], [0, 0, 1, 1], [], []>} : vector<8x8xf32>, vector<8x32xf32>, vector<8x32xf32> -> vector<8x32xf32>
    %414 = arith.addf %389, %413 : vector<8x32xf32>
    %415 = vector.extract_strided_slice %336 {offsets = [0, 24], sizes = [8, 8], strides = [1, 1]} : vector<8x32xf32> to vector<8x8xf32>
    %416 = vector.extract_strided_slice %337 {offsets = [0, 24], sizes = [8, 8], strides = [1, 1]} : vector<8x32xf32> to vector<8x8xf32>
    %417 = tpu.transpose %416, [1, 0] : vector<8x8xf32> -> vector<8x8xf32>
    %cst_170 = arith.constant dense<0.000000e+00> : vector<8x8xf32>
    %418 = tpu.matmul %415, %417, %cst_170 {dimension_numbers = #tpu.dot_dimension_numbers<[1], [0], [0], [1], [0, 0, 1, 1], [], []>} : vector<8x8xf32>, vector<8x8xf32>, vector<8x8xf32> -> vector<8x8xf32>
    %cst_171 = arith.constant 0.353553385 : f32
    %419 = vector.broadcast %cst_171 : f32 to vector<8x8xf32>
    %420 = arith.mulf %418, %419 : vector<8x8xf32>
    %cst_172 = arith.constant 0.000000e+00 : f32
    %421 = vector.broadcast %cst_172 : f32 to vector<8x8xf32>
    %422 = arith.cmpf oeq, %340, %421 : vector<8x8xf32>
    %cst_173 = arith.constant -1.000000e+09 : f32
    %423 = vector.broadcast %cst_173 : f32 to vector<8x8xf32>
    %424 = arith.select %422, %423, %420 : vector<8x8xi1>, vector<8x8xf32>
    %cst_174 = arith.constant dense<0xFF800000> : vector<8xf32>
    %425 = vector.multi_reduction <maximumf>, %424, %cst_174 [1] : vector<8x8xf32> to vector<8xf32>
    %426 = vector.shape_cast %425 : vector<8xf32> to vector<8x1xf32>
    %427 = vector.broadcast %426 : vector<8x1xf32> to vector<8x8xf32>
    %428 = arith.subf %424, %427 : vector<8x8xf32>
    %429 = math.exp %428 : vector<8x8xf32>
    %cst_175 = arith.constant dense<0.000000e+00> : vector<8xf32>
    %430 = vector.multi_reduction <add>, %429, %cst_175 [1] : vector<8x8xf32> to vector<8xf32>
    %431 = vector.shape_cast %430 : vector<8xf32> to vector<8x1xf32>
    %432 = tpu.reciprocal %431 {approx = true} : vector<8x1xf32> -> vector<8x1xf32>
    %433 = vector.broadcast %432 : vector<8x1xf32> to vector<8x8xf32>
    %434 = arith.mulf %429, %433 : vector<8x8xf32>
    %435 = vector.extract_strided_slice %338 {offsets = [0, 24], sizes = [8, 8], strides = [1, 1]} : vector<8x32xf32> to vector<8x8xf32>
    %cst_176 = arith.constant dense<0.000000e+00> : vector<8x8xf32>
    %436 = tpu.matmul %434, %435, %cst_176 {dimension_numbers = #tpu.dot_dimension_numbers<[1], [0], [0], [1], [0, 0, 1, 1], [], []>} : vector<8x8xf32>, vector<8x8xf32>, vector<8x8xf32> -> vector<8x8xf32>
    %437 = vector.extract_strided_slice %333 {offsets = [24, 0], sizes = [8, 32], strides = [1, 1]} : vector<32x32xf32> to vector<8x32xf32>
    %cst_177 = arith.constant dense<0.000000e+00> : vector<8x32xf32>
    %438 = tpu.matmul %436, %437, %cst_177 {dimension_numbers = #tpu.dot_dimension_numbers<[1], [0], [0], [1], [0, 0, 1, 1], [], []>} : vector<8x8xf32>, vector<8x32xf32>, vector<8x32xf32> -> vector<8x32xf32>
    %439 = arith.addf %414, %438 : vector<8x32xf32>
    %440 = vector.extract_strided_slice %329 {offsets = [8, 0], sizes = [8, 32], strides = [1, 1]} : vector<16x32xf32> to vector<8x32xf32>
    %441 = vector.extract_strided_slice %330 {offsets = [8, 0], sizes = [8, 32], strides = [1, 1]} : vector<16x32xf32> to vector<8x32xf32>
    %442 = vector.extract_strided_slice %331 {offsets = [8, 0], sizes = [8, 32], strides = [1, 1]} : vector<16x32xf32> to vector<8x32xf32>
    %443 = vector.extract_strided_slice %0 {offsets = [1, 0, 0], sizes = [1, 8, 8], strides = [1, 1, 1]} : vector<2x8x8xf32> to vector<1x8x8xf32>
    %444 = vector.shape_cast %443 : vector<1x8x8xf32> to vector<8x8xf32>
    %445 = vector.extract_strided_slice %440 {offsets = [0, 0], sizes = [8, 8], strides = [1, 1]} : vector<8x32xf32> to vector<8x8xf32>
    %446 = vector.extract_strided_slice %441 {offsets = [0, 0], sizes = [8, 8], strides = [1, 1]} : vector<8x32xf32> to vector<8x8xf32>
    %447 = tpu.transpose %446, [1, 0] : vector<8x8xf32> -> vector<8x8xf32>
    %cst_178 = arith.constant dense<0.000000e+00> : vector<8x8xf32>
    %448 = tpu.matmul %445, %447, %cst_178 {dimension_numbers = #tpu.dot_dimension_numbers<[1], [0], [0], [1], [0, 0, 1, 1], [], []>} : vector<8x8xf32>, vector<8x8xf32>, vector<8x8xf32> -> vector<8x8xf32>
    %cst_179 = arith.constant 0.353553385 : f32
    %449 = vector.broadcast %cst_179 : f32 to vector<8x8xf32>
    %450 = arith.mulf %448, %449 : vector<8x8xf32>
    %cst_180 = arith.constant 0.000000e+00 : f32
    %451 = vector.broadcast %cst_180 : f32 to vector<8x8xf32>
    %452 = arith.cmpf oeq, %444, %451 : vector<8x8xf32>
    %cst_181 = arith.constant -1.000000e+09 : f32
    %453 = vector.broadcast %cst_181 : f32 to vector<8x8xf32>
    %454 = arith.select %452, %453, %450 : vector<8x8xi1>, vector<8x8xf32>
    %cst_182 = arith.constant dense<0xFF800000> : vector<8xf32>
    %455 = vector.multi_reduction <maximumf>, %454, %cst_182 [1] : vector<8x8xf32> to vector<8xf32>
    %456 = vector.shape_cast %455 : vector<8xf32> to vector<8x1xf32>
    %457 = vector.broadcast %456 : vector<8x1xf32> to vector<8x8xf32>
    %458 = arith.subf %454, %457 : vector<8x8xf32>
    %459 = math.exp %458 : vector<8x8xf32>
    %cst_183 = arith.constant dense<0.000000e+00> : vector<8xf32>
    %460 = vector.multi_reduction <add>, %459, %cst_183 [1] : vector<8x8xf32> to vector<8xf32>
    %461 = vector.shape_cast %460 : vector<8xf32> to vector<8x1xf32>
    %462 = tpu.reciprocal %461 {approx = true} : vector<8x1xf32> -> vector<8x1xf32>
    %463 = vector.broadcast %462 : vector<8x1xf32> to vector<8x8xf32>
    %464 = arith.mulf %459, %463 : vector<8x8xf32>
    %465 = vector.extract_strided_slice %442 {offsets = [0, 0], sizes = [8, 8], strides = [1, 1]} : vector<8x32xf32> to vector<8x8xf32>
    %cst_184 = arith.constant dense<0.000000e+00> : vector<8x8xf32>
    %466 = tpu.matmul %464, %465, %cst_184 {dimension_numbers = #tpu.dot_dimension_numbers<[1], [0], [0], [1], [0, 0, 1, 1], [], []>} : vector<8x8xf32>, vector<8x8xf32>, vector<8x8xf32> -> vector<8x8xf32>
    %467 = vector.extract_strided_slice %333 {offsets = [0, 0], sizes = [8, 32], strides = [1, 1]} : vector<32x32xf32> to vector<8x32xf32>
    %cst_185 = arith.constant dense<0.000000e+00> : vector<8x32xf32>
    %468 = tpu.matmul %466, %467, %cst_185 {dimension_numbers = #tpu.dot_dimension_numbers<[1], [0], [0], [1], [0, 0, 1, 1], [], []>} : vector<8x8xf32>, vector<8x32xf32>, vector<8x32xf32> -> vector<8x32xf32>
    %469 = vector.extract_strided_slice %440 {offsets = [0, 8], sizes = [8, 8], strides = [1, 1]} : vector<8x32xf32> to vector<8x8xf32>
    %470 = vector.extract_strided_slice %441 {offsets = [0, 8], sizes = [8, 8], strides = [1, 1]} : vector<8x32xf32> to vector<8x8xf32>
    %471 = tpu.transpose %470, [1, 0] : vector<8x8xf32> -> vector<8x8xf32>
    %cst_186 = arith.constant dense<0.000000e+00> : vector<8x8xf32>
    %472 = tpu.matmul %469, %471, %cst_186 {dimension_numbers = #tpu.dot_dimension_numbers<[1], [0], [0], [1], [0, 0, 1, 1], [], []>} : vector<8x8xf32>, vector<8x8xf32>, vector<8x8xf32> -> vector<8x8xf32>
    %cst_187 = arith.constant 0.353553385 : f32
    %473 = vector.broadcast %cst_187 : f32 to vector<8x8xf32>
    %474 = arith.mulf %472, %473 : vector<8x8xf32>
    %cst_188 = arith.constant 0.000000e+00 : f32
    %475 = vector.broadcast %cst_188 : f32 to vector<8x8xf32>
    %476 = arith.cmpf oeq, %444, %475 : vector<8x8xf32>
    %cst_189 = arith.constant -1.000000e+09 : f32
    %477 = vector.broadcast %cst_189 : f32 to vector<8x8xf32>
    %478 = arith.select %476, %477, %474 : vector<8x8xi1>, vector<8x8xf32>
    %cst_190 = arith.constant dense<0xFF800000> : vector<8xf32>
    %479 = vector.multi_reduction <maximumf>, %478, %cst_190 [1] : vector<8x8xf32> to vector<8xf32>
    %480 = vector.shape_cast %479 : vector<8xf32> to vector<8x1xf32>
    %481 = vector.broadcast %480 : vector<8x1xf32> to vector<8x8xf32>
    %482 = arith.subf %478, %481 : vector<8x8xf32>
    %483 = math.exp %482 : vector<8x8xf32>
    %cst_191 = arith.constant dense<0.000000e+00> : vector<8xf32>
    %484 = vector.multi_reduction <add>, %483, %cst_191 [1] : vector<8x8xf32> to vector<8xf32>
    %485 = vector.shape_cast %484 : vector<8xf32> to vector<8x1xf32>
    %486 = tpu.reciprocal %485 {approx = true} : vector<8x1xf32> -> vector<8x1xf32>
    %487 = vector.broadcast %486 : vector<8x1xf32> to vector<8x8xf32>
    %488 = arith.mulf %483, %487 : vector<8x8xf32>
    %489 = vector.extract_strided_slice %442 {offsets = [0, 8], sizes = [8, 8], strides = [1, 1]} : vector<8x32xf32> to vector<8x8xf32>
    %cst_192 = arith.constant dense<0.000000e+00> : vector<8x8xf32>
    %490 = tpu.matmul %488, %489, %cst_192 {dimension_numbers = #tpu.dot_dimension_numbers<[1], [0], [0], [1], [0, 0, 1, 1], [], []>} : vector<8x8xf32>, vector<8x8xf32>, vector<8x8xf32> -> vector<8x8xf32>
    %491 = vector.extract_strided_slice %333 {offsets = [8, 0], sizes = [8, 32], strides = [1, 1]} : vector<32x32xf32> to vector<8x32xf32>
    %cst_193 = arith.constant dense<0.000000e+00> : vector<8x32xf32>
    %492 = tpu.matmul %490, %491, %cst_193 {dimension_numbers = #tpu.dot_dimension_numbers<[1], [0], [0], [1], [0, 0, 1, 1], [], []>} : vector<8x8xf32>, vector<8x32xf32>, vector<8x32xf32> -> vector<8x32xf32>
    %493 = arith.addf %468, %492 : vector<8x32xf32>
    %494 = vector.extract_strided_slice %440 {offsets = [0, 16], sizes = [8, 8], strides = [1, 1]} : vector<8x32xf32> to vector<8x8xf32>
    %495 = vector.extract_strided_slice %441 {offsets = [0, 16], sizes = [8, 8], strides = [1, 1]} : vector<8x32xf32> to vector<8x8xf32>
    %496 = tpu.transpose %495, [1, 0] : vector<8x8xf32> -> vector<8x8xf32>
    %cst_194 = arith.constant dense<0.000000e+00> : vector<8x8xf32>
    %497 = tpu.matmul %494, %496, %cst_194 {dimension_numbers = #tpu.dot_dimension_numbers<[1], [0], [0], [1], [0, 0, 1, 1], [], []>} : vector<8x8xf32>, vector<8x8xf32>, vector<8x8xf32> -> vector<8x8xf32>
    %cst_195 = arith.constant 0.353553385 : f32
    %498 = vector.broadcast %cst_195 : f32 to vector<8x8xf32>
    %499 = arith.mulf %497, %498 : vector<8x8xf32>
    %cst_196 = arith.constant 0.000000e+00 : f32
    %500 = vector.broadcast %cst_196 : f32 to vector<8x8xf32>
    %501 = arith.cmpf oeq, %444, %500 : vector<8x8xf32>
    %cst_197 = arith.constant -1.000000e+09 : f32
    %502 = vector.broadcast %cst_197 : f32 to vector<8x8xf32>
    %503 = arith.select %501, %502, %499 : vector<8x8xi1>, vector<8x8xf32>
    %cst_198 = arith.constant dense<0xFF800000> : vector<8xf32>
    %504 = vector.multi_reduction <maximumf>, %503, %cst_198 [1] : vector<8x8xf32> to vector<8xf32>
    %505 = vector.shape_cast %504 : vector<8xf32> to vector<8x1xf32>
    %506 = vector.broadcast %505 : vector<8x1xf32> to vector<8x8xf32>
    %507 = arith.subf %503, %506 : vector<8x8xf32>
    %508 = math.exp %507 : vector<8x8xf32>
    %cst_199 = arith.constant dense<0.000000e+00> : vector<8xf32>
    %509 = vector.multi_reduction <add>, %508, %cst_199 [1] : vector<8x8xf32> to vector<8xf32>
    %510 = vector.shape_cast %509 : vector<8xf32> to vector<8x1xf32>
    %511 = tpu.reciprocal %510 {approx = true} : vector<8x1xf32> -> vector<8x1xf32>
    %512 = vector.broadcast %511 : vector<8x1xf32> to vector<8x8xf32>
    %513 = arith.mulf %508, %512 : vector<8x8xf32>
    %514 = vector.extract_strided_slice %442 {offsets = [0, 16], sizes = [8, 8], strides = [1, 1]} : vector<8x32xf32> to vector<8x8xf32>
    %cst_200 = arith.constant dense<0.000000e+00> : vector<8x8xf32>
    %515 = tpu.matmul %513, %514, %cst_200 {dimension_numbers = #tpu.dot_dimension_numbers<[1], [0], [0], [1], [0, 0, 1, 1], [], []>} : vector<8x8xf32>, vector<8x8xf32>, vector<8x8xf32> -> vector<8x8xf32>
    %516 = vector.extract_strided_slice %333 {offsets = [16, 0], sizes = [8, 32], strides = [1, 1]} : vector<32x32xf32> to vector<8x32xf32>
    %cst_201 = arith.constant dense<0.000000e+00> : vector<8x32xf32>
    %517 = tpu.matmul %515, %516, %cst_201 {dimension_numbers = #tpu.dot_dimension_numbers<[1], [0], [0], [1], [0, 0, 1, 1], [], []>} : vector<8x8xf32>, vector<8x32xf32>, vector<8x32xf32> -> vector<8x32xf32>
    %518 = arith.addf %493, %517 : vector<8x32xf32>
    %519 = vector.extract_strided_slice %440 {offsets = [0, 24], sizes = [8, 8], strides = [1, 1]} : vector<8x32xf32> to vector<8x8xf32>
    %520 = vector.extract_strided_slice %441 {offsets = [0, 24], sizes = [8, 8], strides = [1, 1]} : vector<8x32xf32> to vector<8x8xf32>
    %521 = tpu.transpose %520, [1, 0] : vector<8x8xf32> -> vector<8x8xf32>
    %cst_202 = arith.constant dense<0.000000e+00> : vector<8x8xf32>
    %522 = tpu.matmul %519, %521, %cst_202 {dimension_numbers = #tpu.dot_dimension_numbers<[1], [0], [0], [1], [0, 0, 1, 1], [], []>} : vector<8x8xf32>, vector<8x8xf32>, vector<8x8xf32> -> vector<8x8xf32>
    %cst_203 = arith.constant 0.353553385 : f32
    %523 = vector.broadcast %cst_203 : f32 to vector<8x8xf32>
    %524 = arith.mulf %522, %523 : vector<8x8xf32>
    %cst_204 = arith.constant 0.000000e+00 : f32
    %525 = vector.broadcast %cst_204 : f32 to vector<8x8xf32>
    %526 = arith.cmpf oeq, %444, %525 : vector<8x8xf32>
    %cst_205 = arith.constant -1.000000e+09 : f32
    %527 = vector.broadcast %cst_205 : f32 to vector<8x8xf32>
    %528 = arith.select %526, %527, %524 : vector<8x8xi1>, vector<8x8xf32>
    %cst_206 = arith.constant dense<0xFF800000> : vector<8xf32>
    %529 = vector.multi_reduction <maximumf>, %528, %cst_206 [1] : vector<8x8xf32> to vector<8xf32>
    %530 = vector.shape_cast %529 : vector<8xf32> to vector<8x1xf32>
    %531 = vector.broadcast %530 : vector<8x1xf32> to vector<8x8xf32>
    %532 = arith.subf %528, %531 : vector<8x8xf32>
    %533 = math.exp %532 : vector<8x8xf32>
    %cst_207 = arith.constant dense<0.000000e+00> : vector<8xf32>
    %534 = vector.multi_reduction <add>, %533, %cst_207 [1] : vector<8x8xf32> to vector<8xf32>
    %535 = vector.shape_cast %534 : vector<8xf32> to vector<8x1xf32>
    %536 = tpu.reciprocal %535 {approx = true} : vector<8x1xf32> -> vector<8x1xf32>
    %537 = vector.broadcast %536 : vector<8x1xf32> to vector<8x8xf32>
    %538 = arith.mulf %533, %537 : vector<8x8xf32>
    %539 = vector.extract_strided_slice %442 {offsets = [0, 24], sizes = [8, 8], strides = [1, 1]} : vector<8x32xf32> to vector<8x8xf32>
    %cst_208 = arith.constant dense<0.000000e+00> : vector<8x8xf32>
    %540 = tpu.matmul %538, %539, %cst_208 {dimension_numbers = #tpu.dot_dimension_numbers<[1], [0], [0], [1], [0, 0, 1, 1], [], []>} : vector<8x8xf32>, vector<8x8xf32>, vector<8x8xf32> -> vector<8x8xf32>
    %541 = vector.extract_strided_slice %333 {offsets = [24, 0], sizes = [8, 32], strides = [1, 1]} : vector<32x32xf32> to vector<8x32xf32>
    %cst_209 = arith.constant dense<0.000000e+00> : vector<8x32xf32>
    %542 = tpu.matmul %540, %541, %cst_209 {dimension_numbers = #tpu.dot_dimension_numbers<[1], [0], [0], [1], [0, 0, 1, 1], [], []>} : vector<8x8xf32>, vector<8x32xf32>, vector<8x32xf32> -> vector<8x32xf32>
    %543 = arith.addf %518, %542 : vector<8x32xf32>
    %544 = tpu.concatenate %439, %543 in 0 : vector<8x32xf32>, vector<8x32xf32> -> vector<16x32xf32>
    %545 = vector.broadcast %335 : vector<1x32xf32> to vector<16x32xf32>
    %546 = arith.addf %544, %545 : vector<16x32xf32>
    %547 = arith.addf %296, %546 : vector<16x32xf32>
    %c1_210 = arith.constant 1 : index
    %c0_211 = arith.constant 0 : index
    %c0_212 = arith.constant 0 : index
    %548 = vector.load %arg15[%c1_210, %c0_211, %c0_212] : memref<2x1x32xf32, #tpu.memory_space<vmem>>, vector<1x1x32xf32>
    %549 = vector.shape_cast %548 : vector<1x1x32xf32> to vector<1x32xf32>
    %c1_213 = arith.constant 1 : index
    %c0_214 = arith.constant 0 : index
    %c0_215 = arith.constant 0 : index
    %550 = vector.load %arg16[%c1_213, %c0_214, %c0_215] : memref<2x1x32xf32, #tpu.memory_space<vmem>>, vector<1x1x32xf32>
    %551 = vector.shape_cast %550 : vector<1x1x32xf32> to vector<1x32xf32>
    %cst_216 = arith.constant dense<0.000000e+00> : vector<16xf32>
    %552 = vector.multi_reduction <add>, %547, %cst_216 [1] : vector<16x32xf32> to vector<16xf32>
    %553 = vector.shape_cast %552 : vector<16xf32> to vector<16x1xf32>
    %cst_217 = arith.constant 3.200000e+01 : f32
    %554 = vector.broadcast %cst_217 : f32 to vector<16x1xf32>
    %555 = arith.divf %553, %554 : vector<16x1xf32>
    %556 = vector.broadcast %555 : vector<16x1xf32> to vector<16x32xf32>
    %557 = arith.subf %547, %556 : vector<16x32xf32>
    %558 = arith.mulf %557, %557 : vector<16x32xf32>
    %cst_218 = arith.constant dense<0.000000e+00> : vector<16xf32>
    %559 = vector.multi_reduction <add>, %558, %cst_218 [1] : vector<16x32xf32> to vector<16xf32>
    %560 = vector.shape_cast %559 : vector<16xf32> to vector<16x1xf32>
    %cst_219 = arith.constant 0.0322580636 : f32
    %561 = vector.broadcast %cst_219 : f32 to vector<16x1xf32>
    %562 = arith.mulf %560, %561 : vector<16x1xf32>
    %563 = math.sqrt %562 : vector<16x1xf32>
    %564 = vector.broadcast %549 : vector<1x32xf32> to vector<16x32xf32>
    %565 = arith.mulf %564, %557 : vector<16x32xf32>
    %cst_220 = arith.constant 9.99999997E-7 : f32
    %566 = vector.broadcast %cst_220 : f32 to vector<16x1xf32>
    %567 = arith.addf %563, %566 : vector<16x1xf32>
    %568 = tpu.reciprocal %567 {approx = true} : vector<16x1xf32> -> vector<16x1xf32>
    %569 = vector.broadcast %568 : vector<16x1xf32> to vector<16x32xf32>
    %570 = arith.mulf %565, %569 : vector<16x32xf32>
    %571 = vector.broadcast %551 : vector<1x32xf32> to vector<16x32xf32>
    %572 = arith.addf %570, %571 : vector<16x32xf32>
    %c1_221 = arith.constant 1 : index
    %c0_222 = arith.constant 0 : index
    %c0_223 = arith.constant 0 : index
    %573 = vector.load %arg9[%c1_221, %c0_222, %c0_223] : memref<2x32x64xf32, #tpu.memory_space<vmem>>, vector<1x32x64xf32>
    %574 = vector.shape_cast %573 : vector<1x32x64xf32> to vector<32x64xf32>
    %c1_224 = arith.constant 1 : index
    %c0_225 = arith.constant 0 : index
    %c0_226 = arith.constant 0 : index
    %575 = vector.load %arg10[%c1_224, %c0_225, %c0_226] : memref<2x1x64xf32, #tpu.memory_space<vmem>>, vector<1x1x64xf32>
    %576 = vector.shape_cast %575 : vector<1x1x64xf32> to vector<1x64xf32>
    %c1_227 = arith.constant 1 : index
    %c0_228 = arith.constant 0 : index
    %c0_229 = arith.constant 0 : index
    %577 = vector.load %arg11[%c1_227, %c0_228, %c0_229] : memref<2x64x32xf32, #tpu.memory_space<vmem>>, vector<1x64x32xf32>
    %578 = vector.shape_cast %577 : vector<1x64x32xf32> to vector<64x32xf32>
    %c1_230 = arith.constant 1 : index
    %c0_231 = arith.constant 0 : index
    %c0_232 = arith.constant 0 : index
    %579 = vector.load %arg12[%c1_230, %c0_231, %c0_232] : memref<2x1x32xf32, #tpu.memory_space<vmem>>, vector<1x1x32xf32>
    %580 = vector.shape_cast %579 : vector<1x1x32xf32> to vector<1x32xf32>
    %cst_233 = arith.constant dense<0.000000e+00> : vector<16x64xf32>
    %581 = tpu.matmul %572, %574, %cst_233 {dimension_numbers = #tpu.dot_dimension_numbers<[1], [0], [0], [1], [0, 0, 1, 1], [], []>} : vector<16x32xf32>, vector<32x64xf32>, vector<16x64xf32> -> vector<16x64xf32>
    %582 = vector.broadcast %576 : vector<1x64xf32> to vector<16x64xf32>
    %583 = arith.addf %581, %582 : vector<16x64xf32>
    %cst_234 = arith.constant 0.000000e+00 : f32
    %584 = vector.broadcast %cst_234 : f32 to vector<16x64xf32>
    %585 = arith.maximumf %583, %584 : vector<16x64xf32>
    %cst_235 = arith.constant dense<0.000000e+00> : vector<16x32xf32>
    %586 = tpu.matmul %585, %578, %cst_235 {dimension_numbers = #tpu.dot_dimension_numbers<[1], [0], [0], [1], [0, 0, 1, 1], [], []>} : vector<16x64xf32>, vector<64x32xf32>, vector<16x32xf32> -> vector<16x32xf32>
    %587 = vector.broadcast %580 : vector<1x32xf32> to vector<16x32xf32>
    %588 = arith.addf %586, %587 : vector<16x32xf32>
    %589 = arith.addf %547, %588 : vector<16x32xf32>
    %c0_236 = arith.constant 0 : index
    %c0_237 = arith.constant 0 : index
    %590 = vector.load %arg37[%c0_236, %c0_237] : memref<1x32xf32, #tpu.memory_space<vmem>>, vector<1x32xf32>
    %c0_238 = arith.constant 0 : index
    %c0_239 = arith.constant 0 : index
    %591 = vector.load %arg38[%c0_238, %c0_239] : memref<1x32xf32, #tpu.memory_space<vmem>>, vector<1x32xf32>
    %cst_240 = arith.constant dense<0.000000e+00> : vector<16xf32>
    %592 = vector.multi_reduction <add>, %589, %cst_240 [1] : vector<16x32xf32> to vector<16xf32>
    %593 = vector.shape_cast %592 : vector<16xf32> to vector<16x1xf32>
    %cst_241 = arith.constant 3.200000e+01 : f32
    %594 = vector.broadcast %cst_241 : f32 to vector<16x1xf32>
    %595 = arith.divf %593, %594 : vector<16x1xf32>
    %596 = vector.broadcast %595 : vector<16x1xf32> to vector<16x32xf32>
    %597 = arith.subf %589, %596 : vector<16x32xf32>
    %598 = arith.mulf %597, %597 : vector<16x32xf32>
    %cst_242 = arith.constant dense<0.000000e+00> : vector<16xf32>
    %599 = vector.multi_reduction <add>, %598, %cst_242 [1] : vector<16x32xf32> to vector<16xf32>
    %600 = vector.shape_cast %599 : vector<16xf32> to vector<16x1xf32>
    %cst_243 = arith.constant 0.0322580636 : f32
    %601 = vector.broadcast %cst_243 : f32 to vector<16x1xf32>
    %602 = arith.mulf %600, %601 : vector<16x1xf32>
    %603 = math.sqrt %602 : vector<16x1xf32>
    %604 = vector.broadcast %590 : vector<1x32xf32> to vector<16x32xf32>
    %605 = arith.mulf %604, %597 : vector<16x32xf32>
    %cst_244 = arith.constant 9.99999997E-7 : f32
    %606 = vector.broadcast %cst_244 : f32 to vector<16x1xf32>
    %607 = arith.addf %603, %606 : vector<16x1xf32>
    %608 = tpu.reciprocal %607 {approx = true} : vector<16x1xf32> -> vector<16x1xf32>
    %609 = vector.broadcast %608 : vector<16x1xf32> to vector<16x32xf32>
    %610 = arith.mulf %605, %609 : vector<16x32xf32>
    %611 = vector.broadcast %591 : vector<1x32xf32> to vector<16x32xf32>
    %612 = arith.addf %610, %611 : vector<16x32xf32>
    %c0_245 = arith.constant 0 : index
    %c0_246 = arith.constant 0 : index
    %613 = vector.load %arg1[%c0_245, %c0_246] : memref<16x32xf32, #tpu.memory_space<vmem>>, vector<16x32xf32>
    %c0_247 = arith.constant 0 : index
    %c0_248 = arith.constant 0 : index
    %c0_249 = arith.constant 0 : index
    %614 = vector.load %arg31[%c0_247, %c0_248, %c0_249] : memref<2x1x32xf32, #tpu.memory_space<vmem>>, vector<1x1x32xf32>
    %615 = vector.shape_cast %614 : vector<1x1x32xf32> to vector<1x32xf32>
    %c0_250 = arith.constant 0 : index
    %c0_251 = arith.constant 0 : index
    %c0_252 = arith.constant 0 : index
    %616 = vector.load %arg32[%c0_250, %c0_251, %c0_252] : memref<2x1x32xf32, #tpu.memory_space<vmem>>, vector<1x1x32xf32>
    %617 = vector.shape_cast %616 : vector<1x1x32xf32> to vector<1x32xf32>
    %cst_253 = arith.constant dense<0.000000e+00> : vector<16xf32>
    %618 = vector.multi_reduction <add>, %613, %cst_253 [1] : vector<16x32xf32> to vector<16xf32>
    %619 = vector.shape_cast %618 : vector<16xf32> to vector<16x1xf32>
    %cst_254 = arith.constant 3.200000e+01 : f32
    %620 = vector.broadcast %cst_254 : f32 to vector<16x1xf32>
    %621 = arith.divf %619, %620 : vector<16x1xf32>
    %622 = vector.broadcast %621 : vector<16x1xf32> to vector<16x32xf32>
    %623 = arith.subf %613, %622 : vector<16x32xf32>
    %624 = arith.mulf %623, %623 : vector<16x32xf32>
    %cst_255 = arith.constant dense<0.000000e+00> : vector<16xf32>
    %625 = vector.multi_reduction <add>, %624, %cst_255 [1] : vector<16x32xf32> to vector<16xf32>
    %626 = vector.shape_cast %625 : vector<16xf32> to vector<16x1xf32>
    %cst_256 = arith.constant 0.0322580636 : f32
    %627 = vector.broadcast %cst_256 : f32 to vector<16x1xf32>
    %628 = arith.mulf %626, %627 : vector<16x1xf32>
    %629 = math.sqrt %628 : vector<16x1xf32>
    %630 = vector.broadcast %615 : vector<1x32xf32> to vector<16x32xf32>
    %631 = arith.mulf %630, %623 : vector<16x32xf32>
    %cst_257 = arith.constant 9.99999997E-7 : f32
    %632 = vector.broadcast %cst_257 : f32 to vector<16x1xf32>
    %633 = arith.addf %629, %632 : vector<16x1xf32>
    %634 = tpu.reciprocal %633 {approx = true} : vector<16x1xf32> -> vector<16x1xf32>
    %635 = vector.broadcast %634 : vector<16x1xf32> to vector<16x32xf32>
    %636 = arith.mulf %631, %635 : vector<16x32xf32>
    %637 = vector.broadcast %617 : vector<1x32xf32> to vector<16x32xf32>
    %638 = arith.addf %636, %637 : vector<16x32xf32>
    %c0_258 = arith.constant 0 : index
    %c0_259 = arith.constant 0 : index
    %c0_260 = arith.constant 0 : index
    %639 = vector.load %arg17[%c0_258, %c0_259, %c0_260] : memref<2x32x96xf32, #tpu.memory_space<vmem>>, vector<1x32x96xf32>
    %640 = vector.shape_cast %639 : vector<1x32x96xf32> to vector<32x96xf32>
    %cst_261 = arith.constant dense<0.000000e+00> : vector<16x96xf32>
    %641 = tpu.matmul %638, %640, %cst_261 {dimension_numbers = #tpu.dot_dimension_numbers<[1], [0], [0], [1], [0, 0, 1, 1], [], []>} : vector<16x32xf32>, vector<32x96xf32>, vector<16x96xf32> -> vector<16x96xf32>
    %c0_262 = arith.constant 0 : index
    %c0_263 = arith.constant 0 : index
    %c0_264 = arith.constant 0 : index
    %642 = vector.load %arg18[%c0_262, %c0_263, %c0_264] : memref<2x1x96xf32, #tpu.memory_space<vmem>>, vector<1x1x96xf32>
    %643 = vector.shape_cast %642 : vector<1x1x96xf32> to vector<1x96xf32>
    %644 = vector.broadcast %643 : vector<1x96xf32> to vector<16x96xf32>
    %645 = arith.addf %641, %644 : vector<16x96xf32>
    %646 = vector.extract_strided_slice %645 {offsets = [0, 0], sizes = [16, 32], strides = [1, 1]} : vector<16x96xf32> to vector<16x32xf32>
    %647 = vector.extract_strided_slice %645 {offsets = [0, 32], sizes = [16, 32], strides = [1, 1]} : vector<16x96xf32> to vector<16x32xf32>
    %648 = vector.extract_strided_slice %645 {offsets = [0, 64], sizes = [16, 32], strides = [1, 1]} : vector<16x96xf32> to vector<16x32xf32>
    %c0_265 = arith.constant 0 : index
    %c0_266 = arith.constant 0 : index
    %c0_267 = arith.constant 0 : index
    %649 = vector.load %arg19[%c0_265, %c0_266, %c0_267] : memref<2x32x32xf32, #tpu.memory_space<vmem>>, vector<1x32x32xf32>
    %650 = vector.shape_cast %649 : vector<1x32x32xf32> to vector<32x32xf32>
    %c0_268 = arith.constant 0 : index
    %c0_269 = arith.constant 0 : index
    %c0_270 = arith.constant 0 : index
    %651 = vector.load %arg20[%c0_268, %c0_269, %c0_270] : memref<2x1x32xf32, #tpu.memory_space<vmem>>, vector<1x1x32xf32>
    %652 = vector.shape_cast %651 : vector<1x1x32xf32> to vector<1x32xf32>
    %653 = vector.extract_strided_slice %646 {offsets = [0, 0], sizes = [8, 32], strides = [1, 1]} : vector<16x32xf32> to vector<8x32xf32>
    %654 = vector.extract_strided_slice %647 {offsets = [0, 0], sizes = [8, 32], strides = [1, 1]} : vector<16x32xf32> to vector<8x32xf32>
    %655 = vector.extract_strided_slice %648 {offsets = [0, 0], sizes = [8, 32], strides = [1, 1]} : vector<16x32xf32> to vector<8x32xf32>
    %656 = vector.extract_strided_slice %1 {offsets = [0, 0, 0], sizes = [1, 8, 8], strides = [1, 1, 1]} : vector<2x8x8xf32> to vector<1x8x8xf32>
    %657 = vector.shape_cast %656 : vector<1x8x8xf32> to vector<8x8xf32>
    %658 = vector.extract_strided_slice %653 {offsets = [0, 0], sizes = [8, 8], strides = [1, 1]} : vector<8x32xf32> to vector<8x8xf32>
    %659 = vector.extract_strided_slice %654 {offsets = [0, 0], sizes = [8, 8], strides = [1, 1]} : vector<8x32xf32> to vector<8x8xf32>
    %660 = tpu.transpose %659, [1, 0] : vector<8x8xf32> -> vector<8x8xf32>
    %cst_271 = arith.constant dense<0.000000e+00> : vector<8x8xf32>
    %661 = tpu.matmul %658, %660, %cst_271 {dimension_numbers = #tpu.dot_dimension_numbers<[1], [0], [0], [1], [0, 0, 1, 1], [], []>} : vector<8x8xf32>, vector<8x8xf32>, vector<8x8xf32> -> vector<8x8xf32>
    %cst_272 = arith.constant 0.353553385 : f32
    %662 = vector.broadcast %cst_272 : f32 to vector<8x8xf32>
    %663 = arith.mulf %661, %662 : vector<8x8xf32>
    %cst_273 = arith.constant 0.000000e+00 : f32
    %664 = vector.broadcast %cst_273 : f32 to vector<8x8xf32>
    %665 = arith.cmpf oeq, %657, %664 : vector<8x8xf32>
    %cst_274 = arith.constant -1.000000e+09 : f32
    %666 = vector.broadcast %cst_274 : f32 to vector<8x8xf32>
    %667 = arith.select %665, %666, %663 : vector<8x8xi1>, vector<8x8xf32>
    %cst_275 = arith.constant dense<0xFF800000> : vector<8xf32>
    %668 = vector.multi_reduction <maximumf>, %667, %cst_275 [1] : vector<8x8xf32> to vector<8xf32>
    %669 = vector.shape_cast %668 : vector<8xf32> to vector<8x1xf32>
    %670 = vector.broadcast %669 : vector<8x1xf32> to vector<8x8xf32>
    %671 = arith.subf %667, %670 : vector<8x8xf32>
    %672 = math.exp %671 : vector<8x8xf32>
    %cst_276 = arith.constant dense<0.000000e+00> : vector<8xf32>
    %673 = vector.multi_reduction <add>, %672, %cst_276 [1] : vector<8x8xf32> to vector<8xf32>
    %674 = vector.shape_cast %673 : vector<8xf32> to vector<8x1xf32>
    %675 = tpu.reciprocal %674 {approx = true} : vector<8x1xf32> -> vector<8x1xf32>
    %676 = vector.broadcast %675 : vector<8x1xf32> to vector<8x8xf32>
    %677 = arith.mulf %672, %676 : vector<8x8xf32>
    %678 = vector.extract_strided_slice %655 {offsets = [0, 0], sizes = [8, 8], strides = [1, 1]} : vector<8x32xf32> to vector<8x8xf32>
    %cst_277 = arith.constant dense<0.000000e+00> : vector<8x8xf32>
    %679 = tpu.matmul %677, %678, %cst_277 {dimension_numbers = #tpu.dot_dimension_numbers<[1], [0], [0], [1], [0, 0, 1, 1], [], []>} : vector<8x8xf32>, vector<8x8xf32>, vector<8x8xf32> -> vector<8x8xf32>
    %680 = vector.extract_strided_slice %650 {offsets = [0, 0], sizes = [8, 32], strides = [1, 1]} : vector<32x32xf32> to vector<8x32xf32>
    %cst_278 = arith.constant dense<0.000000e+00> : vector<8x32xf32>
    %681 = tpu.matmul %679, %680, %cst_278 {dimension_numbers = #tpu.dot_dimension_numbers<[1], [0], [0], [1], [0, 0, 1, 1], [], []>} : vector<8x8xf32>, vector<8x32xf32>, vector<8x32xf32> -> vector<8x32xf32>
    %682 = vector.extract_strided_slice %653 {offsets = [0, 8], sizes = [8, 8], strides = [1, 1]} : vector<8x32xf32> to vector<8x8xf32>
    %683 = vector.extract_strided_slice %654 {offsets = [0, 8], sizes = [8, 8], strides = [1, 1]} : vector<8x32xf32> to vector<8x8xf32>
    %684 = tpu.transpose %683, [1, 0] : vector<8x8xf32> -> vector<8x8xf32>
    %cst_279 = arith.constant dense<0.000000e+00> : vector<8x8xf32>
    %685 = tpu.matmul %682, %684, %cst_279 {dimension_numbers = #tpu.dot_dimension_numbers<[1], [0], [0], [1], [0, 0, 1, 1], [], []>} : vector<8x8xf32>, vector<8x8xf32>, vector<8x8xf32> -> vector<8x8xf32>
    %cst_280 = arith.constant 0.353553385 : f32
    %686 = vector.broadcast %cst_280 : f32 to vector<8x8xf32>
    %687 = arith.mulf %685, %686 : vector<8x8xf32>
    %cst_281 = arith.constant 0.000000e+00 : f32
    %688 = vector.broadcast %cst_281 : f32 to vector<8x8xf32>
    %689 = arith.cmpf oeq, %657, %688 : vector<8x8xf32>
    %cst_282 = arith.constant -1.000000e+09 : f32
    %690 = vector.broadcast %cst_282 : f32 to vector<8x8xf32>
    %691 = arith.select %689, %690, %687 : vector<8x8xi1>, vector<8x8xf32>
    %cst_283 = arith.constant dense<0xFF800000> : vector<8xf32>
    %692 = vector.multi_reduction <maximumf>, %691, %cst_283 [1] : vector<8x8xf32> to vector<8xf32>
    %693 = vector.shape_cast %692 : vector<8xf32> to vector<8x1xf32>
    %694 = vector.broadcast %693 : vector<8x1xf32> to vector<8x8xf32>
    %695 = arith.subf %691, %694 : vector<8x8xf32>
    %696 = math.exp %695 : vector<8x8xf32>
    %cst_284 = arith.constant dense<0.000000e+00> : vector<8xf32>
    %697 = vector.multi_reduction <add>, %696, %cst_284 [1] : vector<8x8xf32> to vector<8xf32>
    %698 = vector.shape_cast %697 : vector<8xf32> to vector<8x1xf32>
    %699 = tpu.reciprocal %698 {approx = true} : vector<8x1xf32> -> vector<8x1xf32>
    %700 = vector.broadcast %699 : vector<8x1xf32> to vector<8x8xf32>
    %701 = arith.mulf %696, %700 : vector<8x8xf32>
    %702 = vector.extract_strided_slice %655 {offsets = [0, 8], sizes = [8, 8], strides = [1, 1]} : vector<8x32xf32> to vector<8x8xf32>
    %cst_285 = arith.constant dense<0.000000e+00> : vector<8x8xf32>
    %703 = tpu.matmul %701, %702, %cst_285 {dimension_numbers = #tpu.dot_dimension_numbers<[1], [0], [0], [1], [0, 0, 1, 1], [], []>} : vector<8x8xf32>, vector<8x8xf32>, vector<8x8xf32> -> vector<8x8xf32>
    %704 = vector.extract_strided_slice %650 {offsets = [8, 0], sizes = [8, 32], strides = [1, 1]} : vector<32x32xf32> to vector<8x32xf32>
    %cst_286 = arith.constant dense<0.000000e+00> : vector<8x32xf32>
    %705 = tpu.matmul %703, %704, %cst_286 {dimension_numbers = #tpu.dot_dimension_numbers<[1], [0], [0], [1], [0, 0, 1, 1], [], []>} : vector<8x8xf32>, vector<8x32xf32>, vector<8x32xf32> -> vector<8x32xf32>
    %706 = arith.addf %681, %705 : vector<8x32xf32>
    %707 = vector.extract_strided_slice %653 {offsets = [0, 16], sizes = [8, 8], strides = [1, 1]} : vector<8x32xf32> to vector<8x8xf32>
    %708 = vector.extract_strided_slice %654 {offsets = [0, 16], sizes = [8, 8], strides = [1, 1]} : vector<8x32xf32> to vector<8x8xf32>
    %709 = tpu.transpose %708, [1, 0] : vector<8x8xf32> -> vector<8x8xf32>
    %cst_287 = arith.constant dense<0.000000e+00> : vector<8x8xf32>
    %710 = tpu.matmul %707, %709, %cst_287 {dimension_numbers = #tpu.dot_dimension_numbers<[1], [0], [0], [1], [0, 0, 1, 1], [], []>} : vector<8x8xf32>, vector<8x8xf32>, vector<8x8xf32> -> vector<8x8xf32>
    %cst_288 = arith.constant 0.353553385 : f32
    %711 = vector.broadcast %cst_288 : f32 to vector<8x8xf32>
    %712 = arith.mulf %710, %711 : vector<8x8xf32>
    %cst_289 = arith.constant 0.000000e+00 : f32
    %713 = vector.broadcast %cst_289 : f32 to vector<8x8xf32>
    %714 = arith.cmpf oeq, %657, %713 : vector<8x8xf32>
    %cst_290 = arith.constant -1.000000e+09 : f32
    %715 = vector.broadcast %cst_290 : f32 to vector<8x8xf32>
    %716 = arith.select %714, %715, %712 : vector<8x8xi1>, vector<8x8xf32>
    %cst_291 = arith.constant dense<0xFF800000> : vector<8xf32>
    %717 = vector.multi_reduction <maximumf>, %716, %cst_291 [1] : vector<8x8xf32> to vector<8xf32>
    %718 = vector.shape_cast %717 : vector<8xf32> to vector<8x1xf32>
    %719 = vector.broadcast %718 : vector<8x1xf32> to vector<8x8xf32>
    %720 = arith.subf %716, %719 : vector<8x8xf32>
    %721 = math.exp %720 : vector<8x8xf32>
    %cst_292 = arith.constant dense<0.000000e+00> : vector<8xf32>
    %722 = vector.multi_reduction <add>, %721, %cst_292 [1] : vector<8x8xf32> to vector<8xf32>
    %723 = vector.shape_cast %722 : vector<8xf32> to vector<8x1xf32>
    %724 = tpu.reciprocal %723 {approx = true} : vector<8x1xf32> -> vector<8x1xf32>
    %725 = vector.broadcast %724 : vector<8x1xf32> to vector<8x8xf32>
    %726 = arith.mulf %721, %725 : vector<8x8xf32>
    %727 = vector.extract_strided_slice %655 {offsets = [0, 16], sizes = [8, 8], strides = [1, 1]} : vector<8x32xf32> to vector<8x8xf32>
    %cst_293 = arith.constant dense<0.000000e+00> : vector<8x8xf32>
    %728 = tpu.matmul %726, %727, %cst_293 {dimension_numbers = #tpu.dot_dimension_numbers<[1], [0], [0], [1], [0, 0, 1, 1], [], []>} : vector<8x8xf32>, vector<8x8xf32>, vector<8x8xf32> -> vector<8x8xf32>
    %729 = vector.extract_strided_slice %650 {offsets = [16, 0], sizes = [8, 32], strides = [1, 1]} : vector<32x32xf32> to vector<8x32xf32>
    %cst_294 = arith.constant dense<0.000000e+00> : vector<8x32xf32>
    %730 = tpu.matmul %728, %729, %cst_294 {dimension_numbers = #tpu.dot_dimension_numbers<[1], [0], [0], [1], [0, 0, 1, 1], [], []>} : vector<8x8xf32>, vector<8x32xf32>, vector<8x32xf32> -> vector<8x32xf32>
    %731 = arith.addf %706, %730 : vector<8x32xf32>
    %732 = vector.extract_strided_slice %653 {offsets = [0, 24], sizes = [8, 8], strides = [1, 1]} : vector<8x32xf32> to vector<8x8xf32>
    %733 = vector.extract_strided_slice %654 {offsets = [0, 24], sizes = [8, 8], strides = [1, 1]} : vector<8x32xf32> to vector<8x8xf32>
    %734 = tpu.transpose %733, [1, 0] : vector<8x8xf32> -> vector<8x8xf32>
    %cst_295 = arith.constant dense<0.000000e+00> : vector<8x8xf32>
    %735 = tpu.matmul %732, %734, %cst_295 {dimension_numbers = #tpu.dot_dimension_numbers<[1], [0], [0], [1], [0, 0, 1, 1], [], []>} : vector<8x8xf32>, vector<8x8xf32>, vector<8x8xf32> -> vector<8x8xf32>
    %cst_296 = arith.constant 0.353553385 : f32
    %736 = vector.broadcast %cst_296 : f32 to vector<8x8xf32>
    %737 = arith.mulf %735, %736 : vector<8x8xf32>
    %cst_297 = arith.constant 0.000000e+00 : f32
    %738 = vector.broadcast %cst_297 : f32 to vector<8x8xf32>
    %739 = arith.cmpf oeq, %657, %738 : vector<8x8xf32>
    %cst_298 = arith.constant -1.000000e+09 : f32
    %740 = vector.broadcast %cst_298 : f32 to vector<8x8xf32>
    %741 = arith.select %739, %740, %737 : vector<8x8xi1>, vector<8x8xf32>
    %cst_299 = arith.constant dense<0xFF800000> : vector<8xf32>
    %742 = vector.multi_reduction <maximumf>, %741, %cst_299 [1] : vector<8x8xf32> to vector<8xf32>
    %743 = vector.shape_cast %742 : vector<8xf32> to vector<8x1xf32>
    %744 = vector.broadcast %743 : vector<8x1xf32> to vector<8x8xf32>
    %745 = arith.subf %741, %744 : vector<8x8xf32>
    %746 = math.exp %745 : vector<8x8xf32>
    %cst_300 = arith.constant dense<0.000000e+00> : vector<8xf32>
    %747 = vector.multi_reduction <add>, %746, %cst_300 [1] : vector<8x8xf32> to vector<8xf32>
    %748 = vector.shape_cast %747 : vector<8xf32> to vector<8x1xf32>
    %749 = tpu.reciprocal %748 {approx = true} : vector<8x1xf32> -> vector<8x1xf32>
    %750 = vector.broadcast %749 : vector<8x1xf32> to vector<8x8xf32>
    %751 = arith.mulf %746, %750 : vector<8x8xf32>
    %752 = vector.extract_strided_slice %655 {offsets = [0, 24], sizes = [8, 8], strides = [1, 1]} : vector<8x32xf32> to vector<8x8xf32>
    %cst_301 = arith.constant dense<0.000000e+00> : vector<8x8xf32>
    %753 = tpu.matmul %751, %752, %cst_301 {dimension_numbers = #tpu.dot_dimension_numbers<[1], [0], [0], [1], [0, 0, 1, 1], [], []>} : vector<8x8xf32>, vector<8x8xf32>, vector<8x8xf32> -> vector<8x8xf32>
    %754 = vector.extract_strided_slice %650 {offsets = [24, 0], sizes = [8, 32], strides = [1, 1]} : vector<32x32xf32> to vector<8x32xf32>
    %cst_302 = arith.constant dense<0.000000e+00> : vector<8x32xf32>
    %755 = tpu.matmul %753, %754, %cst_302 {dimension_numbers = #tpu.dot_dimension_numbers<[1], [0], [0], [1], [0, 0, 1, 1], [], []>} : vector<8x8xf32>, vector<8x32xf32>, vector<8x32xf32> -> vector<8x32xf32>
    %756 = arith.addf %731, %755 : vector<8x32xf32>
    %757 = vector.extract_strided_slice %646 {offsets = [8, 0], sizes = [8, 32], strides = [1, 1]} : vector<16x32xf32> to vector<8x32xf32>
    %758 = vector.extract_strided_slice %647 {offsets = [8, 0], sizes = [8, 32], strides = [1, 1]} : vector<16x32xf32> to vector<8x32xf32>
    %759 = vector.extract_strided_slice %648 {offsets = [8, 0], sizes = [8, 32], strides = [1, 1]} : vector<16x32xf32> to vector<8x32xf32>
    %760 = vector.extract_strided_slice %1 {offsets = [1, 0, 0], sizes = [1, 8, 8], strides = [1, 1, 1]} : vector<2x8x8xf32> to vector<1x8x8xf32>
    %761 = vector.shape_cast %760 : vector<1x8x8xf32> to vector<8x8xf32>
    %762 = vector.extract_strided_slice %757 {offsets = [0, 0], sizes = [8, 8], strides = [1, 1]} : vector<8x32xf32> to vector<8x8xf32>
    %763 = vector.extract_strided_slice %758 {offsets = [0, 0], sizes = [8, 8], strides = [1, 1]} : vector<8x32xf32> to vector<8x8xf32>
    %764 = tpu.transpose %763, [1, 0] : vector<8x8xf32> -> vector<8x8xf32>
    %cst_303 = arith.constant dense<0.000000e+00> : vector<8x8xf32>
    %765 = tpu.matmul %762, %764, %cst_303 {dimension_numbers = #tpu.dot_dimension_numbers<[1], [0], [0], [1], [0, 0, 1, 1], [], []>} : vector<8x8xf32>, vector<8x8xf32>, vector<8x8xf32> -> vector<8x8xf32>
    %cst_304 = arith.constant 0.353553385 : f32
    %766 = vector.broadcast %cst_304 : f32 to vector<8x8xf32>
    %767 = arith.mulf %765, %766 : vector<8x8xf32>
    %cst_305 = arith.constant 0.000000e+00 : f32
    %768 = vector.broadcast %cst_305 : f32 to vector<8x8xf32>
    %769 = arith.cmpf oeq, %761, %768 : vector<8x8xf32>
    %cst_306 = arith.constant -1.000000e+09 : f32
    %770 = vector.broadcast %cst_306 : f32 to vector<8x8xf32>
    %771 = arith.select %769, %770, %767 : vector<8x8xi1>, vector<8x8xf32>
    %cst_307 = arith.constant dense<0xFF800000> : vector<8xf32>
    %772 = vector.multi_reduction <maximumf>, %771, %cst_307 [1] : vector<8x8xf32> to vector<8xf32>
    %773 = vector.shape_cast %772 : vector<8xf32> to vector<8x1xf32>
    %774 = vector.broadcast %773 : vector<8x1xf32> to vector<8x8xf32>
    %775 = arith.subf %771, %774 : vector<8x8xf32>
    %776 = math.exp %775 : vector<8x8xf32>
    %cst_308 = arith.constant dense<0.000000e+00> : vector<8xf32>
    %777 = vector.multi_reduction <add>, %776, %cst_308 [1] : vector<8x8xf32> to vector<8xf32>
    %778 = vector.shape_cast %777 : vector<8xf32> to vector<8x1xf32>
    %779 = tpu.reciprocal %778 {approx = true} : vector<8x1xf32> -> vector<8x1xf32>
    %780 = vector.broadcast %779 : vector<8x1xf32> to vector<8x8xf32>
    %781 = arith.mulf %776, %780 : vector<8x8xf32>
    %782 = vector.extract_strided_slice %759 {offsets = [0, 0], sizes = [8, 8], strides = [1, 1]} : vector<8x32xf32> to vector<8x8xf32>
    %cst_309 = arith.constant dense<0.000000e+00> : vector<8x8xf32>
    %783 = tpu.matmul %781, %782, %cst_309 {dimension_numbers = #tpu.dot_dimension_numbers<[1], [0], [0], [1], [0, 0, 1, 1], [], []>} : vector<8x8xf32>, vector<8x8xf32>, vector<8x8xf32> -> vector<8x8xf32>
    %784 = vector.extract_strided_slice %650 {offsets = [0, 0], sizes = [8, 32], strides = [1, 1]} : vector<32x32xf32> to vector<8x32xf32>
    %cst_310 = arith.constant dense<0.000000e+00> : vector<8x32xf32>
    %785 = tpu.matmul %783, %784, %cst_310 {dimension_numbers = #tpu.dot_dimension_numbers<[1], [0], [0], [1], [0, 0, 1, 1], [], []>} : vector<8x8xf32>, vector<8x32xf32>, vector<8x32xf32> -> vector<8x32xf32>
    %786 = vector.extract_strided_slice %757 {offsets = [0, 8], sizes = [8, 8], strides = [1, 1]} : vector<8x32xf32> to vector<8x8xf32>
    %787 = vector.extract_strided_slice %758 {offsets = [0, 8], sizes = [8, 8], strides = [1, 1]} : vector<8x32xf32> to vector<8x8xf32>
    %788 = tpu.transpose %787, [1, 0] : vector<8x8xf32> -> vector<8x8xf32>
    %cst_311 = arith.constant dense<0.000000e+00> : vector<8x8xf32>
    %789 = tpu.matmul %786, %788, %cst_311 {dimension_numbers = #tpu.dot_dimension_numbers<[1], [0], [0], [1], [0, 0, 1, 1], [], []>} : vector<8x8xf32>, vector<8x8xf32>, vector<8x8xf32> -> vector<8x8xf32>
    %cst_312 = arith.constant 0.353553385 : f32
    %790 = vector.broadcast %cst_312 : f32 to vector<8x8xf32>
    %791 = arith.mulf %789, %790 : vector<8x8xf32>
    %cst_313 = arith.constant 0.000000e+00 : f32
    %792 = vector.broadcast %cst_313 : f32 to vector<8x8xf32>
    %793 = arith.cmpf oeq, %761, %792 : vector<8x8xf32>
    %cst_314 = arith.constant -1.000000e+09 : f32
    %794 = vector.broadcast %cst_314 : f32 to vector<8x8xf32>
    %795 = arith.select %793, %794, %791 : vector<8x8xi1>, vector<8x8xf32>
    %cst_315 = arith.constant dense<0xFF800000> : vector<8xf32>
    %796 = vector.multi_reduction <maximumf>, %795, %cst_315 [1] : vector<8x8xf32> to vector<8xf32>
    %797 = vector.shape_cast %796 : vector<8xf32> to vector<8x1xf32>
    %798 = vector.broadcast %797 : vector<8x1xf32> to vector<8x8xf32>
    %799 = arith.subf %795, %798 : vector<8x8xf32>
    %800 = math.exp %799 : vector<8x8xf32>
    %cst_316 = arith.constant dense<0.000000e+00> : vector<8xf32>
    %801 = vector.multi_reduction <add>, %800, %cst_316 [1] : vector<8x8xf32> to vector<8xf32>
    %802 = vector.shape_cast %801 : vector<8xf32> to vector<8x1xf32>
    %803 = tpu.reciprocal %802 {approx = true} : vector<8x1xf32> -> vector<8x1xf32>
    %804 = vector.broadcast %803 : vector<8x1xf32> to vector<8x8xf32>
    %805 = arith.mulf %800, %804 : vector<8x8xf32>
    %806 = vector.extract_strided_slice %759 {offsets = [0, 8], sizes = [8, 8], strides = [1, 1]} : vector<8x32xf32> to vector<8x8xf32>
    %cst_317 = arith.constant dense<0.000000e+00> : vector<8x8xf32>
    %807 = tpu.matmul %805, %806, %cst_317 {dimension_numbers = #tpu.dot_dimension_numbers<[1], [0], [0], [1], [0, 0, 1, 1], [], []>} : vector<8x8xf32>, vector<8x8xf32>, vector<8x8xf32> -> vector<8x8xf32>
    %808 = vector.extract_strided_slice %650 {offsets = [8, 0], sizes = [8, 32], strides = [1, 1]} : vector<32x32xf32> to vector<8x32xf32>
    %cst_318 = arith.constant dense<0.000000e+00> : vector<8x32xf32>
    %809 = tpu.matmul %807, %808, %cst_318 {dimension_numbers = #tpu.dot_dimension_numbers<[1], [0], [0], [1], [0, 0, 1, 1], [], []>} : vector<8x8xf32>, vector<8x32xf32>, vector<8x32xf32> -> vector<8x32xf32>
    %810 = arith.addf %785, %809 : vector<8x32xf32>
    %811 = vector.extract_strided_slice %757 {offsets = [0, 16], sizes = [8, 8], strides = [1, 1]} : vector<8x32xf32> to vector<8x8xf32>
    %812 = vector.extract_strided_slice %758 {offsets = [0, 16], sizes = [8, 8], strides = [1, 1]} : vector<8x32xf32> to vector<8x8xf32>
    %813 = tpu.transpose %812, [1, 0] : vector<8x8xf32> -> vector<8x8xf32>
    %cst_319 = arith.constant dense<0.000000e+00> : vector<8x8xf32>
    %814 = tpu.matmul %811, %813, %cst_319 {dimension_numbers = #tpu.dot_dimension_numbers<[1], [0], [0], [1], [0, 0, 1, 1], [], []>} : vector<8x8xf32>, vector<8x8xf32>, vector<8x8xf32> -> vector<8x8xf32>
    %cst_320 = arith.constant 0.353553385 : f32
    %815 = vector.broadcast %cst_320 : f32 to vector<8x8xf32>
    %816 = arith.mulf %814, %815 : vector<8x8xf32>
    %cst_321 = arith.constant 0.000000e+00 : f32
    %817 = vector.broadcast %cst_321 : f32 to vector<8x8xf32>
    %818 = arith.cmpf oeq, %761, %817 : vector<8x8xf32>
    %cst_322 = arith.constant -1.000000e+09 : f32
    %819 = vector.broadcast %cst_322 : f32 to vector<8x8xf32>
    %820 = arith.select %818, %819, %816 : vector<8x8xi1>, vector<8x8xf32>
    %cst_323 = arith.constant dense<0xFF800000> : vector<8xf32>
    %821 = vector.multi_reduction <maximumf>, %820, %cst_323 [1] : vector<8x8xf32> to vector<8xf32>
    %822 = vector.shape_cast %821 : vector<8xf32> to vector<8x1xf32>
    %823 = vector.broadcast %822 : vector<8x1xf32> to vector<8x8xf32>
    %824 = arith.subf %820, %823 : vector<8x8xf32>
    %825 = math.exp %824 : vector<8x8xf32>
    %cst_324 = arith.constant dense<0.000000e+00> : vector<8xf32>
    %826 = vector.multi_reduction <add>, %825, %cst_324 [1] : vector<8x8xf32> to vector<8xf32>
    %827 = vector.shape_cast %826 : vector<8xf32> to vector<8x1xf32>
    %828 = tpu.reciprocal %827 {approx = true} : vector<8x1xf32> -> vector<8x1xf32>
    %829 = vector.broadcast %828 : vector<8x1xf32> to vector<8x8xf32>
    %830 = arith.mulf %825, %829 : vector<8x8xf32>
    %831 = vector.extract_strided_slice %759 {offsets = [0, 16], sizes = [8, 8], strides = [1, 1]} : vector<8x32xf32> to vector<8x8xf32>
    %cst_325 = arith.constant dense<0.000000e+00> : vector<8x8xf32>
    %832 = tpu.matmul %830, %831, %cst_325 {dimension_numbers = #tpu.dot_dimension_numbers<[1], [0], [0], [1], [0, 0, 1, 1], [], []>} : vector<8x8xf32>, vector<8x8xf32>, vector<8x8xf32> -> vector<8x8xf32>
    %833 = vector.extract_strided_slice %650 {offsets = [16, 0], sizes = [8, 32], strides = [1, 1]} : vector<32x32xf32> to vector<8x32xf32>
    %cst_326 = arith.constant dense<0.000000e+00> : vector<8x32xf32>
    %834 = tpu.matmul %832, %833, %cst_326 {dimension_numbers = #tpu.dot_dimension_numbers<[1], [0], [0], [1], [0, 0, 1, 1], [], []>} : vector<8x8xf32>, vector<8x32xf32>, vector<8x32xf32> -> vector<8x32xf32>
    %835 = arith.addf %810, %834 : vector<8x32xf32>
    %836 = vector.extract_strided_slice %757 {offsets = [0, 24], sizes = [8, 8], strides = [1, 1]} : vector<8x32xf32> to vector<8x8xf32>
    %837 = vector.extract_strided_slice %758 {offsets = [0, 24], sizes = [8, 8], strides = [1, 1]} : vector<8x32xf32> to vector<8x8xf32>
    %838 = tpu.transpose %837, [1, 0] : vector<8x8xf32> -> vector<8x8xf32>
    %cst_327 = arith.constant dense<0.000000e+00> : vector<8x8xf32>
    %839 = tpu.matmul %836, %838, %cst_327 {dimension_numbers = #tpu.dot_dimension_numbers<[1], [0], [0], [1], [0, 0, 1, 1], [], []>} : vector<8x8xf32>, vector<8x8xf32>, vector<8x8xf32> -> vector<8x8xf32>
    %cst_328 = arith.constant 0.353553385 : f32
    %840 = vector.broadcast %cst_328 : f32 to vector<8x8xf32>
    %841 = arith.mulf %839, %840 : vector<8x8xf32>
    %cst_329 = arith.constant 0.000000e+00 : f32
    %842 = vector.broadcast %cst_329 : f32 to vector<8x8xf32>
    %843 = arith.cmpf oeq, %761, %842 : vector<8x8xf32>
    %cst_330 = arith.constant -1.000000e+09 : f32
    %844 = vector.broadcast %cst_330 : f32 to vector<8x8xf32>
    %845 = arith.select %843, %844, %841 : vector<8x8xi1>, vector<8x8xf32>
    %cst_331 = arith.constant dense<0xFF800000> : vector<8xf32>
    %846 = vector.multi_reduction <maximumf>, %845, %cst_331 [1] : vector<8x8xf32> to vector<8xf32>
    %847 = vector.shape_cast %846 : vector<8xf32> to vector<8x1xf32>
    %848 = vector.broadcast %847 : vector<8x1xf32> to vector<8x8xf32>
    %849 = arith.subf %845, %848 : vector<8x8xf32>
    %850 = math.exp %849 : vector<8x8xf32>
    %cst_332 = arith.constant dense<0.000000e+00> : vector<8xf32>
    %851 = vector.multi_reduction <add>, %850, %cst_332 [1] : vector<8x8xf32> to vector<8xf32>
    %852 = vector.shape_cast %851 : vector<8xf32> to vector<8x1xf32>
    %853 = tpu.reciprocal %852 {approx = true} : vector<8x1xf32> -> vector<8x1xf32>
    %854 = vector.broadcast %853 : vector<8x1xf32> to vector<8x8xf32>
    %855 = arith.mulf %850, %854 : vector<8x8xf32>
    %856 = vector.extract_strided_slice %759 {offsets = [0, 24], sizes = [8, 8], strides = [1, 1]} : vector<8x32xf32> to vector<8x8xf32>
    %cst_333 = arith.constant dense<0.000000e+00> : vector<8x8xf32>
    %857 = tpu.matmul %855, %856, %cst_333 {dimension_numbers = #tpu.dot_dimension_numbers<[1], [0], [0], [1], [0, 0, 1, 1], [], []>} : vector<8x8xf32>, vector<8x8xf32>, vector<8x8xf32> -> vector<8x8xf32>
    %858 = vector.extract_strided_slice %650 {offsets = [24, 0], sizes = [8, 32], strides = [1, 1]} : vector<32x32xf32> to vector<8x32xf32>
    %cst_334 = arith.constant dense<0.000000e+00> : vector<8x32xf32>
    %859 = tpu.matmul %857, %858, %cst_334 {dimension_numbers = #tpu.dot_dimension_numbers<[1], [0], [0], [1], [0, 0, 1, 1], [], []>} : vector<8x8xf32>, vector<8x32xf32>, vector<8x32xf32> -> vector<8x32xf32>
    %860 = arith.addf %835, %859 : vector<8x32xf32>
    %861 = tpu.concatenate %756, %860 in 0 : vector<8x32xf32>, vector<8x32xf32> -> vector<16x32xf32>
    %862 = vector.broadcast %652 : vector<1x32xf32> to vector<16x32xf32>
    %863 = arith.addf %861, %862 : vector<16x32xf32>
    %864 = arith.addf %613, %863 : vector<16x32xf32>
    %c0_335 = arith.constant 0 : index
    %c0_336 = arith.constant 0 : index
    %c0_337 = arith.constant 0 : index
    %865 = vector.load %arg33[%c0_335, %c0_336, %c0_337] : memref<2x1x32xf32, #tpu.memory_space<vmem>>, vector<1x1x32xf32>
    %866 = vector.shape_cast %865 : vector<1x1x32xf32> to vector<1x32xf32>
    %c0_338 = arith.constant 0 : index
    %c0_339 = arith.constant 0 : index
    %c0_340 = arith.constant 0 : index
    %867 = vector.load %arg34[%c0_338, %c0_339, %c0_340] : memref<2x1x32xf32, #tpu.memory_space<vmem>>, vector<1x1x32xf32>
    %868 = vector.shape_cast %867 : vector<1x1x32xf32> to vector<1x32xf32>
    %cst_341 = arith.constant dense<0.000000e+00> : vector<16xf32>
    %869 = vector.multi_reduction <add>, %864, %cst_341 [1] : vector<16x32xf32> to vector<16xf32>
    %870 = vector.shape_cast %869 : vector<16xf32> to vector<16x1xf32>
    %cst_342 = arith.constant 3.200000e+01 : f32
    %871 = vector.broadcast %cst_342 : f32 to vector<16x1xf32>
    %872 = arith.divf %870, %871 : vector<16x1xf32>
    %873 = vector.broadcast %872 : vector<16x1xf32> to vector<16x32xf32>
    %874 = arith.subf %864, %873 : vector<16x32xf32>
    %875 = arith.mulf %874, %874 : vector<16x32xf32>
    %cst_343 = arith.constant dense<0.000000e+00> : vector<16xf32>
    %876 = vector.multi_reduction <add>, %875, %cst_343 [1] : vector<16x32xf32> to vector<16xf32>
    %877 = vector.shape_cast %876 : vector<16xf32> to vector<16x1xf32>
    %cst_344 = arith.constant 0.0322580636 : f32
    %878 = vector.broadcast %cst_344 : f32 to vector<16x1xf32>
    %879 = arith.mulf %877, %878 : vector<16x1xf32>
    %880 = math.sqrt %879 : vector<16x1xf32>
    %881 = vector.broadcast %866 : vector<1x32xf32> to vector<16x32xf32>
    %882 = arith.mulf %881, %874 : vector<16x32xf32>
    %cst_345 = arith.constant 9.99999997E-7 : f32
    %883 = vector.broadcast %cst_345 : f32 to vector<16x1xf32>
    %884 = arith.addf %880, %883 : vector<16x1xf32>
    %885 = tpu.reciprocal %884 {approx = true} : vector<16x1xf32> -> vector<16x1xf32>
    %886 = vector.broadcast %885 : vector<16x1xf32> to vector<16x32xf32>
    %887 = arith.mulf %882, %886 : vector<16x32xf32>
    %888 = vector.broadcast %868 : vector<1x32xf32> to vector<16x32xf32>
    %889 = arith.addf %887, %888 : vector<16x32xf32>
    %c0_346 = arith.constant 0 : index
    %c0_347 = arith.constant 0 : index
    %c0_348 = arith.constant 0 : index
    %890 = vector.load %arg21[%c0_346, %c0_347, %c0_348] : memref<2x32x32xf32, #tpu.memory_space<vmem>>, vector<1x32x32xf32>
    %891 = vector.shape_cast %890 : vector<1x32x32xf32> to vector<32x32xf32>
    %cst_349 = arith.constant dense<0.000000e+00> : vector<16x32xf32>
    %892 = tpu.matmul %889, %891, %cst_349 {dimension_numbers = #tpu.dot_dimension_numbers<[1], [0], [0], [1], [0, 0, 1, 1], [], []>} : vector<16x32xf32>, vector<32x32xf32>, vector<16x32xf32> -> vector<16x32xf32>
    %c0_350 = arith.constant 0 : index
    %c0_351 = arith.constant 0 : index
    %c0_352 = arith.constant 0 : index
    %893 = vector.load %arg22[%c0_350, %c0_351, %c0_352] : memref<2x1x32xf32, #tpu.memory_space<vmem>>, vector<1x1x32xf32>
    %894 = vector.shape_cast %893 : vector<1x1x32xf32> to vector<1x32xf32>
    %895 = vector.broadcast %894 : vector<1x32xf32> to vector<16x32xf32>
    %896 = arith.addf %892, %895 : vector<16x32xf32>
    %c0_353 = arith.constant 0 : index
    %c0_354 = arith.constant 0 : index
    %c0_355 = arith.constant 0 : index
    %897 = vector.load %arg23[%c0_353, %c0_354, %c0_355] : memref<2x32x64xf32, #tpu.memory_space<vmem>>, vector<1x32x64xf32>
    %898 = vector.shape_cast %897 : vector<1x32x64xf32> to vector<32x64xf32>
    %cst_356 = arith.constant dense<0.000000e+00> : vector<16x64xf32>
    %899 = tpu.matmul %612, %898, %cst_356 {dimension_numbers = #tpu.dot_dimension_numbers<[1], [0], [0], [1], [0, 0, 1, 1], [], []>} : vector<16x32xf32>, vector<32x64xf32>, vector<16x64xf32> -> vector<16x64xf32>
    %c0_357 = arith.constant 0 : index
    %c0_358 = arith.constant 0 : index
    %c0_359 = arith.constant 0 : index
    %900 = vector.load %arg24[%c0_357, %c0_358, %c0_359] : memref<2x1x64xf32, #tpu.memory_space<vmem>>, vector<1x1x64xf32>
    %901 = vector.shape_cast %900 : vector<1x1x64xf32> to vector<1x64xf32>
    %902 = vector.broadcast %901 : vector<1x64xf32> to vector<16x64xf32>
    %903 = arith.addf %899, %902 : vector<16x64xf32>
    %904 = vector.extract_strided_slice %903 {offsets = [0, 0], sizes = [16, 32], strides = [1, 1]} : vector<16x64xf32> to vector<16x32xf32>
    %905 = vector.extract_strided_slice %903 {offsets = [0, 32], sizes = [16, 32], strides = [1, 1]} : vector<16x64xf32> to vector<16x32xf32>
    %c0_360 = arith.constant 0 : index
    %c0_361 = arith.constant 0 : index
    %c0_362 = arith.constant 0 : index
    %906 = vector.load %arg25[%c0_360, %c0_361, %c0_362] : memref<2x32x32xf32, #tpu.memory_space<vmem>>, vector<1x32x32xf32>
    %907 = vector.shape_cast %906 : vector<1x32x32xf32> to vector<32x32xf32>
    %c0_363 = arith.constant 0 : index
    %c0_364 = arith.constant 0 : index
    %c0_365 = arith.constant 0 : index
    %908 = vector.load %arg26[%c0_363, %c0_364, %c0_365] : memref<2x1x32xf32, #tpu.memory_space<vmem>>, vector<1x1x32xf32>
    %909 = vector.shape_cast %908 : vector<1x1x32xf32> to vector<1x32xf32>
    %910 = vector.extract_strided_slice %896 {offsets = [0, 0], sizes = [8, 32], strides = [1, 1]} : vector<16x32xf32> to vector<8x32xf32>
    %911 = vector.extract_strided_slice %904 {offsets = [0, 0], sizes = [8, 32], strides = [1, 1]} : vector<16x32xf32> to vector<8x32xf32>
    %912 = vector.extract_strided_slice %905 {offsets = [0, 0], sizes = [8, 32], strides = [1, 1]} : vector<16x32xf32> to vector<8x32xf32>
    %913 = vector.extract_strided_slice %2 {offsets = [0, 0, 0], sizes = [1, 8, 8], strides = [1, 1, 1]} : vector<2x8x8xf32> to vector<1x8x8xf32>
    %914 = vector.shape_cast %913 : vector<1x8x8xf32> to vector<8x8xf32>
    %915 = vector.extract_strided_slice %910 {offsets = [0, 0], sizes = [8, 8], strides = [1, 1]} : vector<8x32xf32> to vector<8x8xf32>
    %916 = vector.extract_strided_slice %911 {offsets = [0, 0], sizes = [8, 8], strides = [1, 1]} : vector<8x32xf32> to vector<8x8xf32>
    %917 = tpu.transpose %916, [1, 0] : vector<8x8xf32> -> vector<8x8xf32>
    %cst_366 = arith.constant dense<0.000000e+00> : vector<8x8xf32>
    %918 = tpu.matmul %915, %917, %cst_366 {dimension_numbers = #tpu.dot_dimension_numbers<[1], [0], [0], [1], [0, 0, 1, 1], [], []>} : vector<8x8xf32>, vector<8x8xf32>, vector<8x8xf32> -> vector<8x8xf32>
    %cst_367 = arith.constant 0.353553385 : f32
    %919 = vector.broadcast %cst_367 : f32 to vector<8x8xf32>
    %920 = arith.mulf %918, %919 : vector<8x8xf32>
    %cst_368 = arith.constant 0.000000e+00 : f32
    %921 = vector.broadcast %cst_368 : f32 to vector<8x8xf32>
    %922 = arith.cmpf oeq, %914, %921 : vector<8x8xf32>
    %cst_369 = arith.constant -1.000000e+09 : f32
    %923 = vector.broadcast %cst_369 : f32 to vector<8x8xf32>
    %924 = arith.select %922, %923, %920 : vector<8x8xi1>, vector<8x8xf32>
    %cst_370 = arith.constant dense<0xFF800000> : vector<8xf32>
    %925 = vector.multi_reduction <maximumf>, %924, %cst_370 [1] : vector<8x8xf32> to vector<8xf32>
    %926 = vector.shape_cast %925 : vector<8xf32> to vector<8x1xf32>
    %927 = vector.broadcast %926 : vector<8x1xf32> to vector<8x8xf32>
    %928 = arith.subf %924, %927 : vector<8x8xf32>
    %929 = math.exp %928 : vector<8x8xf32>
    %cst_371 = arith.constant dense<0.000000e+00> : vector<8xf32>
    %930 = vector.multi_reduction <add>, %929, %cst_371 [1] : vector<8x8xf32> to vector<8xf32>
    %931 = vector.shape_cast %930 : vector<8xf32> to vector<8x1xf32>
    %932 = tpu.reciprocal %931 {approx = true} : vector<8x1xf32> -> vector<8x1xf32>
    %933 = vector.broadcast %932 : vector<8x1xf32> to vector<8x8xf32>
    %934 = arith.mulf %929, %933 : vector<8x8xf32>
    %935 = vector.extract_strided_slice %912 {offsets = [0, 0], sizes = [8, 8], strides = [1, 1]} : vector<8x32xf32> to vector<8x8xf32>
    %cst_372 = arith.constant dense<0.000000e+00> : vector<8x8xf32>
    %936 = tpu.matmul %934, %935, %cst_372 {dimension_numbers = #tpu.dot_dimension_numbers<[1], [0], [0], [1], [0, 0, 1, 1], [], []>} : vector<8x8xf32>, vector<8x8xf32>, vector<8x8xf32> -> vector<8x8xf32>
    %937 = vector.extract_strided_slice %907 {offsets = [0, 0], sizes = [8, 32], strides = [1, 1]} : vector<32x32xf32> to vector<8x32xf32>
    %cst_373 = arith.constant dense<0.000000e+00> : vector<8x32xf32>
    %938 = tpu.matmul %936, %937, %cst_373 {dimension_numbers = #tpu.dot_dimension_numbers<[1], [0], [0], [1], [0, 0, 1, 1], [], []>} : vector<8x8xf32>, vector<8x32xf32>, vector<8x32xf32> -> vector<8x32xf32>
    %939 = vector.extract_strided_slice %910 {offsets = [0, 8], sizes = [8, 8], strides = [1, 1]} : vector<8x32xf32> to vector<8x8xf32>
    %940 = vector.extract_strided_slice %911 {offsets = [0, 8], sizes = [8, 8], strides = [1, 1]} : vector<8x32xf32> to vector<8x8xf32>
    %941 = tpu.transpose %940, [1, 0] : vector<8x8xf32> -> vector<8x8xf32>
    %cst_374 = arith.constant dense<0.000000e+00> : vector<8x8xf32>
    %942 = tpu.matmul %939, %941, %cst_374 {dimension_numbers = #tpu.dot_dimension_numbers<[1], [0], [0], [1], [0, 0, 1, 1], [], []>} : vector<8x8xf32>, vector<8x8xf32>, vector<8x8xf32> -> vector<8x8xf32>
    %cst_375 = arith.constant 0.353553385 : f32
    %943 = vector.broadcast %cst_375 : f32 to vector<8x8xf32>
    %944 = arith.mulf %942, %943 : vector<8x8xf32>
    %cst_376 = arith.constant 0.000000e+00 : f32
    %945 = vector.broadcast %cst_376 : f32 to vector<8x8xf32>
    %946 = arith.cmpf oeq, %914, %945 : vector<8x8xf32>
    %cst_377 = arith.constant -1.000000e+09 : f32
    %947 = vector.broadcast %cst_377 : f32 to vector<8x8xf32>
    %948 = arith.select %946, %947, %944 : vector<8x8xi1>, vector<8x8xf32>
    %cst_378 = arith.constant dense<0xFF800000> : vector<8xf32>
    %949 = vector.multi_reduction <maximumf>, %948, %cst_378 [1] : vector<8x8xf32> to vector<8xf32>
    %950 = vector.shape_cast %949 : vector<8xf32> to vector<8x1xf32>
    %951 = vector.broadcast %950 : vector<8x1xf32> to vector<8x8xf32>
    %952 = arith.subf %948, %951 : vector<8x8xf32>
    %953 = math.exp %952 : vector<8x8xf32>
    %cst_379 = arith.constant dense<0.000000e+00> : vector<8xf32>
    %954 = vector.multi_reduction <add>, %953, %cst_379 [1] : vector<8x8xf32> to vector<8xf32>
    %955 = vector.shape_cast %954 : vector<8xf32> to vector<8x1xf32>
    %956 = tpu.reciprocal %955 {approx = true} : vector<8x1xf32> -> vector<8x1xf32>
    %957 = vector.broadcast %956 : vector<8x1xf32> to vector<8x8xf32>
    %958 = arith.mulf %953, %957 : vector<8x8xf32>
    %959 = vector.extract_strided_slice %912 {offsets = [0, 8], sizes = [8, 8], strides = [1, 1]} : vector<8x32xf32> to vector<8x8xf32>
    %cst_380 = arith.constant dense<0.000000e+00> : vector<8x8xf32>
    %960 = tpu.matmul %958, %959, %cst_380 {dimension_numbers = #tpu.dot_dimension_numbers<[1], [0], [0], [1], [0, 0, 1, 1], [], []>} : vector<8x8xf32>, vector<8x8xf32>, vector<8x8xf32> -> vector<8x8xf32>
    %961 = vector.extract_strided_slice %907 {offsets = [8, 0], sizes = [8, 32], strides = [1, 1]} : vector<32x32xf32> to vector<8x32xf32>
    %cst_381 = arith.constant dense<0.000000e+00> : vector<8x32xf32>
    %962 = tpu.matmul %960, %961, %cst_381 {dimension_numbers = #tpu.dot_dimension_numbers<[1], [0], [0], [1], [0, 0, 1, 1], [], []>} : vector<8x8xf32>, vector<8x32xf32>, vector<8x32xf32> -> vector<8x32xf32>
    %963 = arith.addf %938, %962 : vector<8x32xf32>
    %964 = vector.extract_strided_slice %910 {offsets = [0, 16], sizes = [8, 8], strides = [1, 1]} : vector<8x32xf32> to vector<8x8xf32>
    %965 = vector.extract_strided_slice %911 {offsets = [0, 16], sizes = [8, 8], strides = [1, 1]} : vector<8x32xf32> to vector<8x8xf32>
    %966 = tpu.transpose %965, [1, 0] : vector<8x8xf32> -> vector<8x8xf32>
    %cst_382 = arith.constant dense<0.000000e+00> : vector<8x8xf32>
    %967 = tpu.matmul %964, %966, %cst_382 {dimension_numbers = #tpu.dot_dimension_numbers<[1], [0], [0], [1], [0, 0, 1, 1], [], []>} : vector<8x8xf32>, vector<8x8xf32>, vector<8x8xf32> -> vector<8x8xf32>
    %cst_383 = arith.constant 0.353553385 : f32
    %968 = vector.broadcast %cst_383 : f32 to vector<8x8xf32>
    %969 = arith.mulf %967, %968 : vector<8x8xf32>
    %cst_384 = arith.constant 0.000000e+00 : f32
    %970 = vector.broadcast %cst_384 : f32 to vector<8x8xf32>
    %971 = arith.cmpf oeq, %914, %970 : vector<8x8xf32>
    %cst_385 = arith.constant -1.000000e+09 : f32
    %972 = vector.broadcast %cst_385 : f32 to vector<8x8xf32>
    %973 = arith.select %971, %972, %969 : vector<8x8xi1>, vector<8x8xf32>
    %cst_386 = arith.constant dense<0xFF800000> : vector<8xf32>
    %974 = vector.multi_reduction <maximumf>, %973, %cst_386 [1] : vector<8x8xf32> to vector<8xf32>
    %975 = vector.shape_cast %974 : vector<8xf32> to vector<8x1xf32>
    %976 = vector.broadcast %975 : vector<8x1xf32> to vector<8x8xf32>
    %977 = arith.subf %973, %976 : vector<8x8xf32>
    %978 = math.exp %977 : vector<8x8xf32>
    %cst_387 = arith.constant dense<0.000000e+00> : vector<8xf32>
    %979 = vector.multi_reduction <add>, %978, %cst_387 [1] : vector<8x8xf32> to vector<8xf32>
    %980 = vector.shape_cast %979 : vector<8xf32> to vector<8x1xf32>
    %981 = tpu.reciprocal %980 {approx = true} : vector<8x1xf32> -> vector<8x1xf32>
    %982 = vector.broadcast %981 : vector<8x1xf32> to vector<8x8xf32>
    %983 = arith.mulf %978, %982 : vector<8x8xf32>
    %984 = vector.extract_strided_slice %912 {offsets = [0, 16], sizes = [8, 8], strides = [1, 1]} : vector<8x32xf32> to vector<8x8xf32>
    %cst_388 = arith.constant dense<0.000000e+00> : vector<8x8xf32>
    %985 = tpu.matmul %983, %984, %cst_388 {dimension_numbers = #tpu.dot_dimension_numbers<[1], [0], [0], [1], [0, 0, 1, 1], [], []>} : vector<8x8xf32>, vector<8x8xf32>, vector<8x8xf32> -> vector<8x8xf32>
    %986 = vector.extract_strided_slice %907 {offsets = [16, 0], sizes = [8, 32], strides = [1, 1]} : vector<32x32xf32> to vector<8x32xf32>
    %cst_389 = arith.constant dense<0.000000e+00> : vector<8x32xf32>
    %987 = tpu.matmul %985, %986, %cst_389 {dimension_numbers = #tpu.dot_dimension_numbers<[1], [0], [0], [1], [0, 0, 1, 1], [], []>} : vector<8x8xf32>, vector<8x32xf32>, vector<8x32xf32> -> vector<8x32xf32>
    %988 = arith.addf %963, %987 : vector<8x32xf32>
    %989 = vector.extract_strided_slice %910 {offsets = [0, 24], sizes = [8, 8], strides = [1, 1]} : vector<8x32xf32> to vector<8x8xf32>
    %990 = vector.extract_strided_slice %911 {offsets = [0, 24], sizes = [8, 8], strides = [1, 1]} : vector<8x32xf32> to vector<8x8xf32>
    %991 = tpu.transpose %990, [1, 0] : vector<8x8xf32> -> vector<8x8xf32>
    %cst_390 = arith.constant dense<0.000000e+00> : vector<8x8xf32>
    %992 = tpu.matmul %989, %991, %cst_390 {dimension_numbers = #tpu.dot_dimension_numbers<[1], [0], [0], [1], [0, 0, 1, 1], [], []>} : vector<8x8xf32>, vector<8x8xf32>, vector<8x8xf32> -> vector<8x8xf32>
    %cst_391 = arith.constant 0.353553385 : f32
    %993 = vector.broadcast %cst_391 : f32 to vector<8x8xf32>
    %994 = arith.mulf %992, %993 : vector<8x8xf32>
    %cst_392 = arith.constant 0.000000e+00 : f32
    %995 = vector.broadcast %cst_392 : f32 to vector<8x8xf32>
    %996 = arith.cmpf oeq, %914, %995 : vector<8x8xf32>
    %cst_393 = arith.constant -1.000000e+09 : f32
    %997 = vector.broadcast %cst_393 : f32 to vector<8x8xf32>
    %998 = arith.select %996, %997, %994 : vector<8x8xi1>, vector<8x8xf32>
    %cst_394 = arith.constant dense<0xFF800000> : vector<8xf32>
    %999 = vector.multi_reduction <maximumf>, %998, %cst_394 [1] : vector<8x8xf32> to vector<8xf32>
    %1000 = vector.shape_cast %999 : vector<8xf32> to vector<8x1xf32>
    %1001 = vector.broadcast %1000 : vector<8x1xf32> to vector<8x8xf32>
    %1002 = arith.subf %998, %1001 : vector<8x8xf32>
    %1003 = math.exp %1002 : vector<8x8xf32>
    %cst_395 = arith.constant dense<0.000000e+00> : vector<8xf32>
    %1004 = vector.multi_reduction <add>, %1003, %cst_395 [1] : vector<8x8xf32> to vector<8xf32>
    %1005 = vector.shape_cast %1004 : vector<8xf32> to vector<8x1xf32>
    %1006 = tpu.reciprocal %1005 {approx = true} : vector<8x1xf32> -> vector<8x1xf32>
    %1007 = vector.broadcast %1006 : vector<8x1xf32> to vector<8x8xf32>
    %1008 = arith.mulf %1003, %1007 : vector<8x8xf32>
    %1009 = vector.extract_strided_slice %912 {offsets = [0, 24], sizes = [8, 8], strides = [1, 1]} : vector<8x32xf32> to vector<8x8xf32>
    %cst_396 = arith.constant dense<0.000000e+00> : vector<8x8xf32>
    %1010 = tpu.matmul %1008, %1009, %cst_396 {dimension_numbers = #tpu.dot_dimension_numbers<[1], [0], [0], [1], [0, 0, 1, 1], [], []>} : vector<8x8xf32>, vector<8x8xf32>, vector<8x8xf32> -> vector<8x8xf32>
    %1011 = vector.extract_strided_slice %907 {offsets = [24, 0], sizes = [8, 32], strides = [1, 1]} : vector<32x32xf32> to vector<8x32xf32>
    %cst_397 = arith.constant dense<0.000000e+00> : vector<8x32xf32>
    %1012 = tpu.matmul %1010, %1011, %cst_397 {dimension_numbers = #tpu.dot_dimension_numbers<[1], [0], [0], [1], [0, 0, 1, 1], [], []>} : vector<8x8xf32>, vector<8x32xf32>, vector<8x32xf32> -> vector<8x32xf32>
    %1013 = arith.addf %988, %1012 : vector<8x32xf32>
    %1014 = vector.extract_strided_slice %896 {offsets = [8, 0], sizes = [8, 32], strides = [1, 1]} : vector<16x32xf32> to vector<8x32xf32>
    %1015 = vector.extract_strided_slice %904 {offsets = [8, 0], sizes = [8, 32], strides = [1, 1]} : vector<16x32xf32> to vector<8x32xf32>
    %1016 = vector.extract_strided_slice %905 {offsets = [8, 0], sizes = [8, 32], strides = [1, 1]} : vector<16x32xf32> to vector<8x32xf32>
    %1017 = vector.extract_strided_slice %2 {offsets = [1, 0, 0], sizes = [1, 8, 8], strides = [1, 1, 1]} : vector<2x8x8xf32> to vector<1x8x8xf32>
    %1018 = vector.shape_cast %1017 : vector<1x8x8xf32> to vector<8x8xf32>
    %1019 = vector.extract_strided_slice %1014 {offsets = [0, 0], sizes = [8, 8], strides = [1, 1]} : vector<8x32xf32> to vector<8x8xf32>
    %1020 = vector.extract_strided_slice %1015 {offsets = [0, 0], sizes = [8, 8], strides = [1, 1]} : vector<8x32xf32> to vector<8x8xf32>
    %1021 = tpu.transpose %1020, [1, 0] : vector<8x8xf32> -> vector<8x8xf32>
    %cst_398 = arith.constant dense<0.000000e+00> : vector<8x8xf32>
    %1022 = tpu.matmul %1019, %1021, %cst_398 {dimension_numbers = #tpu.dot_dimension_numbers<[1], [0], [0], [1], [0, 0, 1, 1], [], []>} : vector<8x8xf32>, vector<8x8xf32>, vector<8x8xf32> -> vector<8x8xf32>
    %cst_399 = arith.constant 0.353553385 : f32
    %1023 = vector.broadcast %cst_399 : f32 to vector<8x8xf32>
    %1024 = arith.mulf %1022, %1023 : vector<8x8xf32>
    %cst_400 = arith.constant 0.000000e+00 : f32
    %1025 = vector.broadcast %cst_400 : f32 to vector<8x8xf32>
    %1026 = arith.cmpf oeq, %1018, %1025 : vector<8x8xf32>
    %cst_401 = arith.constant -1.000000e+09 : f32
    %1027 = vector.broadcast %cst_401 : f32 to vector<8x8xf32>
    %1028 = arith.select %1026, %1027, %1024 : vector<8x8xi1>, vector<8x8xf32>
    %cst_402 = arith.constant dense<0xFF800000> : vector<8xf32>
    %1029 = vector.multi_reduction <maximumf>, %1028, %cst_402 [1] : vector<8x8xf32> to vector<8xf32>
    %1030 = vector.shape_cast %1029 : vector<8xf32> to vector<8x1xf32>
    %1031 = vector.broadcast %1030 : vector<8x1xf32> to vector<8x8xf32>
    %1032 = arith.subf %1028, %1031 : vector<8x8xf32>
    %1033 = math.exp %1032 : vector<8x8xf32>
    %cst_403 = arith.constant dense<0.000000e+00> : vector<8xf32>
    %1034 = vector.multi_reduction <add>, %1033, %cst_403 [1] : vector<8x8xf32> to vector<8xf32>
    %1035 = vector.shape_cast %1034 : vector<8xf32> to vector<8x1xf32>
    %1036 = tpu.reciprocal %1035 {approx = true} : vector<8x1xf32> -> vector<8x1xf32>
    %1037 = vector.broadcast %1036 : vector<8x1xf32> to vector<8x8xf32>
    %1038 = arith.mulf %1033, %1037 : vector<8x8xf32>
    %1039 = vector.extract_strided_slice %1016 {offsets = [0, 0], sizes = [8, 8], strides = [1, 1]} : vector<8x32xf32> to vector<8x8xf32>
    %cst_404 = arith.constant dense<0.000000e+00> : vector<8x8xf32>
    %1040 = tpu.matmul %1038, %1039, %cst_404 {dimension_numbers = #tpu.dot_dimension_numbers<[1], [0], [0], [1], [0, 0, 1, 1], [], []>} : vector<8x8xf32>, vector<8x8xf32>, vector<8x8xf32> -> vector<8x8xf32>
    %1041 = vector.extract_strided_slice %907 {offsets = [0, 0], sizes = [8, 32], strides = [1, 1]} : vector<32x32xf32> to vector<8x32xf32>
    %cst_405 = arith.constant dense<0.000000e+00> : vector<8x32xf32>
    %1042 = tpu.matmul %1040, %1041, %cst_405 {dimension_numbers = #tpu.dot_dimension_numbers<[1], [0], [0], [1], [0, 0, 1, 1], [], []>} : vector<8x8xf32>, vector<8x32xf32>, vector<8x32xf32> -> vector<8x32xf32>
    %1043 = vector.extract_strided_slice %1014 {offsets = [0, 8], sizes = [8, 8], strides = [1, 1]} : vector<8x32xf32> to vector<8x8xf32>
    %1044 = vector.extract_strided_slice %1015 {offsets = [0, 8], sizes = [8, 8], strides = [1, 1]} : vector<8x32xf32> to vector<8x8xf32>
    %1045 = tpu.transpose %1044, [1, 0] : vector<8x8xf32> -> vector<8x8xf32>
    %cst_406 = arith.constant dense<0.000000e+00> : vector<8x8xf32>
    %1046 = tpu.matmul %1043, %1045, %cst_406 {dimension_numbers = #tpu.dot_dimension_numbers<[1], [0], [0], [1], [0, 0, 1, 1], [], []>} : vector<8x8xf32>, vector<8x8xf32>, vector<8x8xf32> -> vector<8x8xf32>
    %cst_407 = arith.constant 0.353553385 : f32
    %1047 = vector.broadcast %cst_407 : f32 to vector<8x8xf32>
    %1048 = arith.mulf %1046, %1047 : vector<8x8xf32>
    %cst_408 = arith.constant 0.000000e+00 : f32
    %1049 = vector.broadcast %cst_408 : f32 to vector<8x8xf32>
    %1050 = arith.cmpf oeq, %1018, %1049 : vector<8x8xf32>
    %cst_409 = arith.constant -1.000000e+09 : f32
    %1051 = vector.broadcast %cst_409 : f32 to vector<8x8xf32>
    %1052 = arith.select %1050, %1051, %1048 : vector<8x8xi1>, vector<8x8xf32>
    %cst_410 = arith.constant dense<0xFF800000> : vector<8xf32>
    %1053 = vector.multi_reduction <maximumf>, %1052, %cst_410 [1] : vector<8x8xf32> to vector<8xf32>
    %1054 = vector.shape_cast %1053 : vector<8xf32> to vector<8x1xf32>
    %1055 = vector.broadcast %1054 : vector<8x1xf32> to vector<8x8xf32>
    %1056 = arith.subf %1052, %1055 : vector<8x8xf32>
    %1057 = math.exp %1056 : vector<8x8xf32>
    %cst_411 = arith.constant dense<0.000000e+00> : vector<8xf32>
    %1058 = vector.multi_reduction <add>, %1057, %cst_411 [1] : vector<8x8xf32> to vector<8xf32>
    %1059 = vector.shape_cast %1058 : vector<8xf32> to vector<8x1xf32>
    %1060 = tpu.reciprocal %1059 {approx = true} : vector<8x1xf32> -> vector<8x1xf32>
    %1061 = vector.broadcast %1060 : vector<8x1xf32> to vector<8x8xf32>
    %1062 = arith.mulf %1057, %1061 : vector<8x8xf32>
    %1063 = vector.extract_strided_slice %1016 {offsets = [0, 8], sizes = [8, 8], strides = [1, 1]} : vector<8x32xf32> to vector<8x8xf32>
    %cst_412 = arith.constant dense<0.000000e+00> : vector<8x8xf32>
    %1064 = tpu.matmul %1062, %1063, %cst_412 {dimension_numbers = #tpu.dot_dimension_numbers<[1], [0], [0], [1], [0, 0, 1, 1], [], []>} : vector<8x8xf32>, vector<8x8xf32>, vector<8x8xf32> -> vector<8x8xf32>
    %1065 = vector.extract_strided_slice %907 {offsets = [8, 0], sizes = [8, 32], strides = [1, 1]} : vector<32x32xf32> to vector<8x32xf32>
    %cst_413 = arith.constant dense<0.000000e+00> : vector<8x32xf32>
    %1066 = tpu.matmul %1064, %1065, %cst_413 {dimension_numbers = #tpu.dot_dimension_numbers<[1], [0], [0], [1], [0, 0, 1, 1], [], []>} : vector<8x8xf32>, vector<8x32xf32>, vector<8x32xf32> -> vector<8x32xf32>
    %1067 = arith.addf %1042, %1066 : vector<8x32xf32>
    %1068 = vector.extract_strided_slice %1014 {offsets = [0, 16], sizes = [8, 8], strides = [1, 1]} : vector<8x32xf32> to vector<8x8xf32>
    %1069 = vector.extract_strided_slice %1015 {offsets = [0, 16], sizes = [8, 8], strides = [1, 1]} : vector<8x32xf32> to vector<8x8xf32>
    %1070 = tpu.transpose %1069, [1, 0] : vector<8x8xf32> -> vector<8x8xf32>
    %cst_414 = arith.constant dense<0.000000e+00> : vector<8x8xf32>
    %1071 = tpu.matmul %1068, %1070, %cst_414 {dimension_numbers = #tpu.dot_dimension_numbers<[1], [0], [0], [1], [0, 0, 1, 1], [], []>} : vector<8x8xf32>, vector<8x8xf32>, vector<8x8xf32> -> vector<8x8xf32>
    %cst_415 = arith.constant 0.353553385 : f32
    %1072 = vector.broadcast %cst_415 : f32 to vector<8x8xf32>
    %1073 = arith.mulf %1071, %1072 : vector<8x8xf32>
    %cst_416 = arith.constant 0.000000e+00 : f32
    %1074 = vector.broadcast %cst_416 : f32 to vector<8x8xf32>
    %1075 = arith.cmpf oeq, %1018, %1074 : vector<8x8xf32>
    %cst_417 = arith.constant -1.000000e+09 : f32
    %1076 = vector.broadcast %cst_417 : f32 to vector<8x8xf32>
    %1077 = arith.select %1075, %1076, %1073 : vector<8x8xi1>, vector<8x8xf32>
    %cst_418 = arith.constant dense<0xFF800000> : vector<8xf32>
    %1078 = vector.multi_reduction <maximumf>, %1077, %cst_418 [1] : vector<8x8xf32> to vector<8xf32>
    %1079 = vector.shape_cast %1078 : vector<8xf32> to vector<8x1xf32>
    %1080 = vector.broadcast %1079 : vector<8x1xf32> to vector<8x8xf32>
    %1081 = arith.subf %1077, %1080 : vector<8x8xf32>
    %1082 = math.exp %1081 : vector<8x8xf32>
    %cst_419 = arith.constant dense<0.000000e+00> : vector<8xf32>
    %1083 = vector.multi_reduction <add>, %1082, %cst_419 [1] : vector<8x8xf32> to vector<8xf32>
    %1084 = vector.shape_cast %1083 : vector<8xf32> to vector<8x1xf32>
    %1085 = tpu.reciprocal %1084 {approx = true} : vector<8x1xf32> -> vector<8x1xf32>
    %1086 = vector.broadcast %1085 : vector<8x1xf32> to vector<8x8xf32>
    %1087 = arith.mulf %1082, %1086 : vector<8x8xf32>
    %1088 = vector.extract_strided_slice %1016 {offsets = [0, 16], sizes = [8, 8], strides = [1, 1]} : vector<8x32xf32> to vector<8x8xf32>
    %cst_420 = arith.constant dense<0.000000e+00> : vector<8x8xf32>
    %1089 = tpu.matmul %1087, %1088, %cst_420 {dimension_numbers = #tpu.dot_dimension_numbers<[1], [0], [0], [1], [0, 0, 1, 1], [], []>} : vector<8x8xf32>, vector<8x8xf32>, vector<8x8xf32> -> vector<8x8xf32>
    %1090 = vector.extract_strided_slice %907 {offsets = [16, 0], sizes = [8, 32], strides = [1, 1]} : vector<32x32xf32> to vector<8x32xf32>
    %cst_421 = arith.constant dense<0.000000e+00> : vector<8x32xf32>
    %1091 = tpu.matmul %1089, %1090, %cst_421 {dimension_numbers = #tpu.dot_dimension_numbers<[1], [0], [0], [1], [0, 0, 1, 1], [], []>} : vector<8x8xf32>, vector<8x32xf32>, vector<8x32xf32> -> vector<8x32xf32>
    %1092 = arith.addf %1067, %1091 : vector<8x32xf32>
    %1093 = vector.extract_strided_slice %1014 {offsets = [0, 24], sizes = [8, 8], strides = [1, 1]} : vector<8x32xf32> to vector<8x8xf32>
    %1094 = vector.extract_strided_slice %1015 {offsets = [0, 24], sizes = [8, 8], strides = [1, 1]} : vector<8x32xf32> to vector<8x8xf32>
    %1095 = tpu.transpose %1094, [1, 0] : vector<8x8xf32> -> vector<8x8xf32>
    %cst_422 = arith.constant dense<0.000000e+00> : vector<8x8xf32>
    %1096 = tpu.matmul %1093, %1095, %cst_422 {dimension_numbers = #tpu.dot_dimension_numbers<[1], [0], [0], [1], [0, 0, 1, 1], [], []>} : vector<8x8xf32>, vector<8x8xf32>, vector<8x8xf32> -> vector<8x8xf32>
    %cst_423 = arith.constant 0.353553385 : f32
    %1097 = vector.broadcast %cst_423 : f32 to vector<8x8xf32>
    %1098 = arith.mulf %1096, %1097 : vector<8x8xf32>
    %cst_424 = arith.constant 0.000000e+00 : f32
    %1099 = vector.broadcast %cst_424 : f32 to vector<8x8xf32>
    %1100 = arith.cmpf oeq, %1018, %1099 : vector<8x8xf32>
    %cst_425 = arith.constant -1.000000e+09 : f32
    %1101 = vector.broadcast %cst_425 : f32 to vector<8x8xf32>
    %1102 = arith.select %1100, %1101, %1098 : vector<8x8xi1>, vector<8x8xf32>
    %cst_426 = arith.constant dense<0xFF800000> : vector<8xf32>
    %1103 = vector.multi_reduction <maximumf>, %1102, %cst_426 [1] : vector<8x8xf32> to vector<8xf32>
    %1104 = vector.shape_cast %1103 : vector<8xf32> to vector<8x1xf32>
    %1105 = vector.broadcast %1104 : vector<8x1xf32> to vector<8x8xf32>
    %1106 = arith.subf %1102, %1105 : vector<8x8xf32>
    %1107 = math.exp %1106 : vector<8x8xf32>
    %cst_427 = arith.constant dense<0.000000e+00> : vector<8xf32>
    %1108 = vector.multi_reduction <add>, %1107, %cst_427 [1] : vector<8x8xf32> to vector<8xf32>
    %1109 = vector.shape_cast %1108 : vector<8xf32> to vector<8x1xf32>
    %1110 = tpu.reciprocal %1109 {approx = true} : vector<8x1xf32> -> vector<8x1xf32>
    %1111 = vector.broadcast %1110 : vector<8x1xf32> to vector<8x8xf32>
    %1112 = arith.mulf %1107, %1111 : vector<8x8xf32>
    %1113 = vector.extract_strided_slice %1016 {offsets = [0, 24], sizes = [8, 8], strides = [1, 1]} : vector<8x32xf32> to vector<8x8xf32>
    %cst_428 = arith.constant dense<0.000000e+00> : vector<8x8xf32>
    %1114 = tpu.matmul %1112, %1113, %cst_428 {dimension_numbers = #tpu.dot_dimension_numbers<[1], [0], [0], [1], [0, 0, 1, 1], [], []>} : vector<8x8xf32>, vector<8x8xf32>, vector<8x8xf32> -> vector<8x8xf32>
    %1115 = vector.extract_strided_slice %907 {offsets = [24, 0], sizes = [8, 32], strides = [1, 1]} : vector<32x32xf32> to vector<8x32xf32>
    %cst_429 = arith.constant dense<0.000000e+00> : vector<8x32xf32>
    %1116 = tpu.matmul %1114, %1115, %cst_429 {dimension_numbers = #tpu.dot_dimension_numbers<[1], [0], [0], [1], [0, 0, 1, 1], [], []>} : vector<8x8xf32>, vector<8x32xf32>, vector<8x32xf32> -> vector<8x32xf32>
    %1117 = arith.addf %1092, %1116 : vector<8x32xf32>
    %1118 = tpu.concatenate %1013, %1117 in 0 : vector<8x32xf32>, vector<8x32xf32> -> vector<16x32xf32>
    %1119 = vector.broadcast %909 : vector<1x32xf32> to vector<16x32xf32>
    %1120 = arith.addf %1118, %1119 : vector<16x32xf32>
    %1121 = arith.addf %864, %1120 : vector<16x32xf32>
    %c0_430 = arith.constant 0 : index
    %c0_431 = arith.constant 0 : index
    %c0_432 = arith.constant 0 : index
    %1122 = vector.load %arg35[%c0_430, %c0_431, %c0_432] : memref<2x1x32xf32, #tpu.memory_space<vmem>>, vector<1x1x32xf32>
    %1123 = vector.shape_cast %1122 : vector<1x1x32xf32> to vector<1x32xf32>
    %c0_433 = arith.constant 0 : index
    %c0_434 = arith.constant 0 : index
    %c0_435 = arith.constant 0 : index
    %1124 = vector.load %arg36[%c0_433, %c0_434, %c0_435] : memref<2x1x32xf32, #tpu.memory_space<vmem>>, vector<1x1x32xf32>
    %1125 = vector.shape_cast %1124 : vector<1x1x32xf32> to vector<1x32xf32>
    %cst_436 = arith.constant dense<0.000000e+00> : vector<16xf32>
    %1126 = vector.multi_reduction <add>, %1121, %cst_436 [1] : vector<16x32xf32> to vector<16xf32>
    %1127 = vector.shape_cast %1126 : vector<16xf32> to vector<16x1xf32>
    %cst_437 = arith.constant 3.200000e+01 : f32
    %1128 = vector.broadcast %cst_437 : f32 to vector<16x1xf32>
    %1129 = arith.divf %1127, %1128 : vector<16x1xf32>
    %1130 = vector.broadcast %1129 : vector<16x1xf32> to vector<16x32xf32>
    %1131 = arith.subf %1121, %1130 : vector<16x32xf32>
    %1132 = arith.mulf %1131, %1131 : vector<16x32xf32>
    %cst_438 = arith.constant dense<0.000000e+00> : vector<16xf32>
    %1133 = vector.multi_reduction <add>, %1132, %cst_438 [1] : vector<16x32xf32> to vector<16xf32>
    %1134 = vector.shape_cast %1133 : vector<16xf32> to vector<16x1xf32>
    %cst_439 = arith.constant 0.0322580636 : f32
    %1135 = vector.broadcast %cst_439 : f32 to vector<16x1xf32>
    %1136 = arith.mulf %1134, %1135 : vector<16x1xf32>
    %1137 = math.sqrt %1136 : vector<16x1xf32>
    %1138 = vector.broadcast %1123 : vector<1x32xf32> to vector<16x32xf32>
    %1139 = arith.mulf %1138, %1131 : vector<16x32xf32>
    %cst_440 = arith.constant 9.99999997E-7 : f32
    %1140 = vector.broadcast %cst_440 : f32 to vector<16x1xf32>
    %1141 = arith.addf %1137, %1140 : vector<16x1xf32>
    %1142 = tpu.reciprocal %1141 {approx = true} : vector<16x1xf32> -> vector<16x1xf32>
    %1143 = vector.broadcast %1142 : vector<16x1xf32> to vector<16x32xf32>
    %1144 = arith.mulf %1139, %1143 : vector<16x32xf32>
    %1145 = vector.broadcast %1125 : vector<1x32xf32> to vector<16x32xf32>
    %1146 = arith.addf %1144, %1145 : vector<16x32xf32>
    %c0_441 = arith.constant 0 : index
    %c0_442 = arith.constant 0 : index
    %c0_443 = arith.constant 0 : index
    %1147 = vector.load %arg27[%c0_441, %c0_442, %c0_443] : memref<2x32x64xf32, #tpu.memory_space<vmem>>, vector<1x32x64xf32>
    %1148 = vector.shape_cast %1147 : vector<1x32x64xf32> to vector<32x64xf32>
    %c0_444 = arith.constant 0 : index
    %c0_445 = arith.constant 0 : index
    %c0_446 = arith.constant 0 : index
    %1149 = vector.load %arg28[%c0_444, %c0_445, %c0_446] : memref<2x1x64xf32, #tpu.memory_space<vmem>>, vector<1x1x64xf32>
    %1150 = vector.shape_cast %1149 : vector<1x1x64xf32> to vector<1x64xf32>
    %c0_447 = arith.constant 0 : index
    %c0_448 = arith.constant 0 : index
    %c0_449 = arith.constant 0 : index
    %1151 = vector.load %arg29[%c0_447, %c0_448, %c0_449] : memref<2x64x32xf32, #tpu.memory_space<vmem>>, vector<1x64x32xf32>
    %1152 = vector.shape_cast %1151 : vector<1x64x32xf32> to vector<64x32xf32>
    %c0_450 = arith.constant 0 : index
    %c0_451 = arith.constant 0 : index
    %c0_452 = arith.constant 0 : index
    %1153 = vector.load %arg30[%c0_450, %c0_451, %c0_452] : memref<2x1x32xf32, #tpu.memory_space<vmem>>, vector<1x1x32xf32>
    %1154 = vector.shape_cast %1153 : vector<1x1x32xf32> to vector<1x32xf32>
    %cst_453 = arith.constant dense<0.000000e+00> : vector<16x64xf32>
    %1155 = tpu.matmul %1146, %1148, %cst_453 {dimension_numbers = #tpu.dot_dimension_numbers<[1], [0], [0], [1], [0, 0, 1, 1], [], []>} : vector<16x32xf32>, vector<32x64xf32>, vector<16x64xf32> -> vector<16x64xf32>
    %1156 = vector.broadcast %1150 : vector<1x64xf32> to vector<16x64xf32>
    %1157 = arith.addf %1155, %1156 : vector<16x64xf32>
    %cst_454 = arith.constant 0.000000e+00 : f32
    %1158 = vector.broadcast %cst_454 : f32 to vector<16x64xf32>
    %1159 = arith.maximumf %1157, %1158 : vector<16x64xf32>
    %cst_455 = arith.constant dense<0.000000e+00> : vector<16x32xf32>
    %1160 = tpu.matmul %1159, %1152, %cst_455 {dimension_numbers = #tpu.dot_dimension_numbers<[1], [0], [0], [1], [0, 0, 1, 1], [], []>} : vector<16x64xf32>, vector<64x32xf32>, vector<16x32xf32> -> vector<16x32xf32>
    %1161 = vector.broadcast %1154 : vector<1x32xf32> to vector<16x32xf32>
    %1162 = arith.addf %1160, %1161 : vector<16x32xf32>
    %1163 = arith.addf %1121, %1162 : vector<16x32xf32>
    %c1_456 = arith.constant 1 : index
    %c0_457 = arith.constant 0 : index
    %c0_458 = arith.constant 0 : index
    %1164 = vector.load %arg31[%c1_456, %c0_457, %c0_458] : memref<2x1x32xf32, #tpu.memory_space<vmem>>, vector<1x1x32xf32>
    %1165 = vector.shape_cast %1164 : vector<1x1x32xf32> to vector<1x32xf32>
    %c1_459 = arith.constant 1 : index
    %c0_460 = arith.constant 0 : index
    %c0_461 = arith.constant 0 : index
    %1166 = vector.load %arg32[%c1_459, %c0_460, %c0_461] : memref<2x1x32xf32, #tpu.memory_space<vmem>>, vector<1x1x32xf32>
    %1167 = vector.shape_cast %1166 : vector<1x1x32xf32> to vector<1x32xf32>
    %cst_462 = arith.constant dense<0.000000e+00> : vector<16xf32>
    %1168 = vector.multi_reduction <add>, %1163, %cst_462 [1] : vector<16x32xf32> to vector<16xf32>
    %1169 = vector.shape_cast %1168 : vector<16xf32> to vector<16x1xf32>
    %cst_463 = arith.constant 3.200000e+01 : f32
    %1170 = vector.broadcast %cst_463 : f32 to vector<16x1xf32>
    %1171 = arith.divf %1169, %1170 : vector<16x1xf32>
    %1172 = vector.broadcast %1171 : vector<16x1xf32> to vector<16x32xf32>
    %1173 = arith.subf %1163, %1172 : vector<16x32xf32>
    %1174 = arith.mulf %1173, %1173 : vector<16x32xf32>
    %cst_464 = arith.constant dense<0.000000e+00> : vector<16xf32>
    %1175 = vector.multi_reduction <add>, %1174, %cst_464 [1] : vector<16x32xf32> to vector<16xf32>
    %1176 = vector.shape_cast %1175 : vector<16xf32> to vector<16x1xf32>
    %cst_465 = arith.constant 0.0322580636 : f32
    %1177 = vector.broadcast %cst_465 : f32 to vector<16x1xf32>
    %1178 = arith.mulf %1176, %1177 : vector<16x1xf32>
    %1179 = math.sqrt %1178 : vector<16x1xf32>
    %1180 = vector.broadcast %1165 : vector<1x32xf32> to vector<16x32xf32>
    %1181 = arith.mulf %1180, %1173 : vector<16x32xf32>
    %cst_466 = arith.constant 9.99999997E-7 : f32
    %1182 = vector.broadcast %cst_466 : f32 to vector<16x1xf32>
    %1183 = arith.addf %1179, %1182 : vector<16x1xf32>
    %1184 = tpu.reciprocal %1183 {approx = true} : vector<16x1xf32> -> vector<16x1xf32>
    %1185 = vector.broadcast %1184 : vector<16x1xf32> to vector<16x32xf32>
    %1186 = arith.mulf %1181, %1185 : vector<16x32xf32>
    %1187 = vector.broadcast %1167 : vector<1x32xf32> to vector<16x32xf32>
    %1188 = arith.addf %1186, %1187 : vector<16x32xf32>
    %c1_467 = arith.constant 1 : index
    %c0_468 = arith.constant 0 : index
    %c0_469 = arith.constant 0 : index
    %1189 = vector.load %arg17[%c1_467, %c0_468, %c0_469] : memref<2x32x96xf32, #tpu.memory_space<vmem>>, vector<1x32x96xf32>
    %1190 = vector.shape_cast %1189 : vector<1x32x96xf32> to vector<32x96xf32>
    %cst_470 = arith.constant dense<0.000000e+00> : vector<16x96xf32>
    %1191 = tpu.matmul %1188, %1190, %cst_470 {dimension_numbers = #tpu.dot_dimension_numbers<[1], [0], [0], [1], [0, 0, 1, 1], [], []>} : vector<16x32xf32>, vector<32x96xf32>, vector<16x96xf32> -> vector<16x96xf32>
    %c1_471 = arith.constant 1 : index
    %c0_472 = arith.constant 0 : index
    %c0_473 = arith.constant 0 : index
    %1192 = vector.load %arg18[%c1_471, %c0_472, %c0_473] : memref<2x1x96xf32, #tpu.memory_space<vmem>>, vector<1x1x96xf32>
    %1193 = vector.shape_cast %1192 : vector<1x1x96xf32> to vector<1x96xf32>
    %1194 = vector.broadcast %1193 : vector<1x96xf32> to vector<16x96xf32>
    %1195 = arith.addf %1191, %1194 : vector<16x96xf32>
    %1196 = vector.extract_strided_slice %1195 {offsets = [0, 0], sizes = [16, 32], strides = [1, 1]} : vector<16x96xf32> to vector<16x32xf32>
    %1197 = vector.extract_strided_slice %1195 {offsets = [0, 32], sizes = [16, 32], strides = [1, 1]} : vector<16x96xf32> to vector<16x32xf32>
    %1198 = vector.extract_strided_slice %1195 {offsets = [0, 64], sizes = [16, 32], strides = [1, 1]} : vector<16x96xf32> to vector<16x32xf32>
    %c1_474 = arith.constant 1 : index
    %c0_475 = arith.constant 0 : index
    %c0_476 = arith.constant 0 : index
    %1199 = vector.load %arg19[%c1_474, %c0_475, %c0_476] : memref<2x32x32xf32, #tpu.memory_space<vmem>>, vector<1x32x32xf32>
    %1200 = vector.shape_cast %1199 : vector<1x32x32xf32> to vector<32x32xf32>
    %c1_477 = arith.constant 1 : index
    %c0_478 = arith.constant 0 : index
    %c0_479 = arith.constant 0 : index
    %1201 = vector.load %arg20[%c1_477, %c0_478, %c0_479] : memref<2x1x32xf32, #tpu.memory_space<vmem>>, vector<1x1x32xf32>
    %1202 = vector.shape_cast %1201 : vector<1x1x32xf32> to vector<1x32xf32>
    %1203 = vector.extract_strided_slice %1196 {offsets = [0, 0], sizes = [8, 32], strides = [1, 1]} : vector<16x32xf32> to vector<8x32xf32>
    %1204 = vector.extract_strided_slice %1197 {offsets = [0, 0], sizes = [8, 32], strides = [1, 1]} : vector<16x32xf32> to vector<8x32xf32>
    %1205 = vector.extract_strided_slice %1198 {offsets = [0, 0], sizes = [8, 32], strides = [1, 1]} : vector<16x32xf32> to vector<8x32xf32>
    %1206 = vector.extract_strided_slice %1 {offsets = [0, 0, 0], sizes = [1, 8, 8], strides = [1, 1, 1]} : vector<2x8x8xf32> to vector<1x8x8xf32>
    %1207 = vector.shape_cast %1206 : vector<1x8x8xf32> to vector<8x8xf32>
    %1208 = vector.extract_strided_slice %1203 {offsets = [0, 0], sizes = [8, 8], strides = [1, 1]} : vector<8x32xf32> to vector<8x8xf32>
    %1209 = vector.extract_strided_slice %1204 {offsets = [0, 0], sizes = [8, 8], strides = [1, 1]} : vector<8x32xf32> to vector<8x8xf32>
    %1210 = tpu.transpose %1209, [1, 0] : vector<8x8xf32> -> vector<8x8xf32>
    %cst_480 = arith.constant dense<0.000000e+00> : vector<8x8xf32>
    %1211 = tpu.matmul %1208, %1210, %cst_480 {dimension_numbers = #tpu.dot_dimension_numbers<[1], [0], [0], [1], [0, 0, 1, 1], [], []>} : vector<8x8xf32>, vector<8x8xf32>, vector<8x8xf32> -> vector<8x8xf32>
    %cst_481 = arith.constant 0.353553385 : f32
    %1212 = vector.broadcast %cst_481 : f32 to vector<8x8xf32>
    %1213 = arith.mulf %1211, %1212 : vector<8x8xf32>
    %cst_482 = arith.constant 0.000000e+00 : f32
    %1214 = vector.broadcast %cst_482 : f32 to vector<8x8xf32>
    %1215 = arith.cmpf oeq, %1207, %1214 : vector<8x8xf32>
    %cst_483 = arith.constant -1.000000e+09 : f32
    %1216 = vector.broadcast %cst_483 : f32 to vector<8x8xf32>
    %1217 = arith.select %1215, %1216, %1213 : vector<8x8xi1>, vector<8x8xf32>
    %cst_484 = arith.constant dense<0xFF800000> : vector<8xf32>
    %1218 = vector.multi_reduction <maximumf>, %1217, %cst_484 [1] : vector<8x8xf32> to vector<8xf32>
    %1219 = vector.shape_cast %1218 : vector<8xf32> to vector<8x1xf32>
    %1220 = vector.broadcast %1219 : vector<8x1xf32> to vector<8x8xf32>
    %1221 = arith.subf %1217, %1220 : vector<8x8xf32>
    %1222 = math.exp %1221 : vector<8x8xf32>
    %cst_485 = arith.constant dense<0.000000e+00> : vector<8xf32>
    %1223 = vector.multi_reduction <add>, %1222, %cst_485 [1] : vector<8x8xf32> to vector<8xf32>
    %1224 = vector.shape_cast %1223 : vector<8xf32> to vector<8x1xf32>
    %1225 = tpu.reciprocal %1224 {approx = true} : vector<8x1xf32> -> vector<8x1xf32>
    %1226 = vector.broadcast %1225 : vector<8x1xf32> to vector<8x8xf32>
    %1227 = arith.mulf %1222, %1226 : vector<8x8xf32>
    %1228 = vector.extract_strided_slice %1205 {offsets = [0, 0], sizes = [8, 8], strides = [1, 1]} : vector<8x32xf32> to vector<8x8xf32>
    %cst_486 = arith.constant dense<0.000000e+00> : vector<8x8xf32>
    %1229 = tpu.matmul %1227, %1228, %cst_486 {dimension_numbers = #tpu.dot_dimension_numbers<[1], [0], [0], [1], [0, 0, 1, 1], [], []>} : vector<8x8xf32>, vector<8x8xf32>, vector<8x8xf32> -> vector<8x8xf32>
    %1230 = vector.extract_strided_slice %1200 {offsets = [0, 0], sizes = [8, 32], strides = [1, 1]} : vector<32x32xf32> to vector<8x32xf32>
    %cst_487 = arith.constant dense<0.000000e+00> : vector<8x32xf32>
    %1231 = tpu.matmul %1229, %1230, %cst_487 {dimension_numbers = #tpu.dot_dimension_numbers<[1], [0], [0], [1], [0, 0, 1, 1], [], []>} : vector<8x8xf32>, vector<8x32xf32>, vector<8x32xf32> -> vector<8x32xf32>
    %1232 = vector.extract_strided_slice %1203 {offsets = [0, 8], sizes = [8, 8], strides = [1, 1]} : vector<8x32xf32> to vector<8x8xf32>
    %1233 = vector.extract_strided_slice %1204 {offsets = [0, 8], sizes = [8, 8], strides = [1, 1]} : vector<8x32xf32> to vector<8x8xf32>
    %1234 = tpu.transpose %1233, [1, 0] : vector<8x8xf32> -> vector<8x8xf32>
    %cst_488 = arith.constant dense<0.000000e+00> : vector<8x8xf32>
    %1235 = tpu.matmul %1232, %1234, %cst_488 {dimension_numbers = #tpu.dot_dimension_numbers<[1], [0], [0], [1], [0, 0, 1, 1], [], []>} : vector<8x8xf32>, vector<8x8xf32>, vector<8x8xf32> -> vector<8x8xf32>
    %cst_489 = arith.constant 0.353553385 : f32
    %1236 = vector.broadcast %cst_489 : f32 to vector<8x8xf32>
    %1237 = arith.mulf %1235, %1236 : vector<8x8xf32>
    %cst_490 = arith.constant 0.000000e+00 : f32
    %1238 = vector.broadcast %cst_490 : f32 to vector<8x8xf32>
    %1239 = arith.cmpf oeq, %1207, %1238 : vector<8x8xf32>
    %cst_491 = arith.constant -1.000000e+09 : f32
    %1240 = vector.broadcast %cst_491 : f32 to vector<8x8xf32>
    %1241 = arith.select %1239, %1240, %1237 : vector<8x8xi1>, vector<8x8xf32>
    %cst_492 = arith.constant dense<0xFF800000> : vector<8xf32>
    %1242 = vector.multi_reduction <maximumf>, %1241, %cst_492 [1] : vector<8x8xf32> to vector<8xf32>
    %1243 = vector.shape_cast %1242 : vector<8xf32> to vector<8x1xf32>
    %1244 = vector.broadcast %1243 : vector<8x1xf32> to vector<8x8xf32>
    %1245 = arith.subf %1241, %1244 : vector<8x8xf32>
    %1246 = math.exp %1245 : vector<8x8xf32>
    %cst_493 = arith.constant dense<0.000000e+00> : vector<8xf32>
    %1247 = vector.multi_reduction <add>, %1246, %cst_493 [1] : vector<8x8xf32> to vector<8xf32>
    %1248 = vector.shape_cast %1247 : vector<8xf32> to vector<8x1xf32>
    %1249 = tpu.reciprocal %1248 {approx = true} : vector<8x1xf32> -> vector<8x1xf32>
    %1250 = vector.broadcast %1249 : vector<8x1xf32> to vector<8x8xf32>
    %1251 = arith.mulf %1246, %1250 : vector<8x8xf32>
    %1252 = vector.extract_strided_slice %1205 {offsets = [0, 8], sizes = [8, 8], strides = [1, 1]} : vector<8x32xf32> to vector<8x8xf32>
    %cst_494 = arith.constant dense<0.000000e+00> : vector<8x8xf32>
    %1253 = tpu.matmul %1251, %1252, %cst_494 {dimension_numbers = #tpu.dot_dimension_numbers<[1], [0], [0], [1], [0, 0, 1, 1], [], []>} : vector<8x8xf32>, vector<8x8xf32>, vector<8x8xf32> -> vector<8x8xf32>
    %1254 = vector.extract_strided_slice %1200 {offsets = [8, 0], sizes = [8, 32], strides = [1, 1]} : vector<32x32xf32> to vector<8x32xf32>
    %cst_495 = arith.constant dense<0.000000e+00> : vector<8x32xf32>
    %1255 = tpu.matmul %1253, %1254, %cst_495 {dimension_numbers = #tpu.dot_dimension_numbers<[1], [0], [0], [1], [0, 0, 1, 1], [], []>} : vector<8x8xf32>, vector<8x32xf32>, vector<8x32xf32> -> vector<8x32xf32>
    %1256 = arith.addf %1231, %1255 : vector<8x32xf32>
    %1257 = vector.extract_strided_slice %1203 {offsets = [0, 16], sizes = [8, 8], strides = [1, 1]} : vector<8x32xf32> to vector<8x8xf32>
    %1258 = vector.extract_strided_slice %1204 {offsets = [0, 16], sizes = [8, 8], strides = [1, 1]} : vector<8x32xf32> to vector<8x8xf32>
    %1259 = tpu.transpose %1258, [1, 0] : vector<8x8xf32> -> vector<8x8xf32>
    %cst_496 = arith.constant dense<0.000000e+00> : vector<8x8xf32>
    %1260 = tpu.matmul %1257, %1259, %cst_496 {dimension_numbers = #tpu.dot_dimension_numbers<[1], [0], [0], [1], [0, 0, 1, 1], [], []>} : vector<8x8xf32>, vector<8x8xf32>, vector<8x8xf32> -> vector<8x8xf32>
    %cst_497 = arith.constant 0.353553385 : f32
    %1261 = vector.broadcast %cst_497 : f32 to vector<8x8xf32>
    %1262 = arith.mulf %1260, %1261 : vector<8x8xf32>
    %cst_498 = arith.constant 0.000000e+00 : f32
    %1263 = vector.broadcast %cst_498 : f32 to vector<8x8xf32>
    %1264 = arith.cmpf oeq, %1207, %1263 : vector<8x8xf32>
    %cst_499 = arith.constant -1.000000e+09 : f32
    %1265 = vector.broadcast %cst_499 : f32 to vector<8x8xf32>
    %1266 = arith.select %1264, %1265, %1262 : vector<8x8xi1>, vector<8x8xf32>
    %cst_500 = arith.constant dense<0xFF800000> : vector<8xf32>
    %1267 = vector.multi_reduction <maximumf>, %1266, %cst_500 [1] : vector<8x8xf32> to vector<8xf32>
    %1268 = vector.shape_cast %1267 : vector<8xf32> to vector<8x1xf32>
    %1269 = vector.broadcast %1268 : vector<8x1xf32> to vector<8x8xf32>
    %1270 = arith.subf %1266, %1269 : vector<8x8xf32>
    %1271 = math.exp %1270 : vector<8x8xf32>
    %cst_501 = arith.constant dense<0.000000e+00> : vector<8xf32>
    %1272 = vector.multi_reduction <add>, %1271, %cst_501 [1] : vector<8x8xf32> to vector<8xf32>
    %1273 = vector.shape_cast %1272 : vector<8xf32> to vector<8x1xf32>
    %1274 = tpu.reciprocal %1273 {approx = true} : vector<8x1xf32> -> vector<8x1xf32>
    %1275 = vector.broadcast %1274 : vector<8x1xf32> to vector<8x8xf32>
    %1276 = arith.mulf %1271, %1275 : vector<8x8xf32>
    %1277 = vector.extract_strided_slice %1205 {offsets = [0, 16], sizes = [8, 8], strides = [1, 1]} : vector<8x32xf32> to vector<8x8xf32>
    %cst_502 = arith.constant dense<0.000000e+00> : vector<8x8xf32>
    %1278 = tpu.matmul %1276, %1277, %cst_502 {dimension_numbers = #tpu.dot_dimension_numbers<[1], [0], [0], [1], [0, 0, 1, 1], [], []>} : vector<8x8xf32>, vector<8x8xf32>, vector<8x8xf32> -> vector<8x8xf32>
    %1279 = vector.extract_strided_slice %1200 {offsets = [16, 0], sizes = [8, 32], strides = [1, 1]} : vector<32x32xf32> to vector<8x32xf32>
    %cst_503 = arith.constant dense<0.000000e+00> : vector<8x32xf32>
    %1280 = tpu.matmul %1278, %1279, %cst_503 {dimension_numbers = #tpu.dot_dimension_numbers<[1], [0], [0], [1], [0, 0, 1, 1], [], []>} : vector<8x8xf32>, vector<8x32xf32>, vector<8x32xf32> -> vector<8x32xf32>
    %1281 = arith.addf %1256, %1280 : vector<8x32xf32>
    %1282 = vector.extract_strided_slice %1203 {offsets = [0, 24], sizes = [8, 8], strides = [1, 1]} : vector<8x32xf32> to vector<8x8xf32>
    %1283 = vector.extract_strided_slice %1204 {offsets = [0, 24], sizes = [8, 8], strides = [1, 1]} : vector<8x32xf32> to vector<8x8xf32>
    %1284 = tpu.transpose %1283, [1, 0] : vector<8x8xf32> -> vector<8x8xf32>
    %cst_504 = arith.constant dense<0.000000e+00> : vector<8x8xf32>
    %1285 = tpu.matmul %1282, %1284, %cst_504 {dimension_numbers = #tpu.dot_dimension_numbers<[1], [0], [0], [1], [0, 0, 1, 1], [], []>} : vector<8x8xf32>, vector<8x8xf32>, vector<8x8xf32> -> vector<8x8xf32>
    %cst_505 = arith.constant 0.353553385 : f32
    %1286 = vector.broadcast %cst_505 : f32 to vector<8x8xf32>
    %1287 = arith.mulf %1285, %1286 : vector<8x8xf32>
    %cst_506 = arith.constant 0.000000e+00 : f32
    %1288 = vector.broadcast %cst_506 : f32 to vector<8x8xf32>
    %1289 = arith.cmpf oeq, %1207, %1288 : vector<8x8xf32>
    %cst_507 = arith.constant -1.000000e+09 : f32
    %1290 = vector.broadcast %cst_507 : f32 to vector<8x8xf32>
    %1291 = arith.select %1289, %1290, %1287 : vector<8x8xi1>, vector<8x8xf32>
    %cst_508 = arith.constant dense<0xFF800000> : vector<8xf32>
    %1292 = vector.multi_reduction <maximumf>, %1291, %cst_508 [1] : vector<8x8xf32> to vector<8xf32>
    %1293 = vector.shape_cast %1292 : vector<8xf32> to vector<8x1xf32>
    %1294 = vector.broadcast %1293 : vector<8x1xf32> to vector<8x8xf32>
    %1295 = arith.subf %1291, %1294 : vector<8x8xf32>
    %1296 = math.exp %1295 : vector<8x8xf32>
    %cst_509 = arith.constant dense<0.000000e+00> : vector<8xf32>
    %1297 = vector.multi_reduction <add>, %1296, %cst_509 [1] : vector<8x8xf32> to vector<8xf32>
    %1298 = vector.shape_cast %1297 : vector<8xf32> to vector<8x1xf32>
    %1299 = tpu.reciprocal %1298 {approx = true} : vector<8x1xf32> -> vector<8x1xf32>
    %1300 = vector.broadcast %1299 : vector<8x1xf32> to vector<8x8xf32>
    %1301 = arith.mulf %1296, %1300 : vector<8x8xf32>
    %1302 = vector.extract_strided_slice %1205 {offsets = [0, 24], sizes = [8, 8], strides = [1, 1]} : vector<8x32xf32> to vector<8x8xf32>
    %cst_510 = arith.constant dense<0.000000e+00> : vector<8x8xf32>
    %1303 = tpu.matmul %1301, %1302, %cst_510 {dimension_numbers = #tpu.dot_dimension_numbers<[1], [0], [0], [1], [0, 0, 1, 1], [], []>} : vector<8x8xf32>, vector<8x8xf32>, vector<8x8xf32> -> vector<8x8xf32>
    %1304 = vector.extract_strided_slice %1200 {offsets = [24, 0], sizes = [8, 32], strides = [1, 1]} : vector<32x32xf32> to vector<8x32xf32>
    %cst_511 = arith.constant dense<0.000000e+00> : vector<8x32xf32>
    %1305 = tpu.matmul %1303, %1304, %cst_511 {dimension_numbers = #tpu.dot_dimension_numbers<[1], [0], [0], [1], [0, 0, 1, 1], [], []>} : vector<8x8xf32>, vector<8x32xf32>, vector<8x32xf32> -> vector<8x32xf32>
    %1306 = arith.addf %1281, %1305 : vector<8x32xf32>
    %1307 = vector.extract_strided_slice %1196 {offsets = [8, 0], sizes = [8, 32], strides = [1, 1]} : vector<16x32xf32> to vector<8x32xf32>
    %1308 = vector.extract_strided_slice %1197 {offsets = [8, 0], sizes = [8, 32], strides = [1, 1]} : vector<16x32xf32> to vector<8x32xf32>
    %1309 = vector.extract_strided_slice %1198 {offsets = [8, 0], sizes = [8, 32], strides = [1, 1]} : vector<16x32xf32> to vector<8x32xf32>
    %1310 = vector.extract_strided_slice %1 {offsets = [1, 0, 0], sizes = [1, 8, 8], strides = [1, 1, 1]} : vector<2x8x8xf32> to vector<1x8x8xf32>
    %1311 = vector.shape_cast %1310 : vector<1x8x8xf32> to vector<8x8xf32>
    %1312 = vector.extract_strided_slice %1307 {offsets = [0, 0], sizes = [8, 8], strides = [1, 1]} : vector<8x32xf32> to vector<8x8xf32>
    %1313 = vector.extract_strided_slice %1308 {offsets = [0, 0], sizes = [8, 8], strides = [1, 1]} : vector<8x32xf32> to vector<8x8xf32>
    %1314 = tpu.transpose %1313, [1, 0] : vector<8x8xf32> -> vector<8x8xf32>
    %cst_512 = arith.constant dense<0.000000e+00> : vector<8x8xf32>
    %1315 = tpu.matmul %1312, %1314, %cst_512 {dimension_numbers = #tpu.dot_dimension_numbers<[1], [0], [0], [1], [0, 0, 1, 1], [], []>} : vector<8x8xf32>, vector<8x8xf32>, vector<8x8xf32> -> vector<8x8xf32>
    %cst_513 = arith.constant 0.353553385 : f32
    %1316 = vector.broadcast %cst_513 : f32 to vector<8x8xf32>
    %1317 = arith.mulf %1315, %1316 : vector<8x8xf32>
    %cst_514 = arith.constant 0.000000e+00 : f32
    %1318 = vector.broadcast %cst_514 : f32 to vector<8x8xf32>
    %1319 = arith.cmpf oeq, %1311, %1318 : vector<8x8xf32>
    %cst_515 = arith.constant -1.000000e+09 : f32
    %1320 = vector.broadcast %cst_515 : f32 to vector<8x8xf32>
    %1321 = arith.select %1319, %1320, %1317 : vector<8x8xi1>, vector<8x8xf32>
    %cst_516 = arith.constant dense<0xFF800000> : vector<8xf32>
    %1322 = vector.multi_reduction <maximumf>, %1321, %cst_516 [1] : vector<8x8xf32> to vector<8xf32>
    %1323 = vector.shape_cast %1322 : vector<8xf32> to vector<8x1xf32>
    %1324 = vector.broadcast %1323 : vector<8x1xf32> to vector<8x8xf32>
    %1325 = arith.subf %1321, %1324 : vector<8x8xf32>
    %1326 = math.exp %1325 : vector<8x8xf32>
    %cst_517 = arith.constant dense<0.000000e+00> : vector<8xf32>
    %1327 = vector.multi_reduction <add>, %1326, %cst_517 [1] : vector<8x8xf32> to vector<8xf32>
    %1328 = vector.shape_cast %1327 : vector<8xf32> to vector<8x1xf32>
    %1329 = tpu.reciprocal %1328 {approx = true} : vector<8x1xf32> -> vector<8x1xf32>
    %1330 = vector.broadcast %1329 : vector<8x1xf32> to vector<8x8xf32>
    %1331 = arith.mulf %1326, %1330 : vector<8x8xf32>
    %1332 = vector.extract_strided_slice %1309 {offsets = [0, 0], sizes = [8, 8], strides = [1, 1]} : vector<8x32xf32> to vector<8x8xf32>
    %cst_518 = arith.constant dense<0.000000e+00> : vector<8x8xf32>
    %1333 = tpu.matmul %1331, %1332, %cst_518 {dimension_numbers = #tpu.dot_dimension_numbers<[1], [0], [0], [1], [0, 0, 1, 1], [], []>} : vector<8x8xf32>, vector<8x8xf32>, vector<8x8xf32> -> vector<8x8xf32>
    %1334 = vector.extract_strided_slice %1200 {offsets = [0, 0], sizes = [8, 32], strides = [1, 1]} : vector<32x32xf32> to vector<8x32xf32>
    %cst_519 = arith.constant dense<0.000000e+00> : vector<8x32xf32>
    %1335 = tpu.matmul %1333, %1334, %cst_519 {dimension_numbers = #tpu.dot_dimension_numbers<[1], [0], [0], [1], [0, 0, 1, 1], [], []>} : vector<8x8xf32>, vector<8x32xf32>, vector<8x32xf32> -> vector<8x32xf32>
    %1336 = vector.extract_strided_slice %1307 {offsets = [0, 8], sizes = [8, 8], strides = [1, 1]} : vector<8x32xf32> to vector<8x8xf32>
    %1337 = vector.extract_strided_slice %1308 {offsets = [0, 8], sizes = [8, 8], strides = [1, 1]} : vector<8x32xf32> to vector<8x8xf32>
    %1338 = tpu.transpose %1337, [1, 0] : vector<8x8xf32> -> vector<8x8xf32>
    %cst_520 = arith.constant dense<0.000000e+00> : vector<8x8xf32>
    %1339 = tpu.matmul %1336, %1338, %cst_520 {dimension_numbers = #tpu.dot_dimension_numbers<[1], [0], [0], [1], [0, 0, 1, 1], [], []>} : vector<8x8xf32>, vector<8x8xf32>, vector<8x8xf32> -> vector<8x8xf32>
    %cst_521 = arith.constant 0.353553385 : f32
    %1340 = vector.broadcast %cst_521 : f32 to vector<8x8xf32>
    %1341 = arith.mulf %1339, %1340 : vector<8x8xf32>
    %cst_522 = arith.constant 0.000000e+00 : f32
    %1342 = vector.broadcast %cst_522 : f32 to vector<8x8xf32>
    %1343 = arith.cmpf oeq, %1311, %1342 : vector<8x8xf32>
    %cst_523 = arith.constant -1.000000e+09 : f32
    %1344 = vector.broadcast %cst_523 : f32 to vector<8x8xf32>
    %1345 = arith.select %1343, %1344, %1341 : vector<8x8xi1>, vector<8x8xf32>
    %cst_524 = arith.constant dense<0xFF800000> : vector<8xf32>
    %1346 = vector.multi_reduction <maximumf>, %1345, %cst_524 [1] : vector<8x8xf32> to vector<8xf32>
    %1347 = vector.shape_cast %1346 : vector<8xf32> to vector<8x1xf32>
    %1348 = vector.broadcast %1347 : vector<8x1xf32> to vector<8x8xf32>
    %1349 = arith.subf %1345, %1348 : vector<8x8xf32>
    %1350 = math.exp %1349 : vector<8x8xf32>
    %cst_525 = arith.constant dense<0.000000e+00> : vector<8xf32>
    %1351 = vector.multi_reduction <add>, %1350, %cst_525 [1] : vector<8x8xf32> to vector<8xf32>
    %1352 = vector.shape_cast %1351 : vector<8xf32> to vector<8x1xf32>
    %1353 = tpu.reciprocal %1352 {approx = true} : vector<8x1xf32> -> vector<8x1xf32>
    %1354 = vector.broadcast %1353 : vector<8x1xf32> to vector<8x8xf32>
    %1355 = arith.mulf %1350, %1354 : vector<8x8xf32>
    %1356 = vector.extract_strided_slice %1309 {offsets = [0, 8], sizes = [8, 8], strides = [1, 1]} : vector<8x32xf32> to vector<8x8xf32>
    %cst_526 = arith.constant dense<0.000000e+00> : vector<8x8xf32>
    %1357 = tpu.matmul %1355, %1356, %cst_526 {dimension_numbers = #tpu.dot_dimension_numbers<[1], [0], [0], [1], [0, 0, 1, 1], [], []>} : vector<8x8xf32>, vector<8x8xf32>, vector<8x8xf32> -> vector<8x8xf32>
    %1358 = vector.extract_strided_slice %1200 {offsets = [8, 0], sizes = [8, 32], strides = [1, 1]} : vector<32x32xf32> to vector<8x32xf32>
    %cst_527 = arith.constant dense<0.000000e+00> : vector<8x32xf32>
    %1359 = tpu.matmul %1357, %1358, %cst_527 {dimension_numbers = #tpu.dot_dimension_numbers<[1], [0], [0], [1], [0, 0, 1, 1], [], []>} : vector<8x8xf32>, vector<8x32xf32>, vector<8x32xf32> -> vector<8x32xf32>
    %1360 = arith.addf %1335, %1359 : vector<8x32xf32>
    %1361 = vector.extract_strided_slice %1307 {offsets = [0, 16], sizes = [8, 8], strides = [1, 1]} : vector<8x32xf32> to vector<8x8xf32>
    %1362 = vector.extract_strided_slice %1308 {offsets = [0, 16], sizes = [8, 8], strides = [1, 1]} : vector<8x32xf32> to vector<8x8xf32>
    %1363 = tpu.transpose %1362, [1, 0] : vector<8x8xf32> -> vector<8x8xf32>
    %cst_528 = arith.constant dense<0.000000e+00> : vector<8x8xf32>
    %1364 = tpu.matmul %1361, %1363, %cst_528 {dimension_numbers = #tpu.dot_dimension_numbers<[1], [0], [0], [1], [0, 0, 1, 1], [], []>} : vector<8x8xf32>, vector<8x8xf32>, vector<8x8xf32> -> vector<8x8xf32>
    %cst_529 = arith.constant 0.353553385 : f32
    %1365 = vector.broadcast %cst_529 : f32 to vector<8x8xf32>
    %1366 = arith.mulf %1364, %1365 : vector<8x8xf32>
    %cst_530 = arith.constant 0.000000e+00 : f32
    %1367 = vector.broadcast %cst_530 : f32 to vector<8x8xf32>
    %1368 = arith.cmpf oeq, %1311, %1367 : vector<8x8xf32>
    %cst_531 = arith.constant -1.000000e+09 : f32
    %1369 = vector.broadcast %cst_531 : f32 to vector<8x8xf32>
    %1370 = arith.select %1368, %1369, %1366 : vector<8x8xi1>, vector<8x8xf32>
    %cst_532 = arith.constant dense<0xFF800000> : vector<8xf32>
    %1371 = vector.multi_reduction <maximumf>, %1370, %cst_532 [1] : vector<8x8xf32> to vector<8xf32>
    %1372 = vector.shape_cast %1371 : vector<8xf32> to vector<8x1xf32>
    %1373 = vector.broadcast %1372 : vector<8x1xf32> to vector<8x8xf32>
    %1374 = arith.subf %1370, %1373 : vector<8x8xf32>
    %1375 = math.exp %1374 : vector<8x8xf32>
    %cst_533 = arith.constant dense<0.000000e+00> : vector<8xf32>
    %1376 = vector.multi_reduction <add>, %1375, %cst_533 [1] : vector<8x8xf32> to vector<8xf32>
    %1377 = vector.shape_cast %1376 : vector<8xf32> to vector<8x1xf32>
    %1378 = tpu.reciprocal %1377 {approx = true} : vector<8x1xf32> -> vector<8x1xf32>
    %1379 = vector.broadcast %1378 : vector<8x1xf32> to vector<8x8xf32>
    %1380 = arith.mulf %1375, %1379 : vector<8x8xf32>
    %1381 = vector.extract_strided_slice %1309 {offsets = [0, 16], sizes = [8, 8], strides = [1, 1]} : vector<8x32xf32> to vector<8x8xf32>
    %cst_534 = arith.constant dense<0.000000e+00> : vector<8x8xf32>
    %1382 = tpu.matmul %1380, %1381, %cst_534 {dimension_numbers = #tpu.dot_dimension_numbers<[1], [0], [0], [1], [0, 0, 1, 1], [], []>} : vector<8x8xf32>, vector<8x8xf32>, vector<8x8xf32> -> vector<8x8xf32>
    %1383 = vector.extract_strided_slice %1200 {offsets = [16, 0], sizes = [8, 32], strides = [1, 1]} : vector<32x32xf32> to vector<8x32xf32>
    %cst_535 = arith.constant dense<0.000000e+00> : vector<8x32xf32>
    %1384 = tpu.matmul %1382, %1383, %cst_535 {dimension_numbers = #tpu.dot_dimension_numbers<[1], [0], [0], [1], [0, 0, 1, 1], [], []>} : vector<8x8xf32>, vector<8x32xf32>, vector<8x32xf32> -> vector<8x32xf32>
    %1385 = arith.addf %1360, %1384 : vector<8x32xf32>
    %1386 = vector.extract_strided_slice %1307 {offsets = [0, 24], sizes = [8, 8], strides = [1, 1]} : vector<8x32xf32> to vector<8x8xf32>
    %1387 = vector.extract_strided_slice %1308 {offsets = [0, 24], sizes = [8, 8], strides = [1, 1]} : vector<8x32xf32> to vector<8x8xf32>
    %1388 = tpu.transpose %1387, [1, 0] : vector<8x8xf32> -> vector<8x8xf32>
    %cst_536 = arith.constant dense<0.000000e+00> : vector<8x8xf32>
    %1389 = tpu.matmul %1386, %1388, %cst_536 {dimension_numbers = #tpu.dot_dimension_numbers<[1], [0], [0], [1], [0, 0, 1, 1], [], []>} : vector<8x8xf32>, vector<8x8xf32>, vector<8x8xf32> -> vector<8x8xf32>
    %cst_537 = arith.constant 0.353553385 : f32
    %1390 = vector.broadcast %cst_537 : f32 to vector<8x8xf32>
    %1391 = arith.mulf %1389, %1390 : vector<8x8xf32>
    %cst_538 = arith.constant 0.000000e+00 : f32
    %1392 = vector.broadcast %cst_538 : f32 to vector<8x8xf32>
    %1393 = arith.cmpf oeq, %1311, %1392 : vector<8x8xf32>
    %cst_539 = arith.constant -1.000000e+09 : f32
    %1394 = vector.broadcast %cst_539 : f32 to vector<8x8xf32>
    %1395 = arith.select %1393, %1394, %1391 : vector<8x8xi1>, vector<8x8xf32>
    %cst_540 = arith.constant dense<0xFF800000> : vector<8xf32>
    %1396 = vector.multi_reduction <maximumf>, %1395, %cst_540 [1] : vector<8x8xf32> to vector<8xf32>
    %1397 = vector.shape_cast %1396 : vector<8xf32> to vector<8x1xf32>
    %1398 = vector.broadcast %1397 : vector<8x1xf32> to vector<8x8xf32>
    %1399 = arith.subf %1395, %1398 : vector<8x8xf32>
    %1400 = math.exp %1399 : vector<8x8xf32>
    %cst_541 = arith.constant dense<0.000000e+00> : vector<8xf32>
    %1401 = vector.multi_reduction <add>, %1400, %cst_541 [1] : vector<8x8xf32> to vector<8xf32>
    %1402 = vector.shape_cast %1401 : vector<8xf32> to vector<8x1xf32>
    %1403 = tpu.reciprocal %1402 {approx = true} : vector<8x1xf32> -> vector<8x1xf32>
    %1404 = vector.broadcast %1403 : vector<8x1xf32> to vector<8x8xf32>
    %1405 = arith.mulf %1400, %1404 : vector<8x8xf32>
    %1406 = vector.extract_strided_slice %1309 {offsets = [0, 24], sizes = [8, 8], strides = [1, 1]} : vector<8x32xf32> to vector<8x8xf32>
    %cst_542 = arith.constant dense<0.000000e+00> : vector<8x8xf32>
    %1407 = tpu.matmul %1405, %1406, %cst_542 {dimension_numbers = #tpu.dot_dimension_numbers<[1], [0], [0], [1], [0, 0, 1, 1], [], []>} : vector<8x8xf32>, vector<8x8xf32>, vector<8x8xf32> -> vector<8x8xf32>
    %1408 = vector.extract_strided_slice %1200 {offsets = [24, 0], sizes = [8, 32], strides = [1, 1]} : vector<32x32xf32> to vector<8x32xf32>
    %cst_543 = arith.constant dense<0.000000e+00> : vector<8x32xf32>
    %1409 = tpu.matmul %1407, %1408, %cst_543 {dimension_numbers = #tpu.dot_dimension_numbers<[1], [0], [0], [1], [0, 0, 1, 1], [], []>} : vector<8x8xf32>, vector<8x32xf32>, vector<8x32xf32> -> vector<8x32xf32>
    %1410 = arith.addf %1385, %1409 : vector<8x32xf32>
    %1411 = tpu.concatenate %1306, %1410 in 0 : vector<8x32xf32>, vector<8x32xf32> -> vector<16x32xf32>
    %1412 = vector.broadcast %1202 : vector<1x32xf32> to vector<16x32xf32>
    %1413 = arith.addf %1411, %1412 : vector<16x32xf32>
    %1414 = arith.addf %1163, %1413 : vector<16x32xf32>
    %c1_544 = arith.constant 1 : index
    %c0_545 = arith.constant 0 : index
    %c0_546 = arith.constant 0 : index
    %1415 = vector.load %arg33[%c1_544, %c0_545, %c0_546] : memref<2x1x32xf32, #tpu.memory_space<vmem>>, vector<1x1x32xf32>
    %1416 = vector.shape_cast %1415 : vector<1x1x32xf32> to vector<1x32xf32>
    %c1_547 = arith.constant 1 : index
    %c0_548 = arith.constant 0 : index
    %c0_549 = arith.constant 0 : index
    %1417 = vector.load %arg34[%c1_547, %c0_548, %c0_549] : memref<2x1x32xf32, #tpu.memory_space<vmem>>, vector<1x1x32xf32>
    %1418 = vector.shape_cast %1417 : vector<1x1x32xf32> to vector<1x32xf32>
    %cst_550 = arith.constant dense<0.000000e+00> : vector<16xf32>
    %1419 = vector.multi_reduction <add>, %1414, %cst_550 [1] : vector<16x32xf32> to vector<16xf32>
    %1420 = vector.shape_cast %1419 : vector<16xf32> to vector<16x1xf32>
    %cst_551 = arith.constant 3.200000e+01 : f32
    %1421 = vector.broadcast %cst_551 : f32 to vector<16x1xf32>
    %1422 = arith.divf %1420, %1421 : vector<16x1xf32>
    %1423 = vector.broadcast %1422 : vector<16x1xf32> to vector<16x32xf32>
    %1424 = arith.subf %1414, %1423 : vector<16x32xf32>
    %1425 = arith.mulf %1424, %1424 : vector<16x32xf32>
    %cst_552 = arith.constant dense<0.000000e+00> : vector<16xf32>
    %1426 = vector.multi_reduction <add>, %1425, %cst_552 [1] : vector<16x32xf32> to vector<16xf32>
    %1427 = vector.shape_cast %1426 : vector<16xf32> to vector<16x1xf32>
    %cst_553 = arith.constant 0.0322580636 : f32
    %1428 = vector.broadcast %cst_553 : f32 to vector<16x1xf32>
    %1429 = arith.mulf %1427, %1428 : vector<16x1xf32>
    %1430 = math.sqrt %1429 : vector<16x1xf32>
    %1431 = vector.broadcast %1416 : vector<1x32xf32> to vector<16x32xf32>
    %1432 = arith.mulf %1431, %1424 : vector<16x32xf32>
    %cst_554 = arith.constant 9.99999997E-7 : f32
    %1433 = vector.broadcast %cst_554 : f32 to vector<16x1xf32>
    %1434 = arith.addf %1430, %1433 : vector<16x1xf32>
    %1435 = tpu.reciprocal %1434 {approx = true} : vector<16x1xf32> -> vector<16x1xf32>
    %1436 = vector.broadcast %1435 : vector<16x1xf32> to vector<16x32xf32>
    %1437 = arith.mulf %1432, %1436 : vector<16x32xf32>
    %1438 = vector.broadcast %1418 : vector<1x32xf32> to vector<16x32xf32>
    %1439 = arith.addf %1437, %1438 : vector<16x32xf32>
    %c1_555 = arith.constant 1 : index
    %c0_556 = arith.constant 0 : index
    %c0_557 = arith.constant 0 : index
    %1440 = vector.load %arg21[%c1_555, %c0_556, %c0_557] : memref<2x32x32xf32, #tpu.memory_space<vmem>>, vector<1x32x32xf32>
    %1441 = vector.shape_cast %1440 : vector<1x32x32xf32> to vector<32x32xf32>
    %cst_558 = arith.constant dense<0.000000e+00> : vector<16x32xf32>
    %1442 = tpu.matmul %1439, %1441, %cst_558 {dimension_numbers = #tpu.dot_dimension_numbers<[1], [0], [0], [1], [0, 0, 1, 1], [], []>} : vector<16x32xf32>, vector<32x32xf32>, vector<16x32xf32> -> vector<16x32xf32>
    %c1_559 = arith.constant 1 : index
    %c0_560 = arith.constant 0 : index
    %c0_561 = arith.constant 0 : index
    %1443 = vector.load %arg22[%c1_559, %c0_560, %c0_561] : memref<2x1x32xf32, #tpu.memory_space<vmem>>, vector<1x1x32xf32>
    %1444 = vector.shape_cast %1443 : vector<1x1x32xf32> to vector<1x32xf32>
    %1445 = vector.broadcast %1444 : vector<1x32xf32> to vector<16x32xf32>
    %1446 = arith.addf %1442, %1445 : vector<16x32xf32>
    %c1_562 = arith.constant 1 : index
    %c0_563 = arith.constant 0 : index
    %c0_564 = arith.constant 0 : index
    %1447 = vector.load %arg23[%c1_562, %c0_563, %c0_564] : memref<2x32x64xf32, #tpu.memory_space<vmem>>, vector<1x32x64xf32>
    %1448 = vector.shape_cast %1447 : vector<1x32x64xf32> to vector<32x64xf32>
    %cst_565 = arith.constant dense<0.000000e+00> : vector<16x64xf32>
    %1449 = tpu.matmul %612, %1448, %cst_565 {dimension_numbers = #tpu.dot_dimension_numbers<[1], [0], [0], [1], [0, 0, 1, 1], [], []>} : vector<16x32xf32>, vector<32x64xf32>, vector<16x64xf32> -> vector<16x64xf32>
    %c1_566 = arith.constant 1 : index
    %c0_567 = arith.constant 0 : index
    %c0_568 = arith.constant 0 : index
    %1450 = vector.load %arg24[%c1_566, %c0_567, %c0_568] : memref<2x1x64xf32, #tpu.memory_space<vmem>>, vector<1x1x64xf32>
    %1451 = vector.shape_cast %1450 : vector<1x1x64xf32> to vector<1x64xf32>
    %1452 = vector.broadcast %1451 : vector<1x64xf32> to vector<16x64xf32>
    %1453 = arith.addf %1449, %1452 : vector<16x64xf32>
    %1454 = vector.extract_strided_slice %1453 {offsets = [0, 0], sizes = [16, 32], strides = [1, 1]} : vector<16x64xf32> to vector<16x32xf32>
    %1455 = vector.extract_strided_slice %1453 {offsets = [0, 32], sizes = [16, 32], strides = [1, 1]} : vector<16x64xf32> to vector<16x32xf32>
    %c1_569 = arith.constant 1 : index
    %c0_570 = arith.constant 0 : index
    %c0_571 = arith.constant 0 : index
    %1456 = vector.load %arg25[%c1_569, %c0_570, %c0_571] : memref<2x32x32xf32, #tpu.memory_space<vmem>>, vector<1x32x32xf32>
    %1457 = vector.shape_cast %1456 : vector<1x32x32xf32> to vector<32x32xf32>
    %c1_572 = arith.constant 1 : index
    %c0_573 = arith.constant 0 : index
    %c0_574 = arith.constant 0 : index
    %1458 = vector.load %arg26[%c1_572, %c0_573, %c0_574] : memref<2x1x32xf32, #tpu.memory_space<vmem>>, vector<1x1x32xf32>
    %1459 = vector.shape_cast %1458 : vector<1x1x32xf32> to vector<1x32xf32>
    %1460 = vector.extract_strided_slice %1446 {offsets = [0, 0], sizes = [8, 32], strides = [1, 1]} : vector<16x32xf32> to vector<8x32xf32>
    %1461 = vector.extract_strided_slice %1454 {offsets = [0, 0], sizes = [8, 32], strides = [1, 1]} : vector<16x32xf32> to vector<8x32xf32>
    %1462 = vector.extract_strided_slice %1455 {offsets = [0, 0], sizes = [8, 32], strides = [1, 1]} : vector<16x32xf32> to vector<8x32xf32>
    %1463 = vector.extract_strided_slice %2 {offsets = [0, 0, 0], sizes = [1, 8, 8], strides = [1, 1, 1]} : vector<2x8x8xf32> to vector<1x8x8xf32>
    %1464 = vector.shape_cast %1463 : vector<1x8x8xf32> to vector<8x8xf32>
    %1465 = vector.extract_strided_slice %1460 {offsets = [0, 0], sizes = [8, 8], strides = [1, 1]} : vector<8x32xf32> to vector<8x8xf32>
    %1466 = vector.extract_strided_slice %1461 {offsets = [0, 0], sizes = [8, 8], strides = [1, 1]} : vector<8x32xf32> to vector<8x8xf32>
    %1467 = tpu.transpose %1466, [1, 0] : vector<8x8xf32> -> vector<8x8xf32>
    %cst_575 = arith.constant dense<0.000000e+00> : vector<8x8xf32>
    %1468 = tpu.matmul %1465, %1467, %cst_575 {dimension_numbers = #tpu.dot_dimension_numbers<[1], [0], [0], [1], [0, 0, 1, 1], [], []>} : vector<8x8xf32>, vector<8x8xf32>, vector<8x8xf32> -> vector<8x8xf32>
    %cst_576 = arith.constant 0.353553385 : f32
    %1469 = vector.broadcast %cst_576 : f32 to vector<8x8xf32>
    %1470 = arith.mulf %1468, %1469 : vector<8x8xf32>
    %cst_577 = arith.constant 0.000000e+00 : f32
    %1471 = vector.broadcast %cst_577 : f32 to vector<8x8xf32>
    %1472 = arith.cmpf oeq, %1464, %1471 : vector<8x8xf32>
    %cst_578 = arith.constant -1.000000e+09 : f32
    %1473 = vector.broadcast %cst_578 : f32 to vector<8x8xf32>
    %1474 = arith.select %1472, %1473, %1470 : vector<8x8xi1>, vector<8x8xf32>
    %cst_579 = arith.constant dense<0xFF800000> : vector<8xf32>
    %1475 = vector.multi_reduction <maximumf>, %1474, %cst_579 [1] : vector<8x8xf32> to vector<8xf32>
    %1476 = vector.shape_cast %1475 : vector<8xf32> to vector<8x1xf32>
    %1477 = vector.broadcast %1476 : vector<8x1xf32> to vector<8x8xf32>
    %1478 = arith.subf %1474, %1477 : vector<8x8xf32>
    %1479 = math.exp %1478 : vector<8x8xf32>
    %cst_580 = arith.constant dense<0.000000e+00> : vector<8xf32>
    %1480 = vector.multi_reduction <add>, %1479, %cst_580 [1] : vector<8x8xf32> to vector<8xf32>
    %1481 = vector.shape_cast %1480 : vector<8xf32> to vector<8x1xf32>
    %1482 = tpu.reciprocal %1481 {approx = true} : vector<8x1xf32> -> vector<8x1xf32>
    %1483 = vector.broadcast %1482 : vector<8x1xf32> to vector<8x8xf32>
    %1484 = arith.mulf %1479, %1483 : vector<8x8xf32>
    %1485 = vector.extract_strided_slice %1462 {offsets = [0, 0], sizes = [8, 8], strides = [1, 1]} : vector<8x32xf32> to vector<8x8xf32>
    %cst_581 = arith.constant dense<0.000000e+00> : vector<8x8xf32>
    %1486 = tpu.matmul %1484, %1485, %cst_581 {dimension_numbers = #tpu.dot_dimension_numbers<[1], [0], [0], [1], [0, 0, 1, 1], [], []>} : vector<8x8xf32>, vector<8x8xf32>, vector<8x8xf32> -> vector<8x8xf32>
    %1487 = vector.extract_strided_slice %1457 {offsets = [0, 0], sizes = [8, 32], strides = [1, 1]} : vector<32x32xf32> to vector<8x32xf32>
    %cst_582 = arith.constant dense<0.000000e+00> : vector<8x32xf32>
    %1488 = tpu.matmul %1486, %1487, %cst_582 {dimension_numbers = #tpu.dot_dimension_numbers<[1], [0], [0], [1], [0, 0, 1, 1], [], []>} : vector<8x8xf32>, vector<8x32xf32>, vector<8x32xf32> -> vector<8x32xf32>
    %1489 = vector.extract_strided_slice %1460 {offsets = [0, 8], sizes = [8, 8], strides = [1, 1]} : vector<8x32xf32> to vector<8x8xf32>
    %1490 = vector.extract_strided_slice %1461 {offsets = [0, 8], sizes = [8, 8], strides = [1, 1]} : vector<8x32xf32> to vector<8x8xf32>
    %1491 = tpu.transpose %1490, [1, 0] : vector<8x8xf32> -> vector<8x8xf32>
    %cst_583 = arith.constant dense<0.000000e+00> : vector<8x8xf32>
    %1492 = tpu.matmul %1489, %1491, %cst_583 {dimension_numbers = #tpu.dot_dimension_numbers<[1], [0], [0], [1], [0, 0, 1, 1], [], []>} : vector<8x8xf32>, vector<8x8xf32>, vector<8x8xf32> -> vector<8x8xf32>
    %cst_584 = arith.constant 0.353553385 : f32
    %1493 = vector.broadcast %cst_584 : f32 to vector<8x8xf32>
    %1494 = arith.mulf %1492, %1493 : vector<8x8xf32>
    %cst_585 = arith.constant 0.000000e+00 : f32
    %1495 = vector.broadcast %cst_585 : f32 to vector<8x8xf32>
    %1496 = arith.cmpf oeq, %1464, %1495 : vector<8x8xf32>
    %cst_586 = arith.constant -1.000000e+09 : f32
    %1497 = vector.broadcast %cst_586 : f32 to vector<8x8xf32>
    %1498 = arith.select %1496, %1497, %1494 : vector<8x8xi1>, vector<8x8xf32>
    %cst_587 = arith.constant dense<0xFF800000> : vector<8xf32>
    %1499 = vector.multi_reduction <maximumf>, %1498, %cst_587 [1] : vector<8x8xf32> to vector<8xf32>
    %1500 = vector.shape_cast %1499 : vector<8xf32> to vector<8x1xf32>
    %1501 = vector.broadcast %1500 : vector<8x1xf32> to vector<8x8xf32>
    %1502 = arith.subf %1498, %1501 : vector<8x8xf32>
    %1503 = math.exp %1502 : vector<8x8xf32>
    %cst_588 = arith.constant dense<0.000000e+00> : vector<8xf32>
    %1504 = vector.multi_reduction <add>, %1503, %cst_588 [1] : vector<8x8xf32> to vector<8xf32>
    %1505 = vector.shape_cast %1504 : vector<8xf32> to vector<8x1xf32>
    %1506 = tpu.reciprocal %1505 {approx = true} : vector<8x1xf32> -> vector<8x1xf32>
    %1507 = vector.broadcast %1506 : vector<8x1xf32> to vector<8x8xf32>
    %1508 = arith.mulf %1503, %1507 : vector<8x8xf32>
    %1509 = vector.extract_strided_slice %1462 {offsets = [0, 8], sizes = [8, 8], strides = [1, 1]} : vector<8x32xf32> to vector<8x8xf32>
    %cst_589 = arith.constant dense<0.000000e+00> : vector<8x8xf32>
    %1510 = tpu.matmul %1508, %1509, %cst_589 {dimension_numbers = #tpu.dot_dimension_numbers<[1], [0], [0], [1], [0, 0, 1, 1], [], []>} : vector<8x8xf32>, vector<8x8xf32>, vector<8x8xf32> -> vector<8x8xf32>
    %1511 = vector.extract_strided_slice %1457 {offsets = [8, 0], sizes = [8, 32], strides = [1, 1]} : vector<32x32xf32> to vector<8x32xf32>
    %cst_590 = arith.constant dense<0.000000e+00> : vector<8x32xf32>
    %1512 = tpu.matmul %1510, %1511, %cst_590 {dimension_numbers = #tpu.dot_dimension_numbers<[1], [0], [0], [1], [0, 0, 1, 1], [], []>} : vector<8x8xf32>, vector<8x32xf32>, vector<8x32xf32> -> vector<8x32xf32>
    %1513 = arith.addf %1488, %1512 : vector<8x32xf32>
    %1514 = vector.extract_strided_slice %1460 {offsets = [0, 16], sizes = [8, 8], strides = [1, 1]} : vector<8x32xf32> to vector<8x8xf32>
    %1515 = vector.extract_strided_slice %1461 {offsets = [0, 16], sizes = [8, 8], strides = [1, 1]} : vector<8x32xf32> to vector<8x8xf32>
    %1516 = tpu.transpose %1515, [1, 0] : vector<8x8xf32> -> vector<8x8xf32>
    %cst_591 = arith.constant dense<0.000000e+00> : vector<8x8xf32>
    %1517 = tpu.matmul %1514, %1516, %cst_591 {dimension_numbers = #tpu.dot_dimension_numbers<[1], [0], [0], [1], [0, 0, 1, 1], [], []>} : vector<8x8xf32>, vector<8x8xf32>, vector<8x8xf32> -> vector<8x8xf32>
    %cst_592 = arith.constant 0.353553385 : f32
    %1518 = vector.broadcast %cst_592 : f32 to vector<8x8xf32>
    %1519 = arith.mulf %1517, %1518 : vector<8x8xf32>
    %cst_593 = arith.constant 0.000000e+00 : f32
    %1520 = vector.broadcast %cst_593 : f32 to vector<8x8xf32>
    %1521 = arith.cmpf oeq, %1464, %1520 : vector<8x8xf32>
    %cst_594 = arith.constant -1.000000e+09 : f32
    %1522 = vector.broadcast %cst_594 : f32 to vector<8x8xf32>
    %1523 = arith.select %1521, %1522, %1519 : vector<8x8xi1>, vector<8x8xf32>
    %cst_595 = arith.constant dense<0xFF800000> : vector<8xf32>
    %1524 = vector.multi_reduction <maximumf>, %1523, %cst_595 [1] : vector<8x8xf32> to vector<8xf32>
    %1525 = vector.shape_cast %1524 : vector<8xf32> to vector<8x1xf32>
    %1526 = vector.broadcast %1525 : vector<8x1xf32> to vector<8x8xf32>
    %1527 = arith.subf %1523, %1526 : vector<8x8xf32>
    %1528 = math.exp %1527 : vector<8x8xf32>
    %cst_596 = arith.constant dense<0.000000e+00> : vector<8xf32>
    %1529 = vector.multi_reduction <add>, %1528, %cst_596 [1] : vector<8x8xf32> to vector<8xf32>
    %1530 = vector.shape_cast %1529 : vector<8xf32> to vector<8x1xf32>
    %1531 = tpu.reciprocal %1530 {approx = true} : vector<8x1xf32> -> vector<8x1xf32>
    %1532 = vector.broadcast %1531 : vector<8x1xf32> to vector<8x8xf32>
    %1533 = arith.mulf %1528, %1532 : vector<8x8xf32>
    %1534 = vector.extract_strided_slice %1462 {offsets = [0, 16], sizes = [8, 8], strides = [1, 1]} : vector<8x32xf32> to vector<8x8xf32>
    %cst_597 = arith.constant dense<0.000000e+00> : vector<8x8xf32>
    %1535 = tpu.matmul %1533, %1534, %cst_597 {dimension_numbers = #tpu.dot_dimension_numbers<[1], [0], [0], [1], [0, 0, 1, 1], [], []>} : vector<8x8xf32>, vector<8x8xf32>, vector<8x8xf32> -> vector<8x8xf32>
    %1536 = vector.extract_strided_slice %1457 {offsets = [16, 0], sizes = [8, 32], strides = [1, 1]} : vector<32x32xf32> to vector<8x32xf32>
    %cst_598 = arith.constant dense<0.000000e+00> : vector<8x32xf32>
    %1537 = tpu.matmul %1535, %1536, %cst_598 {dimension_numbers = #tpu.dot_dimension_numbers<[1], [0], [0], [1], [0, 0, 1, 1], [], []>} : vector<8x8xf32>, vector<8x32xf32>, vector<8x32xf32> -> vector<8x32xf32>
    %1538 = arith.addf %1513, %1537 : vector<8x32xf32>
    %1539 = vector.extract_strided_slice %1460 {offsets = [0, 24], sizes = [8, 8], strides = [1, 1]} : vector<8x32xf32> to vector<8x8xf32>
    %1540 = vector.extract_strided_slice %1461 {offsets = [0, 24], sizes = [8, 8], strides = [1, 1]} : vector<8x32xf32> to vector<8x8xf32>
    %1541 = tpu.transpose %1540, [1, 0] : vector<8x8xf32> -> vector<8x8xf32>
    %cst_599 = arith.constant dense<0.000000e+00> : vector<8x8xf32>
    %1542 = tpu.matmul %1539, %1541, %cst_599 {dimension_numbers = #tpu.dot_dimension_numbers<[1], [0], [0], [1], [0, 0, 1, 1], [], []>} : vector<8x8xf32>, vector<8x8xf32>, vector<8x8xf32> -> vector<8x8xf32>
    %cst_600 = arith.constant 0.353553385 : f32
    %1543 = vector.broadcast %cst_600 : f32 to vector<8x8xf32>
    %1544 = arith.mulf %1542, %1543 : vector<8x8xf32>
    %cst_601 = arith.constant 0.000000e+00 : f32
    %1545 = vector.broadcast %cst_601 : f32 to vector<8x8xf32>
    %1546 = arith.cmpf oeq, %1464, %1545 : vector<8x8xf32>
    %cst_602 = arith.constant -1.000000e+09 : f32
    %1547 = vector.broadcast %cst_602 : f32 to vector<8x8xf32>
    %1548 = arith.select %1546, %1547, %1544 : vector<8x8xi1>, vector<8x8xf32>
    %cst_603 = arith.constant dense<0xFF800000> : vector<8xf32>
    %1549 = vector.multi_reduction <maximumf>, %1548, %cst_603 [1] : vector<8x8xf32> to vector<8xf32>
    %1550 = vector.shape_cast %1549 : vector<8xf32> to vector<8x1xf32>
    %1551 = vector.broadcast %1550 : vector<8x1xf32> to vector<8x8xf32>
    %1552 = arith.subf %1548, %1551 : vector<8x8xf32>
    %1553 = math.exp %1552 : vector<8x8xf32>
    %cst_604 = arith.constant dense<0.000000e+00> : vector<8xf32>
    %1554 = vector.multi_reduction <add>, %1553, %cst_604 [1] : vector<8x8xf32> to vector<8xf32>
    %1555 = vector.shape_cast %1554 : vector<8xf32> to vector<8x1xf32>
    %1556 = tpu.reciprocal %1555 {approx = true} : vector<8x1xf32> -> vector<8x1xf32>
    %1557 = vector.broadcast %1556 : vector<8x1xf32> to vector<8x8xf32>
    %1558 = arith.mulf %1553, %1557 : vector<8x8xf32>
    %1559 = vector.extract_strided_slice %1462 {offsets = [0, 24], sizes = [8, 8], strides = [1, 1]} : vector<8x32xf32> to vector<8x8xf32>
    %cst_605 = arith.constant dense<0.000000e+00> : vector<8x8xf32>
    %1560 = tpu.matmul %1558, %1559, %cst_605 {dimension_numbers = #tpu.dot_dimension_numbers<[1], [0], [0], [1], [0, 0, 1, 1], [], []>} : vector<8x8xf32>, vector<8x8xf32>, vector<8x8xf32> -> vector<8x8xf32>
    %1561 = vector.extract_strided_slice %1457 {offsets = [24, 0], sizes = [8, 32], strides = [1, 1]} : vector<32x32xf32> to vector<8x32xf32>
    %cst_606 = arith.constant dense<0.000000e+00> : vector<8x32xf32>
    %1562 = tpu.matmul %1560, %1561, %cst_606 {dimension_numbers = #tpu.dot_dimension_numbers<[1], [0], [0], [1], [0, 0, 1, 1], [], []>} : vector<8x8xf32>, vector<8x32xf32>, vector<8x32xf32> -> vector<8x32xf32>
    %1563 = arith.addf %1538, %1562 : vector<8x32xf32>
    %1564 = vector.extract_strided_slice %1446 {offsets = [8, 0], sizes = [8, 32], strides = [1, 1]} : vector<16x32xf32> to vector<8x32xf32>
    %1565 = vector.extract_strided_slice %1454 {offsets = [8, 0], sizes = [8, 32], strides = [1, 1]} : vector<16x32xf32> to vector<8x32xf32>
    %1566 = vector.extract_strided_slice %1455 {offsets = [8, 0], sizes = [8, 32], strides = [1, 1]} : vector<16x32xf32> to vector<8x32xf32>
    %1567 = vector.extract_strided_slice %2 {offsets = [1, 0, 0], sizes = [1, 8, 8], strides = [1, 1, 1]} : vector<2x8x8xf32> to vector<1x8x8xf32>
    %1568 = vector.shape_cast %1567 : vector<1x8x8xf32> to vector<8x8xf32>
    %1569 = vector.extract_strided_slice %1564 {offsets = [0, 0], sizes = [8, 8], strides = [1, 1]} : vector<8x32xf32> to vector<8x8xf32>
    %1570 = vector.extract_strided_slice %1565 {offsets = [0, 0], sizes = [8, 8], strides = [1, 1]} : vector<8x32xf32> to vector<8x8xf32>
    %1571 = tpu.transpose %1570, [1, 0] : vector<8x8xf32> -> vector<8x8xf32>
    %cst_607 = arith.constant dense<0.000000e+00> : vector<8x8xf32>
    %1572 = tpu.matmul %1569, %1571, %cst_607 {dimension_numbers = #tpu.dot_dimension_numbers<[1], [0], [0], [1], [0, 0, 1, 1], [], []>} : vector<8x8xf32>, vector<8x8xf32>, vector<8x8xf32> -> vector<8x8xf32>
    %cst_608 = arith.constant 0.353553385 : f32
    %1573 = vector.broadcast %cst_608 : f32 to vector<8x8xf32>
    %1574 = arith.mulf %1572, %1573 : vector<8x8xf32>
    %cst_609 = arith.constant 0.000000e+00 : f32
    %1575 = vector.broadcast %cst_609 : f32 to vector<8x8xf32>
    %1576 = arith.cmpf oeq, %1568, %1575 : vector<8x8xf32>
    %cst_610 = arith.constant -1.000000e+09 : f32
    %1577 = vector.broadcast %cst_610 : f32 to vector<8x8xf32>
    %1578 = arith.select %1576, %1577, %1574 : vector<8x8xi1>, vector<8x8xf32>
    %cst_611 = arith.constant dense<0xFF800000> : vector<8xf32>
    %1579 = vector.multi_reduction <maximumf>, %1578, %cst_611 [1] : vector<8x8xf32> to vector<8xf32>
    %1580 = vector.shape_cast %1579 : vector<8xf32> to vector<8x1xf32>
    %1581 = vector.broadcast %1580 : vector<8x1xf32> to vector<8x8xf32>
    %1582 = arith.subf %1578, %1581 : vector<8x8xf32>
    %1583 = math.exp %1582 : vector<8x8xf32>
    %cst_612 = arith.constant dense<0.000000e+00> : vector<8xf32>
    %1584 = vector.multi_reduction <add>, %1583, %cst_612 [1] : vector<8x8xf32> to vector<8xf32>
    %1585 = vector.shape_cast %1584 : vector<8xf32> to vector<8x1xf32>
    %1586 = tpu.reciprocal %1585 {approx = true} : vector<8x1xf32> -> vector<8x1xf32>
    %1587 = vector.broadcast %1586 : vector<8x1xf32> to vector<8x8xf32>
    %1588 = arith.mulf %1583, %1587 : vector<8x8xf32>
    %1589 = vector.extract_strided_slice %1566 {offsets = [0, 0], sizes = [8, 8], strides = [1, 1]} : vector<8x32xf32> to vector<8x8xf32>
    %cst_613 = arith.constant dense<0.000000e+00> : vector<8x8xf32>
    %1590 = tpu.matmul %1588, %1589, %cst_613 {dimension_numbers = #tpu.dot_dimension_numbers<[1], [0], [0], [1], [0, 0, 1, 1], [], []>} : vector<8x8xf32>, vector<8x8xf32>, vector<8x8xf32> -> vector<8x8xf32>
    %1591 = vector.extract_strided_slice %1457 {offsets = [0, 0], sizes = [8, 32], strides = [1, 1]} : vector<32x32xf32> to vector<8x32xf32>
    %cst_614 = arith.constant dense<0.000000e+00> : vector<8x32xf32>
    %1592 = tpu.matmul %1590, %1591, %cst_614 {dimension_numbers = #tpu.dot_dimension_numbers<[1], [0], [0], [1], [0, 0, 1, 1], [], []>} : vector<8x8xf32>, vector<8x32xf32>, vector<8x32xf32> -> vector<8x32xf32>
    %1593 = vector.extract_strided_slice %1564 {offsets = [0, 8], sizes = [8, 8], strides = [1, 1]} : vector<8x32xf32> to vector<8x8xf32>
    %1594 = vector.extract_strided_slice %1565 {offsets = [0, 8], sizes = [8, 8], strides = [1, 1]} : vector<8x32xf32> to vector<8x8xf32>
    %1595 = tpu.transpose %1594, [1, 0] : vector<8x8xf32> -> vector<8x8xf32>
    %cst_615 = arith.constant dense<0.000000e+00> : vector<8x8xf32>
    %1596 = tpu.matmul %1593, %1595, %cst_615 {dimension_numbers = #tpu.dot_dimension_numbers<[1], [0], [0], [1], [0, 0, 1, 1], [], []>} : vector<8x8xf32>, vector<8x8xf32>, vector<8x8xf32> -> vector<8x8xf32>
    %cst_616 = arith.constant 0.353553385 : f32
    %1597 = vector.broadcast %cst_616 : f32 to vector<8x8xf32>
    %1598 = arith.mulf %1596, %1597 : vector<8x8xf32>
    %cst_617 = arith.constant 0.000000e+00 : f32
    %1599 = vector.broadcast %cst_617 : f32 to vector<8x8xf32>
    %1600 = arith.cmpf oeq, %1568, %1599 : vector<8x8xf32>
    %cst_618 = arith.constant -1.000000e+09 : f32
    %1601 = vector.broadcast %cst_618 : f32 to vector<8x8xf32>
    %1602 = arith.select %1600, %1601, %1598 : vector<8x8xi1>, vector<8x8xf32>
    %cst_619 = arith.constant dense<0xFF800000> : vector<8xf32>
    %1603 = vector.multi_reduction <maximumf>, %1602, %cst_619 [1] : vector<8x8xf32> to vector<8xf32>
    %1604 = vector.shape_cast %1603 : vector<8xf32> to vector<8x1xf32>
    %1605 = vector.broadcast %1604 : vector<8x1xf32> to vector<8x8xf32>
    %1606 = arith.subf %1602, %1605 : vector<8x8xf32>
    %1607 = math.exp %1606 : vector<8x8xf32>
    %cst_620 = arith.constant dense<0.000000e+00> : vector<8xf32>
    %1608 = vector.multi_reduction <add>, %1607, %cst_620 [1] : vector<8x8xf32> to vector<8xf32>
    %1609 = vector.shape_cast %1608 : vector<8xf32> to vector<8x1xf32>
    %1610 = tpu.reciprocal %1609 {approx = true} : vector<8x1xf32> -> vector<8x1xf32>
    %1611 = vector.broadcast %1610 : vector<8x1xf32> to vector<8x8xf32>
    %1612 = arith.mulf %1607, %1611 : vector<8x8xf32>
    %1613 = vector.extract_strided_slice %1566 {offsets = [0, 8], sizes = [8, 8], strides = [1, 1]} : vector<8x32xf32> to vector<8x8xf32>
    %cst_621 = arith.constant dense<0.000000e+00> : vector<8x8xf32>
    %1614 = tpu.matmul %1612, %1613, %cst_621 {dimension_numbers = #tpu.dot_dimension_numbers<[1], [0], [0], [1], [0, 0, 1, 1], [], []>} : vector<8x8xf32>, vector<8x8xf32>, vector<8x8xf32> -> vector<8x8xf32>
    %1615 = vector.extract_strided_slice %1457 {offsets = [8, 0], sizes = [8, 32], strides = [1, 1]} : vector<32x32xf32> to vector<8x32xf32>
    %cst_622 = arith.constant dense<0.000000e+00> : vector<8x32xf32>
    %1616 = tpu.matmul %1614, %1615, %cst_622 {dimension_numbers = #tpu.dot_dimension_numbers<[1], [0], [0], [1], [0, 0, 1, 1], [], []>} : vector<8x8xf32>, vector<8x32xf32>, vector<8x32xf32> -> vector<8x32xf32>
    %1617 = arith.addf %1592, %1616 : vector<8x32xf32>
    %1618 = vector.extract_strided_slice %1564 {offsets = [0, 16], sizes = [8, 8], strides = [1, 1]} : vector<8x32xf32> to vector<8x8xf32>
    %1619 = vector.extract_strided_slice %1565 {offsets = [0, 16], sizes = [8, 8], strides = [1, 1]} : vector<8x32xf32> to vector<8x8xf32>
    %1620 = tpu.transpose %1619, [1, 0] : vector<8x8xf32> -> vector<8x8xf32>
    %cst_623 = arith.constant dense<0.000000e+00> : vector<8x8xf32>
    %1621 = tpu.matmul %1618, %1620, %cst_623 {dimension_numbers = #tpu.dot_dimension_numbers<[1], [0], [0], [1], [0, 0, 1, 1], [], []>} : vector<8x8xf32>, vector<8x8xf32>, vector<8x8xf32> -> vector<8x8xf32>
    %cst_624 = arith.constant 0.353553385 : f32
    %1622 = vector.broadcast %cst_624 : f32 to vector<8x8xf32>
    %1623 = arith.mulf %1621, %1622 : vector<8x8xf32>
    %cst_625 = arith.constant 0.000000e+00 : f32
    %1624 = vector.broadcast %cst_625 : f32 to vector<8x8xf32>
    %1625 = arith.cmpf oeq, %1568, %1624 : vector<8x8xf32>
    %cst_626 = arith.constant -1.000000e+09 : f32
    %1626 = vector.broadcast %cst_626 : f32 to vector<8x8xf32>
    %1627 = arith.select %1625, %1626, %1623 : vector<8x8xi1>, vector<8x8xf32>
    %cst_627 = arith.constant dense<0xFF800000> : vector<8xf32>
    %1628 = vector.multi_reduction <maximumf>, %1627, %cst_627 [1] : vector<8x8xf32> to vector<8xf32>
    %1629 = vector.shape_cast %1628 : vector<8xf32> to vector<8x1xf32>
    %1630 = vector.broadcast %1629 : vector<8x1xf32> to vector<8x8xf32>
    %1631 = arith.subf %1627, %1630 : vector<8x8xf32>
    %1632 = math.exp %1631 : vector<8x8xf32>
    %cst_628 = arith.constant dense<0.000000e+00> : vector<8xf32>
    %1633 = vector.multi_reduction <add>, %1632, %cst_628 [1] : vector<8x8xf32> to vector<8xf32>
    %1634 = vector.shape_cast %1633 : vector<8xf32> to vector<8x1xf32>
    %1635 = tpu.reciprocal %1634 {approx = true} : vector<8x1xf32> -> vector<8x1xf32>
    %1636 = vector.broadcast %1635 : vector<8x1xf32> to vector<8x8xf32>
    %1637 = arith.mulf %1632, %1636 : vector<8x8xf32>
    %1638 = vector.extract_strided_slice %1566 {offsets = [0, 16], sizes = [8, 8], strides = [1, 1]} : vector<8x32xf32> to vector<8x8xf32>
    %cst_629 = arith.constant dense<0.000000e+00> : vector<8x8xf32>
    %1639 = tpu.matmul %1637, %1638, %cst_629 {dimension_numbers = #tpu.dot_dimension_numbers<[1], [0], [0], [1], [0, 0, 1, 1], [], []>} : vector<8x8xf32>, vector<8x8xf32>, vector<8x8xf32> -> vector<8x8xf32>
    %1640 = vector.extract_strided_slice %1457 {offsets = [16, 0], sizes = [8, 32], strides = [1, 1]} : vector<32x32xf32> to vector<8x32xf32>
    %cst_630 = arith.constant dense<0.000000e+00> : vector<8x32xf32>
    %1641 = tpu.matmul %1639, %1640, %cst_630 {dimension_numbers = #tpu.dot_dimension_numbers<[1], [0], [0], [1], [0, 0, 1, 1], [], []>} : vector<8x8xf32>, vector<8x32xf32>, vector<8x32xf32> -> vector<8x32xf32>
    %1642 = arith.addf %1617, %1641 : vector<8x32xf32>
    %1643 = vector.extract_strided_slice %1564 {offsets = [0, 24], sizes = [8, 8], strides = [1, 1]} : vector<8x32xf32> to vector<8x8xf32>
    %1644 = vector.extract_strided_slice %1565 {offsets = [0, 24], sizes = [8, 8], strides = [1, 1]} : vector<8x32xf32> to vector<8x8xf32>
    %1645 = tpu.transpose %1644, [1, 0] : vector<8x8xf32> -> vector<8x8xf32>
    %cst_631 = arith.constant dense<0.000000e+00> : vector<8x8xf32>
    %1646 = tpu.matmul %1643, %1645, %cst_631 {dimension_numbers = #tpu.dot_dimension_numbers<[1], [0], [0], [1], [0, 0, 1, 1], [], []>} : vector<8x8xf32>, vector<8x8xf32>, vector<8x8xf32> -> vector<8x8xf32>
    %cst_632 = arith.constant 0.353553385 : f32
    %1647 = vector.broadcast %cst_632 : f32 to vector<8x8xf32>
    %1648 = arith.mulf %1646, %1647 : vector<8x8xf32>
    %cst_633 = arith.constant 0.000000e+00 : f32
    %1649 = vector.broadcast %cst_633 : f32 to vector<8x8xf32>
    %1650 = arith.cmpf oeq, %1568, %1649 : vector<8x8xf32>
    %cst_634 = arith.constant -1.000000e+09 : f32
    %1651 = vector.broadcast %cst_634 : f32 to vector<8x8xf32>
    %1652 = arith.select %1650, %1651, %1648 : vector<8x8xi1>, vector<8x8xf32>
    %cst_635 = arith.constant dense<0xFF800000> : vector<8xf32>
    %1653 = vector.multi_reduction <maximumf>, %1652, %cst_635 [1] : vector<8x8xf32> to vector<8xf32>
    %1654 = vector.shape_cast %1653 : vector<8xf32> to vector<8x1xf32>
    %1655 = vector.broadcast %1654 : vector<8x1xf32> to vector<8x8xf32>
    %1656 = arith.subf %1652, %1655 : vector<8x8xf32>
    %1657 = math.exp %1656 : vector<8x8xf32>
    %cst_636 = arith.constant dense<0.000000e+00> : vector<8xf32>
    %1658 = vector.multi_reduction <add>, %1657, %cst_636 [1] : vector<8x8xf32> to vector<8xf32>
    %1659 = vector.shape_cast %1658 : vector<8xf32> to vector<8x1xf32>
    %1660 = tpu.reciprocal %1659 {approx = true} : vector<8x1xf32> -> vector<8x1xf32>
    %1661 = vector.broadcast %1660 : vector<8x1xf32> to vector<8x8xf32>
    %1662 = arith.mulf %1657, %1661 : vector<8x8xf32>
    %1663 = vector.extract_strided_slice %1566 {offsets = [0, 24], sizes = [8, 8], strides = [1, 1]} : vector<8x32xf32> to vector<8x8xf32>
    %cst_637 = arith.constant dense<0.000000e+00> : vector<8x8xf32>
    %1664 = tpu.matmul %1662, %1663, %cst_637 {dimension_numbers = #tpu.dot_dimension_numbers<[1], [0], [0], [1], [0, 0, 1, 1], [], []>} : vector<8x8xf32>, vector<8x8xf32>, vector<8x8xf32> -> vector<8x8xf32>
    %1665 = vector.extract_strided_slice %1457 {offsets = [24, 0], sizes = [8, 32], strides = [1, 1]} : vector<32x32xf32> to vector<8x32xf32>
    %cst_638 = arith.constant dense<0.000000e+00> : vector<8x32xf32>
    %1666 = tpu.matmul %1664, %1665, %cst_638 {dimension_numbers = #tpu.dot_dimension_numbers<[1], [0], [0], [1], [0, 0, 1, 1], [], []>} : vector<8x8xf32>, vector<8x32xf32>, vector<8x32xf32> -> vector<8x32xf32>
    %1667 = arith.addf %1642, %1666 : vector<8x32xf32>
    %1668 = tpu.concatenate %1563, %1667 in 0 : vector<8x32xf32>, vector<8x32xf32> -> vector<16x32xf32>
    %1669 = vector.broadcast %1459 : vector<1x32xf32> to vector<16x32xf32>
    %1670 = arith.addf %1668, %1669 : vector<16x32xf32>
    %1671 = arith.addf %1414, %1670 : vector<16x32xf32>
    %c1_639 = arith.constant 1 : index
    %c0_640 = arith.constant 0 : index
    %c0_641 = arith.constant 0 : index
    %1672 = vector.load %arg35[%c1_639, %c0_640, %c0_641] : memref<2x1x32xf32, #tpu.memory_space<vmem>>, vector<1x1x32xf32>
    %1673 = vector.shape_cast %1672 : vector<1x1x32xf32> to vector<1x32xf32>
    %c1_642 = arith.constant 1 : index
    %c0_643 = arith.constant 0 : index
    %c0_644 = arith.constant 0 : index
    %1674 = vector.load %arg36[%c1_642, %c0_643, %c0_644] : memref<2x1x32xf32, #tpu.memory_space<vmem>>, vector<1x1x32xf32>
    %1675 = vector.shape_cast %1674 : vector<1x1x32xf32> to vector<1x32xf32>
    %cst_645 = arith.constant dense<0.000000e+00> : vector<16xf32>
    %1676 = vector.multi_reduction <add>, %1671, %cst_645 [1] : vector<16x32xf32> to vector<16xf32>
    %1677 = vector.shape_cast %1676 : vector<16xf32> to vector<16x1xf32>
    %cst_646 = arith.constant 3.200000e+01 : f32
    %1678 = vector.broadcast %cst_646 : f32 to vector<16x1xf32>
    %1679 = arith.divf %1677, %1678 : vector<16x1xf32>
    %1680 = vector.broadcast %1679 : vector<16x1xf32> to vector<16x32xf32>
    %1681 = arith.subf %1671, %1680 : vector<16x32xf32>
    %1682 = arith.mulf %1681, %1681 : vector<16x32xf32>
    %cst_647 = arith.constant dense<0.000000e+00> : vector<16xf32>
    %1683 = vector.multi_reduction <add>, %1682, %cst_647 [1] : vector<16x32xf32> to vector<16xf32>
    %1684 = vector.shape_cast %1683 : vector<16xf32> to vector<16x1xf32>
    %cst_648 = arith.constant 0.0322580636 : f32
    %1685 = vector.broadcast %cst_648 : f32 to vector<16x1xf32>
    %1686 = arith.mulf %1684, %1685 : vector<16x1xf32>
    %1687 = math.sqrt %1686 : vector<16x1xf32>
    %1688 = vector.broadcast %1673 : vector<1x32xf32> to vector<16x32xf32>
    %1689 = arith.mulf %1688, %1681 : vector<16x32xf32>
    %cst_649 = arith.constant 9.99999997E-7 : f32
    %1690 = vector.broadcast %cst_649 : f32 to vector<16x1xf32>
    %1691 = arith.addf %1687, %1690 : vector<16x1xf32>
    %1692 = tpu.reciprocal %1691 {approx = true} : vector<16x1xf32> -> vector<16x1xf32>
    %1693 = vector.broadcast %1692 : vector<16x1xf32> to vector<16x32xf32>
    %1694 = arith.mulf %1689, %1693 : vector<16x32xf32>
    %1695 = vector.broadcast %1675 : vector<1x32xf32> to vector<16x32xf32>
    %1696 = arith.addf %1694, %1695 : vector<16x32xf32>
    %c1_650 = arith.constant 1 : index
    %c0_651 = arith.constant 0 : index
    %c0_652 = arith.constant 0 : index
    %1697 = vector.load %arg27[%c1_650, %c0_651, %c0_652] : memref<2x32x64xf32, #tpu.memory_space<vmem>>, vector<1x32x64xf32>
    %1698 = vector.shape_cast %1697 : vector<1x32x64xf32> to vector<32x64xf32>
    %c1_653 = arith.constant 1 : index
    %c0_654 = arith.constant 0 : index
    %c0_655 = arith.constant 0 : index
    %1699 = vector.load %arg28[%c1_653, %c0_654, %c0_655] : memref<2x1x64xf32, #tpu.memory_space<vmem>>, vector<1x1x64xf32>
    %1700 = vector.shape_cast %1699 : vector<1x1x64xf32> to vector<1x64xf32>
    %c1_656 = arith.constant 1 : index
    %c0_657 = arith.constant 0 : index
    %c0_658 = arith.constant 0 : index
    %1701 = vector.load %arg29[%c1_656, %c0_657, %c0_658] : memref<2x64x32xf32, #tpu.memory_space<vmem>>, vector<1x64x32xf32>
    %1702 = vector.shape_cast %1701 : vector<1x64x32xf32> to vector<64x32xf32>
    %c1_659 = arith.constant 1 : index
    %c0_660 = arith.constant 0 : index
    %c0_661 = arith.constant 0 : index
    %1703 = vector.load %arg30[%c1_659, %c0_660, %c0_661] : memref<2x1x32xf32, #tpu.memory_space<vmem>>, vector<1x1x32xf32>
    %1704 = vector.shape_cast %1703 : vector<1x1x32xf32> to vector<1x32xf32>
    %cst_662 = arith.constant dense<0.000000e+00> : vector<16x64xf32>
    %1705 = tpu.matmul %1696, %1698, %cst_662 {dimension_numbers = #tpu.dot_dimension_numbers<[1], [0], [0], [1], [0, 0, 1, 1], [], []>} : vector<16x32xf32>, vector<32x64xf32>, vector<16x64xf32> -> vector<16x64xf32>
    %1706 = vector.broadcast %1700 : vector<1x64xf32> to vector<16x64xf32>
    %1707 = arith.addf %1705, %1706 : vector<16x64xf32>
    %cst_663 = arith.constant 0.000000e+00 : f32
    %1708 = vector.broadcast %cst_663 : f32 to vector<16x64xf32>
    %1709 = arith.maximumf %1707, %1708 : vector<16x64xf32>
    %cst_664 = arith.constant dense<0.000000e+00> : vector<16x32xf32>
    %1710 = tpu.matmul %1709, %1702, %cst_664 {dimension_numbers = #tpu.dot_dimension_numbers<[1], [0], [0], [1], [0, 0, 1, 1], [], []>} : vector<16x64xf32>, vector<64x32xf32>, vector<16x32xf32> -> vector<16x32xf32>
    %1711 = vector.broadcast %1704 : vector<1x32xf32> to vector<16x32xf32>
    %1712 = arith.addf %1710, %1711 : vector<16x32xf32>
    %1713 = arith.addf %1671, %1712 : vector<16x32xf32>
    %c0_665 = arith.constant 0 : index
    %c0_666 = arith.constant 0 : index
    %1714 = vector.load %arg39[%c0_665, %c0_666] : memref<1x32xf32, #tpu.memory_space<vmem>>, vector<1x32xf32>
    %c0_667 = arith.constant 0 : index
    %c0_668 = arith.constant 0 : index
    %1715 = vector.load %arg40[%c0_667, %c0_668] : memref<1x32xf32, #tpu.memory_space<vmem>>, vector<1x32xf32>
    %cst_669 = arith.constant dense<0.000000e+00> : vector<16xf32>
    %1716 = vector.multi_reduction <add>, %1713, %cst_669 [1] : vector<16x32xf32> to vector<16xf32>
    %1717 = vector.shape_cast %1716 : vector<16xf32> to vector<16x1xf32>
    %cst_670 = arith.constant 3.200000e+01 : f32
    %1718 = vector.broadcast %cst_670 : f32 to vector<16x1xf32>
    %1719 = arith.divf %1717, %1718 : vector<16x1xf32>
    %1720 = vector.broadcast %1719 : vector<16x1xf32> to vector<16x32xf32>
    %1721 = arith.subf %1713, %1720 : vector<16x32xf32>
    %1722 = arith.mulf %1721, %1721 : vector<16x32xf32>
    %cst_671 = arith.constant dense<0.000000e+00> : vector<16xf32>
    %1723 = vector.multi_reduction <add>, %1722, %cst_671 [1] : vector<16x32xf32> to vector<16xf32>
    %1724 = vector.shape_cast %1723 : vector<16xf32> to vector<16x1xf32>
    %cst_672 = arith.constant 0.0322580636 : f32
    %1725 = vector.broadcast %cst_672 : f32 to vector<16x1xf32>
    %1726 = arith.mulf %1724, %1725 : vector<16x1xf32>
    %1727 = math.sqrt %1726 : vector<16x1xf32>
    %1728 = vector.broadcast %1714 : vector<1x32xf32> to vector<16x32xf32>
    %1729 = arith.mulf %1728, %1721 : vector<16x32xf32>
    %cst_673 = arith.constant 9.99999997E-7 : f32
    %1730 = vector.broadcast %cst_673 : f32 to vector<16x1xf32>
    %1731 = arith.addf %1727, %1730 : vector<16x1xf32>
    %1732 = tpu.reciprocal %1731 {approx = true} : vector<16x1xf32> -> vector<16x1xf32>
    %1733 = vector.broadcast %1732 : vector<16x1xf32> to vector<16x32xf32>
    %1734 = arith.mulf %1729, %1733 : vector<16x32xf32>
    %1735 = vector.broadcast %1715 : vector<1x32xf32> to vector<16x32xf32>
    %1736 = arith.addf %1734, %1735 : vector<16x32xf32>
    %c0_674 = arith.constant 0 : index
    %c0_675 = arith.constant 0 : index
    %1737 = vector.load %arg41[%c0_674, %c0_675] : memref<16x32xf32, #tpu.memory_space<vmem>>, vector<16x32xf32>
    tpu.vector_store %arg41[%c0_674, %c0_675], %1736 {strides = array<i32>} : memref<16x32xf32, #tpu.memory_space<vmem>>, vector<16x32xf32>,
    return
  }
}

</mosaic_0001>

<bundles_post_ra>
// kernel: forward.1
= control target key start
LH: loop header
LB: loop body
LE: loop exit
PB: predicated region body
PF: predicated region fallthrough
CT: control target
= control target key end

     0   :  { %s16168_s6 = smov 1   ;;  %s16169_s10 = smov 2   ;;  %s18105_s0 = inlined_call_operand.smem [shape: u32[42], index: -1, kind: input, shape index: {}] }
   0x1   :  { %s16234_s5 = sld [smem:[%s18105_s0]]   ;;  %s16170_s14 = smov 3  }
   0x2   :  { %s16239_s9 = sld [smem:[%s18105_s0 + %s16168_s6]]   ;;  %s16171_s18 = smov 4  }
   0x3   :  { %s16244_s13 = sld [smem:[%s18105_s0 + %s16169_s10]]   ;;  %s16172_s22 = smov 5  }
   0x4   :  { %s16249_s17 = sld [smem:[%s18105_s0 + %s16170_s14]]   ;;  %s16173_s26 = smov 6  }
   0x5   :  { %s16254_s21 = sld [smem:[%s18105_s0 + %s16171_s18]]   ;;  %s16174_s30 = smov 7  }
   0x6   :  { %s16259_s25 = sld [smem:[%s18105_s0 + %s16172_s22]]   ;;  %s16175_s4 = smov 8  }
   0x7   :  { %s16264_s29 = sld [smem:[%s18105_s0 + %s16173_s26]]   ;;  %s16176_s10 = smov 9  }
   0x8   :  { %18133 = sst [smem:[#allocation8_spill]] %s16239_s9  ;;  %s16177_s15 = smov 10  }
   0x9   :  { %s16269_s3 = sld [smem:[%s18105_s0 + %s16174_s30]]   ;;  %s16178_s20 = smov 11  }
   0xa   :  { %18134 = sst [smem:[#allocation9_spill]] %s16249_s17  ;;  %s16179_s26 = smov 12  }
   0xb   :  { %18135 = sst [smem:[#allocation10_spill]] %s16254_s21  ;;  %s16180_s1 = smov 13  }
   0xc   :  { %s16274_s8 = sld [smem:[%s18105_s0 + %s16175_s4]]   ;;  %s16181_s7 = smov 14  }
   0xd   :  { %s16279_s14 = sld [smem:[%s18105_s0 + %s16176_s10]]   ;;  %s16183_s22 = smov 16  }
   0xe   :  { %s16284_s19 = sld [smem:[%s18105_s0 + %s16177_s15]]   ;;  %s16182_s15 = smov 15  }
   0xf   :  { %s16289_s24 = sld [smem:[%s18105_s0 + %s16178_s20]]   ;;  %s16184_s28 = smov 17  }
  0x10   :  { %s16294_s30 = sld [smem:[%s18105_s0 + %s16179_s26]]  }
  0x11   :  { %s16299_s6 = sld [smem:[%s18105_s0 + %s16180_s1]]   ;;  %s16208_s1 = smov 41  }
  0x12   :  { %s16304_s12 = sld [smem:[%s18105_s0 + %s16181_s7]]   ;;  %s16185_s7 = smov 18  }
  0x13   :  { %s16309_s20 = sld [smem:[%s18105_s0 + %s16182_s15]]   ;;  %s16186_s15 = smov 19  }
  0x14   :  { %s16314_s27 = sld [smem:[%s18105_s0 + %s16183_s22]]   ;;  %s16187_s22 = smov 20  }
  0x15   :  { %s16319_s4 = sld [smem:[%s18105_s0 + %s16184_s28]]   ;;  %s16188_s28 = smov 21  }
  0x16   :  { %s16324_s21 = sld [smem:[%s18105_s0 + %s16185_s7]]   ;;  %s16189_s7 = smov 22  }
  0x17   :  { %s16329_s17 = sld [smem:[%s18105_s0 + %s16186_s15]]   ;;  %s16190_s15 = smov 23  }
  0x18   :  { %s16334_s9 = sld [smem:[%s18105_s0 + %s16187_s22]]   ;;  %s16191_s22 = smov 24  }
  0x1b   :  { %18136 = sst [smem:[#allocation11_spill]] %s16319_s4 }
  0x1c   :  { %18137 = sst [smem:[#allocation12_spill]] %s16324_s21 }
  0x1d   :  { %18138 = sst [smem:[#allocation13_spill]] %s16329_s17 }
  0x1e   :  { %18139 = sst [smem:[#allocation14_spill]] %s16334_s9 }
  0x1f   :  { %s16339_s4 = sld [smem:[%s18105_s0 + %s16188_s28]]   ;;  %s16192_s28 = smov 25  }
  0x20   :  { %s16344_s21 = sld [smem:[%s18105_s0 + %s16189_s7]]   ;;  %s16193_s7 = smov 26  }
  0x21   :  { %s16349_s17 = sld [smem:[%s18105_s0 + %s16190_s15]]   ;;  %s16194_s15 = smov 27  }
  0x22   :  { %s16354_s9 = sld [smem:[%s18105_s0 + %s16191_s22]]   ;;  %s16195_s22 = smov 28  }
  0x25   :  { %18140 = sst [smem:[#allocation15_spill]] %s16339_s4 }
  0x26   :  { %18141 = sst [smem:[#allocation16_spill]] %s16344_s21 }
  0x27   :  { %18142 = sst [smem:[#allocation17_spill]] %s16349_s17 }
  0x28   :  { %18143 = sst [smem:[#allocation18_spill]] %s16354_s9 }
  0x29   :  { %s16359_s4 = sld [smem:[%s18105_s0 + %s16192_s28]]   ;;  %s16196_s28 = smov 29  }
  0x2a   :  { %s16364_s21 = sld [smem:[%s18105_s0 + %s16193_s7]]   ;;  %s16197_s7 = smov 30  }
  0x2b   :  { %s16369_s17 = sld [smem:[%s18105_s0 + %s16194_s15]]   ;;  %s16198_s15 = smov 31  }
  0x2c   :  { %s16374_s9 = sld [smem:[%s18105_s0 + %s16195_s22]]   ;;  %s16199_s22 = smov 32  }
  0x2f   :  { %18144 = sst [smem:[#allocation19_spill]] %s16359_s4 }
  0x30   :  { %18145 = sst [smem:[#allocation20_spill]] %s16364_s21 }
  0x31   :  { %18146 = sst [smem:[#allocation21_spill]] %s16369_s17 }
  0x32   :  { %18147 = sst [smem:[#allocation22_spill]] %s16374_s9 }
  0x33   :  { %s16379_s4 = sld [smem:[%s18105_s0 + %s16196_s28]]   ;;  %s16200_s28 = smov 33  }
  0x34   :  { %s16384_s21 = sld [smem:[%s18105_s0 + %s16197_s7]]   ;;  %s16201_s7 = smov 34  }
  0x35   :  { %s16389_s17 = sld [smem:[%s18105_s0 + %s16198_s15]]   ;;  %s16202_s15 = smov 35  }
  0x36   :  { %s16394_s9 = sld [smem:[%s18105_s0 + %s16199_s22]]   ;;  %s16203_s22 = smov 36  }
  0x39   :  { %18148 = sst [smem:[#allocation23_spill]] %s16379_s4 }
  0x3a   :  { %18149 = sst [smem:[#allocation24_spill]] %s16384_s21 }
  0x3b   :  { %18150 = sst [smem:[#allocation25_spill]] %s16389_s17 }
  0x3c   :  { %18151 = sst [smem:[#allocation26_spill]] %s16394_s9 }
  0x3d   :  { %s16399_s4 = sld [smem:[%s18105_s0 + %s16200_s28]]   ;;  %s16204_s28 = smov 37  }
  0x3e   :  { %s16404_s21 = sld [smem:[%s18105_s0 + %s16201_s7]]   ;;  %s16205_s7 = smov 38  }
  0x3f   :  { %s16409_s17 = sld [smem:[%s18105_s0 + %s16202_s15]]   ;;  %s16206_s15 = smov 39  }
  0x40   :  { %s16414_s9 = sld [smem:[%s18105_s0 + %s16203_s22]]   ;;  %s16207_s22 = smov 40  }
  0x43   :  { %18152 = sst [smem:[#allocation27_spill]] %s16399_s4 }
  0x44   :  { %18153 = sst [smem:[#allocation28_spill]] %s16404_s21 }
  0x45   :  { %18154 = sst [smem:[#allocation29_spill]] %s16409_s17 }
  0x46   :  { %18155 = sst [smem:[#allocation30_spill]] %s16414_s9 }
  0x47   :  { %s16419_s4 = sld [smem:[%s18105_s0 + %s16204_s28]]  }
  0x48   :  { %s16424_s21 = sld [smem:[%s18105_s0 + %s16205_s7]]  }
  0x49   :  { %s16429_s17 = sld [smem:[%s18105_s0 + %s16206_s15]]  }
  0x4a   :  { %s14105_s9 = sld [smem:[%s18105_s0 + %s16207_s22]]  }
  0x4d   :  { %18156 = sst [smem:[#allocation31_spill]] %s16419_s4 }
  0x4e   :  { %s16437_s4 = sld [smem:[%s18105_s0 + %s16208_s1]]  }
  0x4f   :  { %88 = vsyncpa [#allocation3], 0 }
  0x50   :  { %89 = vsyncpa [#allocation4], 0  ;;  %s16209_s7 = smov [#allocation2]  }
  0x51   :  { %s176_s10 = sshll.u32 %s16209_s7, 4  ;;  %s177_s10 = int_to_ptr.vmem [resolvable:$true] %s176_s10 }
  0x52   :  { %s16132_s11 = scalar_lea.vmem %s177_s10, 16  ;;  %s16136_s15 = scalar_lea.vmem %s177_s10, 32 }
  0x53   :  { %p16133_p0 = scmp.ne.s32.totalorder %s177_s10, %s16132_s11  ;;  %p16137_p1 = scmp.lt.s32.totalorder %s177_s10, %s177_s10 }
  0x54   :  { %p16138_p2 = scmp.lt.s32.totalorder %s16136_s15, %s16132_s11 }
  0x56   :  { %p16139_p3 = por %p16138_p2, %p16137_p1 }
  0x58   :  { %p16140_p4 = pnand %p16139_p3, %p16133_p0 }
  0x5a   :  { %16143 = shalt.err (!%p16140_p4)
}
  0x5b   :  { %179 = dma.hbm_to_vmem [thread:$0]  %s14105_s9, 16, %s177_s10, [#allocation3]  }
  0x5c   :  { %16164 = dma.done.wait [#allocation3], 16  }
  0x5d   :  { %16165 = vsyncadd [#allocation3], 4294967280  ;;  %vm193_vm0 = vcmask 261120   ;;  %v16440_v0 = vld [vmem:[%s16234_s5] sm:$0xff]  ;;  %v16443_v1 = vld [vmem:[%s16234_s5 + $0x8] sm:$0xff]  ;;  %v16210_v44 = vmov 0.0  }
  0x5e   :  { %v194_v2 = vsel %vm193_vm0, %v16440_v0, 0.0  ;;  %v197_v3 = vsel %vm193_vm0, %v16443_v1, 0.0  ;;  %v254_v14 = vld [vmem:[%s16259_s25 + $0x18] sm:$0xff]  ;;  %v253_v15 = vld [vmem:[%s16259_s25 + $0x10] sm:$0xff]  ;;  %v252_v16 = vld [vmem:[%s16259_s25 + $0x8] sm:$0xff]  ;;  %14866 = vmatprep.subr.mxu1 %v16210_v44  ;;  %vm16211_vm5 = vmmov 0  }
  0x5f   :  { %195 = vadd.xlane.f32.xlu0 %v194_v2  ;;  %14850 = vmatprep.subr.mxu0 %v254_v14  ;;  %v251_v17 = vld [vmem:[%s16259_s25] sm:$0xff]  ;;  %s16212_s0 = smov 88   ;;  %s16213_s5 = smov 96   ;;  %vm351_vm6 = vcmask 64512   ;;  %vm2450_vm13 = vcmask 523264  }
  0x60   :  { %14851 = vmatpush3.msra.mxu0 %v254_v14  ;;  %v14107_v34 = vld [vmem:[%s16299_s6] ss:$0 sm:$0xff]  ;;  %14868 = vmatprep.mubr.msk.f32.mxu1 %vm16211_vm5, %v16210_v44  ;;  %s16214_s9 = smov 120   ;;  %s16215_s16 = smov 64  }
  0x61   :  { %14852 = vmatprep.subr.mxu0 %v253_v15  ;;  %v14108_v37 = vld [vmem:[%s16304_s12] ss:$0 sm:$0xff]  ;;  %s16216_s18 = smov 80   ;;  %s16217_s22 = smov 112  }
  0x62   :  { %14853 = vmatpush3.msra.mxu0 %v253_v15  ;;  %v14109_v45 = vld [vmem:[%s16264_s29] ss:$0 sm:$0xff]  ;;  %s16218_s23 = smov 56   ;;  %s18131_s26 = smov 72  }
  0x63   :  { %198 = vadd.xlane.f32.xlu0 %v197_v3  ;;  %14854 = vmatprep.subr.mxu0 %v252_v16  ;;  %v16490_v53 = vld [vmem:[%s16244_s13] sm:$0xff]  ;;  %s16220_s1 = smov 104   ;;  %s16221_s28 = smov 48  }
  0x64   :  { %14855 = vmatpush3.msra.mxu0 %v252_v16  ;;  %vm427_vm7 = vcmp.eq.f32.partialorder %v16490_v53, 0.0  ;;  %s18129_s2 = smov 40   ;;  %s18171_s7 = sld [smem:[#allocation16_spill]] }
  0x65   :  { %14856 = vmatprep.subr.mxu0 %v251_v17  ;;  %s18172_s10 = sld [smem:[#allocation10_spill]] }
  0x66   :  { %14857 = vmatpush3.msra.mxu0 %v251_v17  ;;  %s18173_s11 = sld [smem:[#allocation19_spill]] }
  0x67   :  { %14861 = vmatprep.subr.mxu0 %v16210_v44  ;;  %s18174_s15 = sld [smem:[#allocation20_spill]] }
  0xe8   :  { %v196_v4 = vpop.xlane.xlu0 %195 }
  0xe9   :  { %v201_v5 = vmul.f32 0.03125, %v196_v4 }
  0xeb   :  { %v203_v6 = vsub.f32 %v16440_v0, %v201_v5 }
  0xec   :  { %v199_v7 = vpop.xlane.xlu0 %198 }
  0xed   :  { %v202_v8 = vmul.f32 0.03125, %v199_v7  ;;  %v205_v9 = vmul.f32 %v203_v6, %v203_v6  ;;  %v235_v35 = vmul.f32 %v14107_v34, %v203_v6 }
  0xef   :  { %v204_v10 = vsub.f32 %v16443_v1, %v202_v8  ;;  %v207_v11 = vsel %vm193_vm0, %v205_v9, 0.0 }
  0xf0   :  { %208 = vadd.xlane.f32.xlu1 %v207_v11 }
  0xf1   :  { %v206_v12 = vmul.f32 %v204_v10, %v204_v10  ;;  %v236_v39 = vmul.f32 %v14107_v34, %v204_v10 }
  0xf3   :  { %v210_v13 = vsel %vm193_vm0, %v206_v12, 0.0 }
  0xf4   :  { %211 = vadd.xlane.f32.xlu1 %v210_v13 }
 0x179   :  { %v209_v18 = vpop.xlane.xlu1 %208 }
 0x17a   :  { %v213_v19 = vmul.f32 0.032258064, %v209_v18 }
 0x17c   :  { %15836 = vrsqrt.f32 %v213_v19  ;;  %vm217_vm1 = vcmp.eq.f32.partialorder %v213_v19, inf  ;;  %v220_v24 = vand.u32 2147483648, %v213_v19  ;;  %vm219_vm2 = vcmp.eq.f32.partialorder %v213_v19, 0.0 }
 0x17d   :  { %v212_v20 = vpop.xlane.xlu1 %211 }
 0x17e   :  { %v214_v21 = vmul.f32 0.032258064, %v212_v20  ;;  %v16518_v20 = vld [vmem:[%s16269_s3] sm:$0xff] }
 0x180   :  { %15838 = vrsqrt.f32 %v214_v21  ;;  %vm224_vm3 = vcmp.eq.f32.partialorder %v214_v21, inf  ;;  %v227_v30 = vand.u32 2147483648, %v214_v21  ;;  %vm226_vm4 = vcmp.eq.f32.partialorder %v214_v21, 0.0 }
 0x189   :  { %v15837_v22 = vpop.eup %15836 }
 0x18a   :  { %v216_v23 = vmul.f32 %v15837_v22, %v213_v19 }
 0x18c   :  { %v218_v25 = vsel %vm217_vm1, %v213_v19, %v216_v23 }
 0x18d   :  { %v15839_v26 = vpop.eup %15838  ;;  %v221_v27 = vsel %vm219_vm2, %v220_v24, %v218_v25 }
 0x18e   :  { %v223_v28 = vmul.f32 %v15839_v26, %v214_v21  ;;  %v237_v29 = vadd.f32 1e-06, %v221_v27 }
 0x190   :  { %v225_v31 = vsel %vm224_vm3, %v214_v21, %v223_v28  ;;  %15840 = vrcp.f32 %v237_v29  ;;  %v16522_v21 = vld [vmem:[%s16269_s3 + $0x8] sm:$0xff] }
 0x191   :  { %v228_v32 = vsel %vm226_vm4, %v227_v30, %v225_v31 }
 0x192   :  { %v238_v33 = vadd.f32 1e-06, %v228_v32 }
 0x194   :  { %15842 = vrcp.f32 %v238_v33 }
 0x19d   :  { %v15841_v36 = vpop.eup %15840 }
 0x19e   :  { %v241_v38 = vmul.f32 %v15841_v36, %v235_v35 }
 0x1a0   :  { %v249_v40 = vadd.f32 %v14108_v37, %v241_v38 }
 0x1a1   :  { %v15843_v41 = vpop.eup %15842 }
 0x1a2   :  { %v242_v42 = vmul.f32 %v15843_v41, %v236_v39  ;;  %14858 = vmatprep.mubr.msk.f32.mxu0 %vm193_vm0, %v249_v40 }
 0x1a4   :  { %v250_v43 = vadd.f32 %v14108_v37, %v242_v42 }
 0x1a6   :  { %14859 = vmatmul.mubr.msk.f32.vlgmr.msra.gmra.mxu0 %vm193_vm0, %v250_v43 }
 0x1a7   :  { %14863 = vmatprep.mubr.msk.f32.mxu0 %vm16211_vm5, %v16210_v44 }
 0x266   :  { %v14860_v46 = vpop.f32.mrf.mxu0 }
 0x267   :  { %v16468_v47 = vadd.f32 %v14860_v46, %v14109_v45 }
 0x268   :  { %v334_v48 = vpop.f32.mrf.mxu0 }
 0x269   :  { %v16470_v49 = vadd.f32 %v14109_v45, %v334_v48 }
 0x26b   :  { %518 = vrot.lane.b32.xlu1 %v16470_v49, %s16212_s0  ;;  %349 = vrot.lane.b32.xlu0 %v16470_v49, %s16213_s5 }
 0x26f   :  { %516 = vrot.lane.b32.xlu1 %v16470_v49, %s16214_s9 }
 0x2dd   :  { %v350_v50 = vpop.permute.xlu0 %349  ;;  %v519_v51 = vpop.permute.xlu1 %518 }
 0x2de   :  { %14862 = vmatpush3.xpose.msk.msra.mxu0 %vm351_vm6, %v350_v50 }
 0x2df   :  { %14871 = vmatprep.subr.mxu0 %v16210_v44 }
 0x2e1   :  { %14864 = vmatmul.mubr.msk.f32.vlgmr.msra.gmra.mxu0 %vm351_vm6, %v16470_v49  ;;  %v517_v52 = vpop.permute.xlu1 %516 }
 0x2e2   :  { %14872 = vmatpush3.xpose.msk.msra.mxu0 %vm351_vm6, %v519_v51  ;;  %14873 = vmatprep.mubr.msk.f32.mxu0 %vm16211_vm5, %v16210_v44 }
 0x2e3   :  { %14881 = vmatprep.subr.mxu0 %v16210_v44 }
 0x2e5   :  { %14874 = vmatmul.mubr.msk.f32.vlgmr.msra.gmra.mxu0 %vm351_vm6, %v517_v52  ;;  %v16562_v52 = vld [vmem:[%s16269_s3 + $0x10] sm:$0xff] }
 0x2e6   :  { %14883 = vmatprep.mubr.msk.f32.mxu0 %vm16211_vm5, %v16210_v44  ;;  %14882 = vmatpush3.msra.mxu0 %v16522_v21 }
 0x2e7   :  { %14891 = vmatprep.subr.mxu0 %v16210_v44 }
 0x3a1   :  { %v422_v54 = vpop.f32.mrf.mxu0 }
 0x3a2   :  { %v426_v55 = vmul.f32 0.35355338, %v422_v54 }
 0x3a3   :  { %v14865_v56 = vpop.f32.mrf.mxu0 }
 0x3a4   :  { %v428_v57 = vsel %vm427_vm7, -1e+09, %v426_v55 }
 0x3a5   :  { %v590_v58 = vpop.f32.mrf.mxu0  ;;  %v429_v59 = vsel %vm351_vm6, %v428_v57, -inf }
 0x3a6   :  { %v594_v60 = vmul.f32 0.35355338, %v590_v58  ;;  %430 = vmax.xlane.f32.xlu1 %v429_v59 }
 0x3a7   :  { %v14875_v61 = vpop.f32.mrf.mxu0 }
 0x3a8   :  { %v595_v62 = vsel %vm427_vm7, -1e+09, %v594_v60 }
 0x3a9   :  { %v596_v63 = vsel %vm351_vm6, %v595_v62, -inf }
 0x3aa   :  { %597 = vmax.xlane.f32.xlu0 %v596_v63 }
 0x3b7   :  { %440 = vrot.lane.b32.xlu1 %v16470_v49, %s16215_s16 }
 0x3bb   :  { %831 = vrot.lane.b32.xlu1 %v16470_v49, %s16216_s18 }
 0x3bf   :  { %829 = vrot.lane.b32.xlu1 %v16470_v49, %s16217_s22 }
 0x42f   :  { %v431_v2 = vpop.xlane.xlu1 %430 }
 0x430   :  { %v432_v3 = vsub.f32 %v428_v57, %v431_v2 }
 0x432   :  { %v433_v4 = vmul.f32 1.442695, %v432_v3 }
 0x433   :  { %v598_v5 = vpop.xlane.xlu0 %597  ;;  %v441_v6 = vpop.permute.xlu1 %440 }
 0x434   :  { %15844 = vpow2.f32 %v433_v4  ;;  %v599_v7 = vsub.f32 %v595_v62, %v598_v5  ;;  %14867 = vmatpush3.msra.mxu1 %v441_v6 }
 0x435   :  { %14876 = vmatprep.subr.mxu1 %v16210_v44 }
 0x436   :  { %v600_v8 = vmul.f32 1.442695, %v599_v7 }
 0x437   :  { %v832_v23 = vpop.permute.xlu1 %831 }
 0x438   :  { %15846 = vpow2.f32 %v600_v8 }
 0x43b   :  { %v830_v27 = vpop.permute.xlu1 %829 }
 0x441   :  { %v15845_v9 = vpop.eup %15844 }
 0x442   :  { %v435_v10 = vsel %vm351_vm6, %v15845_v9, 0.0 }
 0x443   :  { %436 = vadd.xlane.f32.xlu0 %v435_v10 }
 0x445   :  { %v15847_v11 = vpop.eup %15846 }
 0x446   :  { %v602_v12 = vsel %vm351_vm6, %v15847_v11, 0.0 }
 0x447   :  { %603 = vadd.xlane.f32.xlu0 %v602_v12 }
 0x45d   :  { %607 = vrot.lane.b32.xlu0 %v16470_v49, %s16218_s23 }
 0x4cc   :  { %v437_v13 = vpop.xlane.xlu0 %436 }
 0x4cd   :  { %15848 = vrcp.f32 %v437_v13  ;;  %v16598_v13 = vld [vmem:[%s16269_s3 + $0x18] sm:$0xff] }
 0x4d0   :  { %v604_v14 = vpop.xlane.xlu0 %603 }
 0x4d1   :  { %15850 = vrcp.f32 %v604_v14 }
 0x4d4   :  { %v608_v17 = vpop.permute.xlu0 %607 }
 0x4da   :  { %v15849_v15 = vpop.eup %15848 }
 0x4db   :  { %v439_v16 = vmul.f32 %v15849_v15, %v15845_v9  ;;  %v16604_v15 = vld [vmem:[%s16244_s13 + $0x8] sm:$0xff]  ;;  %s18157_s13 = sld [smem:[#allocation8_spill]] }
 0x4dc   :  { %vm1389_vm8 = vcmp.eq.f32.partialorder %v16604_v15, 0.0 }
 0x4dd   :  { %14869 = vmatmul.mubr.msk.f32.vlgmr.msra.gmra.mxu1 %vm351_vm6, %v439_v16 }
 0x4de   :  { %v15851_v18 = vpop.eup %15850  ;;  %14877 = vmatpush3.msra.mxu1 %v608_v17  ;;  %14878 = vmatprep.mubr.msk.f32.mxu1 %vm16211_vm5, %v16210_v44 }
 0x4df   :  { %v606_v19 = vmul.f32 %v15851_v18, %v15847_v11  ;;  %14886 = vmatprep.subr.mxu1 %v16210_v44 }
 0x4e1   :  { %14879 = vmatmul.mubr.msk.f32.vlgmr.msra.gmra.mxu1 %vm351_vm6, %v606_v19 }
 0x4e2   :  { %14888 = vmatprep.mubr.msk.f32.mxu1 %vm16211_vm5, %v16210_v44  ;;  %14887 = vmatpush3.msra.mxu1 %v16518_v20 }
 0x4e3   :  { %14896 = vmatprep.subr.mxu1 %v16210_v44 }
 0x59d   :  { %v512_v22 = vpop.f32.mrf.mxu1 }
 0x59e   :  { %14889 = vmatmul.mubr.msk.f32.vlgmr.msra.gmra.mxu1 %vm351_vm6, %v512_v22 }
 0x59f   :  { %v14870_v24 = vpop.f32.mrf.mxu1  ;;  %14898 = vmatprep.mubr.msk.f32.mxu1 %vm16211_vm5, %v16210_v44 }
 0x5a1   :  { %v679_v25 = vpop.f32.mrf.mxu1 }
 0x5a2   :  { %14884 = vmatmul.mubr.msk.f32.vlgmr.msra.gmra.mxu0 %vm351_vm6, %v679_v25 }
 0x5a3   :  { %14892 = vmatpush3.xpose.msk.msra.mxu0 %vm351_vm6, %v832_v23  ;;  %v14880_v26 = vpop.f32.mrf.mxu1  ;;  %14893 = vmatprep.mubr.msk.f32.mxu0 %vm16211_vm5, %v16210_v44 }
 0x5a4   :  { %14901 = vmatprep.subr.mxu0 %v16210_v44 }
 0x5a6   :  { %14894 = vmatmul.mubr.msk.f32.vlgmr.msra.gmra.mxu0 %vm351_vm6, %v830_v27 }
 0x5a7   :  { %14903 = vmatprep.mubr.msk.f32.mxu0 %vm16211_vm5, %v16210_v44  ;;  %14902 = vmatpush3.msra.mxu0 %v16562_v52 }
 0x5a8   :  { %14911 = vmatprep.subr.mxu0 %v16210_v44 }
 0x65e   :  { %v825_v28 = vpop.f32.mrf.mxu1 }
 0x660   :  { %v14890_v29 = vpop.f32.mrf.mxu1 }
 0x662   :  { %v752_v30 = vpop.f32.mrf.mxu0 }
 0x663   :  { %v16538_v31 = vadd.f32 %v825_v28, %v752_v30 }
 0x664   :  { %v14885_v32 = vpop.f32.mrf.mxu0 }
 0x666   :  { %v903_v33 = vpop.f32.mrf.mxu0 }
 0x667   :  { %v907_v34 = vmul.f32 0.35355338, %v903_v33 }
 0x668   :  { %v14895_v35 = vpop.f32.mrf.mxu0 }
 0x669   :  { %v908_v36 = vsel %vm427_vm7, -1e+09, %v907_v34 }
 0x66a   :  { %v909_v37 = vsel %vm351_vm6, %v908_v36, -inf }
 0x66b   :  { %910 = vmax.xlane.f32.xlu1 %v909_v37 }
 0x67c   :  { %1072 = vrot.lane.b32.xlu1 %v16470_v49, %s18131_s26 }
 0x680   :  { %1070 = vrot.lane.b32.xlu1 %v16470_v49, %s16220_s1 }
 0x684   :  { %1312 = vrot.lane.b32.xlu1 %v16468_v47, %s16213_s5 }
 0x6f4   :  { %v911_v38 = vpop.xlane.xlu1 %910 }
 0x6f5   :  { %v912_v39 = vsub.f32 %v908_v36, %v911_v38 }
 0x6f7   :  { %v913_v40 = vmul.f32 1.442695, %v912_v39 }
 0x6f8   :  { %v1073_v48 = vpop.permute.xlu1 %1072 }
 0x6f9   :  { %15852 = vpow2.f32 %v913_v40 }
 0x6fc   :  { %v1071_v51 = vpop.permute.xlu1 %1070 }
 0x700   :  { %v1313_v7 = vpop.permute.xlu1 %1312 }
 0x706   :  { %v15853_v41 = vpop.eup %15852 }
 0x707   :  { %v915_v42 = vsel %vm351_vm6, %v15853_v41, 0.0 }
 0x708   :  { %916 = vadd.xlane.f32.xlu0 %v915_v42 }
 0x71e   :  { %920 = vrot.lane.b32.xlu0 %v16470_v49, %s16221_s28 }
 0x791   :  { %v917_v43 = vpop.xlane.xlu0 %916 }
 0x792   :  { %15854 = vrcp.f32 %v917_v43 }
 0x795   :  { %v921_v45 = vpop.permute.xlu0 %920 }
 0x796   :  { %14897 = vmatpush3.msra.mxu1 %v921_v45 }
 0x797   :  { %14906 = vmatprep.subr.mxu1 %v16210_v44 }
 0x79f   :  { %v15855_v46 = vpop.eup %15854 }
 0x7a0   :  { %v919_v50 = vmul.f32 %v15855_v46, %v15853_v41 }
 0x7a2   :  { %14899 = vmatmul.mubr.msk.f32.vlgmr.msra.gmra.mxu1 %vm351_vm6, %v919_v50 }
 0x7a3   :  { %14907 = vmatpush3.xpose.msk.msra.mxu1 %vm351_vm6, %v1073_v48  ;;  %14908 = vmatprep.mubr.msk.f32.mxu1 %vm16211_vm5, %v16210_v44 }
 0x7a4   :  { %14916 = vmatprep.subr.mxu1 %v16210_v44 }
 0x7a6   :  { %14909 = vmatmul.mubr.msk.f32.vlgmr.msra.gmra.mxu1 %vm351_vm6, %v1071_v51 }
 0x7a7   :  { %14918 = vmatprep.mubr.msk.f32.mxu1 %vm16211_vm5, %v16210_v44  ;;  %14917 = vmatpush3.msra.mxu1 %v16598_v13 }
 0x7a8   :  { %14926 = vmatprep.subr.mxu1 %v16210_v44 }
 0x862   :  { %v992_v54 = vpop.f32.mrf.mxu1 }
 0x863   :  { %14904 = vmatmul.mubr.msk.f32.vlgmr.msra.gmra.mxu0 %vm351_vm6, %v992_v54 }
 0x864   :  { %v14900_v55 = vpop.f32.mrf.mxu1  ;;  %14913 = vmatprep.mubr.msk.f32.mxu0 %vm16211_vm5, %v16210_v44 }
 0x866   :  { %v1144_v56 = vpop.f32.mrf.mxu1 }
 0x867   :  { %v1148_v57 = vmul.f32 0.35355338, %v1144_v56 }
 0x868   :  { %v14910_v58 = vpop.f32.mrf.mxu1 }
 0x869   :  { %v1149_v59 = vsel %vm427_vm7, -1e+09, %v1148_v57 }
 0x86a   :  { %v1150_v60 = vsel %vm351_vm6, %v1149_v59, -inf }
 0x86b   :  { %1151 = vmax.xlane.f32.xlu0 %v1150_v60 }
 0x881   :  { %1161 = vrot.lane.b32.xlu0 %v16470_v49, %s18129_s2 }
 0x885   :  { %1480 = vrot.lane.b32.xlu0 %v16468_v47, %s16212_s0 }
 0x8f4   :  { %v1152_v61 = vpop.xlane.xlu0 %1151 }
 0x8f5   :  { %v1153_v62 = vsub.f32 %v1149_v59, %v1152_v61 }
 0x8f7   :  { %v1154_v63 = vmul.f32 1.442695, %v1153_v62 }
 0x8f8   :  { %v1162_v2 = vpop.permute.xlu0 %1161 }
 0x8f9   :  { %15856 = vpow2.f32 %v1154_v63  ;;  %14912 = vmatpush3.msra.mxu0 %v1162_v2 }
 0x8fa   :  { %14921 = vmatprep.subr.mxu0 %v16210_v44 }
 0x8fc   :  { %v1481_v11 = vpop.permute.xlu0 %1480 }
 0x906   :  { %v15857_v3 = vpop.eup %15856 }
 0x907   :  { %v1156_v4 = vsel %vm351_vm6, %v15857_v3, 0.0 }
 0x908   :  { %1157 = vadd.xlane.f32.xlu1 %v1156_v4 }
 0x919   :  { %1478 = vrot.lane.b32.xlu1 %v16468_v47, %s16214_s9 }
 0x923   :  { %v1065_v5 = vpop.f32.mrf.mxu0 }
 0x924   :  { %v1069_v49 = vadd.f32 %v1065_v5, %v16538_v31 }
 0x925   :  { %v14905_v6 = vpop.f32.mrf.mxu0 }
 0x991   :  { %v1158_v8 = vpop.xlane.xlu1 %1157 }
 0x992   :  { %15858 = vrcp.f32 %v1158_v8 }
 0x995   :  { %v1479_v12 = vpop.permute.xlu1 %1478 }
 0x99f   :  { %v15859_v9 = vpop.eup %15858 }
 0x9a0   :  { %v1160_v10 = vmul.f32 %v15859_v9, %v15857_v3 }
 0x9a2   :  { %14914 = vmatmul.mubr.msk.f32.vlgmr.msra.gmra.mxu0 %vm351_vm6, %v1160_v10 }
 0x9a3   :  { %14922 = vmatpush3.xpose.msk.msra.mxu0 %vm351_vm6, %v1313_v7  ;;  %14923 = vmatprep.mubr.msk.f32.mxu0 %vm16211_vm5, %v16210_v44 }
 0x9a4   :  { %14931 = vmatprep.subr.mxu0 %v16210_v44 }
 0x9a6   :  { %14924 = vmatmul.mubr.msk.f32.vlgmr.msra.gmra.mxu0 %vm351_vm6, %v16468_v47 }
 0x9a7   :  { %14932 = vmatpush3.xpose.msk.msra.mxu0 %vm351_vm6, %v1481_v11  ;;  %14933 = vmatprep.mubr.msk.f32.mxu0 %vm16211_vm5, %v16210_v44 }
 0x9a8   :  { %14941 = vmatprep.subr.mxu0 %v16210_v44 }
 0x9aa   :  { %14934 = vmatmul.mubr.msk.f32.vlgmr.msra.gmra.mxu0 %vm351_vm6, %v1479_v12 }
 0x9ab   :  { %14942 = vmatpush3.msra.mxu0 %v16522_v21  ;;  %14943 = vmatprep.mubr.msk.f32.mxu0 %vm16211_vm5, %v16210_v44 }
 0x9ac   :  { %14951 = vmatprep.subr.mxu0 %v16210_v44 }
 0xa62   :  { %v1233_v14 = vpop.f32.mrf.mxu0 }
 0xa63   :  { %14919 = vmatmul.mubr.msk.f32.vlgmr.msra.gmra.mxu1 %vm351_vm6, %v1233_v14 }
 0xa64   :  { %v14915_v16 = vpop.f32.mrf.mxu0  ;;  %14928 = vmatprep.mubr.msk.f32.mxu1 %vm16211_vm5, %v16210_v44 }
 0xa66   :  { %v1384_v17 = vpop.f32.mrf.mxu0 }
 0xa67   :  { %v1388_v18 = vmul.f32 0.35355338, %v1384_v17 }
 0xa68   :  { %v14925_v19 = vpop.f32.mrf.mxu0 }
 0xa69   :  { %v1390_v21 = vsel %vm1389_vm8, -1e+09, %v1388_v18  ;;  %v14144_v19 = vld [vmem:[%s16274_s8] ss:$0 sm:$0xff] }
 0xa6a   :  { %v1552_v22 = vpop.f32.mrf.mxu0  ;;  %v1391_v23 = vsel %vm351_vm6, %v1390_v21, -inf }
 0xa6b   :  { %v1556_v24 = vmul.f32 0.35355338, %v1552_v22  ;;  %1392 = vmax.xlane.f32.xlu0 %v1391_v23 }
 0xa6c   :  { %v14935_v25 = vpop.f32.mrf.mxu0 }
 0xa6d   :  { %v1557_v26 = vsel %vm1389_vm8, -1e+09, %v1556_v24 }
 0xa6e   :  { %v1558_v27 = vsel %vm351_vm6, %v1557_v26, -inf }
 0xa6f   :  { %1559 = vmax.xlane.f32.xlu1 %v1558_v27 }
 0xa80   :  { %1569 = vrot.lane.b32.xlu1 %v16468_v47, %s16218_s23 }
 0xa84   :  { %1793 = vrot.lane.b32.xlu1 %v16468_v47, %s16216_s18 }
 0xa88   :  { %1791 = vrot.lane.b32.xlu1 %v16468_v47, %s16217_s22 }
 0xaf4   :  { %v1393_v28 = vpop.xlane.xlu0 %1392 }
 0xaf5   :  { %v1394_v29 = vsub.f32 %v1390_v21, %v1393_v28 }
 0xaf7   :  { %v1395_v30 = vmul.f32 1.442695, %v1394_v29 }
 0xaf8   :  { %v1560_v31 = vpop.xlane.xlu1 %1559 }
 0xaf9   :  { %15860 = vpow2.f32 %v1395_v30  ;;  %v1561_v32 = vsub.f32 %v1557_v26, %v1560_v31 }
 0xafb   :  { %v1562_v33 = vmul.f32 1.442695, %v1561_v32 }
 0xafc   :  { %v1570_v48 = vpop.permute.xlu1 %1569 }
 0xafd   :  { %15862 = vpow2.f32 %v1562_v33 }
 0xb00   :  { %v1794_v55 = vpop.permute.xlu1 %1793 }
 0xb06   :  { %v15861_v34 = vpop.eup %15860 }
 0xb07   :  { %v1397_v35 = vsel %vm351_vm6, %v15861_v34, 0.0 }
 0xb08   :  { %1398 = vadd.xlane.f32.xlu0 %v1397_v35 }
 0xb0a   :  { %v15863_v36 = vpop.eup %15862 }
 0xb0b   :  { %v1564_v37 = vsel %vm351_vm6, %v15863_v36, 0.0 }
 0xb0c   :  { %1565 = vadd.xlane.f32.xlu0 %v1564_v37 }
 0xb22   :  { %1402 = vrot.lane.b32.xlu0 %v16468_v47, %s16215_s16 }
 0xb23   :  { %v1306_v38 = vpop.f32.mrf.mxu1 }
 0xb24   :  { %v16625_v39 = vadd.f32 %v1306_v38, %v1069_v49 }
 0xb25   :  { %v14920_v40 = vpop.f32.mrf.mxu1 }
 0xb26   :  { %v2279_v22 = vadd.f32 %v14144_v19, %v16625_v39 }
 0xb91   :  { %v1399_v41 = vpop.xlane.xlu0 %1398 }
 0xb92   :  { %15864 = vrcp.f32 %v1399_v41 }
 0xb95   :  { %v1566_v42 = vpop.xlane.xlu0 %1565 }
 0xb96   :  { %15866 = vrcp.f32 %v1566_v42 }
 0xb99   :  { %v1403_v43 = vpop.permute.xlu0 %1402 }
 0xb9a   :  { %14927 = vmatpush3.msra.mxu1 %v1403_v43 }
 0xb9b   :  { %14936 = vmatprep.subr.mxu1 %v16210_v44 }
 0xb9f   :  { %v15865_v45 = vpop.eup %15864 }
 0xba0   :  { %v1401_v46 = vmul.f32 %v15865_v45, %v15861_v34 }
 0xba2   :  { %14929 = vmatmul.mubr.msk.f32.vlgmr.msra.gmra.mxu1 %vm351_vm6, %v1401_v46 }
 0xba3   :  { %v15867_v50 = vpop.eup %15866  ;;  %14937 = vmatpush3.msra.mxu1 %v1570_v48  ;;  %14938 = vmatprep.mubr.msk.f32.mxu1 %vm16211_vm5, %v16210_v44 }
 0xba4   :  { %v1568_v51 = vmul.f32 %v15867_v50, %v15863_v36  ;;  %14946 = vmatprep.subr.mxu1 %v16210_v44 }
 0xba6   :  { %14939 = vmatmul.mubr.msk.f32.vlgmr.msra.gmra.mxu1 %vm351_vm6, %v1568_v51 }
 0xba7   :  { %14947 = vmatpush3.msra.mxu1 %v16518_v20  ;;  %14948 = vmatprep.mubr.msk.f32.mxu1 %vm16211_vm5, %v16210_v44  ;;  %v1792_v20 = vpop.permute.xlu1 %1791 }
 0xba8   :  { %14956 = vmatprep.subr.mxu1 %v16210_v44 }
 0xc62   :  { %v1474_v54 = vpop.f32.mrf.mxu1 }
 0xc63   :  { %14949 = vmatmul.mubr.msk.f32.vlgmr.msra.gmra.mxu1 %vm351_vm6, %v1474_v54 }
 0xc64   :  { %v14930_v56 = vpop.f32.mrf.mxu1  ;;  %14958 = vmatprep.mubr.msk.f32.mxu1 %vm16211_vm5, %v16210_v44 }
 0xc66   :  { %v1641_v57 = vpop.f32.mrf.mxu1 }
 0xc67   :  { %14944 = vmatmul.mubr.msk.f32.vlgmr.msra.gmra.mxu0 %vm351_vm6, %v1641_v57 }
 0xc68   :  { %14952 = vmatpush3.xpose.msk.msra.mxu0 %vm351_vm6, %v1794_v55  ;;  %v14940_v58 = vpop.f32.mrf.mxu1  ;;  %14953 = vmatprep.mubr.msk.f32.mxu0 %vm16211_vm5, %v16210_v44 }
 0xc69   :  { %14961 = vmatprep.subr.mxu0 %v16210_v44 }
 0xc6b   :  { %14954 = vmatmul.mubr.msk.f32.vlgmr.msra.gmra.mxu0 %vm351_vm6, %v1792_v20 }
 0xc6c   :  { %14962 = vmatpush3.msra.mxu0 %v16562_v52  ;;  %14963 = vmatprep.mubr.msk.f32.mxu0 %vm16211_vm5, %v16210_v44 }
 0xc6d   :  { %14971 = vmatprep.subr.mxu0 %v16210_v44 }
 0xd23   :  { %v1787_v59 = vpop.f32.mrf.mxu1 }
 0xd25   :  { %v14950_v60 = vpop.f32.mrf.mxu1 }
 0xd27   :  { %v1714_v61 = vpop.f32.mrf.mxu0 }
 0xd28   :  { %v1788_v62 = vadd.f32 %v1787_v59, %v1714_v61 }
 0xd29   :  { %v14945_v63 = vpop.f32.mrf.mxu0 }
 0xd2b   :  { %v1865_v2 = vpop.f32.mrf.mxu0 }
 0xd2c   :  { %v1869_v3 = vmul.f32 0.35355338, %v1865_v2 }
 0xd2d   :  { %v14955_v4 = vpop.f32.mrf.mxu0 }
 0xd2e   :  { %v1870_v5 = vsel %vm1389_vm8, -1e+09, %v1869_v3 }
 0xd2f   :  { %v1871_v49 = vsel %vm351_vm6, %v1870_v5, -inf }
 0xd30   :  { %1872 = vmax.xlane.f32.xlu0 %v1871_v49  ;;  %v14145_v49 = vld [vmem:[%s16309_s20] ss:$0 sm:$0xff] }
 0xd46   :  { %1882 = vrot.lane.b32.xlu0 %v16468_v47, %s16221_s28 }
 0xd4a   :  { %2032 = vrot.lane.b32.xlu0 %v16468_v47, %s16220_s1 }
 0xdb9   :  { %v1873_v52 = vpop.xlane.xlu0 %1872 }
 0xdba   :  { %v1874_v6 = vsub.f32 %v1870_v5, %v1873_v52 }
 0xdbc   :  { %v1875_v7 = vmul.f32 1.442695, %v1874_v6 }
 0xdbd   :  { %v1883_v8 = vpop.permute.xlu0 %1882 }
 0xdbe   :  { %15868 = vpow2.f32 %v1875_v7  ;;  %14957 = vmatpush3.msra.mxu1 %v1883_v8  ;;  %v14146_v7 = vld [vmem:[%s16314_s27] ss:$0 sm:$0xff] }
 0xdbf   :  { %14966 = vmatprep.subr.mxu1 %v16210_v44 }
 0xdc1   :  { %v2033_v17 = vpop.permute.xlu0 %2032 }
 0xdcb   :  { %v15869_v9 = vpop.eup %15868 }
 0xdcc   :  { %v1877_v10 = vsel %vm351_vm6, %v15869_v9, 0.0 }
 0xdcd   :  { %1878 = vadd.xlane.f32.xlu1 %v1877_v10  ;;  %v2343_v10 = vld [vmem:[%s16279_s14 + $0x10] sm:$0xff] }
 0xdde   :  { %2034 = vrot.lane.b32.xlu1 %v16468_v47, %s18131_s26 }
 0xe56   :  { %v1879_v11 = vpop.xlane.xlu1 %1878 }
 0xe57   :  { %15870 = vrcp.f32 %v1879_v11 }
 0xe5a   :  { %v2035_v16 = vpop.permute.xlu1 %2034 }
 0xe64   :  { %v15871_v12 = vpop.eup %15870 }
 0xe65   :  { %v1881_v14 = vmul.f32 %v15871_v12, %v15869_v9  ;;  %v2344_v9 = vld [vmem:[%s16279_s14 + $0x18] sm:$0xff]  ;;  %v2342_v12 = vld [vmem:[%s16279_s14 + $0x8] sm:$0xff] }
 0xe67   :  { %14959 = vmatmul.mubr.msk.f32.vlgmr.msra.gmra.mxu1 %vm351_vm6, %v1881_v14  ;;  %v2341_v14 = vld [vmem:[%s16279_s14] sm:$0xff] }
 0xe68   :  { %14967 = vmatpush3.xpose.msk.msra.mxu1 %vm351_vm6, %v2035_v16  ;;  %14968 = vmatprep.mubr.msk.f32.mxu1 %vm16211_vm5, %v16210_v44  ;;  %v2353_v16 = vld [vmem:[%s16289_s24 + $0x38] sm:$0xff] }
 0xe69   :  { %14976 = vmatprep.subr.mxu1 %v16210_v44 }
 0xe6b   :  { %14969 = vmatmul.mubr.msk.f32.vlgmr.msra.gmra.mxu1 %vm351_vm6, %v2033_v17  ;;  %v2352_v17 = vld [vmem:[%s16289_s24 + $0x30] sm:$0xff] }
 0xe6c   :  { %14977 = vmatpush3.msra.mxu1 %v16598_v13  ;;  %14978 = vmatprep.mubr.msk.f32.mxu1 %vm16211_vm5, %v16210_v44  ;;  %v16678_v13 = vadd.f32 %v2279_v22, %v16440_v0 }
 0xe6d   :  { %14992 = vmatprep.subr.mxu1 %v2353_v16 }
 0xe6e   :  { %v2285_v28 = vsel %vm193_vm0, %v16678_v13, 0.0 }
 0xf27   :  { %v1954_v18 = vpop.f32.mrf.mxu1 }
 0xf28   :  { %14964 = vmatmul.mubr.msk.f32.vlgmr.msra.gmra.mxu0 %vm351_vm6, %v1954_v18  ;;  %v2351_v18 = vld [vmem:[%s16289_s24 + $0x28] sm:$0xff] }
 0xf29   :  { %v14960_v21 = vpop.f32.mrf.mxu1  ;;  %14973 = vmatprep.mubr.msk.f32.mxu0 %vm16211_vm5, %v16210_v44 }
 0xf2b   :  { %v2106_v23 = vpop.f32.mrf.mxu1 }
 0xf2c   :  { %v2110_v24 = vmul.f32 0.35355338, %v2106_v23 }
 0xf2d   :  { %v14970_v25 = vpop.f32.mrf.mxu1 }
 0xf2e   :  { %v2111_v26 = vsel %vm1389_vm8, -1e+09, %v2110_v24 }
 0xf2f   :  { %v2112_v27 = vsel %vm351_vm6, %v2111_v26, -inf }
 0xf30   :  { %2113 = vmax.xlane.f32.xlu1 %v2112_v27 }
 0xf34   :  { %2286 = vadd.xlane.f32.xlu1 %v2285_v28 }
 0xfb9   :  { %v2114_v29 = vpop.xlane.xlu1 %2113 }
 0xfba   :  { %v2115_v30 = vsub.f32 %v2111_v26, %v2114_v29 }
 0xfbc   :  { %v2116_v31 = vmul.f32 1.442695, %v2115_v30 }
 0xfbd   :  { %v2287_v42 = vpop.xlane.xlu1 %2286 }
 0xfbe   :  { %15872 = vpow2.f32 %v2116_v31  ;;  %v2291_v43 = vmul.f32 0.03125, %v2287_v42 }
 0xfc0   :  { %v2293_v48 = vsub.f32 %v16678_v13, %v2291_v43  ;;  %v14150_v43 = vld [vmem:[%s16294_s30] ss:$0 sm:$0xff] }
 0xfc2   :  { %v2295_v55 = vmul.f32 %v2293_v48, %v2293_v48  ;;  %v2325_v52 = vmul.f32 %v14145_v49, %v2293_v48 }
 0xfc4   :  { %v2297_v56 = vsel %vm193_vm0, %v2295_v55, 0.0 }
 0xfcb   :  { %v15873_v32 = vpop.eup %15872 }
 0xfcc   :  { %v2118_v33 = vsel %vm351_vm6, %v15873_v32, 0.0 }
 0xfcd   :  { %2119 = vadd.xlane.f32.xlu0 %v2118_v33  ;;  %v2349_v33 = vld [vmem:[%s16289_s24 + $0x18] sm:$0xff] }
 0xfe3   :  { %2123 = vrot.lane.b32.xlu0 %v16468_v47, %s18129_s2 }
 0xfe8   :  { %v2027_v0 = vpop.f32.mrf.mxu0 }
 0xfe9   :  { %v2031_v34 = vadd.f32 %v2027_v0, %v1788_v62  ;;  %v2348_v0 = vld [vmem:[%s16289_s24 + $0x10] sm:$0xff] }
 0xfea   :  { %v14965_v35 = vpop.f32.mrf.mxu0 }
 0xfeb   :  { %v2346_v35 = vld [vmem:[%s16289_s24] sm:$0xff] }
0x1056   :  { %v2120_v36 = vpop.xlane.xlu0 %2119 }
0x1057   :  { %15874 = vrcp.f32 %v2120_v36  ;;  %v14147_v36 = vld [vmem:[%s16284_s19] ss:$0 sm:$0xff] }
0x105a   :  { %v2124_v37 = vpop.permute.xlu0 %2123 }
0x105b   :  { %14972 = vmatpush3.msra.mxu0 %v2124_v37 }
0x105c   :  { %14981 = vmatprep.subr.mxu0 %v2344_v9 }
0x1064   :  { %v15875_v38 = vpop.eup %15874 }
0x1065   :  { %v2122_v39 = vmul.f32 %v15875_v38, %v15873_v32 }
0x1067   :  { %14974 = vmatmul.mubr.msk.f32.vlgmr.msra.gmra.mxu0 %vm351_vm6, %v2122_v39 }
0x1068   :  { %14982 = vmatpush3.msra.mxu0 %v2344_v9 }
0x1069   :  { %14983 = vmatprep.subr.mxu0 %v2343_v10 }
0x106a   :  { %14984 = vmatpush3.msra.mxu0 %v2343_v10 }
0x106b   :  { %14985 = vmatprep.subr.mxu0 %v2342_v12 }
0x106c   :  { %14986 = vmatpush3.msra.mxu0 %v2342_v12 }
0x106d   :  { %14987 = vmatprep.subr.mxu0 %v2341_v14 }
0x106e   :  { %14988 = vmatpush3.msra.mxu0 %v2341_v14 }
0x1127   :  { %v2195_v40 = vpop.f32.mrf.mxu0 }
0x1128   :  { %14979 = vmatmul.mubr.msk.f32.vlgmr.msra.gmra.mxu1 %vm351_vm6, %v2195_v40 }
0x1129   :  { %v14975_v41 = vpop.f32.mrf.mxu0  ;;  %14993 = vmatpush3.msra.mxu1 %v2353_v16 }
0x112a   :  { %14994 = vmatprep.subr.mxu1 %v2352_v17 }
0x112b   :  { %14995 = vmatpush3.msra.mxu1 %v2352_v17 }
0x112c   :  { %14996 = vmatprep.subr.mxu1 %v2351_v18 }
0x112d   :  { %14997 = vmatpush3.msra.mxu1 %v2351_v18 }
0x11e8   :  { %v2268_v45 = vpop.f32.mrf.mxu1 }
0x11e9   :  { %v2272_v46 = vadd.f32 %v2268_v45, %v2031_v34  ;;  %v2347_v34 = vld [vmem:[%s16289_s24 + $0x8] sm:$0xff] }
0x11ea   :  { %v14980_v47 = vpop.f32.mrf.mxu1 }
0x11eb   :  { %v2280_v50 = vadd.f32 %v14144_v19, %v2272_v46  ;;  %v2350_v19 = vld [vmem:[%s16289_s24 + $0x20] sm:$0xff] }
0x11ec   :  { %14998 = vmatprep.subr.mxu1 %v2350_v19 }
0x11ed   :  { %v16690_v51 = vadd.f32 %v2280_v50, %v16443_v1  ;;  %14999 = vmatpush3.msra.mxu1 %v2350_v19 }
0x11ee   :  { %15000 = vmatprep.subr.mxu1 %v2349_v33 }
0x11ef   :  { %v2288_v54 = vsel %vm193_vm0, %v16690_v51, 0.0  ;;  %15001 = vmatpush3.msra.mxu1 %v2349_v33 }
0x11f0   :  { %2289 = vadd.xlane.f32.xlu1 %v2288_v54  ;;  %15002 = vmatprep.subr.mxu1 %v2348_v0 }
0x11f1   :  { %15003 = vmatpush3.msra.mxu1 %v2348_v0 }
0x11f2   :  { %15004 = vmatprep.subr.mxu1 %v2347_v34 }
0x11f3   :  { %15005 = vmatpush3.msra.mxu1 %v2347_v34 }
0x11f4   :  { %2298 = vadd.xlane.f32.xlu1 %v2297_v56  ;;  %15006 = vmatprep.subr.mxu1 %v2346_v35 }
0x11f5   :  { %15007 = vmatpush3.msra.mxu1 %v2346_v35 }
0x11f6   :  { %15027 = vmatprep.subr.mxu1 %v16210_v44 }
0x1279   :  { %v2290_v57 = vpop.xlane.xlu1 %2289 }
0x127a   :  { %v2292_v58 = vmul.f32 0.03125, %v2290_v57 }
0x127c   :  { %v2294_v20 = vsub.f32 %v16690_v51, %v2292_v58 }
0x127d   :  { %v2299_v59 = vpop.xlane.xlu1 %2298 }
0x127e   :  { %v2303_v60 = vmul.f32 0.032258064, %v2299_v59  ;;  %v2296_v61 = vmul.f32 %v2294_v20, %v2294_v20  ;;  %v2326_v29 = vmul.f32 %v14145_v49, %v2294_v20 }
0x1280   :  { %15876 = vrsqrt.f32 %v2303_v60  ;;  %v2300_v1 = vsel %vm193_vm0, %v2296_v61, 0.0  ;;  %vm2307_vm9 = vcmp.eq.f32.partialorder %v2303_v60, inf  ;;  %v2310_v2 = vand.u32 2147483648, %v2303_v60 }
0x1281   :  { %2301 = vadd.xlane.f32.xlu1 %v2300_v1  ;;  %vm2309_vm10 = vcmp.eq.f32.partialorder %v2303_v60, 0.0 }
0x128d   :  { %v15877_v62 = vpop.eup %15876 }
0x128e   :  { %v2306_v63 = vmul.f32 %v15877_v62, %v2303_v60 }
0x1290   :  { %v2308_v3 = vsel %vm2307_vm9, %v2303_v60, %v2306_v63  ;;  %v14160_v63 = vld [vmem:[%s16259_s25 + $0x38] sm:$0xff] }
0x1291   :  { %v2311_v4 = vsel %vm2309_vm10, %v2310_v2, %v2308_v3  ;;  %v14159_v2 = vld [vmem:[%s16259_s25 + $0x30] sm:$0xff]  ;;  %15011 = vmatprep.subr.mxu0 %v14160_v63  ;;  %v14158_v3 = vld [vmem:[%s16259_s25 + $0x28] sm:$0xff] }
0x1292   :  { %v2327_v5 = vadd.f32 1e-06, %v2311_v4  ;;  %v14157_v4 = vld [vmem:[%s16259_s25 + $0x20] sm:$0xff]  ;;  %s18158_s25 = sld [smem:[#allocation11_spill]] }
0x1294   :  { %15878 = vrcp.f32 %v2327_v5 }
0x12a1   :  { %v15879_v6 = vpop.eup %15878 }
0x12a2   :  { %v2331_v8 = vmul.f32 %v15879_v6, %v2325_v52 }
0x12a4   :  { %v2339_v11 = vadd.f32 %v14146_v7, %v2331_v8 }
0x12a6   :  { %14989 = vmatprep.mubr.msk.f32.mxu0 %vm193_vm0, %v2339_v11 }
0x130a   :  { %v2302_v21 = vpop.xlane.xlu1 %2301 }
0x130b   :  { %v2304_v22 = vmul.f32 0.032258064, %v2302_v21 }
0x130d   :  { %15880 = vrsqrt.f32 %v2304_v22  ;;  %vm2314_vm11 = vcmp.eq.f32.partialorder %v2304_v22, inf  ;;  %v2317_v25 = vand.u32 2147483648, %v2304_v22  ;;  %vm2316_vm12 = vcmp.eq.f32.partialorder %v2304_v22, 0.0 }
0x131a   :  { %v15881_v23 = vpop.eup %15880 }
0x131b   :  { %v2313_v24 = vmul.f32 %v15881_v23, %v2304_v22 }
0x131d   :  { %v2315_v26 = vsel %vm2314_vm11, %v2304_v22, %v2313_v24  ;;  %v14155_v22 = vld [vmem:[%s16299_s6 + $0x1] ss:$0 sm:$0xff]  ;;  %s18166_s6 = sld [smem:[#allocation31_spill]] }
0x131e   :  { %v2318_v27 = vsel %vm2316_vm12, %v2317_v25, %v2315_v26  ;;  %v14156_v25 = vld [vmem:[%s16304_s12 + $0x1] ss:$0 sm:$0xff]  ;;  %s18167_s12 = sld [smem:[#allocation27_spill]] }
0x131f   :  { %v2328_v28 = vadd.f32 1e-06, %v2318_v27 }
0x1321   :  { %15882 = vrcp.f32 %v2328_v28 }
0x132e   :  { %v15883_v30 = vpop.eup %15882 }
0x132f   :  { %v2332_v31 = vmul.f32 %v15883_v30, %v2326_v29 }
0x1331   :  { %v2340_v32 = vadd.f32 %v14146_v7, %v2332_v31 }
0x1333   :  { %14990 = vmatmul.mubr.msk.f32.vlgmr.msra.gmra.mxu0 %vm193_vm0, %v2340_v32  ;;  %v14162_v32 = vld [vmem:[%s16264_s29 + $0x1] ss:$0 sm:$0xff]  ;;  %s18159_s29 = sld [smem:[#allocation25_spill]] }
0x1334   :  { %15012 = vmatpush3.msra.mxu0 %v14160_v63 }
0x1335   :  { %15013 = vmatprep.subr.mxu0 %v14159_v2 }
0x1336   :  { %15014 = vmatpush3.msra.mxu0 %v14159_v2 }
0x1337   :  { %15015 = vmatprep.subr.mxu0 %v14158_v3 }
0x1338   :  { %15016 = vmatpush3.msra.mxu0 %v14158_v3 }
0x1339   :  { %15017 = vmatprep.subr.mxu0 %v14157_v4 }
0x133a   :  { %15018 = vmatpush3.msra.mxu0 %v14157_v4 }
0x133b   :  { %15022 = vmatprep.subr.mxu0 %v16210_v44 }
0x13f3   :  { %v14991_v37 = vpop.f32.mrf.mxu0 }
0x13f4   :  { %v2439_v38 = vadd.f32 %v14991_v37, %v14147_v36 }
0x13f5   :  { %v2433_v39 = vpop.f32.mrf.mxu0 }
0x13f6   :  { %v2434_v40 = vadd.f32 %v14147_v36, %v2433_v39  ;;  %v2443_v42 = vmax.f32 %v2439_v38, 0.0 }
0x13f8   :  { %v2442_v41 = vmax.f32 %v2434_v40, 0.0 }
0x13fa   :  { %15008 = vmatprep.mubr.msk.f32.mxu1 %vm2450_vm13, %v2442_v41 }
0x13fb   :  { %15009 = vmatmul.mubr.msk.f32.vlgmr.msra.gmra.mxu1 %vm2450_vm13, %v2443_v42 }
0x13fc   :  { %15029 = vmatprep.mubr.msk.f32.mxu1 %vm16211_vm5, %v16210_v44 }
0x14bb   :  { %v15010_v45 = vpop.f32.mrf.mxu1 }
0x14bc   :  { %v2529_v46 = vadd.f32 %v15010_v45, %v14150_v43 }
0x14bd   :  { %v2523_v47 = vpop.f32.mrf.mxu1 }
0x14be   :  { %v16721_v48 = vadd.f32 %v2529_v46, %v16690_v51  ;;  %v2524_v50 = vadd.f32 %v14150_v43, %v2523_v47 }
0x14c0   :  { %v16724_v54 = vadd.f32 %v2524_v50, %v16678_v13  ;;  %v2541_v55 = vsel %vm193_vm0, %v16721_v48, 0.0 }
0x14c1   :  { %2542 = vadd.xlane.f32.xlu0 %v2541_v55 }
0x14c2   :  { %v2538_v56 = vsel %vm193_vm0, %v16724_v54, 0.0 }
0x14c3   :  { %2539 = vadd.xlane.f32.xlu1 %v2538_v56 }
0x154a   :  { %v2543_v57 = vpop.xlane.xlu0 %2542 }
0x154b   :  { %v2545_v58 = vmul.f32 0.03125, %v2543_v57 }
0x154c   :  { %v2540_v20 = vpop.xlane.xlu1 %2539 }
0x154d   :  { %v2544_v51 = vmul.f32 0.03125, %v2540_v20  ;;  %v2547_v59 = vsub.f32 %v16721_v48, %v2545_v58 }
0x154f   :  { %v2546_v13 = vsub.f32 %v16724_v54, %v2544_v51  ;;  %v2549_v1 = vmul.f32 %v2547_v59, %v2547_v59  ;;  %v2579_v27 = vmul.f32 %v14155_v22, %v2547_v59 }
0x1551   :  { %v2548_v60 = vmul.f32 %v2546_v13, %v2546_v13  ;;  %v2553_v62 = vsel %vm193_vm0, %v2549_v1, 0.0  ;;  %v2578_v23 = vmul.f32 %v14155_v22, %v2546_v13 }
0x1553   :  { %v2550_v61 = vsel %vm193_vm0, %v2548_v60, 0.0 }
0x1554   :  { %2551 = vadd.xlane.f32.xlu1 %v2550_v61 }
0x1558   :  { %2554 = vadd.xlane.f32.xlu1 %v2553_v62 }
0x15dd   :  { %v2552_v5 = vpop.xlane.xlu1 %2551 }
0x15de   :  { %v2556_v49 = vmul.f32 0.032258064, %v2552_v5 }
0x15e0   :  { %15884 = vrsqrt.f32 %v2556_v49  ;;  %vm2560_vm14 = vcmp.eq.f32.partialorder %v2556_v49, inf  ;;  %v2563_v9 = vand.u32 2147483648, %v2556_v49  ;;  %vm2562_vm15 = vcmp.eq.f32.partialorder %v2556_v49, 0.0 }
0x15e1   :  { %v2555_v52 = vpop.xlane.xlu1 %2554 }
0x15e2   :  { %v2557_v6 = vmul.f32 0.032258064, %v2555_v52 }
0x15e4   :  { %15886 = vrsqrt.f32 %v2557_v6  ;;  %vm2567_vm1 = vcmp.eq.f32.partialorder %v2557_v6, inf  ;;  %v2570_v17 = vand.u32 2147483648, %v2557_v6  ;;  %vm2569_vm2 = vcmp.eq.f32.partialorder %v2557_v6, 0.0 }
0x15ed   :  { %v15885_v7 = vpop.eup %15884 }
0x15ee   :  { %v2559_v8 = vmul.f32 %v15885_v7, %v2556_v49  ;;  %v16796_v7 = vld [vmem:[%s16269_s3 + $0x28] sm:$0xff] }
0x15f0   :  { %v2561_v10 = vsel %vm2560_vm14, %v2556_v49, %v2559_v8 }
0x15f1   :  { %v15887_v11 = vpop.eup %15886  ;;  %v2564_v12 = vsel %vm2562_vm15, %v2563_v9, %v2561_v10 }
0x15f2   :  { %v2580_v14 = vadd.f32 1e-06, %v2564_v12  ;;  %v2566_v16 = vmul.f32 %v15887_v11, %v2557_v6 }
0x15f4   :  { %15888 = vrcp.f32 %v2580_v14  ;;  %v2568_v18 = vsel %vm2567_vm1, %v2557_v6, %v2566_v16  ;;  %v16792_v6 = vld [vmem:[%s16269_s3 + $0x20] sm:$0xff] }
0x15f5   :  { %v2571_v19 = vsel %vm2569_vm2, %v2570_v17, %v2568_v18 }
0x15f6   :  { %v2581_v21 = vadd.f32 1e-06, %v2571_v19 }
0x15f8   :  { %15890 = vrcp.f32 %v2581_v21 }
0x1601   :  { %v15889_v24 = vpop.eup %15888 }
0x1602   :  { %v2584_v26 = vmul.f32 %v15889_v24, %v2578_v23 }
0x1604   :  { %v2592_v28 = vadd.f32 %v14156_v25, %v2584_v26 }
0x1605   :  { %v15891_v29 = vpop.eup %15890 }
0x1606   :  { %v2585_v30 = vmul.f32 %v15891_v29, %v2579_v27  ;;  %15019 = vmatprep.mubr.msk.f32.mxu0 %vm193_vm0, %v2592_v28 }
0x1608   :  { %v2593_v31 = vadd.f32 %v14156_v25, %v2585_v30 }
0x160a   :  { %15020 = vmatmul.mubr.msk.f32.vlgmr.msra.gmra.mxu0 %vm193_vm0, %v2593_v31 }
0x160b   :  { %15024 = vmatprep.mubr.msk.f32.mxu0 %vm16211_vm5, %v16210_v44 }
0x16ca   :  { %v15021_v33 = vpop.f32.mrf.mxu0 }
0x16cb   :  { %v16746_v0 = vadd.f32 %v15021_v33, %v14162_v32 }
0x16cc   :  { %v2679_v34 = vpop.f32.mrf.mxu0 }
0x16cd   :  { %v16748_v35 = vadd.f32 %v14162_v32, %v2679_v34 }
0x16cf   :  { %2861 = vrot.lane.b32.xlu0 %v16748_v35, %s16214_s9  ;;  %2696 = vrot.lane.b32.xlu1 %v16748_v35, %s16213_s5 }
0x16d3   :  { %2863 = vrot.lane.b32.xlu1 %v16748_v35, %s16212_s0 }
0x1741   :  { %v2697_v36 = vpop.permute.xlu1 %2696  ;;  %v2862_v38 = vpop.permute.xlu0 %2861 }
0x1742   :  { %15023 = vmatpush3.xpose.msk.msra.mxu0 %vm351_vm6, %v2697_v36 }
0x1743   :  { %15032 = vmatprep.subr.mxu0 %v16210_v44 }
0x1745   :  { %15025 = vmatmul.mubr.msk.f32.vlgmr.msra.gmra.mxu0 %vm351_vm6, %v16748_v35  ;;  %v2864_v37 = vpop.permute.xlu1 %2863 }
0x1746   :  { %15033 = vmatpush3.xpose.msk.msra.mxu0 %vm351_vm6, %v2864_v37  ;;  %15034 = vmatprep.mubr.msk.f32.mxu0 %vm16211_vm5, %v16210_v44 }
0x1747   :  { %15042 = vmatprep.subr.mxu0 %v16210_v44 }
0x1749   :  { %15035 = vmatmul.mubr.msk.f32.vlgmr.msra.gmra.mxu0 %vm351_vm6, %v2862_v38 }
0x174a   :  { %15044 = vmatprep.mubr.msk.f32.mxu0 %vm16211_vm5, %v16210_v44  ;;  %15043 = vmatpush3.msra.mxu0 %v16796_v7 }
0x174b   :  { %15052 = vmatprep.subr.mxu0 %v16210_v44 }
0x1805   :  { %v2768_v39 = vpop.f32.mrf.mxu0 }
0x1806   :  { %v2772_v40 = vmul.f32 0.35355338, %v2768_v39  ;;  %v16832_v39 = vld [vmem:[%s16269_s3 + $0x30] sm:$0xff] }
0x1807   :  { %v15026_v41 = vpop.f32.mrf.mxu0 }
0x1808   :  { %v2773_v42 = vsel %vm427_vm7, -1e+09, %v2772_v40 }
0x1809   :  { %v2935_v43 = vpop.f32.mrf.mxu0  ;;  %v2774_v45 = vsel %vm351_vm6, %v2773_v42, -inf }
0x180a   :  { %v2939_v46 = vmul.f32 0.35355338, %v2935_v43  ;;  %2775 = vmax.xlane.f32.xlu1 %v2774_v45 }
0x180b   :  { %v15036_v47 = vpop.f32.mrf.mxu0 }
0x180c   :  { %v2940_v50 = vsel %vm427_vm7, -1e+09, %v2939_v46 }
0x180d   :  { %v2941_v55 = vsel %vm351_vm6, %v2940_v50, -inf }
0x180e   :  { %2942 = vmax.xlane.f32.xlu0 %v2941_v55 }
0x1824   :  { %2952 = vrot.lane.b32.xlu0 %v16748_v35, %s16218_s23 }
0x1893   :  { %v2776_v56 = vpop.xlane.xlu1 %2775 }
0x1894   :  { %v2777_v57 = vsub.f32 %v2773_v42, %v2776_v56 }
0x1896   :  { %v2778_v58 = vmul.f32 1.442695, %v2777_v57 }
0x1897   :  { %v2943_v20 = vpop.xlane.xlu0 %2942 }
0x1898   :  { %15892 = vpow2.f32 %v2778_v58  ;;  %v2944_v51 = vsub.f32 %v2940_v50, %v2943_v20 }
0x189a   :  { %v2945_v59 = vmul.f32 1.442695, %v2944_v51 }
0x189b   :  { %v2953_v5 = vpop.permute.xlu0 %2952 }
0x189c   :  { %15894 = vpow2.f32 %v2945_v59 }
0x18a5   :  { %v15893_v13 = vpop.eup %15892 }
0x18a6   :  { %v2780_v60 = vsel %vm351_vm6, %v15893_v13, 0.0 }
0x18a7   :  { %2781 = vadd.xlane.f32.xlu1 %v2780_v60 }
0x18a9   :  { %v15895_v61 = vpop.eup %15894 }
0x18aa   :  { %v2947_v1 = vsel %vm351_vm6, %v15895_v61, 0.0 }
0x18ab   :  { %2948 = vadd.xlane.f32.xlu1 %v2947_v1 }
0x18bc   :  { %2785 = vrot.lane.b32.xlu1 %v16748_v35, %s16215_s16 }
0x18c0   :  { %3176 = vrot.lane.b32.xlu1 %v16748_v35, %s16216_s18 }
0x18c4   :  { %3174 = vrot.lane.b32.xlu1 %v16748_v35, %s16217_s22 }
0x1930   :  { %v2782_v62 = vpop.xlane.xlu1 %2781 }
0x1931   :  { %15896 = vrcp.f32 %v2782_v62 }
0x1934   :  { %v2949_v63 = vpop.xlane.xlu1 %2948 }
0x1935   :  { %15898 = vrcp.f32 %v2949_v63  ;;  %v16869_v63 = vld [vmem:[%s16269_s3 + $0x38] sm:$0xff]  ;;  %s18160_s3 = sld [smem:[#allocation26_spill]] }
0x1938   :  { %v2786_v2 = vpop.permute.xlu1 %2785 }
0x1939   :  { %15028 = vmatpush3.msra.mxu1 %v2786_v2 }
0x193a   :  { %15037 = vmatprep.subr.mxu1 %v16210_v44 }
0x193c   :  { %v3177_v9 = vpop.permute.xlu1 %3176 }
0x193e   :  { %v15897_v3 = vpop.eup %15896 }
0x193f   :  { %v2784_v4 = vmul.f32 %v15897_v3, %v15893_v13 }
0x1940   :  { %v3175_v14 = vpop.permute.xlu1 %3174 }
0x1941   :  { %15030 = vmatmul.mubr.msk.f32.vlgmr.msra.gmra.mxu1 %vm351_vm6, %v2784_v4 }
0x1942   :  { %v15899_v49 = vpop.eup %15898  ;;  %15038 = vmatpush3.msra.mxu1 %v2953_v5  ;;  %15039 = vmatprep.mubr.msk.f32.mxu1 %vm16211_vm5, %v16210_v44 }
0x1943   :  { %v2951_v52 = vmul.f32 %v15899_v49, %v15895_v61  ;;  %15047 = vmatprep.subr.mxu1 %v16210_v44 }
0x1945   :  { %15040 = vmatmul.mubr.msk.f32.vlgmr.msra.gmra.mxu1 %vm351_vm6, %v2951_v52 }
0x1946   :  { %15049 = vmatprep.mubr.msk.f32.mxu1 %vm16211_vm5, %v16210_v44  ;;  %15048 = vmatpush3.msra.mxu1 %v16792_v6 }
0x1947   :  { %15057 = vmatprep.subr.mxu1 %v16210_v44 }
0x1a01   :  { %v2857_v8 = vpop.f32.mrf.mxu1 }
0x1a02   :  { %15050 = vmatmul.mubr.msk.f32.vlgmr.msra.gmra.mxu1 %vm351_vm6, %v2857_v8 }
0x1a03   :  { %v15031_v10 = vpop.f32.mrf.mxu1  ;;  %15059 = vmatprep.mubr.msk.f32.mxu1 %vm16211_vm5, %v16210_v44 }
0x1a05   :  { %v3024_v11 = vpop.f32.mrf.mxu1 }
0x1a06   :  { %15045 = vmatmul.mubr.msk.f32.vlgmr.msra.gmra.mxu0 %vm351_vm6, %v3024_v11 }
0x1a07   :  { %15053 = vmatpush3.xpose.msk.msra.mxu0 %vm351_vm6, %v3177_v9  ;;  %v15041_v12 = vpop.f32.mrf.mxu1  ;;  %15054 = vmatprep.mubr.msk.f32.mxu0 %vm16211_vm5, %v16210_v44 }
0x1a08   :  { %15062 = vmatprep.subr.mxu0 %v16210_v44 }
0x1a0a   :  { %15055 = vmatmul.mubr.msk.f32.vlgmr.msra.gmra.mxu0 %vm351_vm6, %v3175_v14 }
0x1a0b   :  { %15064 = vmatprep.mubr.msk.f32.mxu0 %vm16211_vm5, %v16210_v44  ;;  %15063 = vmatpush3.msra.mxu0 %v16832_v39 }
0x1a0c   :  { %15072 = vmatprep.subr.mxu0 %v16210_v44 }
0x1ac2   :  { %v3170_v16 = vpop.f32.mrf.mxu1 }
0x1ac4   :  { %v15051_v17 = vpop.f32.mrf.mxu1 }
0x1ac6   :  { %v3097_v18 = vpop.f32.mrf.mxu0 }
0x1ac7   :  { %v3171_v19 = vadd.f32 %v3170_v16, %v3097_v18 }
0x1ac8   :  { %v15046_v21 = vpop.f32.mrf.mxu0 }
0x1aca   :  { %v3248_v22 = vpop.f32.mrf.mxu0 }
0x1acb   :  { %v3252_v23 = vmul.f32 0.35355338, %v3248_v22 }
0x1acc   :  { %v15056_v24 = vpop.f32.mrf.mxu0 }
0x1acd   :  { %v3253_v25 = vsel %vm427_vm7, -1e+09, %v3252_v23 }
0x1ace   :  { %v3254_v26 = vsel %vm351_vm6, %v3253_v25, -inf }
0x1acf   :  { %3255 = vmax.xlane.f32.xlu1 %v3254_v26 }
0x1ae0   :  { %3265 = vrot.lane.b32.xlu1 %v16748_v35, %s16221_s28 }
0x1ae4   :  { %3415 = vrot.lane.b32.xlu1 %v16748_v35, %s16220_s1 }
0x1b58   :  { %v3256_v27 = vpop.xlane.xlu1 %3255 }
0x1b59   :  { %v3257_v28 = vsub.f32 %v3253_v25, %v3256_v27 }
0x1b5b   :  { %v3258_v29 = vmul.f32 1.442695, %v3257_v28 }
0x1b5c   :  { %v3266_v30 = vpop.permute.xlu1 %3265 }
0x1b5d   :  { %15900 = vpow2.f32 %v3258_v29  ;;  %15058 = vmatpush3.msra.mxu1 %v3266_v30 }
0x1b5e   :  { %15067 = vmatprep.subr.mxu1 %v16210_v44 }
0x1b60   :  { %v3416_v38 = vpop.permute.xlu1 %3415 }
0x1b6a   :  { %v15901_v31 = vpop.eup %15900 }
0x1b6b   :  { %v3260_v32 = vsel %vm351_vm6, %v15901_v31, 0.0 }
0x1b6c   :  { %3261 = vadd.xlane.f32.xlu0 %v3260_v32 }
0x1b82   :  { %3417 = vrot.lane.b32.xlu0 %v16748_v35, %s18131_s26 }
0x1bf5   :  { %v3262_v33 = vpop.xlane.xlu0 %3261 }
0x1bf6   :  { %15902 = vrcp.f32 %v3262_v33 }
0x1bf9   :  { %v3418_v37 = vpop.permute.xlu0 %3417 }
0x1c03   :  { %v15903_v34 = vpop.eup %15902 }
0x1c04   :  { %v3264_v36 = vmul.f32 %v15903_v34, %v15901_v31 }
0x1c06   :  { %15060 = vmatmul.mubr.msk.f32.vlgmr.msra.gmra.mxu1 %vm351_vm6, %v3264_v36 }
0x1c07   :  { %15068 = vmatpush3.xpose.msk.msra.mxu1 %vm351_vm6, %v3418_v37  ;;  %15069 = vmatprep.mubr.msk.f32.mxu1 %vm16211_vm5, %v16210_v44 }
0x1c08   :  { %15077 = vmatprep.subr.mxu1 %v16210_v44 }
0x1c0a   :  { %15070 = vmatmul.mubr.msk.f32.vlgmr.msra.gmra.mxu1 %vm351_vm6, %v3416_v38 }
0x1c0b   :  { %15079 = vmatprep.mubr.msk.f32.mxu1 %vm16211_vm5, %v16210_v44  ;;  %15078 = vmatpush3.msra.mxu1 %v16869_v63 }
0x1c0c   :  { %15087 = vmatprep.subr.mxu1 %v16210_v44 }
0x1cc6   :  { %v3337_v40 = vpop.f32.mrf.mxu1 }
0x1cc7   :  { %15065 = vmatmul.mubr.msk.f32.vlgmr.msra.gmra.mxu0 %vm351_vm6, %v3337_v40 }
0x1cc8   :  { %v15061_v41 = vpop.f32.mrf.mxu1  ;;  %15074 = vmatprep.mubr.msk.f32.mxu0 %vm16211_vm5, %v16210_v44 }
0x1cca   :  { %v3489_v42 = vpop.f32.mrf.mxu1 }
0x1ccb   :  { %v3493_v43 = vmul.f32 0.35355338, %v3489_v42 }
0x1ccc   :  { %v15071_v45 = vpop.f32.mrf.mxu1 }
0x1ccd   :  { %v3494_v46 = vsel %vm427_vm7, -1e+09, %v3493_v43 }
0x1cce   :  { %v3495_v47 = vsel %vm351_vm6, %v3494_v46, -inf }
0x1ccf   :  { %3496 = vmax.xlane.f32.xlu1 %v3495_v47 }
0x1ce0   :  { %3657 = vrot.lane.b32.xlu1 %v16746_v0, %s16213_s5 }
0x1ce4   :  { %3824 = vrot.lane.b32.xlu1 %v16746_v0, %s16212_s0 }
0x1d58   :  { %v3497_v50 = vpop.xlane.xlu1 %3496 }
0x1d59   :  { %v3498_v55 = vsub.f32 %v3494_v46, %v3497_v50 }
0x1d5b   :  { %v3499_v56 = vmul.f32 1.442695, %v3498_v55 }
0x1d5c   :  { %v3658_v61 = vpop.permute.xlu1 %3657 }
0x1d5d   :  { %15904 = vpow2.f32 %v3499_v56 }
0x1d6a   :  { %v15905_v57 = vpop.eup %15904 }
0x1d6b   :  { %v3501_v58 = vsel %vm351_vm6, %v15905_v57, 0.0 }
0x1d6c   :  { %3502 = vadd.xlane.f32.xlu0 %v3501_v58 }
0x1d82   :  { %3506 = vrot.lane.b32.xlu0 %v16748_v35, %s18129_s2  ;;  %v3825_v35 = vpop.permute.xlu1 %3824 }
0x1d86   :  { %3822 = vrot.lane.b32.xlu0 %v16746_v0, %s16214_s9 }
0x1d87   :  { %v3410_v53 = vpop.f32.mrf.mxu0 }
0x1d88   :  { %v3414_v20 = vadd.f32 %v3410_v53, %v3171_v19 }
0x1d89   :  { %v15066_v51 = vpop.f32.mrf.mxu0 }
0x1df5   :  { %v3503_v59 = vpop.xlane.xlu0 %3502 }
0x1df6   :  { %15906 = vrcp.f32 %v3503_v59 }
0x1df9   :  { %v3507_v13 = vpop.permute.xlu0 %3506 }
0x1dfa   :  { %15073 = vmatpush3.msra.mxu0 %v3507_v13 }
0x1dfb   :  { %15082 = vmatprep.subr.mxu0 %v16210_v44 }
0x1dfd   :  { %v3823_v62 = vpop.permute.xlu0 %3822 }
0x1e03   :  { %v15907_v60 = vpop.eup %15906 }
0x1e04   :  { %v3505_v1 = vmul.f32 %v15907_v60, %v15905_v57 }
0x1e06   :  { %15075 = vmatmul.mubr.msk.f32.vlgmr.msra.gmra.mxu0 %vm351_vm6, %v3505_v1 }
0x1e07   :  { %15083 = vmatpush3.xpose.msk.msra.mxu0 %vm351_vm6, %v3658_v61  ;;  %15084 = vmatprep.mubr.msk.f32.mxu0 %vm16211_vm5, %v16210_v44 }
0x1e08   :  { %15092 = vmatprep.subr.mxu0 %v16210_v44 }
0x1e0a   :  { %15085 = vmatmul.mubr.msk.f32.vlgmr.msra.gmra.mxu0 %vm351_vm6, %v16746_v0 }
0x1e0b   :  { %15093 = vmatpush3.xpose.msk.msra.mxu0 %vm351_vm6, %v3825_v35  ;;  %15094 = vmatprep.mubr.msk.f32.mxu0 %vm16211_vm5, %v16210_v44 }
0x1e0c   :  { %15102 = vmatprep.subr.mxu0 %v16210_v44 }
0x1e0e   :  { %15095 = vmatmul.mubr.msk.f32.vlgmr.msra.gmra.mxu0 %vm351_vm6, %v3823_v62 }
0x1e0f   :  { %15103 = vmatpush3.msra.mxu0 %v16796_v7  ;;  %15104 = vmatprep.mubr.msk.f32.mxu0 %vm16211_vm5, %v16210_v44 }
0x1e10   :  { %15112 = vmatprep.subr.mxu0 %v16210_v44 }
0x1ec6   :  { %v3578_v2 = vpop.f32.mrf.mxu0 }
0x1ec7   :  { %15080 = vmatmul.mubr.msk.f32.vlgmr.msra.gmra.mxu1 %vm351_vm6, %v3578_v2 }
0x1ec8   :  { %v15076_v3 = vpop.f32.mrf.mxu0  ;;  %15089 = vmatprep.mubr.msk.f32.mxu1 %vm16211_vm5, %v16210_v44 }
0x1eca   :  { %v3729_v4 = vpop.f32.mrf.mxu0 }
0x1ecb   :  { %v3733_v5 = vmul.f32 0.35355338, %v3729_v4 }
0x1ecc   :  { %v15086_v49 = vpop.f32.mrf.mxu0 }
0x1ecd   :  { %v3734_v52 = vsel %vm1389_vm8, -1e+09, %v3733_v5 }
0x1ece   :  { %v3896_v7 = vpop.f32.mrf.mxu0  ;;  %v3735_v8 = vsel %vm351_vm6, %v3734_v52, -inf }
0x1ecf   :  { %v3900_v9 = vmul.f32 0.35355338, %v3896_v7  ;;  %3736 = vmax.xlane.f32.xlu1 %v3735_v8 }
0x1ed0   :  { %v15096_v10 = vpop.f32.mrf.mxu0 }
0x1ed1   :  { %v3901_v11 = vsel %vm1389_vm8, -1e+09, %v3900_v9 }
0x1ed2   :  { %v3902_v12 = vsel %vm351_vm6, %v3901_v11, -inf }
0x1ed3   :  { %3903 = vmax.xlane.f32.xlu0 %v3902_v12 }
0x1f58   :  { %v3737_v14 = vpop.xlane.xlu1 %3736 }
0x1f59   :  { %v3738_v16 = vsub.f32 %v3734_v52, %v3737_v14  ;;  %v14202_v14 = vld [vmem:[%s16274_s8 + $0x1] ss:$0 sm:$0xff]  ;;  %s18161_s8 = sld [smem:[#allocation12_spill]] }
0x1f5b   :  { %v3739_v17 = vmul.f32 1.442695, %v3738_v16 }
0x1f5c   :  { %v3904_v18 = vpop.xlane.xlu0 %3903 }
0x1f5d   :  { %15908 = vpow2.f32 %v3739_v17  ;;  %v3905_v19 = vsub.f32 %v3901_v11, %v3904_v18 }
0x1f5f   :  { %v3906_v21 = vmul.f32 1.442695, %v3905_v19 }
0x1f61   :  { %15910 = vpow2.f32 %v3906_v21 }
0x1f6a   :  { %v15909_v22 = vpop.eup %15908 }
0x1f6b   :  { %v3741_v23 = vsel %vm351_vm6, %v15909_v22, 0.0 }
0x1f6c   :  { %3742 = vadd.xlane.f32.xlu0 %v3741_v23 }
0x1f6e   :  { %v15911_v24 = vpop.eup %15910 }
0x1f6f   :  { %v3908_v25 = vsel %vm351_vm6, %v15911_v24, 0.0 }
0x1f70   :  { %3909 = vadd.xlane.f32.xlu1 %v3908_v25 }
0x1f81   :  { %3913 = vrot.lane.b32.xlu1 %v16746_v0, %s16218_s23 }
0x1f82   :  { %3746 = vrot.lane.b32.xlu0 %v16746_v0, %s16215_s16 }
0x1f85   :  { %4137 = vrot.lane.b32.xlu1 %v16746_v0, %s16216_s18 }
0x1f86   :  { %4135 = vrot.lane.b32.xlu0 %v16746_v0, %s16217_s22 }
0x1f87   :  { %v3651_v26 = vpop.f32.mrf.mxu1 }
0x1f88   :  { %v16892_v27 = vadd.f32 %v3651_v26, %v3414_v20 }
0x1f89   :  { %v15081_v28 = vpop.f32.mrf.mxu1 }
0x1f8a   :  { %v4623_v16 = vadd.f32 %v14202_v14, %v16892_v27 }
0x1f8c   :  { %v16948_v18 = vadd.f32 %v4623_v16, %v16724_v54  ;;  %v14218_v16 = vld [vmem:[%s16289_s24 + $0x70] sm:$0xff] }
0x1f8e   :  { %v4631_v19 = vsel %vm193_vm0, %v16948_v18, 0.0 }
0x1ff5   :  { %v3743_v29 = vpop.xlane.xlu0 %3742 }
0x1ff6   :  { %15912 = vrcp.f32 %v3743_v29 }
0x1ff9   :  { %v3910_v30 = vpop.xlane.xlu1 %3909  ;;  %v3747_v31 = vpop.permute.xlu0 %3746 }
0x1ffa   :  { %15914 = vrcp.f32 %v3910_v30  ;;  %15088 = vmatpush3.msra.mxu1 %v3747_v31 }
0x1ffb   :  { %15097 = vmatprep.subr.mxu1 %v16210_v44 }
0x1ffd   :  { %v3914_v34 = vpop.permute.xlu1 %3913 }
0x2001   :  { %v4138_v42 = vpop.permute.xlu1 %4137 }
0x2003   :  { %v15913_v32 = vpop.eup %15912 }
0x2004   :  { %v3745_v33 = vmul.f32 %v15913_v32, %v15909_v22 }
0x2006   :  { %15090 = vmatmul.mubr.msk.f32.vlgmr.msra.gmra.mxu1 %vm351_vm6, %v3745_v33 }
0x2007   :  { %v15915_v36 = vpop.eup %15914  ;;  %15098 = vmatpush3.msra.mxu1 %v3914_v34  ;;  %15099 = vmatprep.mubr.msk.f32.mxu1 %vm16211_vm5, %v16210_v44 }
0x2008   :  { %v3912_v37 = vmul.f32 %v15915_v36, %v15911_v24  ;;  %15107 = vmatprep.subr.mxu1 %v16210_v44 }
0x200a   :  { %15100 = vmatmul.mubr.msk.f32.vlgmr.msra.gmra.mxu1 %vm351_vm6, %v3912_v37 }
0x200b   :  { %15108 = vmatpush3.msra.mxu1 %v16792_v6  ;;  %15109 = vmatprep.mubr.msk.f32.mxu1 %vm16211_vm5, %v16210_v44  ;;  %v4136_v6 = vpop.permute.xlu0 %4135 }
0x200c   :  { %15117 = vmatprep.subr.mxu1 %v16210_v44 }
0x20c6   :  { %v3818_v38 = vpop.f32.mrf.mxu1 }
0x20c7   :  { %15110 = vmatmul.mubr.msk.f32.vlgmr.msra.gmra.mxu1 %vm351_vm6, %v3818_v38 }
0x20c8   :  { %v15091_v40 = vpop.f32.mrf.mxu1  ;;  %15119 = vmatprep.mubr.msk.f32.mxu1 %vm16211_vm5, %v16210_v44 }
0x20c9   :  { %v16957_v40 = vld [vmem:[%s16309_s20 + $0x1] ss:$0 sm:$0xff]  ;;  %s18168_s20 = sld [smem:[#allocation15_spill]] }
0x20ca   :  { %v3985_v41 = vpop.f32.mrf.mxu1 }
0x20cb   :  { %15105 = vmatmul.mubr.msk.f32.vlgmr.msra.gmra.mxu0 %vm351_vm6, %v3985_v41 }
0x20cc   :  { %15113 = vmatpush3.xpose.msk.msra.mxu0 %vm351_vm6, %v4138_v42  ;;  %v15101_v43 = vpop.f32.mrf.mxu1  ;;  %15114 = vmatprep.mubr.msk.f32.mxu0 %vm16211_vm5, %v16210_v44 }
0x20cd   :  { %15122 = vmatprep.subr.mxu0 %v16210_v44  ;;  %v16961_v43 = vld [vmem:[%s16314_s27 + $0x1] ss:$0 sm:$0xff]  ;;  %s18169_s27 = sld [smem:[#allocation28_spill]] }
0x20cf   :  { %15115 = vmatmul.mubr.msk.f32.vlgmr.msra.gmra.mxu0 %vm351_vm6, %v4136_v6 }
0x20d0   :  { %15123 = vmatpush3.msra.mxu0 %v16832_v39  ;;  %15124 = vmatprep.mubr.msk.f32.mxu0 %vm16211_vm5, %v16210_v44 }
0x20d1   :  { %15132 = vmatprep.subr.mxu0 %v16210_v44 }
0x2187   :  { %v4131_v45 = vpop.f32.mrf.mxu1 }
0x2189   :  { %v15111_v46 = vpop.f32.mrf.mxu1 }
0x218b   :  { %v4058_v47 = vpop.f32.mrf.mxu0 }
0x218c   :  { %v4132_v50 = vadd.f32 %v4131_v45, %v4058_v47 }
0x218d   :  { %v15106_v55 = vpop.f32.mrf.mxu0 }
0x218f   :  { %v4209_v56 = vpop.f32.mrf.mxu0 }
0x2190   :  { %v4213_v57 = vmul.f32 0.35355338, %v4209_v56 }
0x2191   :  { %v15116_v58 = vpop.f32.mrf.mxu0 }
0x2192   :  { %v4214_v53 = vsel %vm1389_vm8, -1e+09, %v4213_v57 }
0x2193   :  { %v4215_v20 = vsel %vm351_vm6, %v4214_v53, -inf }
0x2194   :  { %4216 = vmax.xlane.f32.xlu1 %v4215_v20 }
0x21a5   :  { %4378 = vrot.lane.b32.xlu1 %v16746_v0, %s18131_s26 }
0x21a9   :  { %4376 = vrot.lane.b32.xlu1 %v16746_v0, %s16220_s1 }
0x221d   :  { %v4217_v39 = vpop.xlane.xlu1 %4216 }
0x221e   :  { %v4218_v51 = vsub.f32 %v4214_v53, %v4217_v39  ;;  %v16970_v53 = vld [vmem:[%s18157_s13] sm:$0xff] }
0x221f   :  { %v4945_v39 = vsel %vm193_vm0, %v16970_v53, 0.0 }
0x2220   :  { %v4219_v59 = vmul.f32 1.442695, %v4218_v51  ;;  %v16977_v51 = vld [vmem:[%s18157_s13 + $0x8] sm:$0xff]  ;;  %s18175_s13 = sld [smem:[#allocation29_spill]] }
0x2221   :  { %v4379_v62 = vpop.permute.xlu1 %4378 }
0x2222   :  { %15916 = vpow2.f32 %v4219_v59  ;;  %v4948_v59 = vsel %vm193_vm0, %v16977_v51, 0.0 }
0x2225   :  { %v4377_v3 = vpop.permute.xlu1 %4376 }
0x222f   :  { %v15917_v13 = vpop.eup %15916 }
0x2230   :  { %v4221_v60 = vsel %vm351_vm6, %v15917_v13, 0.0 }
0x2231   :  { %4222 = vadd.xlane.f32.xlu0 %v4221_v60 }
0x2247   :  { %4226 = vrot.lane.b32.xlu0 %v16746_v0, %s16221_s28 }
0x22ba   :  { %v4223_v61 = vpop.xlane.xlu0 %4222 }
0x22bb   :  { %15918 = vrcp.f32 %v4223_v61 }
0x22be   :  { %v4227_v1 = vpop.permute.xlu0 %4226 }
0x22bf   :  { %15118 = vmatpush3.msra.mxu1 %v4227_v1 }
0x22c0   :  { %15127 = vmatprep.subr.mxu1 %v16210_v44 }
0x22c8   :  { %v15919_v35 = vpop.eup %15918 }
0x22c9   :  { %v4225_v2 = vmul.f32 %v15919_v35, %v15917_v13 }
0x22cb   :  { %15120 = vmatmul.mubr.msk.f32.vlgmr.msra.gmra.mxu1 %vm351_vm6, %v4225_v2 }
0x22cc   :  { %15128 = vmatpush3.xpose.msk.msra.mxu1 %vm351_vm6, %v4379_v62  ;;  %15129 = vmatprep.mubr.msk.f32.mxu1 %vm16211_vm5, %v16210_v44 }
0x22cd   :  { %15137 = vmatprep.subr.mxu1 %v16210_v44 }
0x22cf   :  { %15130 = vmatmul.mubr.msk.f32.vlgmr.msra.gmra.mxu1 %vm351_vm6, %v4377_v3 }
0x22d0   :  { %15138 = vmatpush3.msra.mxu1 %v16869_v63  ;;  %15139 = vmatprep.mubr.msk.f32.mxu1 %vm16211_vm5, %v16210_v44 }
0x238b   :  { %v4298_v4 = vpop.f32.mrf.mxu1 }
0x238c   :  { %15125 = vmatmul.mubr.msk.f32.vlgmr.msra.gmra.mxu0 %vm351_vm6, %v4298_v4 }
0x238d   :  { %v15121_v5 = vpop.f32.mrf.mxu1  ;;  %15134 = vmatprep.mubr.msk.f32.mxu0 %vm16211_vm5, %v16210_v44 }
0x238f   :  { %v4450_v49 = vpop.f32.mrf.mxu1 }
0x2390   :  { %v4454_v52 = vmul.f32 0.35355338, %v4450_v49 }
0x2391   :  { %v15131_v7 = vpop.f32.mrf.mxu1 }
0x2392   :  { %v4455_v8 = vsel %vm1389_vm8, -1e+09, %v4454_v52 }
0x2393   :  { %v4456_v9 = vsel %vm351_vm6, %v4455_v8, -inf }
0x2394   :  { %4457 = vmax.xlane.f32.xlu0 %v4456_v9  ;;  %v14210_v9 = vld [vmem:[%s16279_s14 + $0x38] sm:$0xff] }
0x23aa   :  { %4467 = vrot.lane.b32.xlu0 %v16746_v0, %s18129_s2 }
0x241d   :  { %v4458_v63 = vpop.xlane.xlu0 %4457 }
0x241e   :  { %v4459_v10 = vsub.f32 %v4455_v8, %v4458_v63  ;;  %v14209_v63 = vld [vmem:[%s16279_s14 + $0x30] sm:$0xff] }
0x2420   :  { %v4460_v11 = vmul.f32 1.442695, %v4459_v10  ;;  %v14208_v10 = vld [vmem:[%s16279_s14 + $0x28] sm:$0xff] }
0x2421   :  { %v4468_v12 = vpop.permute.xlu0 %4467 }
0x2422   :  { %15920 = vpow2.f32 %v4460_v11  ;;  %15133 = vmatpush3.msra.mxu0 %v4468_v12  ;;  %v14207_v11 = vld [vmem:[%s16279_s14 + $0x20] sm:$0xff]  ;;  %v5004_v12 = vld [vmem:[%s18158_s25 + $0x18] sm:$0xff]  ;;  %s18162_s14 = sld [smem:[#allocation9_spill]] }
0x2423   :  { %15142 = vmatprep.subr.mxu0 %v14210_v9 }
0x242f   :  { %v15921_v17 = vpop.eup %15920 }
0x2430   :  { %v4462_v15 = vsel %vm351_vm6, %v15921_v17, 0.0 }
0x2431   :  { %4463 = vadd.xlane.f32.xlu1 %v4462_v15  ;;  %v14216_v15 = vld [vmem:[%s16289_s24 + $0x60] sm:$0xff] }
0x2435   :  { %4632 = vadd.xlane.f32.xlu1 %v4631_v19 }
0x244c   :  { %v4371_v0 = vpop.f32.mrf.mxu0 }
0x244d   :  { %v4375_v21 = vadd.f32 %v4371_v0, %v4132_v50 }
0x244e   :  { %v15126_v22 = vpop.f32.mrf.mxu0 }
0x24ba   :  { %v4464_v23 = vpop.xlane.xlu1 %4463 }
0x24bb   :  { %15922 = vrcp.f32 %v4464_v23 }
0x24be   :  { %v4633_v24 = vpop.xlane.xlu1 %4632 }
0x24bf   :  { %v4637_v25 = vmul.f32 0.03125, %v4633_v24 }
0x24c1   :  { %v4639_v26 = vsub.f32 %v16948_v18, %v4637_v25 }
0x24c3   :  { %v4641_v27 = vmul.f32 %v4639_v26, %v4639_v26  ;;  %v4671_v41 = vmul.f32 %v16957_v40, %v4639_v26 }
0x24c5   :  { %v4643_v54 = vsel %vm193_vm0, %v4641_v27, 0.0 }
0x24c6   :  { %4644 = vadd.xlane.f32.xlu0 %v4643_v54 }
0x24c8   :  { %v15923_v28 = vpop.eup %15922 }
0x24c9   :  { %v4466_v29 = vmul.f32 %v15923_v28, %v15921_v17  ;;  %v14217_v17 = vld [vmem:[%s16289_s24 + $0x68] sm:$0xff] }
0x24cb   :  { %15135 = vmatmul.mubr.msk.f32.vlgmr.msra.gmra.mxu0 %vm351_vm6, %v4466_v29 }
0x24cc   :  { %15143 = vmatpush3.msra.mxu0 %v14210_v9 }
0x24cd   :  { %15144 = vmatprep.subr.mxu0 %v14209_v63 }
0x24ce   :  { %15145 = vmatpush3.msra.mxu0 %v14209_v63 }
0x24cf   :  { %15146 = vmatprep.subr.mxu0 %v14208_v10 }
0x24d0   :  { %15147 = vmatpush3.msra.mxu0 %v14208_v10  ;;  %v14231_v10 = vld [vmem:[%s18161_s8] ss:$0 sm:$0xff] }
0x24d1   :  { %15148 = vmatprep.subr.mxu0 %v14207_v11 }
0x24d2   :  { %15149 = vmatpush3.msra.mxu0 %v14207_v11 }
0x24d3   :  { %15172 = vmatprep.subr.mxu0 %v5004_v12 }
0x254f   :  { %v4645_v30 = vpop.xlane.xlu0 %4644 }
0x2550   :  { %v4649_v31 = vmul.f32 0.032258064, %v4645_v30 }
0x2552   :  { %15924 = vrsqrt.f32 %v4649_v31  ;;  %vm4653_vm3 = vcmp.eq.f32.partialorder %v4649_v31, inf  ;;  %v4656_v34 = vand.u32 2147483648, %v4649_v31  ;;  %vm4655_vm4 = vcmp.eq.f32.partialorder %v4649_v31, 0.0 }
0x255f   :  { %v15925_v32 = vpop.eup %15924 }
0x2560   :  { %v4652_v33 = vmul.f32 %v15925_v32, %v4649_v31 }
0x2562   :  { %v4654_v36 = vsel %vm4653_vm3, %v4649_v31, %v4652_v33 }
0x2563   :  { %v4657_v37 = vsel %vm4655_vm4, %v4656_v34, %v4654_v36 }
0x2564   :  { %v4673_v38 = vadd.f32 1e-06, %v4657_v37 }
0x2566   :  { %15926 = vrcp.f32 %v4673_v38 }
0x2573   :  { %v15927_v42 = vpop.eup %15926 }
0x2574   :  { %v4677_v6 = vmul.f32 %v15927_v42, %v4671_v41 }
0x2576   :  { %v4685_v45 = vadd.f32 %v16961_v43, %v4677_v6 }
0x2578   :  { %15150 = vmatprep.mubr.msk.f32.mxu0 %vm193_vm0, %v4685_v45 }
0x258b   :  { %v4539_v46 = vpop.f32.mrf.mxu0 }
0x258c   :  { %15140 = vmatmul.mubr.msk.f32.vlgmr.msra.gmra.mxu1 %vm351_vm6, %v4539_v46 }
0x258d   :  { %v15136_v47 = vpop.f32.mrf.mxu0 }
0x264c   :  { %v4612_v50 = vpop.f32.mrf.mxu1 }
0x264d   :  { %v4616_v55 = vadd.f32 %v4612_v50, %v4375_v21  ;;  %v14229_v50 = vld [vmem:[%s18159_s29] ss:$0 sm:$0xff] }
0x264e   :  { %v15141_v56 = vpop.f32.mrf.mxu1 }
0x264f   :  { %v4624_v57 = vadd.f32 %v14202_v14, %v4616_v55  ;;  %v14219_v14 = vld [vmem:[%s16289_s24 + $0x78] sm:$0xff] }
0x2650   :  { %15153 = vmatprep.subr.mxu1 %v14219_v14 }
0x2651   :  { %v16967_v58 = vadd.f32 %v4624_v57, %v16721_v48  ;;  %15154 = vmatpush3.msra.mxu1 %v14219_v14 }
0x2652   :  { %15155 = vmatprep.subr.mxu1 %v14218_v16 }
0x2653   :  { %v4634_v20 = vsel %vm193_vm0, %v16967_v58, 0.0  ;;  %15156 = vmatpush3.msra.mxu1 %v14218_v16 }
0x2654   :  { %4635 = vadd.xlane.f32.xlu1 %v4634_v20  ;;  %15157 = vmatprep.subr.mxu1 %v14217_v17 }
0x2655   :  { %15158 = vmatpush3.msra.mxu1 %v14217_v17 }
0x2656   :  { %15159 = vmatprep.subr.mxu1 %v14216_v15 }
0x2657   :  { %15160 = vmatpush3.msra.mxu1 %v14216_v15 }
0x2658   :  { %4946 = vadd.xlane.f32.xlu1 %v4945_v39  ;;  %v5003_v39 = vld [vmem:[%s18158_s25 + $0x10] sm:$0xff] }
0x265c   :  { %4949 = vadd.xlane.f32.xlu1 %v4948_v59  ;;  %v14230_v59 = vld [vmem:[%s18160_s3] ss:$0 sm:$0xff] }
0x26dd   :  { %v4636_v13 = vpop.xlane.xlu1 %4635 }
0x26de   :  { %v4638_v60 = vmul.f32 0.03125, %v4636_v13 }
0x26e0   :  { %v16982_v48 = vsub.f32 %v16967_v58, %v4638_v60  ;;  %v5002_v60 = vld [vmem:[%s18158_s25 + $0x8] sm:$0xff] }
0x26e1   :  { %v4947_v61 = vpop.xlane.xlu1 %4946 }
0x26e2   :  { %v4951_v1 = vmul.f32 0.03125, %v4947_v61  ;;  %v4642_v35 = vmul.f32 %v16982_v48, %v16982_v48  ;;  %v4672_v46 = vmul.f32 %v16957_v40, %v16982_v48 }
0x26e4   :  { %v16987_v62 = vsub.f32 %v16970_v53, %v4951_v1  ;;  %v4646_v2 = vsel %vm193_vm0, %v4642_v35, 0.0  ;;  %v5001_v1 = vld [vmem:[%s18158_s25] sm:$0xff] }
0x26e5   :  { %4647 = vadd.xlane.f32.xlu1 %v4646_v2  ;;  %v4950_v3 = vpop.xlane.xlu1 %4949  ;;  %v14214_v2 = vld [vmem:[%s16289_s24 + $0x50] sm:$0xff] }
0x26e6   :  { %v4952_v4 = vmul.f32 0.03125, %v4950_v3  ;;  %v4955_v5 = vmul.f32 %v16987_v62, %v16987_v62  ;;  %v4985_v56 = vmul.f32 %v14229_v50, %v16987_v62  ;;  %v14215_v62 = vld [vmem:[%s16289_s24 + $0x58] sm:$0xff]  ;;  %v14213_v3 = vld [vmem:[%s16289_s24 + $0x48] sm:$0xff] }
0x26e7   :  { %15161 = vmatprep.subr.mxu1 %v14215_v62 }
0x26e8   :  { %v16993_v49 = vsub.f32 %v16977_v51, %v4952_v4  ;;  %v4957_v52 = vsel %vm193_vm0, %v4955_v5, 0.0  ;;  %15162 = vmatpush3.msra.mxu1 %v14215_v62  ;;  %v14212_v4 = vld [vmem:[%s16289_s24 + $0x40] sm:$0xff]  ;;  %s18164_s24 = sld [smem:[#allocation14_spill]] }
0x26e9   :  { %4958 = vadd.xlane.f32.xlu1 %v4957_v52  ;;  %15163 = vmatprep.subr.mxu1 %v14214_v2  ;;  %v14221_v5 = vld [vmem:[%s16284_s19 + $0x1] ss:$0 sm:$0xff]  ;;  %s18163_s19 = sld [smem:[#allocation13_spill]] }
0x26ea   :  { %v4956_v7 = vmul.f32 %v16993_v49, %v16993_v49  ;;  %v4986_v61 = vmul.f32 %v14229_v50, %v16993_v49  ;;  %15164 = vmatpush3.msra.mxu1 %v14214_v2 }
0x26eb   :  { %15165 = vmatprep.subr.mxu1 %v14213_v3 }
0x26ec   :  { %v4960_v8 = vsel %vm193_vm0, %v4956_v7, 0.0  ;;  %15166 = vmatpush3.msra.mxu1 %v14213_v3 }
0x26ed   :  { %4961 = vadd.xlane.f32.xlu1 %v4960_v8  ;;  %15167 = vmatprep.subr.mxu1 %v14212_v4 }
0x26ee   :  { %15168 = vmatpush3.msra.mxu1 %v14212_v4 }
0x26ef   :  { %15188 = vmatprep.subr.mxu1 %v16210_v44 }
0x276e   :  { %v4648_v19 = vpop.xlane.xlu1 %4647 }
0x276f   :  { %v4650_v0 = vmul.f32 0.032258064, %v4648_v19 }
0x2771   :  { %15928 = vrsqrt.f32 %v4650_v0  ;;  %vm4660_vm7 = vcmp.eq.f32.partialorder %v4650_v0, inf  ;;  %v4663_v27 = vand.u32 2147483648, %v4650_v0  ;;  %vm4662_vm8 = vcmp.eq.f32.partialorder %v4650_v0, 0.0 }
0x2772   :  { %v4959_v21 = vpop.xlane.xlu1 %4958 }
0x2773   :  { %v4963_v22 = vmul.f32 0.032258064, %v4959_v21 }
0x2775   :  { %15930 = vrsqrt.f32 %v4963_v22  ;;  %vm4967_vm9 = vcmp.eq.f32.partialorder %v4963_v22, inf  ;;  %v4970_v32 = vand.u32 2147483648, %v4963_v22  ;;  %vm4969_vm10 = vcmp.eq.f32.partialorder %v4963_v22, 0.0 }
0x2776   :  { %v4962_v23 = vpop.xlane.xlu1 %4961 }
0x2777   :  { %v4964_v24 = vmul.f32 0.032258064, %v4962_v23 }
0x2779   :  { %15932 = vrsqrt.f32 %v4964_v24  ;;  %vm4974_vm11 = vcmp.eq.f32.partialorder %v4964_v24, inf  ;;  %v4977_v41 = vand.u32 2147483648, %v4964_v24  ;;  %vm4976_vm12 = vcmp.eq.f32.partialorder %v4964_v24, 0.0 }
0x277e   :  { %v15929_v25 = vpop.eup %15928 }
0x277f   :  { %v4659_v26 = vmul.f32 %v15929_v25, %v4650_v0 }
0x2781   :  { %v4661_v54 = vsel %vm4660_vm7, %v4650_v0, %v4659_v26  ;;  %v17057_v0 = vld [vmem:[%s18162_s14] sm:$0xff] }
0x2782   :  { %v15931_v28 = vpop.eup %15930  ;;  %v4664_v29 = vsel %vm4662_vm8, %v4663_v27, %v4661_v54  ;;  %vm5176_vm14 = vcmp.eq.f32.partialorder %v17057_v0, 0.0 }
0x2783   :  { %v4674_v30 = vadd.f32 1e-06, %v4664_v29  ;;  %v4966_v31 = vmul.f32 %v15931_v28, %v4963_v22 }
0x2785   :  { %15934 = vrcp.f32 %v4674_v30  ;;  %v4968_v33 = vsel %vm4967_vm9, %v4963_v22, %v4966_v31 }
0x2786   :  { %v15933_v34 = vpop.eup %15932  ;;  %v4971_v36 = vsel %vm4969_vm10, %v4970_v32, %v4968_v33 }
0x2787   :  { %v4987_v37 = vadd.f32 1e-06, %v4971_v36  ;;  %v4973_v38 = vmul.f32 %v15933_v34, %v4964_v24 }
0x2789   :  { %15936 = vrcp.f32 %v4987_v37  ;;  %v4975_v42 = vsel %vm4974_vm11, %v4964_v24, %v4973_v38 }
0x278a   :  { %v4978_v6 = vsel %vm4976_vm12, %v4977_v41, %v4975_v42 }
0x278b   :  { %v4988_v45 = vadd.f32 1e-06, %v4978_v6 }
0x278d   :  { %15938 = vrcp.f32 %v4988_v45 }
0x2792   :  { %v15935_v47 = vpop.eup %15934 }
0x2793   :  { %v4678_v55 = vmul.f32 %v15935_v47, %v4672_v46 }
0x2795   :  { %v4686_v57 = vadd.f32 %v16961_v43, %v4678_v55 }
0x2796   :  { %v15937_v20 = vpop.eup %15936 }
0x2797   :  { %15151 = vmatmul.mubr.msk.f32.vlgmr.msra.gmra.mxu0 %vm193_vm0, %v4686_v57  ;;  %v4991_v13 = vmul.f32 %v15937_v20, %v4985_v56  ;;  %v17085_v20 = vld [vmem:[%s18163_s19] sm:$0xff] }
0x2798   :  { %15173 = vmatpush3.msra.mxu0 %v5004_v12 }
0x2799   :  { %15174 = vmatprep.subr.mxu0 %v5003_v39  ;;  %v4999_v40 = vadd.f32 %v14230_v59, %v4991_v13 }
0x279a   :  { %v15939_v48 = vpop.eup %15938  ;;  %15175 = vmatpush3.msra.mxu0 %v5003_v39  ;;  %v17089_v39 = vld [vmem:[%s18163_s19 + $0x8] sm:$0xff] }
0x279b   :  { %15176 = vmatprep.subr.mxu0 %v5002_v60  ;;  %v4992_v43 = vmul.f32 %v15939_v48, %v4986_v61  ;;  %15180 = vmatprep.mubr.msk.f32.mxu0 %vm193_vm0, %v4999_v40 }
0x279c   :  { %15177 = vmatpush3.msra.mxu0 %v5002_v60 }
0x279d   :  { %v5000_v35 = vadd.f32 %v14230_v59, %v4992_v43  ;;  %15178 = vmatprep.subr.mxu0 %v5001_v1 }
0x279e   :  { %15179 = vmatpush3.msra.mxu0 %v5001_v1 }
0x279f   :  { %15181 = vmatmul.mubr.msk.f32.vlgmr.msra.gmra.mxu0 %vm193_vm0, %v5000_v35  ;;  %15183 = vmatprep.subr.mxu0 %v16210_v44 }
0x27a0   :  { %15185 = vmatprep.mubr.msk.f32.mxu0 %vm16211_vm5, %v16210_v44 }
0x2857   :  { %v15152_v49 = vpop.f32.mrf.mxu0 }
0x2858   :  { %v4789_v52 = vadd.f32 %v15152_v49, %v14221_v5 }
0x2859   :  { %v4783_v7 = vpop.f32.mrf.mxu0 }
0x285a   :  { %v4784_v8 = vadd.f32 %v14221_v5, %v4783_v7  ;;  %v4793_v63 = vmax.f32 %v4789_v52, 0.0 }
0x285c   :  { %v4792_v9 = vmax.f32 %v4784_v8, 0.0 }
0x285e   :  { %15169 = vmatprep.mubr.msk.f32.mxu1 %vm2450_vm13, %v4792_v9 }
0x285f   :  { %15170 = vmatmul.mubr.msk.f32.vlgmr.msra.gmra.mxu1 %vm2450_vm13, %v4793_v63  ;;  %v15182_v11 = vpop.f32.mrf.mxu0 }
0x2860   :  { %v17033_v12 = vadd.f32 %v15182_v11, %v14231_v10  ;;  %15190 = vmatprep.mubr.msk.f32.mxu1 %vm16211_vm5, %v16210_v44 }
0x2861   :  { %v5084_v14 = vpop.f32.mrf.mxu0 }
0x2862   :  { %v17037_v16 = vadd.f32 %v14231_v10, %v5084_v14 }
0x2864   :  { %5265 = vrot.lane.b32.xlu0 %v17037_v16, %s16214_s9  ;;  %5099 = vrot.lane.b32.xlu1 %v17037_v16, %s16213_s5 }
0x2868   :  { %5267 = vrot.lane.b32.xlu1 %v17037_v16, %s16212_s0 }
0x28d6   :  { %v5100_v17 = vpop.permute.xlu1 %5099  ;;  %v5266_v19 = vpop.permute.xlu0 %5265 }
0x28d7   :  { %15184 = vmatpush3.xpose.msk.msra.mxu0 %vm351_vm6, %v5100_v17 }
0x28d8   :  { %15193 = vmatprep.subr.mxu0 %v16210_v44 }
0x28da   :  { %15186 = vmatmul.mubr.msk.f32.vlgmr.msra.gmra.mxu0 %vm351_vm6, %v17037_v16  ;;  %v5268_v15 = vpop.permute.xlu1 %5267 }
0x28db   :  { %15194 = vmatpush3.xpose.msk.msra.mxu0 %vm351_vm6, %v5268_v15  ;;  %15195 = vmatprep.mubr.msk.f32.mxu0 %vm16211_vm5, %v16210_v44 }
0x28dc   :  { %15203 = vmatprep.subr.mxu0 %v16210_v44 }
0x28de   :  { %15196 = vmatmul.mubr.msk.f32.vlgmr.msra.gmra.mxu0 %vm351_vm6, %v5266_v19 }
0x28df   :  { %15205 = vmatprep.mubr.msk.f32.mxu0 %vm16211_vm5, %v16210_v44  ;;  %15204 = vmatpush3.msra.mxu0 %v17089_v39 }
0x28e0   :  { %15213 = vmatprep.subr.mxu0 %v16210_v44 }
0x291f   :  { %v17094_v59 = vpop.f32.mrf.mxu1 }
0x2921   :  { %v17096_v13 = vpop.f32.mrf.mxu1 }
0x299a   :  { %v5171_v21 = vpop.f32.mrf.mxu0 }
0x299b   :  { %v5175_v22 = vmul.f32 0.35355338, %v5171_v21 }
0x299c   :  { %v15187_v23 = vpop.f32.mrf.mxu0 }
0x299d   :  { %v5177_v24 = vsel %vm5176_vm14, -1e+09, %v5175_v22 }
0x299e   :  { %v5339_v25 = vpop.f32.mrf.mxu0  ;;  %v5178_v26 = vsel %vm351_vm6, %v5177_v24, -inf }
0x299f   :  { %v5343_v27 = vmul.f32 0.35355338, %v5339_v25  ;;  %5179 = vmax.xlane.f32.xlu1 %v5178_v26 }
0x29a0   :  { %v15197_v54 = vpop.f32.mrf.mxu0 }
0x29a1   :  { %v5344_v28 = vsel %vm5176_vm14, -1e+09, %v5343_v27 }
0x29a2   :  { %v5345_v29 = vsel %vm351_vm6, %v5344_v28, -inf }
0x29a3   :  { %5346 = vmax.xlane.f32.xlu0 %v5345_v29 }
0x29b9   :  { %5356 = vrot.lane.b32.xlu0 %v17037_v16, %s16218_s23 }
0x2a28   :  { %v5180_v30 = vpop.xlane.xlu1 %5179 }
0x2a29   :  { %v5181_v31 = vsub.f32 %v5177_v24, %v5180_v30  ;;  %v17131_v24 = vld [vmem:[%s18163_s19 + $0x10] sm:$0xff] }
0x2a2b   :  { %v5182_v32 = vmul.f32 1.442695, %v5181_v31 }
0x2a2c   :  { %v5347_v33 = vpop.xlane.xlu0 %5346 }
0x2a2d   :  { %15940 = vpow2.f32 %v5182_v32  ;;  %v5348_v34 = vsub.f32 %v5344_v28, %v5347_v33 }
0x2a2f   :  { %v5349_v36 = vmul.f32 1.442695, %v5348_v34 }
0x2a30   :  { %v5357_v55 = vpop.permute.xlu0 %5356 }
0x2a31   :  { %15942 = vpow2.f32 %v5349_v36 }
0x2a3a   :  { %v15941_v37 = vpop.eup %15940 }
0x2a3b   :  { %v5184_v38 = vsel %vm351_vm6, %v15941_v37, 0.0 }
0x2a3c   :  { %5185 = vadd.xlane.f32.xlu1 %v5184_v38 }
0x2a3e   :  { %v15943_v41 = vpop.eup %15942 }
0x2a3f   :  { %v5351_v42 = vsel %vm351_vm6, %v15943_v41, 0.0 }
0x2a40   :  { %5352 = vadd.xlane.f32.xlu1 %v5351_v42 }
0x2a51   :  { %5189 = vrot.lane.b32.xlu1 %v17037_v16, %s16215_s16 }
0x2a55   :  { %5580 = vrot.lane.b32.xlu1 %v17037_v16, %s16216_s18 }
0x2a59   :  { %5578 = vrot.lane.b32.xlu1 %v17037_v16, %s16217_s22 }
0x2ac5   :  { %v5186_v6 = vpop.xlane.xlu1 %5185 }
0x2ac6   :  { %15944 = vrcp.f32 %v5186_v6 }
0x2ac9   :  { %v5353_v45 = vpop.xlane.xlu1 %5352 }
0x2aca   :  { %15946 = vrcp.f32 %v5353_v45 }
0x2acd   :  { %v5190_v46 = vpop.permute.xlu1 %5189 }
0x2ace   :  { %15189 = vmatpush3.msra.mxu1 %v5190_v46 }
0x2acf   :  { %15198 = vmatprep.subr.mxu1 %v16210_v44 }
0x2ad1   :  { %v5581_v61 = vpop.permute.xlu1 %5580 }
0x2ad3   :  { %v15945_v47 = vpop.eup %15944 }
0x2ad4   :  { %v5188_v50 = vmul.f32 %v15945_v47, %v15941_v37 }
0x2ad5   :  { %v5579_v43 = vpop.permute.xlu1 %5578 }
0x2ad6   :  { %15191 = vmatmul.mubr.msk.f32.vlgmr.msra.gmra.mxu1 %vm351_vm6, %v5188_v50 }
0x2ad7   :  { %v15947_v56 = vpop.eup %15946  ;;  %15199 = vmatpush3.msra.mxu1 %v5357_v55  ;;  %15200 = vmatprep.mubr.msk.f32.mxu1 %vm16211_vm5, %v16210_v44  ;;  %v17168_v55 = vld [vmem:[%s18163_s19 + $0x18] sm:$0xff] }
0x2ad8   :  { %v5355_v57 = vmul.f32 %v15947_v56, %v15943_v41  ;;  %15208 = vmatprep.subr.mxu1 %v16210_v44 }
0x2ada   :  { %15201 = vmatmul.mubr.msk.f32.vlgmr.msra.gmra.mxu1 %vm351_vm6, %v5355_v57  ;;  %v17174_v57 = vld [vmem:[%s18162_s14 + $0x8] sm:$0xff]  ;;  %s18176_s14 = sld [smem:[#allocation30_spill]] }
0x2adb   :  { %15210 = vmatprep.mubr.msk.f32.mxu1 %vm16211_vm5, %v16210_v44  ;;  %15209 = vmatpush3.msra.mxu1 %v17085_v20  ;;  %vm6138_vm15 = vcmp.eq.f32.partialorder %v17174_v57, 0.0 }
0x2adc   :  { %15218 = vmatprep.subr.mxu1 %v16210_v44 }
0x2b96   :  { %v5261_v60 = vpop.f32.mrf.mxu1 }
0x2b97   :  { %15211 = vmatmul.mubr.msk.f32.vlgmr.msra.gmra.mxu1 %vm351_vm6, %v5261_v60 }
0x2b98   :  { %v15192_v40 = vpop.f32.mrf.mxu1  ;;  %15220 = vmatprep.mubr.msk.f32.mxu1 %vm16211_vm5, %v16210_v44 }
0x2b9a   :  { %v5428_v48 = vpop.f32.mrf.mxu1 }
0x2b9b   :  { %15206 = vmatmul.mubr.msk.f32.vlgmr.msra.gmra.mxu0 %vm351_vm6, %v5428_v48 }
0x2b9c   :  { %15214 = vmatpush3.xpose.msk.msra.mxu0 %vm351_vm6, %v5581_v61  ;;  %v15202_v1 = vpop.f32.mrf.mxu1  ;;  %15215 = vmatprep.mubr.msk.f32.mxu0 %vm16211_vm5, %v16210_v44 }
0x2b9d   :  { %15223 = vmatprep.subr.mxu0 %v16210_v44 }
0x2b9f   :  { %15216 = vmatmul.mubr.msk.f32.vlgmr.msra.gmra.mxu0 %vm351_vm6, %v5579_v43 }
0x2ba0   :  { %15225 = vmatprep.mubr.msk.f32.mxu0 %vm16211_vm5, %v16210_v44  ;;  %15224 = vmatpush3.msra.mxu0 %v17131_v24 }
0x2ba1   :  { %15233 = vmatprep.subr.mxu0 %v16210_v44 }
0x2c57   :  { %v5574_v35 = vpop.f32.mrf.mxu1 }
0x2c59   :  { %v15212_v62 = vpop.f32.mrf.mxu1 }
0x2c5b   :  { %v5501_v2 = vpop.f32.mrf.mxu0 }
0x2c5c   :  { %v5575_v3 = vadd.f32 %v5574_v35, %v5501_v2 }
0x2c5d   :  { %v15207_v4 = vpop.f32.mrf.mxu0 }
0x2c5f   :  { %v5652_v5 = vpop.f32.mrf.mxu0 }
0x2c60   :  { %v5656_v49 = vmul.f32 0.35355338, %v5652_v5 }
0x2c61   :  { %v15217_v52 = vpop.f32.mrf.mxu0 }
0x2c62   :  { %v5657_v7 = vsel %vm5176_vm14, -1e+09, %v5656_v49 }
0x2c63   :  { %v5658_v8 = vsel %vm351_vm6, %v5657_v7, -inf }
0x2c64   :  { %5659 = vmax.xlane.f32.xlu1 %v5658_v8 }
0x2c75   :  { %5821 = vrot.lane.b32.xlu1 %v17037_v16, %s18131_s26 }
0x2c79   :  { %5819 = vrot.lane.b32.xlu1 %v17037_v16, %s16220_s1 }
0x2c7d   :  { %6061 = vrot.lane.b32.xlu1 %v17033_v12, %s16213_s5 }
0x2ced   :  { %v5660_v9 = vpop.xlane.xlu1 %5659 }
0x2cee   :  { %v5661_v63 = vsub.f32 %v5657_v7, %v5660_v9 }
0x2cf0   :  { %v5662_v10 = vmul.f32 1.442695, %v5661_v63 }
0x2cf1   :  { %v5822_v21 = vpop.permute.xlu1 %5821 }
0x2cf2   :  { %15948 = vpow2.f32 %v5662_v10 }
0x2cf5   :  { %v5820_v23 = vpop.permute.xlu1 %5819 }
0x2cf9   :  { %v6062_v42 = vpop.permute.xlu1 %6061 }
0x2cff   :  { %v15949_v11 = vpop.eup %15948 }
0x2d00   :  { %v5664_v14 = vsel %vm351_vm6, %v15949_v11, 0.0 }
0x2d01   :  { %5665 = vadd.xlane.f32.xlu0 %v5664_v14 }
0x2d17   :  { %5669 = vrot.lane.b32.xlu0 %v17037_v16, %s16221_s28 }
0x2d8a   :  { %v5666_v17 = vpop.xlane.xlu0 %5665 }
0x2d8b   :  { %15950 = vrcp.f32 %v5666_v17 }
0x2d8e   :  { %v5670_v15 = vpop.permute.xlu0 %5669 }
0x2d8f   :  { %15219 = vmatpush3.msra.mxu1 %v5670_v15 }
0x2d90   :  { %15228 = vmatprep.subr.mxu1 %v16210_v44 }
0x2d98   :  { %v15951_v19 = vpop.eup %15950 }
0x2d99   :  { %v5668_v22 = vmul.f32 %v15951_v19, %v15949_v11 }
0x2d9b   :  { %15221 = vmatmul.mubr.msk.f32.vlgmr.msra.gmra.mxu1 %vm351_vm6, %v5668_v22 }
0x2d9c   :  { %15229 = vmatpush3.xpose.msk.msra.mxu1 %vm351_vm6, %v5822_v21  ;;  %15230 = vmatprep.mubr.msk.f32.mxu1 %vm16211_vm5, %v16210_v44 }
0x2d9d   :  { %15238 = vmatprep.subr.mxu1 %v16210_v44 }
0x2d9f   :  { %15231 = vmatmul.mubr.msk.f32.vlgmr.msra.gmra.mxu1 %vm351_vm6, %v5820_v23 }
0x2da0   :  { %15240 = vmatprep.mubr.msk.f32.mxu1 %vm16211_vm5, %v16210_v44  ;;  %15239 = vmatpush3.msra.mxu1 %v17168_v55 }
0x2da1   :  { %15248 = vmatprep.subr.mxu1 %v16210_v44 }
0x2e5b   :  { %v5741_v25 = vpop.f32.mrf.mxu1 }
0x2e5c   :  { %15226 = vmatmul.mubr.msk.f32.vlgmr.msra.gmra.mxu0 %vm351_vm6, %v5741_v25 }
0x2e5d   :  { %v15222_v26 = vpop.f32.mrf.mxu1  ;;  %15235 = vmatprep.mubr.msk.f32.mxu0 %vm16211_vm5, %v16210_v44 }
0x2e5f   :  { %v5893_v27 = vpop.f32.mrf.mxu1 }
0x2e60   :  { %v5897_v54 = vmul.f32 0.35355338, %v5893_v27 }
0x2e61   :  { %v15232_v28 = vpop.f32.mrf.mxu1 }
0x2e62   :  { %v5898_v29 = vsel %vm5176_vm14, -1e+09, %v5897_v54 }
0x2e63   :  { %v5899_v30 = vsel %vm351_vm6, %v5898_v29, -inf }
0x2e64   :  { %5900 = vmax.xlane.f32.xlu0 %v5899_v30 }
0x2e7a   :  { %5910 = vrot.lane.b32.xlu0 %v17037_v16, %s18129_s2 }
0x2e7e   :  { %6229 = vrot.lane.b32.xlu0 %v17033_v12, %s16212_s0 }
0x2eed   :  { %v5901_v31 = vpop.xlane.xlu0 %5900 }
0x2eee   :  { %v5902_v32 = vsub.f32 %v5898_v29, %v5901_v31 }
0x2ef0   :  { %v5903_v33 = vmul.f32 1.442695, %v5902_v32 }
0x2ef1   :  { %v5911_v34 = vpop.permute.xlu0 %5910 }
0x2ef2   :  { %15952 = vpow2.f32 %v5903_v33  ;;  %15234 = vmatpush3.msra.mxu0 %v5911_v34 }
0x2ef3   :  { %15243 = vmatprep.subr.mxu0 %v16210_v44 }
0x2ef5   :  { %v6230_v47 = vpop.permute.xlu0 %6229 }
0x2eff   :  { %v15953_v36 = vpop.eup %15952 }
0x2f00   :  { %v5905_v37 = vsel %vm351_vm6, %v15953_v36, 0.0 }
0x2f01   :  { %5906 = vadd.xlane.f32.xlu1 %v5905_v37 }
0x2f12   :  { %6227 = vrot.lane.b32.xlu1 %v17033_v12, %s16214_s9 }
0x2f1c   :  { %v5814_v38 = vpop.f32.mrf.mxu0 }
0x2f1d   :  { %v17149_v16 = vadd.f32 %v5814_v38, %v5575_v3 }
0x2f1e   :  { %v15227_v41 = vpop.f32.mrf.mxu0 }
0x2f8a   :  { %v5907_v6 = vpop.xlane.xlu1 %5906 }
0x2f8b   :  { %15954 = vrcp.f32 %v5907_v6 }
0x2f8e   :  { %v6228_v50 = vpop.permute.xlu1 %6227 }
0x2f98   :  { %v15955_v45 = vpop.eup %15954 }
0x2f99   :  { %v5909_v46 = vmul.f32 %v15955_v45, %v15953_v36 }
0x2f9b   :  { %15236 = vmatmul.mubr.msk.f32.vlgmr.msra.gmra.mxu0 %vm351_vm6, %v5909_v46 }
0x2f9c   :  { %15244 = vmatpush3.xpose.msk.msra.mxu0 %vm351_vm6, %v6062_v42  ;;  %15245 = vmatprep.mubr.msk.f32.mxu0 %vm16211_vm5, %v16210_v44 }
0x2f9d   :  { %15253 = vmatprep.subr.mxu0 %v16210_v44 }
0x2f9f   :  { %15246 = vmatmul.mubr.msk.f32.vlgmr.msra.gmra.mxu0 %vm351_vm6, %v17033_v12 }
0x2fa0   :  { %15254 = vmatpush3.xpose.msk.msra.mxu0 %vm351_vm6, %v6230_v47  ;;  %15255 = vmatprep.mubr.msk.f32.mxu0 %vm16211_vm5, %v16210_v44 }
0x2fa1   :  { %15263 = vmatprep.subr.mxu0 %v16210_v44 }
0x2fa3   :  { %15256 = vmatmul.mubr.msk.f32.vlgmr.msra.gmra.mxu0 %vm351_vm6, %v6228_v50 }
0x2fa4   :  { %15264 = vmatpush3.msra.mxu0 %v17089_v39  ;;  %15265 = vmatprep.mubr.msk.f32.mxu0 %vm16211_vm5, %v16210_v44 }
0x2fa5   :  { %15273 = vmatprep.subr.mxu0 %v16210_v44 }
0x305b   :  { %v5982_v56 = vpop.f32.mrf.mxu0 }
0x305c   :  { %15241 = vmatmul.mubr.msk.f32.vlgmr.msra.gmra.mxu1 %vm351_vm6, %v5982_v56 }
0x305d   :  { %v15237_v60 = vpop.f32.mrf.mxu0  ;;  %15250 = vmatprep.mubr.msk.f32.mxu1 %vm16211_vm5, %v16210_v44 }
0x305f   :  { %v6133_v39 = vpop.f32.mrf.mxu0 }
0x3060   :  { %v6137_v61 = vmul.f32 0.35355338, %v6133_v39 }
0x3061   :  { %v15247_v40 = vpop.f32.mrf.mxu0 }
0x3062   :  { %v6139_v48 = vsel %vm6138_vm15, -1e+09, %v6137_v61 }
0x3063   :  { %v6301_v1 = vpop.f32.mrf.mxu0  ;;  %v6140_v43 = vsel %vm351_vm6, %v6139_v48, -inf }
0x3064   :  { %v6305_v35 = vmul.f32 0.35355338, %v6301_v1  ;;  %6141 = vmax.xlane.f32.xlu0 %v6140_v43 }
0x3065   :  { %v15257_v62 = vpop.f32.mrf.mxu0 }
0x3066   :  { %v6306_v2 = vsel %vm6138_vm15, -1e+09, %v6305_v35  ;;  %v14224_v62 = vld [vmem:[%s16294_s30 + $0x1] ss:$0 sm:$0xff]  ;;  %s18165_s30 = sld [smem:[#allocation17_spill]] }
0x3067   :  { %v6307_v3 = vsel %vm351_vm6, %v6306_v2, -inf }
0x3068   :  { %6308 = vmax.xlane.f32.xlu1 %v6307_v3 }
0x3079   :  { %6151 = vrot.lane.b32.xlu1 %v17033_v12, %s16215_s16 }
0x307d   :  { %6542 = vrot.lane.b32.xlu1 %v17033_v12, %s16216_s18 }
0x3081   :  { %6540 = vrot.lane.b32.xlu1 %v17033_v12, %s16217_s22 }
0x30ed   :  { %v6142_v4 = vpop.xlane.xlu0 %6141 }
0x30ee   :  { %v6143_v5 = vsub.f32 %v6139_v48, %v6142_v4 }
0x30f0   :  { %v6144_v49 = vmul.f32 1.442695, %v6143_v5 }
0x30f1   :  { %v6309_v52 = vpop.xlane.xlu1 %6308 }
0x30f2   :  { %15956 = vpow2.f32 %v6144_v49  ;;  %v6310_v7 = vsub.f32 %v6306_v2, %v6309_v52  ;;  %v4873_v2 = vadd.f32 %v14224_v62, %v17096_v13 }
0x30f4   :  { %v6311_v8 = vmul.f32 1.442695, %v6310_v7  ;;  %v4881_v52 = vadd.f32 %v4873_v2, %v16948_v18 }
0x30f5   :  { %v6152_v9 = vpop.permute.xlu1 %6151 }
0x30f6   :  { %15958 = vpow2.f32 %v6311_v8  ;;  %15249 = vmatpush3.msra.mxu1 %v6152_v9  ;;  %v14266_v8 = vld [vmem:[%s18164_s24] ss:$0 sm:$0xff]  ;;  %v4885_v13 = vsel %vm193_vm0, %v4881_v52, 0.0 }
0x30f7   :  { %15258 = vmatprep.subr.mxu1 %v16210_v44 }
0x30f9   :  { %v6543_v29 = vpop.permute.xlu1 %6542 }
0x30ff   :  { %v15957_v63 = vpop.eup %15956 }
0x3100   :  { %v6146_v10 = vsel %vm351_vm6, %v15957_v63, 0.0 }
0x3101   :  { %6147 = vadd.xlane.f32.xlu0 %v6146_v10 }
0x3103   :  { %v15959_v11 = vpop.eup %15958 }
0x3104   :  { %v6313_v14 = vsel %vm351_vm6, %v15959_v11, 0.0 }
0x3105   :  { %6314 = vadd.xlane.f32.xlu0 %v6313_v14 }
0x311b   :  { %6318 = vrot.lane.b32.xlu0 %v17033_v12, %s16218_s23 }
0x311c   :  { %v6055_v17 = vpop.f32.mrf.mxu1 }
0x311d   :  { %v17197_v15 = vadd.f32 %v6055_v17, %v17149_v16 }
0x311e   :  { %v15242_v19 = vpop.f32.mrf.mxu1 }
0x318a   :  { %v6148_v21 = vpop.xlane.xlu0 %6147 }
0x318b   :  { %15960 = vrcp.f32 %v6148_v21 }
0x318e   :  { %v6315_v22 = vpop.xlane.xlu0 %6314 }
0x318f   :  { %15962 = vrcp.f32 %v6315_v22 }
0x3192   :  { %v6319_v26 = vpop.permute.xlu0 %6318 }
0x3198   :  { %v15961_v23 = vpop.eup %15960 }
0x3199   :  { %v6150_v25 = vmul.f32 %v15961_v23, %v15957_v63  ;;  %v7028_v63 = vadd.f32 %v14266_v8, %v17197_v15 }
0x319b   :  { %15251 = vmatmul.mubr.msk.f32.vlgmr.msra.gmra.mxu1 %vm351_vm6, %v6150_v25  ;;  %v17258_v10 = vadd.f32 %v7028_v63, %v16970_v53 }
0x319c   :  { %v15963_v27 = vpop.eup %15962  ;;  %15259 = vmatpush3.msra.mxu1 %v6319_v26  ;;  %15260 = vmatprep.mubr.msk.f32.mxu1 %vm16211_vm5, %v16210_v44 }
0x319d   :  { %v6317_v54 = vmul.f32 %v15963_v27, %v15959_v11  ;;  %15268 = vmatprep.subr.mxu1 %v16210_v44  ;;  %v7034_v18 = vsel %vm193_vm0, %v17258_v10, 0.0 }
0x319f   :  { %15261 = vmatmul.mubr.msk.f32.vlgmr.msra.gmra.mxu1 %vm351_vm6, %v6317_v54 }
0x31a0   :  { %15269 = vmatpush3.msra.mxu1 %v17085_v20  ;;  %15270 = vmatprep.mubr.msk.f32.mxu1 %vm16211_vm5, %v16210_v44  ;;  %v6541_v20 = vpop.permute.xlu1 %6540 }
0x31a1   :  { %15278 = vmatprep.subr.mxu1 %v16210_v44 }
0x325b   :  { %v6223_v28 = vpop.f32.mrf.mxu1 }
0x325c   :  { %15271 = vmatmul.mubr.msk.f32.vlgmr.msra.gmra.mxu1 %vm351_vm6, %v6223_v28 }
0x325d   :  { %v15252_v30 = vpop.f32.mrf.mxu1  ;;  %15280 = vmatprep.mubr.msk.f32.mxu1 %vm16211_vm5, %v16210_v44 }
0x325f   :  { %v6390_v31 = vpop.f32.mrf.mxu1 }
0x3260   :  { %15266 = vmatmul.mubr.msk.f32.vlgmr.msra.gmra.mxu0 %vm351_vm6, %v6390_v31 }
0x3261   :  { %15274 = vmatpush3.xpose.msk.msra.mxu0 %vm351_vm6, %v6543_v29  ;;  %v15262_v32 = vpop.f32.mrf.mxu1  ;;  %15275 = vmatprep.mubr.msk.f32.mxu0 %vm16211_vm5, %v16210_v44 }
0x3262   :  { %15283 = vmatprep.subr.mxu0 %v16210_v44 }
0x3264   :  { %15276 = vmatmul.mubr.msk.f32.vlgmr.msra.gmra.mxu0 %vm351_vm6, %v6541_v20 }
0x3265   :  { %15284 = vmatpush3.msra.mxu0 %v17131_v24  ;;  %15285 = vmatprep.mubr.msk.f32.mxu0 %vm16211_vm5, %v16210_v44 }
0x3266   :  { %15293 = vmatprep.subr.mxu0 %v16210_v44 }
0x331c   :  { %v6536_v33 = vpop.f32.mrf.mxu1 }
0x331e   :  { %v15272_v34 = vpop.f32.mrf.mxu1 }
0x3320   :  { %v6463_v36 = vpop.f32.mrf.mxu0 }
0x3321   :  { %v17221_v37 = vadd.f32 %v6536_v33, %v6463_v36 }
0x3322   :  { %v15267_v38 = vpop.f32.mrf.mxu0 }
0x3324   :  { %v6614_v16 = vpop.f32.mrf.mxu0 }
0x3325   :  { %v6618_v41 = vmul.f32 0.35355338, %v6614_v16 }
0x3326   :  { %v15277_v42 = vpop.f32.mrf.mxu0 }
0x3327   :  { %v6619_v6 = vsel %vm6138_vm15, -1e+09, %v6618_v41 }
0x3328   :  { %v6620_v45 = vsel %vm351_vm6, %v6619_v6, -inf }
0x3329   :  { %6621 = vmax.xlane.f32.xlu0 %v6620_v45 }
0x333f   :  { %6631 = vrot.lane.b32.xlu0 %v17033_v12, %s16221_s28 }
0x3343   :  { %6781 = vrot.lane.b32.xlu0 %v17033_v12, %s16220_s1 }
0x33b2   :  { %v6622_v24 = vpop.xlane.xlu0 %6621 }
0x33b3   :  { %v6623_v46 = vsub.f32 %v6619_v6, %v6622_v24 }
0x33b5   :  { %v6624_v47 = vmul.f32 1.442695, %v6623_v46 }
0x33b6   :  { %v6632_v50 = vpop.permute.xlu0 %6631 }
0x33b7   :  { %15964 = vpow2.f32 %v6624_v47  ;;  %15279 = vmatpush3.msra.mxu1 %v6632_v50  ;;  %v7185_v50 = vld [vmem:[%s18165_s30 + $0x18] sm:$0xff] }
0x33b8   :  { %15288 = vmatprep.subr.mxu1 %v16210_v44 }
0x33ba   :  { %v6782_v1 = vpop.permute.xlu0 %6781 }
0x33c4   :  { %v15965_v56 = vpop.eup %15964 }
0x33c5   :  { %v6626_v60 = vsel %vm351_vm6, %v15965_v56, 0.0 }
0x33c6   :  { %6627 = vadd.xlane.f32.xlu1 %v6626_v60  ;;  %v7183_v60 = vld [vmem:[%s18165_s30 + $0x8] sm:$0xff] }
0x33d7   :  { %6783 = vrot.lane.b32.xlu1 %v17033_v12, %s18131_s26 }
0x344f   :  { %v6628_v39 = vpop.xlane.xlu1 %6627 }
0x3450   :  { %15966 = vrcp.f32 %v6628_v39  ;;  %v7182_v39 = vld [vmem:[%s18165_s30] sm:$0xff] }
0x3453   :  { %v6784_v48 = vpop.permute.xlu1 %6783 }
0x345d   :  { %v15967_v61 = vpop.eup %15966 }
0x345e   :  { %v6630_v40 = vmul.f32 %v15967_v61, %v15965_v56  ;;  %v7184_v56 = vld [vmem:[%s18165_s30 + $0x10] sm:$0xff] }
0x3460   :  { %15281 = vmatmul.mubr.msk.f32.vlgmr.msra.gmra.mxu1 %vm351_vm6, %v6630_v40 }
0x3461   :  { %15289 = vmatpush3.xpose.msk.msra.mxu1 %vm351_vm6, %v6784_v48  ;;  %15290 = vmatprep.mubr.msk.f32.mxu1 %vm16211_vm5, %v16210_v44 }
0x3462   :  { %15298 = vmatprep.subr.mxu1 %v16210_v44 }
0x3464   :  { %15291 = vmatmul.mubr.msk.f32.vlgmr.msra.gmra.mxu1 %vm351_vm6, %v6782_v1 }
0x3465   :  { %15299 = vmatpush3.msra.mxu1 %v17168_v55  ;;  %15300 = vmatprep.mubr.msk.f32.mxu1 %vm16211_vm5, %v16210_v44  ;;  %v4878_v55 = vadd.f32 %v17094_v59, %v14224_v62 }
0x3466   :  { %15314 = vmatprep.subr.mxu1 %v7185_v50 }
0x3467   :  { %v4882_v9 = vadd.f32 %v4878_v55, %v16967_v58 }
0x3469   :  { %v4888_v11 = vsel %vm193_vm0, %v4882_v9, 0.0 }
0x3520   :  { %v6703_v43 = vpop.f32.mrf.mxu1 }
0x3521   :  { %15286 = vmatmul.mubr.msk.f32.vlgmr.msra.gmra.mxu0 %vm351_vm6, %v6703_v43 }
0x3522   :  { %v15282_v35 = vpop.f32.mrf.mxu1  ;;  %15295 = vmatprep.mubr.msk.f32.mxu0 %vm16211_vm5, %v16210_v44 }
0x3524   :  { %v6855_v3 = vpop.f32.mrf.mxu1 }
0x3525   :  { %v6859_v4 = vmul.f32 0.35355338, %v6855_v3 }
0x3526   :  { %v15292_v5 = vpop.f32.mrf.mxu1 }
0x3527   :  { %v6860_v49 = vsel %vm6138_vm15, -1e+09, %v6859_v4 }
0x3528   :  { %v6861_v7 = vsel %vm351_vm6, %v6860_v49, -inf }
0x3529   :  { %6862 = vmax.xlane.f32.xlu1 %v6861_v7 }
0x352d   :  { %4886 = vadd.xlane.f32.xlu1 %v4885_v13 }
0x3531   :  { %4889 = vadd.xlane.f32.xlu1 %v4888_v11 }
0x3535   :  { %7035 = vadd.xlane.f32.xlu1 %v7034_v18 }
0x35b2   :  { %v6863_v59 = vpop.xlane.xlu1 %6862 }
0x35b3   :  { %v6864_v14 = vsub.f32 %v6860_v49, %v6863_v59 }
0x35b5   :  { %v6865_v17 = vmul.f32 1.442695, %v6864_v14 }
0x35b6   :  { %v4887_v22 = vpop.xlane.xlu1 %4886 }
0x35b7   :  { %15968 = vpow2.f32 %v6865_v17  ;;  %v4891_v20 = vmul.f32 0.03125, %v4887_v22  ;;  %v14227_v22 = vld [vmem:[%s18166_s6] ss:$0 sm:$0xff]  ;;  %s18177_s6 = sld [smem:[#allocation21_spill]] }
0x35b9   :  { %v17274_v38 = vsub.f32 %v4881_v52, %v4891_v20 }
0x35ba   :  { %v4890_v23 = vpop.xlane.xlu1 %4889 }
0x35bb   :  { %v4892_v25 = vmul.f32 0.03125, %v4890_v23  ;;  %v4895_v24 = vmul.f32 %v17274_v38, %v17274_v38 }
0x35bd   :  { %v17267_v26 = vsub.f32 %v4882_v9, %v4892_v25  ;;  %v4897_v46 = vsel %vm193_vm0, %v4895_v24, 0.0 }
0x35be   :  { %v7036_v33 = vpop.xlane.xlu1 %7035 }
0x35bf   :  { %v4896_v27 = vmul.f32 %v17267_v26, %v17267_v26  ;;  %v7040_v16 = vmul.f32 0.03125, %v7036_v33  ;;  %v4926_v25 = vmul.f32 %v14227_v22, %v17267_v26 }
0x35c1   :  { %v4900_v54 = vsel %vm193_vm0, %v4896_v27, 0.0  ;;  %v17280_v6 = vsub.f32 %v17258_v10, %v7040_v16  ;;  %v4925_v27 = vmul.f32 %v14227_v22, %v17274_v38  ;;  %v7090_v16 = vld [vmem:[%s18168_s20] sm:$0xff] }
0x35c3   :  { %v7044_v47 = vmul.f32 %v17280_v6, %v17280_v6 }
0x35c4   :  { %v15969_v58 = vpop.eup %15968 }
0x35c5   :  { %v6867_v15 = vsel %vm351_vm6, %v15969_v58, 0.0 }
0x35c6   :  { %6868 = vadd.xlane.f32.xlu0 %v6867_v15 }
0x35dc   :  { %6872 = vrot.lane.b32.xlu0 %v17033_v12, %s18129_s2  ;;  %s18179_s2 = sld [smem:[#allocation22_spill]] }
0x35e1   :  { %v6776_v53 = vpop.f32.mrf.mxu0 }
0x35e2   :  { %v6780_v19 = vadd.f32 %v6776_v53, %v17221_v37 }
0x35e3   :  { %v15287_v21 = vpop.f32.mrf.mxu0 }
0x35fb   :  { %4901 = vadd.xlane.f32.xlu0 %v4900_v54 }
0x364f   :  { %v6869_v28 = vpop.xlane.xlu0 %6868 }
0x3650   :  { %15970 = vrcp.f32 %v6869_v28  ;;  %v14267_v28 = vld [vmem:[%s18167_s12] ss:$0 sm:$0xff] }
0x3651   :  { %v7074_v20 = vmul.f32 %v14267_v28, %v17280_v6 }
0x3653   :  { %v6873_v29 = vpop.permute.xlu0 %6872 }
0x3654   :  { %15294 = vmatpush3.msra.mxu0 %v6873_v29 }
0x365d   :  { %v15971_v12 = vpop.eup %15970 }
0x365e   :  { %v6871_v30 = vmul.f32 %v15971_v12, %v15969_v58  ;;  %v14228_v12 = vld [vmem:[%s16424_s21] ss:$0 sm:$0xff]  ;;  %s18170_s21 = sld [smem:[#allocation18_spill]] }
0x3660   :  { %15296 = vmatmul.mubr.msk.f32.vlgmr.msra.gmra.mxu0 %vm351_vm6, %v6871_v30 }
0x3684   :  { %v4902_v61 = vpop.xlane.xlu0 %4901 }
0x3685   :  { %v4904_v40 = vmul.f32 0.032258064, %v4902_v61 }
0x3687   :  { %15972 = vrsqrt.f32 %v4904_v40  ;;  %vm4914_vm1 = vcmp.eq.f32.partialorder %v4904_v40, inf  ;;  %v4917_v7 = vand.u32 2147483648, %v4904_v40  ;;  %vm4916_vm2 = vcmp.eq.f32.partialorder %v4904_v40, 0.0 }
0x3694   :  { %v15973_v3 = vpop.eup %15972 }
0x3695   :  { %v4913_v55 = vmul.f32 %v15973_v3, %v4904_v40 }
0x3697   :  { %v4915_v52 = vsel %vm4914_vm1, %v4904_v40, %v4913_v55 }
0x3720   :  { %v6944_v31 = vpop.f32.mrf.mxu0 }
0x3721   :  { %15301 = vmatmul.mubr.msk.f32.vlgmr.msra.gmra.mxu1 %vm351_vm6, %v6944_v31  ;;  %v7093_v31 = vld [vmem:[%s18168_s20 + $0x18] sm:$0xff] }
0x3722   :  { %v15297_v32 = vpop.f32.mrf.mxu0  ;;  %15315 = vmatpush3.msra.mxu1 %v7185_v50  ;;  %15303 = vmatprep.subr.mxu0 %v7093_v31 }
0x3723   :  { %15316 = vmatprep.subr.mxu1 %v7184_v56  ;;  %v7092_v32 = vld [vmem:[%s18168_s20 + $0x10] sm:$0xff]  ;;  %15304 = vmatpush3.msra.mxu0 %v7093_v31 }
0x3724   :  { %15317 = vmatpush3.msra.mxu1 %v7184_v56  ;;  %15305 = vmatprep.subr.mxu0 %v7092_v32 }
0x3725   :  { %15318 = vmatprep.subr.mxu1 %v7183_v60  ;;  %15306 = vmatpush3.msra.mxu0 %v7092_v32  ;;  %v17379_v32 = vld [vmem:[%s18173_s11 + $0x8] sm:$0xff] }
0x3726   :  { %15319 = vmatpush3.msra.mxu1 %v7183_v60 }
0x3727   :  { %15320 = vmatprep.subr.mxu1 %v7182_v39 }
0x3728   :  { %15321 = vmatpush3.msra.mxu1 %v7182_v39 }
0x3729   :  { %15330 = vmatprep.subr.mxu1 %v16210_v44 }
0x37e1   :  { %v7017_v34 = vpop.f32.mrf.mxu1 }
0x37e2   :  { %v7021_v36 = vadd.f32 %v7017_v34, %v6780_v19  ;;  %v7091_v34 = vld [vmem:[%s18168_s20 + $0x8] sm:$0xff] }
0x37e3   :  { %v15302_v37 = vpop.f32.mrf.mxu1  ;;  %15307 = vmatprep.subr.mxu0 %v7091_v34 }
0x37e4   :  { %v7029_v41 = vadd.f32 %v14266_v8, %v7021_v36  ;;  %v4918_v8 = vsel %vm4916_vm2, %v4917_v7, %v4915_v52  ;;  %v14268_v37 = vld [vmem:[%s18169_s27] ss:$0 sm:$0xff]  ;;  %15308 = vmatpush3.msra.mxu0 %v7091_v34 }
0x37e5   :  { %v4928_v63 = vadd.f32 1e-06, %v4918_v8  ;;  %15309 = vmatprep.subr.mxu0 %v7090_v16  ;;  %v17355_v7 = vld [vmem:[%s18172_s10] sm:$0xff] }
0x37e6   :  { %v17277_v42 = vadd.f32 %v7029_v41, %v16977_v51  ;;  %v7046_v51 = vsel %vm193_vm0, %v7044_v47, 0.0  ;;  %15310 = vmatpush3.msra.mxu0 %v7090_v16  ;;  %vm7356_vm11 = vcmp.eq.f32.partialorder %v17355_v7, 0.0 }
0x37e7   :  { %15325 = vmatprep.subr.mxu0 %v16210_v44 }
0x37e8   :  { %v7037_v45 = vsel %vm193_vm0, %v17277_v42, 0.0 }
0x37e9   :  { %7038 = vadd.xlane.f32.xlu1 %v7037_v45 }
0x37ed   :  { %4898 = vadd.xlane.f32.xlu1 %v4897_v46 }
0x37f1   :  { %7047 = vadd.xlane.f32.xlu1 %v7046_v51 }
0x3872   :  { %v7039_v48 = vpop.xlane.xlu1 %7038 }
0x3873   :  { %v7041_v1 = vmul.f32 0.03125, %v7039_v48  ;;  %v14272_v48 = vld [vmem:[%s18170_s21] ss:$0 sm:$0xff] }
0x3875   :  { %v17296_v43 = vsub.f32 %v17277_v42, %v7041_v1 }
0x3876   :  { %v4899_v35 = vpop.xlane.xlu1 %4898 }
0x3877   :  { %v4903_v62 = vmul.f32 0.032258064, %v4899_v35  ;;  %v7045_v2 = vmul.f32 %v17296_v43, %v17296_v43  ;;  %v7075_v60 = vmul.f32 %v14267_v28, %v17296_v43  ;;  %v14269_v43 = vld [vmem:[%s18171_s7] ss:$0 sm:$0xff] }
0x3879   :  { %15974 = vrsqrt.f32 %v4903_v62  ;;  %v7049_v4 = vsel %vm193_vm0, %v7045_v2, 0.0  ;;  %vm4907_vm3 = vcmp.eq.f32.partialorder %v4903_v62, inf  ;;  %v4910_v11 = vand.u32 2147483648, %v4903_v62 }
0x387a   :  { %v7048_v5 = vpop.xlane.xlu1 %7047  ;;  %7050 = vadd.xlane.f32.xlu1 %v7049_v4  ;;  %vm4909_vm4 = vcmp.eq.f32.partialorder %v4903_v62, 0.0 }
0x387b   :  { %v7052_v49 = vmul.f32 0.032258064, %v7048_v5 }
0x387d   :  { %15976 = vrsqrt.f32 %v7052_v49  ;;  %vm7056_vm7 = vcmp.eq.f32.partialorder %v7052_v49, inf  ;;  %v7059_v15 = vand.u32 2147483648, %v7052_v49  ;;  %vm7058_vm8 = vcmp.eq.f32.partialorder %v7052_v49, 0.0 }
0x387e   :  { %15978 = vrcp.f32 %v4928_v63 }
0x3886   :  { %v15975_v9 = vpop.eup %15974 }
0x3887   :  { %v4906_v13 = vmul.f32 %v15975_v9, %v4903_v62 }
0x3889   :  { %v4908_v18 = vsel %vm4907_vm3, %v4903_v62, %v4906_v13 }
0x388a   :  { %v15977_v59 = vpop.eup %15976  ;;  %v4911_v14 = vsel %vm4909_vm4, %v4910_v11, %v4908_v18 }
0x388b   :  { %v4927_v17 = vadd.f32 1e-06, %v4911_v14  ;;  %v7055_v58 = vmul.f32 %v15977_v59, %v7052_v49  ;;  %v15979_v23 = vpop.eup %15978 }
0x388c   :  { %v4932_v29 = vmul.f32 %v15979_v23, %v4926_v25 }
0x388d   :  { %15980 = vrcp.f32 %v4927_v17  ;;  %v7057_v53 = vsel %vm7056_vm7, %v7052_v49, %v7055_v58 }
0x388e   :  { %v7060_v19 = vsel %vm7058_vm8, %v7059_v15, %v7057_v53  ;;  %v17312_v26 = vadd.f32 %v14228_v12, %v4932_v29 }
0x388f   :  { %v7076_v21 = vadd.f32 1e-06, %v7060_v19 }
0x3891   :  { %15982 = vrcp.f32 %v7076_v21 }
0x389a   :  { %v15981_v54 = vpop.eup %15980 }
0x389b   :  { %v4931_v30 = vmul.f32 %v15981_v54, %v4925_v27 }
0x389d   :  { %v17309_v33 = vadd.f32 %v14228_v12, %v4931_v30 }
0x389e   :  { %v15983_v36 = vpop.eup %15982 }
0x389f   :  { %15322 = vmatprep.mubr.msk.f32.mxu1 %vm193_vm0, %v17309_v33  ;;  %v7080_v38 = vmul.f32 %v15983_v36, %v7074_v20 }
0x38a0   :  { %15323 = vmatmul.mubr.msk.f32.vlgmr.msra.gmra.mxu1 %vm193_vm0, %v17312_v26 }
0x38a1   :  { %v7088_v41 = vadd.f32 %v14268_v37, %v7080_v38  ;;  %15332 = vmatprep.mubr.msk.f32.mxu1 %vm16211_vm5, %v16210_v44  ;;  %v17385_v38 = vld [vmem:[%s18173_s11] sm:$0xff] }
0x38a3   :  { %15311 = vmatprep.mubr.msk.f32.mxu0 %vm193_vm0, %v7088_v41 }
0x3903   :  { %v7051_v6 = vpop.xlane.xlu1 %7050 }
0x3904   :  { %v7053_v45 = vmul.f32 0.032258064, %v7051_v6 }
0x3906   :  { %15984 = vrsqrt.f32 %v7053_v45  ;;  %vm7063_vm9 = vcmp.eq.f32.partialorder %v7053_v45, inf  ;;  %v7066_v47 = vand.u32 2147483648, %v7053_v45  ;;  %vm7065_vm10 = vcmp.eq.f32.partialorder %v7053_v45, 0.0 }
0x3913   :  { %v15985_v24 = vpop.eup %15984 }
0x3914   :  { %v7062_v46 = vmul.f32 %v15985_v24, %v7053_v45 }
0x3916   :  { %v7064_v51 = vsel %vm7063_vm9, %v7053_v45, %v7062_v46 }
0x3917   :  { %v7067_v50 = vsel %vm7065_vm10, %v7066_v47, %v7064_v51 }
0x3918   :  { %v7077_v56 = vadd.f32 1e-06, %v7067_v50 }
0x391a   :  { %15986 = vrcp.f32 %v7077_v56 }
0x3927   :  { %v15987_v39 = vpop.eup %15986 }
0x3928   :  { %v7081_v61 = vmul.f32 %v15987_v39, %v7075_v60 }
0x392a   :  { %v7089_v40 = vadd.f32 %v14268_v37, %v7081_v61 }
0x392c   :  { %15312 = vmatmul.mubr.msk.f32.vlgmr.msra.gmra.mxu0 %vm193_vm0, %v7089_v40 }
0x392d   :  { %15327 = vmatprep.mubr.msk.f32.mxu0 %vm16211_vm5, %v16210_v44 }
0x3960   :  { %v15324_v1 = vpop.f32.mrf.mxu1 }
0x3961   :  { %v17329_v35 = vadd.f32 %v15324_v1, %v14272_v48 }
0x3962   :  { %v7265_v62 = vpop.f32.mrf.mxu1 }
0x3963   :  { %v17331_v2 = vadd.f32 %v14272_v48, %v7265_v62 }
0x3965   :  { %7447 = vrot.lane.b32.xlu1 %v17331_v2, %s16214_s9  ;;  %15326 = vmatpush3.xpose.msk.msra.mxu0 %vm351_vm6, %v17331_v2 }
0x3966   :  { %15335 = vmatprep.subr.mxu0 %v16210_v44 }
0x39d7   :  { %v7448_v55 = vpop.permute.xlu1 %7447 }
0x39ec   :  { %v15313_v3 = vpop.f32.mrf.mxu0 }
0x39ed   :  { %v17339_v4 = vadd.f32 %v15313_v3, %v14269_v43 }
0x39ee   :  { %v7173_v5 = vpop.f32.mrf.mxu0 }
0x39ef   :  { %v17341_v49 = vadd.f32 %v14269_v43, %v7173_v5 }
0x39f1   :  { %7445 = vrot.lane.b32.xlu1 %v17341_v49, %s16214_s9  ;;  %15328 = vmatmul.mubr.msk.f32.vlgmr.msra.gmra.mxu0 %vm351_vm6, %v17341_v49 }
0x39f2   :  { %15336 = vmatpush3.xpose.msk.msra.mxu0 %vm351_vm6, %v7448_v55  ;;  %15337 = vmatprep.mubr.msk.f32.mxu0 %vm16211_vm5, %v16210_v44 }
0x39f3   :  { %15345 = vmatprep.subr.mxu0 %v16210_v44 }
0x3a63   :  { %v7446_v52 = vpop.permute.xlu1 %7445 }
0x3a64   :  { %15338 = vmatmul.mubr.msk.f32.vlgmr.msra.gmra.mxu0 %vm351_vm6, %v7446_v52 }
0x3a65   :  { %15347 = vmatprep.mubr.msk.f32.mxu0 %vm16211_vm5, %v16210_v44  ;;  %15346 = vmatpush3.msra.mxu0 %v17379_v32 }
0x3a66   :  { %15355 = vmatprep.subr.mxu0 %v16210_v44 }
0x3ab1   :  { %v7351_v8 = vpop.f32.mrf.mxu0 }
0x3ab2   :  { %v7355_v9 = vmul.f32 0.35355338, %v7351_v8 }
0x3ab3   :  { %v15329_v63 = vpop.f32.mrf.mxu0 }
0x3ab4   :  { %v7357_v13 = vsel %vm7356_vm11, -1e+09, %v7355_v9 }
0x3ab5   :  { %v7358_v11 = vsel %vm351_vm6, %v7357_v13, -inf }
0x3ab6   :  { %7359 = vmax.xlane.f32.xlu1 %v7358_v11 }
0x3ac7   :  { %7760 = vrot.lane.b32.xlu1 %v17331_v2, %s16217_s22 }
0x3b24   :  { %v7519_v18 = vpop.f32.mrf.mxu0 }
0x3b25   :  { %v7523_v59 = vmul.f32 0.35355338, %v7519_v18 }
0x3b26   :  { %v15339_v14 = vpop.f32.mrf.mxu0 }
0x3b27   :  { %v7524_v17 = vsel %vm7356_vm11, -1e+09, %v7523_v59 }
0x3b28   :  { %v7525_v58 = vsel %vm351_vm6, %v7524_v17, -inf }
0x3b29   :  { %7526 = vmax.xlane.f32.xlu0 %v7525_v58 }
0x3b3f   :  { %7369 = vrot.lane.b32.xlu0 %v17331_v2, %s16213_s5  ;;  %v7360_v15 = vpop.xlane.xlu1 %7359 }
0x3b40   :  { %v7361_v53 = vsub.f32 %v7357_v13, %v7360_v15  ;;  %v17423_v13 = vld [vmem:[%s18173_s11 + $0x10] sm:$0xff] }
0x3b42   :  { %v7362_v19 = vmul.f32 1.442695, %v7361_v53 }
0x3b43   :  { %v7761_v45 = vpop.permute.xlu1 %7760 }
0x3b44   :  { %15988 = vpow2.f32 %v7362_v19 }
0x3b51   :  { %v15989_v21 = vpop.eup %15988 }
0x3b52   :  { %v7364_v22 = vsel %vm351_vm6, %v15989_v21, 0.0 }
0x3b5e   :  { %7365 = vadd.xlane.f32.xlu0 %v7364_v22 }
0x3bb2   :  { %v7527_v23 = vpop.xlane.xlu0 %7526 }
0x3bb3   :  { %v7528_v25 = vsub.f32 %v7524_v17, %v7527_v23 }
0x3bb5   :  { %v7529_v27 = vmul.f32 1.442695, %v7528_v25 }
0x3bb6   :  { %v7370_v54 = vpop.permute.xlu0 %7369 }
0x3bb7   :  { %15990 = vpow2.f32 %v7529_v27  ;;  %15331 = vmatpush3.msra.mxu1 %v7370_v54 }
0x3bb8   :  { %15340 = vmatprep.subr.mxu1 %v16210_v44 }
0x3bc4   :  { %v15991_v28 = vpop.eup %15990 }
0x3bc5   :  { %v7531_v29 = vsel %vm351_vm6, %v15991_v28, 0.0 }
0x3bc6   :  { %7532 = vadd.xlane.f32.xlu0 %v7531_v29 }
0x3bdc   :  { %7536 = vrot.lane.b32.xlu0 %v17331_v2, %s16212_s0 }
0x3be0   :  { %7758 = vrot.lane.b32.xlu0 %v17341_v49, %s16217_s22 }
0x3be7   :  { %v7366_v12 = vpop.xlane.xlu0 %7365 }
0x3be8   :  { %15992 = vrcp.f32 %v7366_v12 }
0x3bf5   :  { %v15993_v30 = vpop.eup %15992 }
0x3bf6   :  { %v7368_v31 = vmul.f32 %v15993_v30, %v15989_v21 }
0x3bf8   :  { %15333 = vmatmul.mubr.msk.f32.vlgmr.msra.gmra.mxu1 %vm351_vm6, %v7368_v31 }
0x3bf9   :  { %15342 = vmatprep.mubr.msk.f32.mxu1 %vm16211_vm5, %v16210_v44 }
0x3c4f   :  { %v7533_v20 = vpop.xlane.xlu0 %7532 }
0x3c50   :  { %15994 = vrcp.f32 %v7533_v20 }
0x3c53   :  { %v7537_v34 = vpop.permute.xlu0 %7536 }
0x3c54   :  { %15341 = vmatpush3.msra.mxu1 %v7537_v34  ;;  %v17461_v34 = vld [vmem:[%s18173_s11 + $0x18] sm:$0xff] }
0x3c55   :  { %15350 = vmatprep.subr.mxu1 %v16210_v44 }
0x3c57   :  { %v7759_v46 = vpop.permute.xlu0 %7758 }
0x3c5d   :  { %v15995_v36 = vpop.eup %15994 }
0x3c5e   :  { %v7535_v37 = vmul.f32 %v15995_v36, %v15991_v28 }
0x3c60   :  { %15343 = vmatmul.mubr.msk.f32.vlgmr.msra.gmra.mxu1 %vm351_vm6, %v7535_v37  ;;  %v17467_v37 = vld [vmem:[%s18172_s10 + $0x8] sm:$0xff]  ;;  %s18178_s10 = sld [smem:[#allocation23_spill]] }
0x3c61   :  { %15351 = vmatpush3.msra.mxu1 %v17385_v38  ;;  %15352 = vmatprep.mubr.msk.f32.mxu1 %vm16211_vm5, %v16210_v44  ;;  %vm8317_vm12 = vcmp.eq.f32.partialorder %v17467_v37, 0.0 }
0x3c62   :  { %15360 = vmatprep.subr.mxu1 %v16210_v44 }
0x3cb8   :  { %v7441_v16 = vpop.f32.mrf.mxu1 }
0x3cb9   :  { %15353 = vmatmul.mubr.msk.f32.vlgmr.msra.gmra.mxu1 %vm351_vm6, %v7441_v16 }
0x3cba   :  { %v15334_v41 = vpop.f32.mrf.mxu1  ;;  %15362 = vmatprep.mubr.msk.f32.mxu1 %vm16211_vm5, %v16210_v44 }
0x3d20   :  { %v7608_v6 = vpop.f32.mrf.mxu1 }
0x3d21   :  { %15348 = vmatmul.mubr.msk.f32.vlgmr.msra.gmra.mxu0 %vm351_vm6, %v7608_v6 }
0x3d22   :  { %15356 = vmatpush3.xpose.msk.msra.mxu0 %vm351_vm6, %v7761_v45  ;;  %v15344_v24 = vpop.f32.mrf.mxu1  ;;  %15357 = vmatprep.mubr.msk.f32.mxu0 %vm16211_vm5, %v16210_v44 }
0x3d23   :  { %15365 = vmatprep.subr.mxu0 %v16210_v44 }
0x3d25   :  { %15358 = vmatmul.mubr.msk.f32.vlgmr.msra.gmra.mxu0 %vm351_vm6, %v7759_v46 }
0x3d26   :  { %15367 = vmatprep.mubr.msk.f32.mxu0 %vm16211_vm5, %v16210_v44  ;;  %15366 = vmatpush3.msra.mxu0 %v17423_v13 }
0x3d27   :  { %15375 = vmatprep.subr.mxu0 %v16210_v44 }
0x3d79   :  { %v7754_v47 = vpop.f32.mrf.mxu1 }
0x3d7b   :  { %v15354_v51 = vpop.f32.mrf.mxu1 }
0x3de1   :  { %v7681_v50 = vpop.f32.mrf.mxu0 }
0x3de2   :  { %v7755_v27 = vadd.f32 %v7754_v47, %v7681_v50 }
0x3de3   :  { %v15349_v56 = vpop.f32.mrf.mxu0 }
0x3de5   :  { %v7832_v60 = vpop.f32.mrf.mxu0 }
0x3de6   :  { %v7836_v39 = vmul.f32 0.35355338, %v7832_v60 }
0x3de7   :  { %v15359_v61 = vpop.f32.mrf.mxu0 }
0x3de8   :  { %v7837_v40 = vsel %vm7356_vm11, -1e+09, %v7836_v39 }
0x3de9   :  { %v7838_v48 = vsel %vm351_vm6, %v7837_v40, -inf }
0x3dea   :  { %7839 = vmax.xlane.f32.xlu0 %v7838_v48 }
0x3e00   :  { %7849 = vrot.lane.b32.xlu0 %v17331_v2, %s16216_s18 }
0x3e04   :  { %7999 = vrot.lane.b32.xlu0 %v17341_v49, %s16220_s1 }
0x3e73   :  { %v7840_v1 = vpop.xlane.xlu0 %7839 }
0x3e74   :  { %v7841_v62 = vsub.f32 %v7837_v40, %v7840_v1 }
0x3e76   :  { %v7842_v43 = vmul.f32 1.442695, %v7841_v62 }
0x3e77   :  { %v7850_v3 = vpop.permute.xlu0 %7849 }
0x3e78   :  { %15996 = vpow2.f32 %v7842_v43  ;;  %15361 = vmatpush3.msra.mxu1 %v7850_v3 }
0x3e79   :  { %15370 = vmatprep.subr.mxu1 %v16210_v44 }
0x3e7b   :  { %v8000_v63 = vpop.permute.xlu0 %7999 }
0x3e85   :  { %v15997_v5 = vpop.eup %15996 }
0x3e86   :  { %v7844_v55 = vsel %vm351_vm6, %v15997_v5, 0.0 }
0x3e87   :  { %7845 = vadd.xlane.f32.xlu1 %v7844_v55 }
0x3e98   :  { %8001 = vrot.lane.b32.xlu1 %v17331_v2, %s16220_s1 }
0x3f10   :  { %v7846_v52 = vpop.xlane.xlu1 %7845 }
0x3f11   :  { %15998 = vrcp.f32 %v7846_v52 }
0x3f14   :  { %v8002_v9 = vpop.permute.xlu1 %8001 }
0x3f1e   :  { %v15999_v8 = vpop.eup %15998 }
0x3f1f   :  { %v7848_v49 = vmul.f32 %v15999_v8, %v15997_v5 }
0x3f21   :  { %15363 = vmatmul.mubr.msk.f32.vlgmr.msra.gmra.mxu1 %vm351_vm6, %v7848_v49 }
0x3f22   :  { %15371 = vmatpush3.xpose.msk.msra.mxu1 %vm351_vm6, %v8002_v9  ;;  %15372 = vmatprep.mubr.msk.f32.mxu1 %vm16211_vm5, %v16210_v44 }
0x3f23   :  { %15380 = vmatprep.subr.mxu1 %v16210_v44 }
0x3f25   :  { %15373 = vmatmul.mubr.msk.f32.vlgmr.msra.gmra.mxu1 %vm351_vm6, %v8000_v63 }
0x3f26   :  { %15382 = vmatprep.mubr.msk.f32.mxu1 %vm16211_vm5, %v16210_v44  ;;  %15381 = vmatpush3.msra.mxu1 %v17461_v34 }
0x3f27   :  { %15390 = vmatprep.subr.mxu1 %v16210_v44 }
0x3fe1   :  { %v7921_v11 = vpop.f32.mrf.mxu1 }
0x3fe2   :  { %15368 = vmatmul.mubr.msk.f32.vlgmr.msra.gmra.mxu0 %vm351_vm6, %v7921_v11 }
0x3fe3   :  { %v15364_v18 = vpop.f32.mrf.mxu1  ;;  %15377 = vmatprep.mubr.msk.f32.mxu0 %vm16211_vm5, %v16210_v44 }
0x3fe5   :  { %v8073_v59 = vpop.f32.mrf.mxu1 }
0x3fe6   :  { %v8077_v14 = vmul.f32 0.35355338, %v8073_v59 }
0x3fe7   :  { %v15374_v17 = vpop.f32.mrf.mxu1 }
0x3fe8   :  { %v8078_v58 = vsel %vm7356_vm11, -1e+09, %v8077_v14 }
0x3fe9   :  { %v8079_v15 = vsel %vm351_vm6, %v8078_v58, -inf }
0x3fea   :  { %8080 = vmax.xlane.f32.xlu0 %v8079_v15 }
0x4000   :  { %8090 = vrot.lane.b32.xlu0 %v17331_v2, %s18131_s26 }
0x4004   :  { %8406 = vrot.lane.b32.xlu0 %v17339_v4, %s16214_s9 }
0x4073   :  { %v8081_v53 = vpop.xlane.xlu0 %8080 }
0x4074   :  { %v8082_v19 = vsub.f32 %v8078_v58, %v8081_v53 }
0x4076   :  { %v8083_v21 = vmul.f32 1.442695, %v8082_v19 }
0x4077   :  { %v8091_v22 = vpop.permute.xlu0 %8090 }
0x4078   :  { %16000 = vpow2.f32 %v8083_v21  ;;  %15376 = vmatpush3.msra.mxu0 %v8091_v22 }
0x4079   :  { %15385 = vmatprep.subr.mxu0 %v16210_v44 }
0x407b   :  { %v8407_v20 = vpop.permute.xlu0 %8406 }
0x4085   :  { %v16001_v23 = vpop.eup %16000 }
0x4086   :  { %v8085_v25 = vsel %vm351_vm6, %v16001_v23, 0.0 }
0x4087   :  { %8086 = vadd.xlane.f32.xlu1 %v8085_v25 }
0x4098   :  { %8408 = vrot.lane.b32.xlu1 %v17329_v35, %s16214_s9 }
0x40a2   :  { %v7994_v2 = vpop.f32.mrf.mxu0 }
0x40a3   :  { %v17441_v54 = vadd.f32 %v7994_v2, %v7755_v27 }
0x40a4   :  { %v15369_v28 = vpop.f32.mrf.mxu0 }
0x4110   :  { %v8087_v29 = vpop.xlane.xlu1 %8086 }
0x4111   :  { %16002 = vrcp.f32 %v8087_v29 }
0x4114   :  { %v8409_v31 = vpop.permute.xlu1 %8408 }
0x411e   :  { %v16003_v12 = vpop.eup %16002 }
0x411f   :  { %v8089_v30 = vmul.f32 %v16003_v12, %v16001_v23 }
0x4121   :  { %15378 = vmatmul.mubr.msk.f32.vlgmr.msra.gmra.mxu0 %vm351_vm6, %v8089_v30 }
0x4122   :  { %15386 = vmatpush3.xpose.msk.msra.mxu0 %vm351_vm6, %v17329_v35  ;;  %15387 = vmatprep.mubr.msk.f32.mxu0 %vm16211_vm5, %v16210_v44 }
0x4123   :  { %15395 = vmatprep.subr.mxu0 %v16210_v44 }
0x4125   :  { %15388 = vmatmul.mubr.msk.f32.vlgmr.msra.gmra.mxu0 %vm351_vm6, %v17339_v4 }
0x4126   :  { %15396 = vmatpush3.xpose.msk.msra.mxu0 %vm351_vm6, %v8409_v31  ;;  %15397 = vmatprep.mubr.msk.f32.mxu0 %vm16211_vm5, %v16210_v44 }
0x4127   :  { %15405 = vmatprep.subr.mxu0 %v16210_v44 }
0x4129   :  { %15398 = vmatmul.mubr.msk.f32.vlgmr.msra.gmra.mxu0 %vm351_vm6, %v8407_v20 }
0x412a   :  { %15406 = vmatpush3.msra.mxu0 %v17379_v32  ;;  %15407 = vmatprep.mubr.msk.f32.mxu0 %vm16211_vm5, %v16210_v44 }
0x412b   :  { %15415 = vmatprep.subr.mxu0 %v16210_v44 }
0x41e1   :  { %v8162_v36 = vpop.f32.mrf.mxu0 }
0x41e2   :  { %15383 = vmatmul.mubr.msk.f32.vlgmr.msra.gmra.mxu1 %vm351_vm6, %v8162_v36 }
0x41e3   :  { %v15379_v16 = vpop.f32.mrf.mxu0  ;;  %15392 = vmatprep.mubr.msk.f32.mxu1 %vm16211_vm5, %v16210_v44 }
0x41e5   :  { %v8312_v32 = vpop.f32.mrf.mxu0 }
0x41e6   :  { %v8316_v41 = vmul.f32 0.35355338, %v8312_v32 }
0x41e7   :  { %v15389_v6 = vpop.f32.mrf.mxu0 }
0x41e8   :  { %v8318_v45 = vsel %vm8317_vm12, -1e+09, %v8316_v41 }
0x41e9   :  { %v8480_v24 = vpop.f32.mrf.mxu0  ;;  %v8319_v46 = vsel %vm351_vm6, %v8318_v45, -inf }
0x41ea   :  { %v8484_v47 = vmul.f32 0.35355338, %v8480_v24  ;;  %8320 = vmax.xlane.f32.xlu0 %v8319_v46 }
0x41eb   :  { %v15399_v51 = vpop.f32.mrf.mxu0 }
0x41ec   :  { %v8485_v50 = vsel %vm8317_vm12, -1e+09, %v8484_v47  ;;  %v14307_v47 = vld [vmem:[%s18174_s15] ss:$0 sm:$0xff] }
0x41ed   :  { %v8486_v56 = vsel %vm351_vm6, %v8485_v50, -inf }
0x41ee   :  { %8487 = vmax.xlane.f32.xlu1 %v8486_v56 }
0x41ff   :  { %8330 = vrot.lane.b32.xlu1 %v17329_v35, %s16213_s5 }
0x4203   :  { %8721 = vrot.lane.b32.xlu1 %v17329_v35, %s16217_s22 }
0x4207   :  { %8719 = vrot.lane.b32.xlu1 %v17339_v4, %s16217_s22 }
0x4273   :  { %v8321_v60 = vpop.xlane.xlu0 %8320 }
0x4274   :  { %v8322_v39 = vsub.f32 %v8318_v45, %v8321_v60 }
0x4276   :  { %v8323_v61 = vmul.f32 1.442695, %v8322_v39 }
0x4277   :  { %v8488_v40 = vpop.xlane.xlu1 %8487 }
0x4278   :  { %16004 = vpow2.f32 %v8323_v61  ;;  %v8489_v48 = vsub.f32 %v8485_v50, %v8488_v40 }
0x427a   :  { %v8490_v1 = vmul.f32 1.442695, %v8489_v48 }
0x427b   :  { %v8331_v62 = vpop.permute.xlu1 %8330 }
0x427c   :  { %16006 = vpow2.f32 %v8490_v1  ;;  %15391 = vmatpush3.msra.mxu1 %v8331_v62 }
0x427d   :  { %15400 = vmatprep.subr.mxu1 %v16210_v44 }
0x427f   :  { %v8722_v15 = vpop.permute.xlu1 %8721 }
0x4285   :  { %v16005_v43 = vpop.eup %16004 }
0x4286   :  { %v8325_v3 = vsel %vm351_vm6, %v16005_v43, 0.0 }
0x4287   :  { %8326 = vadd.xlane.f32.xlu0 %v8325_v3 }
0x4289   :  { %v16007_v5 = vpop.eup %16006 }
0x428a   :  { %v8492_v55 = vsel %vm351_vm6, %v16007_v5, 0.0 }
0x428b   :  { %8493 = vadd.xlane.f32.xlu0 %v8492_v55 }
0x42a1   :  { %8497 = vrot.lane.b32.xlu0 %v17329_v35, %s16212_s0 }
0x42a2   :  { %v8235_v52 = vpop.f32.mrf.mxu1 }
0x42a3   :  { %v17490_v8 = vadd.f32 %v8235_v52, %v17441_v54 }
0x42a4   :  { %v15384_v49 = vpop.f32.mrf.mxu1 }
0x42a5   :  { %v9207_v50 = vadd.f32 %v14307_v47, %v17490_v8 }
0x4310   :  { %v8327_v9 = vpop.xlane.xlu0 %8326 }
0x4311   :  { %16008 = vrcp.f32 %v8327_v9 }
0x4314   :  { %v8494_v63 = vpop.xlane.xlu0 %8493 }
0x4315   :  { %16010 = vrcp.f32 %v8494_v63 }
0x4318   :  { %v8498_v59 = vpop.permute.xlu0 %8497 }
0x431e   :  { %v16009_v11 = vpop.eup %16008 }
0x431f   :  { %v8329_v18 = vmul.f32 %v16009_v11, %v16005_v43 }
0x4321   :  { %15393 = vmatmul.mubr.msk.f32.vlgmr.msra.gmra.mxu1 %vm351_vm6, %v8329_v18 }
0x4322   :  { %v16011_v14 = vpop.eup %16010  ;;  %15401 = vmatpush3.msra.mxu1 %v8498_v59  ;;  %15402 = vmatprep.mubr.msk.f32.mxu1 %vm16211_vm5, %v16210_v44 }
0x4323   :  { %v8496_v17 = vmul.f32 %v16011_v14, %v16007_v5  ;;  %15410 = vmatprep.subr.mxu1 %v16210_v44 }
0x4325   :  { %15403 = vmatmul.mubr.msk.f32.vlgmr.msra.gmra.mxu1 %vm351_vm6, %v8496_v17 }
0x4326   :  { %15411 = vmatpush3.msra.mxu1 %v17385_v38  ;;  %15412 = vmatprep.mubr.msk.f32.mxu1 %vm16211_vm5, %v16210_v44  ;;  %v8720_v38 = vpop.permute.xlu1 %8719 }
0x4327   :  { %15420 = vmatprep.subr.mxu1 %v16210_v44 }
0x43e1   :  { %v8402_v58 = vpop.f32.mrf.mxu1 }
0x43e2   :  { %15413 = vmatmul.mubr.msk.f32.vlgmr.msra.gmra.mxu1 %vm351_vm6, %v8402_v58 }
0x43e3   :  { %v15394_v53 = vpop.f32.mrf.mxu1  ;;  %15422 = vmatprep.mubr.msk.f32.mxu1 %vm16211_vm5, %v16210_v44 }
0x43e5   :  { %v8569_v19 = vpop.f32.mrf.mxu1 }
0x43e6   :  { %15408 = vmatmul.mubr.msk.f32.vlgmr.msra.gmra.mxu0 %vm351_vm6, %v8569_v19 }
0x43e7   :  { %15416 = vmatpush3.xpose.msk.msra.mxu0 %vm351_vm6, %v8722_v15  ;;  %v15404_v21 = vpop.f32.mrf.mxu1  ;;  %15417 = vmatprep.mubr.msk.f32.mxu0 %vm16211_vm5, %v16210_v44 }
0x43e8   :  { %15425 = vmatprep.subr.mxu0 %v16210_v44 }
0x43ea   :  { %15418 = vmatmul.mubr.msk.f32.vlgmr.msra.gmra.mxu0 %vm351_vm6, %v8720_v38 }
0x43eb   :  { %15426 = vmatpush3.msra.mxu0 %v17423_v13  ;;  %15427 = vmatprep.mubr.msk.f32.mxu0 %vm16211_vm5, %v16210_v44 }
0x43ec   :  { %15435 = vmatprep.subr.mxu0 %v16210_v44 }
0x44a2   :  { %v8715_v22 = vpop.f32.mrf.mxu1 }
0x44a4   :  { %v15414_v23 = vpop.f32.mrf.mxu1 }
0x44a6   :  { %v8642_v25 = vpop.f32.mrf.mxu0 }
0x44a7   :  { %v8716_v27 = vadd.f32 %v8715_v22, %v8642_v25 }
0x44a8   :  { %v15409_v2 = vpop.f32.mrf.mxu0 }
0x44aa   :  { %v8793_v54 = vpop.f32.mrf.mxu0 }
0x44ab   :  { %v8797_v28 = vmul.f32 0.35355338, %v8793_v54 }
0x44ac   :  { %v15419_v29 = vpop.f32.mrf.mxu0 }
0x44ad   :  { %v8798_v12 = vsel %vm8317_vm12, -1e+09, %v8797_v28 }
0x44ae   :  { %v8799_v30 = vsel %vm351_vm6, %v8798_v12, -inf }
0x44af   :  { %8800 = vmax.xlane.f32.xlu0 %v8799_v30 }
0x44c5   :  { %8810 = vrot.lane.b32.xlu0 %v17329_v35, %s16216_s18 }
0x44c9   :  { %8960 = vrot.lane.b32.xlu0 %v17339_v4, %s16220_s1 }
0x4538   :  { %v8801_v13 = vpop.xlane.xlu0 %8800 }
0x4539   :  { %v8802_v31 = vsub.f32 %v8798_v12, %v8801_v13 }
0x453b   :  { %v8803_v20 = vmul.f32 1.442695, %v8802_v31 }
0x453c   :  { %v8811_v36 = vpop.permute.xlu0 %8810 }
0x453d   :  { %16012 = vpow2.f32 %v8803_v20  ;;  %15421 = vmatpush3.msra.mxu1 %v8811_v36  ;;  %v14308_v36 = vld [vmem:[%s18175_s13] ss:$0 sm:$0xff] }
0x453e   :  { %15430 = vmatprep.subr.mxu1 %v16210_v44 }
0x4540   :  { %v8961_v24 = vpop.permute.xlu0 %8960 }
0x454a   :  { %v16013_v16 = vpop.eup %16012 }
0x454b   :  { %v8805_v32 = vsel %vm351_vm6, %v16013_v16, 0.0 }
0x454c   :  { %8806 = vadd.xlane.f32.xlu1 %v8805_v32 }
0x455d   :  { %8962 = vrot.lane.b32.xlu1 %v17329_v35, %s16220_s1 }
0x45d5   :  { %v8807_v41 = vpop.xlane.xlu1 %8806 }
0x45d6   :  { %16014 = vrcp.f32 %v8807_v41  ;;  %v14309_v41 = vld [vmem:[%s18176_s14] ss:$0 sm:$0xff] }
0x45d9   :  { %v8963_v45 = vpop.permute.xlu1 %8962 }
0x45e3   :  { %v16015_v6 = vpop.eup %16014 }
0x45e4   :  { %v8809_v4 = vmul.f32 %v16015_v6, %v16013_v16 }
0x45e6   :  { %15423 = vmatmul.mubr.msk.f32.vlgmr.msra.gmra.mxu1 %vm351_vm6, %v8809_v4  ;;  %v9272_v4 = vld [vmem:[%s18177_s6 + $0x18] sm:$0xff] }
0x45e7   :  { %15431 = vmatpush3.xpose.msk.msra.mxu1 %vm351_vm6, %v8963_v45  ;;  %15432 = vmatprep.mubr.msk.f32.mxu1 %vm16211_vm5, %v16210_v44  ;;  %v9271_v45 = vld [vmem:[%s18177_s6 + $0x10] sm:$0xff] }
0x45e8   :  { %15440 = vmatprep.subr.mxu1 %v16210_v44 }
0x45ea   :  { %15433 = vmatmul.mubr.msk.f32.vlgmr.msra.gmra.mxu1 %vm351_vm6, %v8961_v24 }
0x45eb   :  { %15441 = vmatpush3.msra.mxu1 %v17461_v34  ;;  %15442 = vmatprep.mubr.msk.f32.mxu1 %vm16211_vm5, %v16210_v44  ;;  %v17542_v34 = vadd.f32 %v9207_v50, %v17258_v10  ;;  %v9280_v50 = vld [vmem:[%s18178_s10 + $0x30] sm:$0xff] }
0x45ed   :  { %v9213_v48 = vsel %vm193_vm0, %v17542_v34, 0.0 }
0x46a6   :  { %v8882_v46 = vpop.f32.mrf.mxu1 }
0x46a7   :  { %15428 = vmatmul.mubr.msk.f32.vlgmr.msra.gmra.mxu0 %vm351_vm6, %v8882_v46  ;;  %v9270_v46 = vld [vmem:[%s18177_s6 + $0x8] sm:$0xff] }
0x46a8   :  { %v15424_v51 = vpop.f32.mrf.mxu1  ;;  %15437 = vmatprep.mubr.msk.f32.mxu0 %vm16211_vm5, %v16210_v44 }
0x46a9   :  { %v9281_v51 = vld [vmem:[%s18178_s10 + $0x38] sm:$0xff] }
0x46aa   :  { %v9034_v56 = vpop.f32.mrf.mxu1  ;;  %15456 = vmatprep.subr.mxu1 %v9281_v51 }
0x46ab   :  { %v9038_v60 = vmul.f32 0.35355338, %v9034_v56  ;;  %v9279_v56 = vld [vmem:[%s18178_s10 + $0x28] sm:$0xff] }
0x46ac   :  { %v15434_v39 = vpop.f32.mrf.mxu1 }
0x46ad   :  { %v9039_v61 = vsel %vm8317_vm12, -1e+09, %v9038_v60  ;;  %v9278_v60 = vld [vmem:[%s18178_s10 + $0x20] sm:$0xff] }
0x46ae   :  { %v9040_v40 = vsel %vm351_vm6, %v9039_v61, -inf }
0x46af   :  { %9041 = vmax.xlane.f32.xlu1 %v9040_v40 }
0x46b3   :  { %9214 = vadd.xlane.f32.xlu1 %v9213_v48 }
0x4738   :  { %v9042_v1 = vpop.xlane.xlu1 %9041 }
0x4739   :  { %v9043_v62 = vsub.f32 %v9039_v61, %v9042_v1 }
0x473b   :  { %v9044_v43 = vmul.f32 1.442695, %v9043_v62 }
0x473c   :  { %v9215_v59 = vpop.xlane.xlu1 %9214 }
0x473d   :  { %16016 = vpow2.f32 %v9044_v43  ;;  %v9219_v14 = vmul.f32 0.03125, %v9215_v59 }
0x473f   :  { %v9221_v15 = vsub.f32 %v17542_v34, %v9219_v14 }
0x4741   :  { %v9223_v38 = vmul.f32 %v9221_v15, %v9221_v15  ;;  %v9253_v16 = vmul.f32 %v14308_v36, %v9221_v15 }
0x4743   :  { %v9225_v22 = vsel %vm193_vm0, %v9223_v38, 0.0 }
0x474a   :  { %v16017_v3 = vpop.eup %16016 }
0x474b   :  { %v9046_v5 = vsel %vm351_vm6, %v16017_v3, 0.0 }
0x474c   :  { %9047 = vadd.xlane.f32.xlu0 %v9046_v5 }
0x4762   :  { %9051 = vrot.lane.b32.xlu0 %v17329_v35, %s18131_s26  ;;  %s18180_s26 = sld [smem:[#allocation24_spill]] }
0x4767   :  { %v8955_v10 = vpop.f32.mrf.mxu0 }
0x4768   :  { %v8959_v55 = vadd.f32 %v8955_v10, %v8716_v27  ;;  %v14313_v15 = vld [vmem:[%s18180_s26] ss:$0 sm:$0xff] }
0x4769   :  { %v15429_v52 = vpop.f32.mrf.mxu0 }
0x47d5   :  { %v9048_v8 = vpop.xlane.xlu0 %9047 }
0x47d6   :  { %16018 = vrcp.f32 %v9048_v8  ;;  %v9277_v8 = vld [vmem:[%s18178_s10 + $0x18] sm:$0xff] }
0x47d9   :  { %v9052_v49 = vpop.permute.xlu0 %9051 }
0x47da   :  { %15436 = vmatpush3.msra.mxu0 %v9052_v49  ;;  %v9276_v49 = vld [vmem:[%s18178_s10 + $0x10] sm:$0xff] }
0x47db   :  { %15445 = vmatprep.subr.mxu0 %v9272_v4 }
0x47e3   :  { %v16019_v9 = vpop.eup %16018 }
0x47e4   :  { %v9050_v63 = vmul.f32 %v16019_v9, %v16017_v3  ;;  %v9275_v9 = vld [vmem:[%s18178_s10 + $0x8] sm:$0xff] }
0x47e6   :  { %15438 = vmatmul.mubr.msk.f32.vlgmr.msra.gmra.mxu0 %vm351_vm6, %v9050_v63  ;;  %v9274_v63 = vld [vmem:[%s18178_s10] sm:$0xff] }
0x47e7   :  { %15446 = vmatpush3.msra.mxu0 %v9272_v4 }
0x47e8   :  { %15447 = vmatprep.subr.mxu0 %v9271_v45 }
0x47e9   :  { %15448 = vmatpush3.msra.mxu0 %v9271_v45 }
0x47ea   :  { %15449 = vmatprep.subr.mxu0 %v9270_v46 }
0x47eb   :  { %15450 = vmatpush3.msra.mxu0 %v9270_v46 }
0x48a6   :  { %v9123_v11 = vpop.f32.mrf.mxu0 }
0x48a7   :  { %15443 = vmatmul.mubr.msk.f32.vlgmr.msra.gmra.mxu1 %vm351_vm6, %v9123_v11  ;;  %v14310_v11 = vld [vmem:[%s18179_s2] ss:$0 sm:$0xff] }
0x48a8   :  { %v15439_v18 = vpop.f32.mrf.mxu0  ;;  %15457 = vmatpush3.msra.mxu1 %v9281_v51 }
0x48a9   :  { %15458 = vmatprep.subr.mxu1 %v9280_v50 }
0x48aa   :  { %15459 = vmatpush3.msra.mxu1 %v9280_v50 }
0x48ab   :  { %15460 = vmatprep.subr.mxu1 %v9279_v56 }
0x48ac   :  { %15461 = vmatpush3.msra.mxu1 %v9279_v56 }
0x48ad   :  { %15462 = vmatprep.subr.mxu1 %v9278_v60 }
0x48ae   :  { %15463 = vmatpush3.msra.mxu1 %v9278_v60 }
0x48af   :  { %15464 = vmatprep.subr.mxu1 %v9277_v8 }
0x48b0   :  { %15465 = vmatpush3.msra.mxu1 %v9277_v8 }
0x48b1   :  { %15466 = vmatprep.subr.mxu1 %v9276_v49 }
0x48b2   :  { %15467 = vmatpush3.msra.mxu1 %v9276_v49 }
0x48b3   :  { %15468 = vmatprep.subr.mxu1 %v9275_v9 }
0x48b4   :  { %15469 = vmatpush3.msra.mxu1 %v9275_v9 }
0x48b5   :  { %15470 = vmatprep.subr.mxu1 %v9274_v63 }
0x48b6   :  { %15471 = vmatpush3.msra.mxu1 %v9274_v63  ;;  %v14325_v63 = vld [vmem:[%s18161_s8 + $0x1] ss:$0 sm:$0xff] }
0x48b7   :  { %15491 = vmatprep.subr.mxu1 %v16210_v44 }
0x4967   :  { %v9196_v17 = vpop.f32.mrf.mxu1 }
0x4968   :  { %v9200_v58 = vadd.f32 %v9196_v17, %v8959_v55 }
0x4969   :  { %v15444_v35 = vpop.f32.mrf.mxu1 }
0x496a   :  { %v9208_v53 = vadd.f32 %v14307_v47, %v9200_v58  ;;  %v9269_v47 = vld [vmem:[%s18177_s6] sm:$0xff] }
0x496b   :  { %15451 = vmatprep.subr.mxu0 %v9269_v47 }
0x496c   :  { %v17554_v19 = vadd.f32 %v9208_v53, %v17277_v42  ;;  %15452 = vmatpush3.msra.mxu0 %v9269_v47 }
0x496e   :  { %v9216_v21 = vsel %vm193_vm0, %v17554_v19, 0.0 }
0x496f   :  { %9217 = vadd.xlane.f32.xlu1 %v9216_v21 }
0x4973   :  { %9226 = vadd.xlane.f32.xlu1 %v9225_v22 }
0x49f8   :  { %v9218_v23 = vpop.xlane.xlu1 %9217 }
0x49f9   :  { %v9220_v25 = vmul.f32 0.03125, %v9218_v23 }
0x49fb   :  { %v9222_v27 = vsub.f32 %v17554_v19, %v9220_v25 }
0x49fc   :  { %v9227_v2 = vpop.xlane.xlu1 %9226 }
0x49fd   :  { %v9231_v54 = vmul.f32 0.032258064, %v9227_v2  ;;  %v9224_v28 = vmul.f32 %v9222_v27, %v9222_v27  ;;  %v9254_v5 = vmul.f32 %v14308_v36, %v9222_v27  ;;  %v14322_v36 = vld [vmem:[%s18158_s25 + $0x30] sm:$0xff] }
0x49ff   :  { %16020 = vrsqrt.f32 %v9231_v54  ;;  %v9228_v42 = vsel %vm193_vm0, %v9224_v28, 0.0  ;;  %vm9235_vm1 = vcmp.eq.f32.partialorder %v9231_v54, inf  ;;  %v9238_v30 = vand.u32 2147483648, %v9231_v54 }
0x4a00   :  { %9229 = vadd.xlane.f32.xlu1 %v9228_v42  ;;  %vm9237_vm2 = vcmp.eq.f32.partialorder %v9231_v54, 0.0 }
0x4a0c   :  { %v16021_v29 = vpop.eup %16020 }
0x4a0d   :  { %v9234_v12 = vmul.f32 %v16021_v29, %v9231_v54 }
0x4a0f   :  { %v9236_v13 = vsel %vm9235_vm1, %v9231_v54, %v9234_v12 }
0x4a10   :  { %v9239_v31 = vsel %vm9237_vm2, %v9238_v30, %v9236_v13 }
0x4a11   :  { %v9255_v20 = vadd.f32 1e-06, %v9239_v31 }
0x4a13   :  { %16022 = vrcp.f32 %v9255_v20  ;;  %v14323_v20 = vld [vmem:[%s18158_s25 + $0x38] sm:$0xff] }
0x4a14   :  { %15475 = vmatprep.subr.mxu0 %v14323_v20 }
0x4a20   :  { %v16023_v32 = vpop.eup %16022 }
0x4a21   :  { %v9259_v6 = vmul.f32 %v16023_v32, %v9253_v16  ;;  %v14321_v16 = vld [vmem:[%s18158_s25 + $0x28] sm:$0xff]  ;;  %v14320_v32 = vld [vmem:[%s18158_s25 + $0x20] sm:$0xff]  ;;  %s18181_s25 = smov 72  }
0x4a23   :  { %v9267_v24 = vadd.f32 %v14309_v41, %v9259_v6 }
0x4a25   :  { %15453 = vmatprep.mubr.msk.f32.mxu0 %vm193_vm0, %v9267_v24 }
0x4a89   :  { %v9230_v39 = vpop.xlane.xlu1 %9229 }
0x4a8a   :  { %v9232_v61 = vmul.f32 0.032258064, %v9230_v39 }
0x4a8c   :  { %16024 = vrsqrt.f32 %v9232_v61  ;;  %vm9242_vm3 = vcmp.eq.f32.partialorder %v9232_v61, inf  ;;  %v9245_v1 = vand.u32 2147483648, %v9232_v61  ;;  %vm9244_vm4 = vcmp.eq.f32.partialorder %v9232_v61, 0.0 }
0x4a99   :  { %v16025_v40 = vpop.eup %16024 }
0x4a9a   :  { %v9241_v48 = vmul.f32 %v16025_v40, %v9232_v61 }
0x4a9c   :  { %v9243_v62 = vsel %vm9242_vm3, %v9232_v61, %v9241_v48 }
0x4a9d   :  { %v9246_v43 = vsel %vm9244_vm4, %v9245_v1, %v9243_v62  ;;  %v14318_v62 = vld [vmem:[%s18159_s29 + $0x1] ss:$0 sm:$0xff]  ;;  %s18182_s29 = smov 40  }
0x4a9e   :  { %v9256_v3 = vadd.f32 1e-06, %v9246_v43 }
0x4aa0   :  { %16026 = vrcp.f32 %v9256_v3 }
0x4aad   :  { %v16027_v10 = vpop.eup %16026 }
0x4aae   :  { %v9260_v55 = vmul.f32 %v16027_v10, %v9254_v5  ;;  %v14319_v5 = vld [vmem:[%s18160_s3 + $0x1] ss:$0 sm:$0xff] }
0x4ab0   :  { %v9268_v52 = vadd.f32 %v14309_v41, %v9260_v55 }
0x4ab2   :  { %15454 = vmatmul.mubr.msk.f32.vlgmr.msra.gmra.mxu0 %vm193_vm0, %v9268_v52 }
0x4ab3   :  { %15476 = vmatpush3.msra.mxu0 %v14323_v20 }
0x4ab4   :  { %15477 = vmatprep.subr.mxu0 %v14322_v36 }
0x4ab5   :  { %15478 = vmatpush3.msra.mxu0 %v14322_v36 }
0x4ab6   :  { %15479 = vmatprep.subr.mxu0 %v14321_v16 }
0x4ab7   :  { %15480 = vmatpush3.msra.mxu0 %v14321_v16 }
0x4ab8   :  { %15481 = vmatprep.subr.mxu0 %v14320_v32 }
0x4ab9   :  { %15482 = vmatpush3.msra.mxu0 %v14320_v32 }
0x4aba   :  { %15486 = vmatprep.subr.mxu0 %v16210_v44 }
0x4b72   :  { %v15455_v18 = vpop.f32.mrf.mxu0 }
0x4b73   :  { %v9367_v59 = vadd.f32 %v15455_v18, %v14310_v11 }
0x4b74   :  { %v9361_v14 = vpop.f32.mrf.mxu0 }
0x4b75   :  { %v9362_v17 = vadd.f32 %v14310_v11, %v9361_v14  ;;  %v9371_v35 = vmax.f32 %v9367_v59, 0.0 }
0x4b77   :  { %v9370_v58 = vmax.f32 %v9362_v17, 0.0 }
0x4b79   :  { %15472 = vmatprep.mubr.msk.f32.mxu1 %vm2450_vm13, %v9370_v58 }
0x4b7a   :  { %15473 = vmatmul.mubr.msk.f32.vlgmr.msra.gmra.mxu1 %vm2450_vm13, %v9371_v35 }
0x4b7b   :  { %15493 = vmatprep.mubr.msk.f32.mxu1 %vm16211_vm5, %v16210_v44 }
0x4c3a   :  { %v15474_v53 = vpop.f32.mrf.mxu1 }
0x4c3b   :  { %v9456_v21 = vadd.f32 %v15474_v53, %v14313_v15 }
0x4c3c   :  { %v9450_v38 = vpop.f32.mrf.mxu1 }
0x4c3d   :  { %v17585_v22 = vadd.f32 %v9456_v21, %v17554_v19  ;;  %v9451_v23 = vadd.f32 %v14313_v15, %v9450_v38 }
0x4c3f   :  { %v17588_v25 = vadd.f32 %v9451_v23, %v17542_v34  ;;  %v9468_v27 = vsel %vm193_vm0, %v17585_v22, 0.0 }
0x4c40   :  { %9469 = vadd.xlane.f32.xlu0 %v9468_v27 }
0x4c41   :  { %v9465_v2 = vsel %vm193_vm0, %v17588_v25, 0.0 }
0x4c42   :  { %9466 = vadd.xlane.f32.xlu1 %v9465_v2 }
0x4cc9   :  { %v9470_v54 = vpop.xlane.xlu0 %9469 }
0x4cca   :  { %v9472_v28 = vmul.f32 0.03125, %v9470_v54 }
0x4ccb   :  { %v9467_v42 = vpop.xlane.xlu1 %9466 }
0x4ccc   :  { %v9471_v19 = vmul.f32 0.03125, %v9467_v42  ;;  %v9474_v29 = vsub.f32 %v17585_v22, %v9472_v28 }
0x4cce   :  { %v9473_v34 = vsub.f32 %v17588_v25, %v9471_v19  ;;  %v9476_v13 = vmul.f32 %v9474_v29, %v9474_v29  ;;  %v9506_v55 = vmul.f32 %v14318_v62, %v9474_v29 }
0x4cd0   :  { %v9475_v12 = vmul.f32 %v9473_v34, %v9473_v34  ;;  %v9480_v31 = vsel %vm193_vm0, %v9476_v13, 0.0  ;;  %v9505_v43 = vmul.f32 %v14318_v62, %v9473_v34 }
0x4cd2   :  { %v9477_v30 = vsel %vm193_vm0, %v9475_v12, 0.0 }
0x4cd3   :  { %9478 = vadd.xlane.f32.xlu1 %v9477_v30 }
0x4cd7   :  { %9481 = vadd.xlane.f32.xlu1 %v9480_v31 }
0x4d5c   :  { %v9479_v41 = vpop.xlane.xlu1 %9478 }
0x4d5d   :  { %v9483_v6 = vmul.f32 0.032258064, %v9479_v41 }
0x4d5f   :  { %16028 = vrsqrt.f32 %v9483_v6  ;;  %vm9487_vm7 = vcmp.eq.f32.partialorder %v9483_v6, inf  ;;  %v9490_v47 = vand.u32 2147483648, %v9483_v6  ;;  %vm9489_vm8 = vcmp.eq.f32.partialorder %v9483_v6, 0.0 }
0x4d60   :  { %v9482_v4 = vpop.xlane.xlu1 %9481 }
0x4d61   :  { %v9484_v45 = vmul.f32 0.032258064, %v9482_v4 }
0x4d63   :  { %16030 = vrsqrt.f32 %v9484_v45  ;;  %vm9494_vm9 = vcmp.eq.f32.partialorder %v9484_v45, inf  ;;  %v9497_v61 = vand.u32 2147483648, %v9484_v45  ;;  %vm9496_vm10 = vcmp.eq.f32.partialorder %v9484_v45, 0.0 }
0x4d6c   :  { %v16029_v24 = vpop.eup %16028 }
0x4d6d   :  { %v9486_v46 = vmul.f32 %v16029_v24, %v9483_v6 }
0x4d6f   :  { %v9488_v51 = vsel %vm9487_vm7, %v9483_v6, %v9486_v46 }
0x4d70   :  { %v16031_v50 = vpop.eup %16030  ;;  %v9491_v56 = vsel %vm9489_vm8, %v9490_v47, %v9488_v51  ;;  %v17656_v51 = vld [vmem:[%s18163_s19 + $0x20] sm:$0xff] }
0x4d71   :  { %v9507_v60 = vadd.f32 1e-06, %v9491_v56  ;;  %v9493_v39 = vmul.f32 %v16031_v50, %v9484_v45  ;;  %v17660_v50 = vld [vmem:[%s18163_s19 + $0x28] sm:$0xff] }
0x4d73   :  { %16032 = vrcp.f32 %v9507_v60  ;;  %v9495_v40 = vsel %vm9494_vm9, %v9484_v45, %v9493_v39 }
0x4d74   :  { %v9498_v48 = vsel %vm9496_vm10, %v9497_v61, %v9495_v40 }
0x4d75   :  { %v9508_v1 = vadd.f32 1e-06, %v9498_v48 }
0x4d77   :  { %16034 = vrcp.f32 %v9508_v1 }
0x4d80   :  { %v16033_v3 = vpop.eup %16032 }
0x4d81   :  { %v9511_v10 = vmul.f32 %v16033_v3, %v9505_v43 }
0x4d83   :  { %v9519_v52 = vadd.f32 %v14319_v5, %v9511_v10 }
0x4d84   :  { %v16035_v8 = vpop.eup %16034 }
0x4d85   :  { %v9512_v49 = vmul.f32 %v16035_v8, %v9506_v55  ;;  %15483 = vmatprep.mubr.msk.f32.mxu0 %vm193_vm0, %v9519_v52 }
0x4d87   :  { %v9520_v9 = vadd.f32 %v14319_v5, %v9512_v49 }
0x4d89   :  { %15484 = vmatmul.mubr.msk.f32.vlgmr.msra.gmra.mxu0 %vm193_vm0, %v9520_v9 }
0x4d8a   :  { %15488 = vmatprep.mubr.msk.f32.mxu0 %vm16211_vm5, %v16210_v44 }
0x4e49   :  { %v15485_v11 = vpop.f32.mrf.mxu0 }
0x4e4a   :  { %v17610_v18 = vadd.f32 %v15485_v11, %v14325_v63 }
0x4e4b   :  { %v9606_v59 = vpop.f32.mrf.mxu0 }
0x4e4c   :  { %v17612_v14 = vadd.f32 %v14325_v63, %v9606_v59 }
0x4e4e   :  { %9623 = vrot.lane.b32.xlu1 %v17612_v14, %s16213_s5 }
0x4e52   :  { %9790 = vrot.lane.b32.xlu1 %v17612_v14, %s16212_s0 }
0x4e56   :  { %9788 = vrot.lane.b32.xlu1 %v17612_v14, %s16214_s9 }
0x4ec0   :  { %v9624_v17 = vpop.permute.xlu1 %9623 }
0x4ec1   :  { %15487 = vmatpush3.xpose.msk.msra.mxu0 %vm351_vm6, %v9624_v17 }
0x4ec2   :  { %15496 = vmatprep.subr.mxu0 %v16210_v44 }
0x4ec4   :  { %15489 = vmatmul.mubr.msk.f32.vlgmr.msra.gmra.mxu0 %vm351_vm6, %v17612_v14  ;;  %v9791_v58 = vpop.permute.xlu1 %9790 }
0x4ec5   :  { %15497 = vmatpush3.xpose.msk.msra.mxu0 %vm351_vm6, %v9791_v58  ;;  %15498 = vmatprep.mubr.msk.f32.mxu0 %vm16211_vm5, %v16210_v44 }
0x4ec6   :  { %15506 = vmatprep.subr.mxu0 %v16210_v44 }
0x4ec8   :  { %v9789_v35 = vpop.permute.xlu1 %9788 }
0x4ec9   :  { %15499 = vmatmul.mubr.msk.f32.vlgmr.msra.gmra.mxu0 %vm351_vm6, %v9789_v35 }
0x4eca   :  { %15508 = vmatprep.mubr.msk.f32.mxu0 %vm16211_vm5, %v16210_v44  ;;  %15507 = vmatpush3.msra.mxu0 %v17660_v50 }
0x4ecb   :  { %15516 = vmatprep.subr.mxu0 %v16210_v44 }
0x4f84   :  { %v9695_v15 = vpop.f32.mrf.mxu0 }
0x4f85   :  { %v9699_v53 = vmul.f32 0.35355338, %v9695_v15 }
0x4f86   :  { %v15490_v21 = vpop.f32.mrf.mxu0 }
0x4f87   :  { %v9700_v38 = vsel %vm5176_vm14, -1e+09, %v9699_v53 }
0x4f88   :  { %v9701_v23 = vsel %vm351_vm6, %v9700_v38, -inf }
0x4f89   :  { %9702 = vmax.xlane.f32.xlu0 %v9701_v23  ;;  %v9862_v27 = vpop.f32.mrf.mxu0  ;;  %v17696_v23 = vld [vmem:[%s18163_s19 + $0x30] sm:$0xff] }
0x4f8a   :  { %v9866_v2 = vmul.f32 0.35355338, %v9862_v27 }
0x4f8b   :  { %v15500_v54 = vpop.f32.mrf.mxu0 }
0x4f8c   :  { %v9867_v28 = vsel %vm5176_vm14, -1e+09, %v9866_v2 }
0x4f8d   :  { %v9868_v42 = vsel %vm351_vm6, %v9867_v28, -inf }
0x4f8e   :  { %9869 = vmax.xlane.f32.xlu1 %v9868_v42 }
0x4f9f   :  { %9712 = vrot.lane.b32.xlu0 %v17612_v14, %s16215_s16  ;;  %10101 = vrot.lane.b32.xlu1 %v17612_v14, %s16217_s22 }
0x5012   :  { %v9703_v19 = vpop.xlane.xlu0 %9702 }
0x5013   :  { %v9704_v29 = vsub.f32 %v9700_v38, %v9703_v19 }
0x5015   :  { %v9705_v34 = vmul.f32 1.442695, %v9704_v29 }
0x5016   :  { %v9713_v12 = vpop.permute.xlu0 %9712 }
0x5017   :  { %16036 = vpow2.f32 %v9705_v34  ;;  %15492 = vmatpush3.msra.mxu1 %v9713_v12  ;;  %v9870_v30 = vpop.xlane.xlu1 %9869 }
0x5018   :  { %v9871_v13 = vsub.f32 %v9867_v28, %v9870_v30  ;;  %15501 = vmatprep.subr.mxu1 %v16210_v44 }
0x501a   :  { %v9872_v31 = vmul.f32 1.442695, %v9871_v13 }
0x501b   :  { %v10102_v48 = vpop.permute.xlu1 %10101 }
0x501c   :  { %16038 = vpow2.f32 %v9872_v31 }
0x5024   :  { %v16037_v20 = vpop.eup %16036 }
0x5025   :  { %v9707_v36 = vsel %vm351_vm6, %v16037_v20, 0.0 }
0x5026   :  { %9708 = vadd.xlane.f32.xlu0 %v9707_v36 }
0x5029   :  { %v16039_v16 = vpop.eup %16038 }
0x502a   :  { %v9874_v32 = vsel %vm351_vm6, %v16039_v16, 0.0 }
0x502b   :  { %9875 = vadd.xlane.f32.xlu0 %v9874_v32 }
0x5041   :  { %9879 = vrot.lane.b32.xlu0 %v17612_v14, %s16218_s23 }
0x5045   :  { %10103 = vrot.lane.b32.xlu0 %v17612_v14, %s16216_s18 }
0x50af   :  { %v9709_v41 = vpop.xlane.xlu0 %9708 }
0x50b0   :  { %16040 = vrcp.f32 %v9709_v41 }
0x50b4   :  { %v9876_v6 = vpop.xlane.xlu0 %9875 }
0x50b5   :  { %16042 = vrcp.f32 %v9876_v6 }
0x50b8   :  { %v9880_v24 = vpop.permute.xlu0 %9879 }
0x50bc   :  { %v10104_v61 = vpop.permute.xlu0 %10103 }
0x50bd   :  { %v16041_v4 = vpop.eup %16040 }
0x50be   :  { %v9711_v45 = vmul.f32 %v16041_v4, %v16037_v20 }
0x50c0   :  { %15494 = vmatmul.mubr.msk.f32.vlgmr.msra.gmra.mxu1 %vm351_vm6, %v9711_v45 }
0x50c1   :  { %15502 = vmatpush3.msra.mxu1 %v9880_v24  ;;  %15503 = vmatprep.mubr.msk.f32.mxu1 %vm16211_vm5, %v16210_v44  ;;  %v17733_v24 = vld [vmem:[%s18163_s19 + $0x38] sm:$0xff] }
0x50c2   :  { %v16043_v46 = vpop.eup %16042  ;;  %15511 = vmatprep.subr.mxu1 %v16210_v44 }
0x50c3   :  { %v9878_v47 = vmul.f32 %v16043_v46, %v16039_v16 }
0x50c5   :  { %15504 = vmatmul.mubr.msk.f32.vlgmr.msra.gmra.mxu1 %vm351_vm6, %v9878_v47 }
0x50c6   :  { %15513 = vmatprep.mubr.msk.f32.mxu1 %vm16211_vm5, %v16210_v44  ;;  %15512 = vmatpush3.msra.mxu1 %v17656_v51 }
0x50c7   :  { %15521 = vmatprep.subr.mxu1 %v16210_v44 }
0x5180   :  { %v9784_v56 = vpop.f32.mrf.mxu1 }
0x5181   :  { %15514 = vmatmul.mubr.msk.f32.vlgmr.msra.gmra.mxu1 %vm351_vm6, %v9784_v56 }
0x5182   :  { %v15495_v60 = vpop.f32.mrf.mxu1  ;;  %15523 = vmatprep.mubr.msk.f32.mxu1 %vm16211_vm5, %v16210_v44 }
0x5185   :  { %v9951_v39 = vpop.f32.mrf.mxu1 }
0x5186   :  { %15509 = vmatmul.mubr.msk.f32.vlgmr.msra.gmra.mxu0 %vm351_vm6, %v9951_v39 }
0x5187   :  { %15517 = vmatpush3.xpose.msk.msra.mxu0 %vm351_vm6, %v10104_v61  ;;  %v15505_v40 = vpop.f32.mrf.mxu1  ;;  %15518 = vmatprep.mubr.msk.f32.mxu0 %vm16211_vm5, %v16210_v44 }
0x5188   :  { %15526 = vmatprep.subr.mxu0 %v16210_v44 }
0x518a   :  { %15519 = vmatmul.mubr.msk.f32.vlgmr.msra.gmra.mxu0 %vm351_vm6, %v10102_v48 }
0x518b   :  { %15528 = vmatprep.mubr.msk.f32.mxu0 %vm16211_vm5, %v16210_v44  ;;  %15527 = vmatpush3.msra.mxu0 %v17696_v23 }
0x518c   :  { %15536 = vmatprep.subr.mxu0 %v16210_v44 }
0x5241   :  { %v10097_v1 = vpop.f32.mrf.mxu1 }
0x5243   :  { %v15515_v62 = vpop.f32.mrf.mxu1 }
0x5246   :  { %v10024_v43 = vpop.f32.mrf.mxu0 }
0x5247   :  { %v10098_v3 = vadd.f32 %v10097_v1, %v10024_v43 }
0x5248   :  { %v15510_v5 = vpop.f32.mrf.mxu0 }
0x524a   :  { %v10175_v10 = vpop.f32.mrf.mxu0 }
0x524b   :  { %v10179_v55 = vmul.f32 0.35355338, %v10175_v10 }
0x524c   :  { %v15520_v52 = vpop.f32.mrf.mxu0 }
0x524d   :  { %v10180_v8 = vsel %vm5176_vm14, -1e+09, %v10179_v55 }
0x524e   :  { %v10181_v49 = vsel %vm351_vm6, %v10180_v8, -inf }
0x524f   :  { %10182 = vmax.xlane.f32.xlu0 %v10181_v49 }
0x5265   :  { %10192 = vrot.lane.b32.xlu0 %v17612_v14, %s16221_s28 }
0x5269   :  { %10342 = vrot.lane.b32.xlu0 %v17612_v14, %s16220_s1 }
0x52d8   :  { %v10183_v9 = vpop.xlane.xlu0 %10182 }
0x52d9   :  { %v10184_v63 = vsub.f32 %v10180_v8, %v10183_v9 }
0x52db   :  { %v10185_v11 = vmul.f32 1.442695, %v10184_v63 }
0x52dc   :  { %v10193_v59 = vpop.permute.xlu0 %10192 }
0x52dd   :  { %16044 = vpow2.f32 %v10185_v11  ;;  %15522 = vmatpush3.msra.mxu1 %v10193_v59 }
0x52de   :  { %15531 = vmatprep.subr.mxu1 %v16210_v44 }
0x52e0   :  { %v10343_v38 = vpop.permute.xlu0 %10342 }
0x52ea   :  { %v16045_v17 = vpop.eup %16044 }
0x52eb   :  { %v10187_v58 = vsel %vm351_vm6, %v16045_v17, 0.0 }
0x52ec   :  { %10188 = vadd.xlane.f32.xlu1 %v10187_v58 }
0x52fd   :  { %10344 = vrot.lane.b32.xlu1 %v17612_v14, %s18181_s25 }
0x5375   :  { %v10189_v35 = vpop.xlane.xlu1 %10188 }
0x5376   :  { %16046 = vrcp.f32 %v10189_v35 }
0x5379   :  { %v10345_v21 = vpop.permute.xlu1 %10344 }
0x5383   :  { %v16047_v15 = vpop.eup %16046 }
0x5384   :  { %v10191_v53 = vmul.f32 %v16047_v15, %v16045_v17 }
0x5386   :  { %15524 = vmatmul.mubr.msk.f32.vlgmr.msra.gmra.mxu1 %vm351_vm6, %v10191_v53 }
0x5387   :  { %15532 = vmatpush3.xpose.msk.msra.mxu1 %vm351_vm6, %v10345_v21  ;;  %15533 = vmatprep.mubr.msk.f32.mxu1 %vm16211_vm5, %v16210_v44 }
0x5388   :  { %15541 = vmatprep.subr.mxu1 %v16210_v44 }
0x538a   :  { %15534 = vmatmul.mubr.msk.f32.vlgmr.msra.gmra.mxu1 %vm351_vm6, %v10343_v38 }
0x538b   :  { %15543 = vmatprep.mubr.msk.f32.mxu1 %vm16211_vm5, %v16210_v44  ;;  %15542 = vmatpush3.msra.mxu1 %v17733_v24 }
0x538c   :  { %15551 = vmatprep.subr.mxu1 %v16210_v44 }
0x5446   :  { %v10264_v27 = vpop.f32.mrf.mxu1 }
0x5447   :  { %15529 = vmatmul.mubr.msk.f32.vlgmr.msra.gmra.mxu0 %vm351_vm6, %v10264_v27 }
0x5448   :  { %v15525_v2 = vpop.f32.mrf.mxu1  ;;  %15538 = vmatprep.mubr.msk.f32.mxu0 %vm16211_vm5, %v16210_v44 }
0x544a   :  { %v10416_v54 = vpop.f32.mrf.mxu1 }
0x544b   :  { %v10420_v28 = vmul.f32 0.35355338, %v10416_v54 }
0x544c   :  { %v15535_v42 = vpop.f32.mrf.mxu1 }
0x544d   :  { %v10421_v19 = vsel %vm5176_vm14, -1e+09, %v10420_v28 }
0x544e   :  { %v10422_v29 = vsel %vm351_vm6, %v10421_v19, -inf }
0x544f   :  { %10423 = vmax.xlane.f32.xlu0 %v10422_v29 }
0x5465   :  { %10433 = vrot.lane.b32.xlu0 %v17612_v14, %s18182_s29 }
0x5469   :  { %10751 = vrot.lane.b32.xlu0 %v17610_v18, %s16212_s0 }
0x546d   :  { %10749 = vrot.lane.b32.xlu0 %v17610_v18, %s16214_s9 }
0x54d8   :  { %v10424_v34 = vpop.xlane.xlu0 %10423 }
0x54d9   :  { %v10425_v12 = vsub.f32 %v10421_v19, %v10424_v34 }
0x54db   :  { %v10426_v30 = vmul.f32 1.442695, %v10425_v12 }
0x54dc   :  { %v10434_v13 = vpop.permute.xlu0 %10433 }
0x54dd   :  { %16048 = vpow2.f32 %v10426_v30  ;;  %15537 = vmatpush3.msra.mxu0 %v10434_v13 }
0x54de   :  { %15546 = vmatprep.subr.mxu0 %v16210_v44 }
0x54e0   :  { %v10752_v4 = vpop.permute.xlu0 %10751 }
0x54e4   :  { %v10750_v45 = vpop.permute.xlu0 %10749 }
0x54ea   :  { %v16049_v0 = vpop.eup %16048 }
0x54eb   :  { %v10428_v31 = vsel %vm351_vm6, %v16049_v0, 0.0 }
0x54ec   :  { %10429 = vadd.xlane.f32.xlu1 %v10428_v31 }
0x54fd   :  { %10584 = vrot.lane.b32.xlu1 %v17610_v18, %s16213_s5 }
0x5507   :  { %v10337_v14 = vpop.f32.mrf.mxu0 }
0x5508   :  { %v10341_v20 = vadd.f32 %v10337_v14, %v10098_v3 }
0x5509   :  { %v15530_v36 = vpop.f32.mrf.mxu0 }
0x5575   :  { %v10430_v16 = vpop.xlane.xlu1 %10429 }
0x5576   :  { %16050 = vrcp.f32 %v10430_v16 }
0x5579   :  { %v10585_v6 = vpop.permute.xlu1 %10584 }
0x5583   :  { %v16051_v32 = vpop.eup %16050 }
0x5584   :  { %v10432_v41 = vmul.f32 %v16051_v32, %v16049_v0 }
0x5586   :  { %15539 = vmatmul.mubr.msk.f32.vlgmr.msra.gmra.mxu0 %vm351_vm6, %v10432_v41 }
0x5587   :  { %15547 = vmatpush3.xpose.msk.msra.mxu0 %vm351_vm6, %v10585_v6  ;;  %15548 = vmatprep.mubr.msk.f32.mxu0 %vm16211_vm5, %v16210_v44 }
0x5588   :  { %15556 = vmatprep.subr.mxu0 %v16210_v44 }
0x558a   :  { %15549 = vmatmul.mubr.msk.f32.vlgmr.msra.gmra.mxu0 %vm351_vm6, %v17610_v18 }
0x558b   :  { %15557 = vmatpush3.xpose.msk.msra.mxu0 %vm351_vm6, %v10752_v4  ;;  %15558 = vmatprep.mubr.msk.f32.mxu0 %vm16211_vm5, %v16210_v44 }
0x558c   :  { %15566 = vmatprep.subr.mxu0 %v16210_v44 }
0x558e   :  { %15559 = vmatmul.mubr.msk.f32.vlgmr.msra.gmra.mxu0 %vm351_vm6, %v10750_v45 }
0x558f   :  { %15567 = vmatpush3.msra.mxu0 %v17660_v50  ;;  %15568 = vmatprep.mubr.msk.f32.mxu0 %vm16211_vm5, %v16210_v44 }
0x5590   :  { %15576 = vmatprep.subr.mxu0 %v16210_v44 }
0x5646   :  { %v10505_v46 = vpop.f32.mrf.mxu0 }
0x5647   :  { %15544 = vmatmul.mubr.msk.f32.vlgmr.msra.gmra.mxu1 %vm351_vm6, %v10505_v46 }
0x5648   :  { %v15540_v47 = vpop.f32.mrf.mxu0  ;;  %15553 = vmatprep.mubr.msk.f32.mxu1 %vm16211_vm5, %v16210_v44 }
0x564a   :  { %v10656_v56 = vpop.f32.mrf.mxu0 }
0x564b   :  { %v10660_v50 = vmul.f32 0.35355338, %v10656_v56 }
0x564c   :  { %v15550_v60 = vpop.f32.mrf.mxu0 }
0x564d   :  { %v10661_v39 = vsel %vm6138_vm15, -1e+09, %v10660_v50 }
0x564e   :  { %v10823_v61 = vpop.f32.mrf.mxu0  ;;  %v10662_v40 = vsel %vm351_vm6, %v10661_v39, -inf }
0x564f   :  { %v10827_v48 = vmul.f32 0.35355338, %v10823_v61  ;;  %10663 = vmax.xlane.f32.xlu0 %v10662_v40  ;;  %v14365_v40 = vld [vmem:[%s18164_s24 + $0x1] ss:$0 sm:$0xff] }
0x5650   :  { %v15560_v1 = vpop.f32.mrf.mxu0 }
0x5651   :  { %v10828_v62 = vsel %vm6138_vm15, -1e+09, %v10827_v48 }
0x5652   :  { %v10829_v43 = vsel %vm351_vm6, %v10828_v62, -inf }
0x5653   :  { %10830 = vmax.xlane.f32.xlu1 %v10829_v43 }
0x5664   :  { %10673 = vrot.lane.b32.xlu1 %v17610_v18, %s16215_s16 }
0x5668   :  { %11064 = vrot.lane.b32.xlu1 %v17610_v18, %s16216_s18 }
0x566c   :  { %11062 = vrot.lane.b32.xlu1 %v17610_v18, %s16217_s22 }
0x56d8   :  { %v10664_v3 = vpop.xlane.xlu0 %10663 }
0x56d9   :  { %v10665_v5 = vsub.f32 %v10661_v39, %v10664_v3 }
0x56db   :  { %v10666_v10 = vmul.f32 1.442695, %v10665_v5 }
0x56dc   :  { %v10831_v55 = vpop.xlane.xlu1 %10830 }
0x56dd   :  { %16052 = vpow2.f32 %v10666_v10  ;;  %v10832_v52 = vsub.f32 %v10828_v62, %v10831_v55 }
0x56df   :  { %v10833_v8 = vmul.f32 1.442695, %v10832_v52 }
0x56e0   :  { %v10674_v49 = vpop.permute.xlu1 %10673 }
0x56e1   :  { %16054 = vpow2.f32 %v10833_v8  ;;  %15552 = vmatpush3.msra.mxu1 %v10674_v49 }
0x56e2   :  { %15561 = vmatprep.subr.mxu1 %v16210_v44 }
0x56e4   :  { %v11065_v42 = vpop.permute.xlu1 %11064 }
0x56ea   :  { %v16053_v9 = vpop.eup %16052 }
0x56eb   :  { %v10668_v63 = vsel %vm351_vm6, %v16053_v9, 0.0 }
0x56ec   :  { %10669 = vadd.xlane.f32.xlu0 %v10668_v63 }
0x56ee   :  { %v16055_v11 = vpop.eup %16054 }
0x56ef   :  { %v10835_v59 = vsel %vm351_vm6, %v16055_v11, 0.0 }
0x56f0   :  { %10836 = vadd.xlane.f32.xlu0 %v10835_v59 }
0x5706   :  { %10840 = vrot.lane.b32.xlu0 %v17610_v18, %s16218_s23 }
0x5707   :  { %v10578_v17 = vpop.f32.mrf.mxu1 }
0x5708   :  { %v17757_v58 = vadd.f32 %v10578_v17, %v10341_v20 }
0x5709   :  { %v15545_v35 = vpop.f32.mrf.mxu1 }
0x570a   :  { %v11550_v1 = vadd.f32 %v14365_v40, %v17757_v58 }
0x5775   :  { %v10670_v15 = vpop.xlane.xlu0 %10669 }
0x5776   :  { %16056 = vrcp.f32 %v10670_v15  ;;  %v14381_v15 = vld [vmem:[%s18165_s30 + $0x38] sm:$0xff] }
0x5779   :  { %v10837_v53 = vpop.xlane.xlu0 %10836 }
0x577a   :  { %16058 = vrcp.f32 %v10837_v53 }
0x577d   :  { %v10841_v27 = vpop.permute.xlu0 %10840 }
0x5783   :  { %v16057_v21 = vpop.eup %16056 }
0x5784   :  { %v10672_v38 = vmul.f32 %v16057_v21, %v16053_v9  ;;  %v14380_v21 = vld [vmem:[%s18165_s30 + $0x30] sm:$0xff] }
0x5786   :  { %15554 = vmatmul.mubr.msk.f32.vlgmr.msra.gmra.mxu1 %vm351_vm6, %v10672_v38  ;;  %v14379_v38 = vld [vmem:[%s18165_s30 + $0x28] sm:$0xff] }
0x5787   :  { %v16059_v2 = vpop.eup %16058  ;;  %15562 = vmatpush3.msra.mxu1 %v10841_v27  ;;  %15563 = vmatprep.mubr.msk.f32.mxu1 %vm16211_vm5, %v16210_v44  ;;  %v14378_v27 = vld [vmem:[%s18165_s30 + $0x20] sm:$0xff] }
0x5788   :  { %v10839_v54 = vmul.f32 %v16059_v2, %v16055_v11  ;;  %15571 = vmatprep.subr.mxu1 %v16210_v44 }
0x578a   :  { %15564 = vmatmul.mubr.msk.f32.vlgmr.msra.gmra.mxu1 %vm351_vm6, %v10839_v54 }
0x578b   :  { %15572 = vmatpush3.msra.mxu1 %v17656_v51  ;;  %15573 = vmatprep.mubr.msk.f32.mxu1 %vm16211_vm5, %v16210_v44  ;;  %v11063_v51 = vpop.permute.xlu1 %11062 }
0x578c   :  { %15581 = vmatprep.subr.mxu1 %v16210_v44 }
0x5846   :  { %v10745_v28 = vpop.f32.mrf.mxu1 }
0x5847   :  { %15574 = vmatmul.mubr.msk.f32.vlgmr.msra.gmra.mxu1 %vm351_vm6, %v10745_v28 }
0x5848   :  { %v15555_v19 = vpop.f32.mrf.mxu1  ;;  %15583 = vmatprep.mubr.msk.f32.mxu1 %vm16211_vm5, %v16210_v44 }
0x584a   :  { %v10912_v29 = vpop.f32.mrf.mxu1 }
0x584b   :  { %15569 = vmatmul.mubr.msk.f32.vlgmr.msra.gmra.mxu0 %vm351_vm6, %v10912_v29 }
0x584c   :  { %15577 = vmatpush3.xpose.msk.msra.mxu0 %vm351_vm6, %v11065_v42  ;;  %v15565_v34 = vpop.f32.mrf.mxu1  ;;  %15578 = vmatprep.mubr.msk.f32.mxu0 %vm16211_vm5, %v16210_v44 }
0x584d   :  { %15586 = vmatprep.subr.mxu0 %v16210_v44 }
0x584f   :  { %15579 = vmatmul.mubr.msk.f32.vlgmr.msra.gmra.mxu0 %vm351_vm6, %v11063_v51  ;;  %v14383_v51 = vld [vmem:[%s18170_s21 + $0x1] ss:$0 sm:$0xff] }
0x5850   :  { %15587 = vmatpush3.msra.mxu0 %v17696_v23  ;;  %15588 = vmatprep.mubr.msk.f32.mxu0 %vm16211_vm5, %v16210_v44 }
0x5851   :  { %15596 = vmatprep.subr.mxu0 %v16210_v44 }
0x5907   :  { %v11058_v12 = vpop.f32.mrf.mxu1 }
0x5909   :  { %v15575_v30 = vpop.f32.mrf.mxu1 }
0x590b   :  { %v10985_v13 = vpop.f32.mrf.mxu0 }
0x590c   :  { %v11059_v0 = vadd.f32 %v11058_v12, %v10985_v13 }
0x590d   :  { %v15570_v31 = vpop.f32.mrf.mxu0 }
0x590f   :  { %v11136_v14 = vpop.f32.mrf.mxu0 }
0x5910   :  { %v11140_v20 = vmul.f32 0.35355338, %v11136_v14 }
0x5911   :  { %v15580_v36 = vpop.f32.mrf.mxu0 }
0x5912   :  { %v11141_v16 = vsel %vm6138_vm15, -1e+09, %v11140_v20 }
0x5913   :  { %v11142_v32 = vsel %vm351_vm6, %v11141_v16, -inf }
0x5914   :  { %11143 = vmax.xlane.f32.xlu0 %v11142_v32 }
0x592a   :  { %11153 = vrot.lane.b32.xlu0 %v17610_v18, %s16221_s28 }
0x592e   :  { %11303 = vrot.lane.b32.xlu0 %v17610_v18, %s16220_s1 }
0x599d   :  { %v11144_v23 = vpop.xlane.xlu0 %11143 }
0x599e   :  { %v11145_v41 = vsub.f32 %v11141_v16, %v11144_v23 }
0x59a0   :  { %v11146_v6 = vmul.f32 1.442695, %v11145_v41 }
0x59a1   :  { %v11154_v4 = vpop.permute.xlu0 %11153 }
0x59a2   :  { %16060 = vpow2.f32 %v11146_v6  ;;  %15582 = vmatpush3.msra.mxu1 %v11154_v4 }
0x59a3   :  { %15591 = vmatprep.subr.mxu1 %v16210_v44 }
0x59a5   :  { %v11304_v39 = vpop.permute.xlu0 %11303 }
0x59af   :  { %v16061_v45 = vpop.eup %16060 }
0x59b0   :  { %v11148_v46 = vsel %vm351_vm6, %v16061_v45, 0.0 }
0x59b1   :  { %11149 = vadd.xlane.f32.xlu1 %v11148_v46 }
0x59c2   :  { %11305 = vrot.lane.b32.xlu1 %v17610_v18, %s18181_s25 }
0x5a3a   :  { %v11150_v47 = vpop.xlane.xlu1 %11149 }
0x5a3b   :  { %16062 = vrcp.f32 %v11150_v47 }
0x5a3e   :  { %v11306_v60 = vpop.permute.xlu1 %11305 }
0x5a48   :  { %v16063_v56 = vpop.eup %16062 }
0x5a49   :  { %v11152_v50 = vmul.f32 %v16063_v56, %v16061_v45 }
0x5a4b   :  { %15584 = vmatmul.mubr.msk.f32.vlgmr.msra.gmra.mxu1 %vm351_vm6, %v11152_v50  ;;  %v14368_v50 = vld [vmem:[%s18167_s12 + $0x1] ss:$0 sm:$0xff] }
0x5a4c   :  { %15592 = vmatpush3.xpose.msk.msra.mxu1 %vm351_vm6, %v11306_v60  ;;  %15593 = vmatprep.mubr.msk.f32.mxu1 %vm16211_vm5, %v16210_v44 }
0x5a4d   :  { %15601 = vmatprep.subr.mxu1 %v16210_v44 }
0x5a4f   :  { %15594 = vmatmul.mubr.msk.f32.vlgmr.msra.gmra.mxu1 %vm351_vm6, %v11304_v39 }
0x5a50   :  { %15602 = vmatpush3.msra.mxu1 %v17733_v24  ;;  %15603 = vmatprep.mubr.msk.f32.mxu1 %vm16211_vm5, %v16210_v44  ;;  %v17809_v24 = vadd.f32 %v11550_v1, %v17588_v25  ;;  %v14372_v1 = vld [vmem:[%s18168_s20 + $0x30] sm:$0xff] }
0x5a51   :  { %15617 = vmatprep.subr.mxu1 %v14381_v15 }
0x5a52   :  { %v11558_v55 = vsel %vm193_vm0, %v17809_v24, 0.0 }
0x5b0b   :  { %v11225_v61 = vpop.f32.mrf.mxu1 }
0x5b0c   :  { %15589 = vmatmul.mubr.msk.f32.vlgmr.msra.gmra.mxu0 %vm351_vm6, %v11225_v61  ;;  %v14369_v61 = vld [vmem:[%s18169_s27 + $0x1] ss:$0 sm:$0xff] }
0x5b0d   :  { %v15585_v48 = vpop.f32.mrf.mxu1  ;;  %15598 = vmatprep.mubr.msk.f32.mxu0 %vm16211_vm5, %v16210_v44 }
0x5b0e   :  { %v14373_v48 = vld [vmem:[%s18168_s20 + $0x38] sm:$0xff] }
0x5b0f   :  { %v11377_v62 = vpop.f32.mrf.mxu1 }
0x5b10   :  { %v11381_v43 = vmul.f32 0.35355338, %v11377_v62 }
0x5b11   :  { %v15595_v3 = vpop.f32.mrf.mxu1 }
0x5b12   :  { %v11382_v5 = vsel %vm6138_vm15, -1e+09, %v11381_v43  ;;  %v14371_v43 = vld [vmem:[%s18168_s20 + $0x28] sm:$0xff]  ;;  %v14370_v3 = vld [vmem:[%s18168_s20 + $0x20] sm:$0xff] }
0x5b13   :  { %v11383_v10 = vsel %vm351_vm6, %v11382_v5, -inf }
0x5b14   :  { %11384 = vmax.xlane.f32.xlu1 %v11383_v10 }
0x5b18   :  { %11559 = vadd.xlane.f32.xlu1 %v11558_v55 }
0x5b9d   :  { %v11385_v52 = vpop.xlane.xlu1 %11384 }
0x5b9e   :  { %v11386_v8 = vsub.f32 %v11382_v5, %v11385_v52 }
0x5ba0   :  { %v11387_v49 = vmul.f32 1.442695, %v11386_v8 }
0x5ba1   :  { %v11560_v2 = vpop.xlane.xlu1 %11559 }
0x5ba2   :  { %16064 = vpow2.f32 %v11387_v49  ;;  %v11564_v54 = vmul.f32 0.03125, %v11560_v2 }
0x5ba4   :  { %v11566_v19 = vsub.f32 %v17809_v24, %v11564_v54 }
0x5ba6   :  { %v11568_v12 = vmul.f32 %v11566_v19, %v11566_v19  ;;  %v11598_v60 = vmul.f32 %v14368_v50, %v11566_v19 }
0x5baf   :  { %v16065_v9 = vpop.eup %16064 }
0x5bb0   :  { %v11389_v63 = vsel %vm351_vm6, %v16065_v9, 0.0 }
0x5bb1   :  { %11390 = vadd.xlane.f32.xlu0 %v11389_v63 }
0x5bc7   :  { %11394 = vrot.lane.b32.xlu0 %v17610_v18, %s18182_s29 }
0x5bcc   :  { %v11298_v57 = vpop.f32.mrf.mxu0 }
0x5bcd   :  { %v11302_v25 = vadd.f32 %v11298_v57, %v11059_v0  ;;  %v11570_v0 = vsel %vm193_vm0, %v11568_v12, 0.0 }
0x5bce   :  { %v15590_v11 = vpop.f32.mrf.mxu0 }
0x5c3a   :  { %v11391_v59 = vpop.xlane.xlu0 %11390 }
0x5c3b   :  { %16066 = vrcp.f32 %v11391_v59 }
0x5c3e   :  { %v11395_v17 = vpop.permute.xlu0 %11394 }
0x5c3f   :  { %15597 = vmatpush3.msra.mxu0 %v11395_v17  ;;  %v14375_v17 = vld [vmem:[%s18171_s7 + $0x1] ss:$0 sm:$0xff] }
0x5c40   :  { %15606 = vmatprep.subr.mxu0 %v14373_v48 }
0x5c48   :  { %v16067_v58 = vpop.eup %16066 }
0x5c49   :  { %v11393_v35 = vmul.f32 %v16067_v58, %v16065_v9 }
0x5c4b   :  { %15599 = vmatmul.mubr.msk.f32.vlgmr.msra.gmra.mxu0 %vm351_vm6, %v11393_v35 }
0x5c4c   :  { %15607 = vmatpush3.msra.mxu0 %v14373_v48 }
0x5c4d   :  { %15608 = vmatprep.subr.mxu0 %v14372_v1 }
0x5c4e   :  { %15609 = vmatpush3.msra.mxu0 %v14372_v1 }
0x5c4f   :  { %15610 = vmatprep.subr.mxu0 %v14371_v43 }
0x5c50   :  { %15611 = vmatpush3.msra.mxu0 %v14371_v43 }
0x5c51   :  { %15612 = vmatprep.subr.mxu0 %v14370_v3 }
0x5c52   :  { %15613 = vmatpush3.msra.mxu0 %v14370_v3 }
0x5c53   :  { %15628 = vmatprep.subr.mxu0 %v16210_v44 }
0x5d0b   :  { %v11466_v53 = vpop.f32.mrf.mxu0 }
0x5d0c   :  { %15604 = vmatmul.mubr.msk.f32.vlgmr.msra.gmra.mxu1 %vm351_vm6, %v11466_v53 }
0x5d0d   :  { %15618 = vmatpush3.msra.mxu1 %v14381_v15  ;;  %v15600_v18 = vpop.f32.mrf.mxu0  ;;  %15625 = vmatprep.mubr.msk.f32.mxu1 %vm193_vm0, %v17309_v33 }
0x5d0e   :  { %15619 = vmatprep.subr.mxu1 %v14380_v21 }
0x5d0f   :  { %15620 = vmatpush3.msra.mxu1 %v14380_v21 }
0x5d10   :  { %15621 = vmatprep.subr.mxu1 %v14379_v38 }
0x5d11   :  { %15622 = vmatpush3.msra.mxu1 %v14379_v38 }
0x5d12   :  { %15623 = vmatprep.subr.mxu1 %v14378_v27 }
0x5d13   :  { %15624 = vmatpush3.msra.mxu1 %v14378_v27 }
0x5d14   :  { %15626 = vmatmul.mubr.msk.f32.vlgmr.msra.gmra.mxu1 %vm193_vm0, %v17312_v26  ;;  %15633 = vmatprep.subr.mxu1 %v16210_v44 }
0x5d15   :  { %15635 = vmatprep.mubr.msk.f32.mxu1 %vm16211_vm5, %v16210_v44 }
0x5dcc   :  { %v11539_v33 = vpop.f32.mrf.mxu1 }
0x5dcd   :  { %v11543_v28 = vadd.f32 %v11539_v33, %v11302_v25 }
0x5dce   :  { %v15605_v42 = vpop.f32.mrf.mxu1 }
0x5dcf   :  { %v11551_v29 = vadd.f32 %v14365_v40, %v11543_v28 }
0x5dd1   :  { %v17832_v34 = vadd.f32 %v11551_v29, %v17585_v22 }
0x5dd3   :  { %v11561_v26 = vsel %vm193_vm0, %v17832_v34, 0.0 }
0x5dd4   :  { %v15627_v30 = vpop.f32.mrf.mxu1  ;;  %11562 = vadd.xlane.f32.xlu1 %v11561_v26 }
0x5dd5   :  { %v17837_v13 = vadd.f32 %v15627_v30, %v14383_v51 }
0x5dd6   :  { %v11787_v41 = vpop.f32.mrf.mxu1 }
0x5dd7   :  { %v17842_v46 = vadd.f32 %v14383_v51, %v11787_v41 }
0x5dd8   :  { %11571 = vadd.xlane.f32.xlu1 %v11570_v0 }
0x5e5d   :  { %v11563_v31 = vpop.xlane.xlu1 %11562 }
0x5e5e   :  { %v11565_v14 = vmul.f32 0.03125, %v11563_v31 }
0x5e60   :  { %v11567_v20 = vsub.f32 %v17832_v34, %v11565_v14 }
0x5e61   :  { %v11572_v36 = vpop.xlane.xlu1 %11571 }
0x5e62   :  { %v11576_v16 = vmul.f32 0.032258064, %v11572_v36  ;;  %v11569_v22 = vmul.f32 %v11567_v20, %v11567_v20  ;;  %v11599_v57 = vmul.f32 %v14368_v50, %v11567_v20  ;;  %v17901_v50 = vld [vmem:[%s18173_s11 + $0x20] sm:$0xff] }
0x5e64   :  { %16068 = vrsqrt.f32 %v11576_v16  ;;  %v11573_v32 = vsel %vm193_vm0, %v11569_v22, 0.0  ;;  %vm11580_vm14 = vcmp.eq.f32.partialorder %v11576_v16, inf  ;;  %v11583_v4 = vand.u32 2147483648, %v11576_v16 }
0x5e65   :  { %11574 = vadd.xlane.f32.xlu1 %v11573_v32  ;;  %vm11582_vm15 = vcmp.eq.f32.partialorder %v11576_v16, 0.0 }
0x5e71   :  { %v16069_v23 = vpop.eup %16068 }
0x5e72   :  { %v11579_v6 = vmul.f32 %v16069_v23, %v11576_v16 }
0x5e74   :  { %v11581_v45 = vsel %vm11580_vm14, %v11576_v16, %v11579_v6 }
0x5e75   :  { %v11584_v47 = vsel %vm11582_vm15, %v11583_v4, %v11581_v45 }
0x5e76   :  { %v11600_v56 = vadd.f32 1e-06, %v11584_v47  ;;  %11970 = vrot.lane.b32.xlu1 %v17842_v46, %s16214_s9 }
0x5e78   :  { %16070 = vrcp.f32 %v11600_v56 }
0x5e85   :  { %v16071_v39 = vpop.eup %16070 }
0x5e86   :  { %v11604_v40 = vmul.f32 %v16071_v39, %v11598_v60  ;;  %v17905_v60 = vld [vmem:[%s18173_s11 + $0x28] sm:$0xff] }
0x5e88   :  { %v11612_v62 = vadd.f32 %v14369_v61, %v11604_v40 }
0x5e8a   :  { %15614 = vmatprep.mubr.msk.f32.mxu0 %vm193_vm0, %v11612_v62 }
0x5eee   :  { %v11575_v5 = vpop.xlane.xlu1 %11574 }
0x5eef   :  { %v11577_v10 = vmul.f32 0.032258064, %v11575_v5 }
0x5ef1   :  { %16072 = vrsqrt.f32 %v11577_v10  ;;  %vm11587_vm1 = vcmp.eq.f32.partialorder %v11577_v10, inf  ;;  %v11590_v8 = vand.u32 2147483648, %v11577_v10  ;;  %vm11589_vm2 = vcmp.eq.f32.partialorder %v11577_v10, 0.0 }
0x5ef2   :  { %v11971_v21 = vpop.permute.xlu1 %11970 }
0x5efe   :  { %v16073_v55 = vpop.eup %16072 }
0x5eff   :  { %v11586_v52 = vmul.f32 %v16073_v55, %v11577_v10 }
0x5f01   :  { %v11588_v49 = vsel %vm11587_vm1, %v11577_v10, %v11586_v52 }
0x5f02   :  { %v11591_v9 = vsel %vm11589_vm2, %v11590_v8, %v11588_v49 }
0x5f03   :  { %v11601_v63 = vadd.f32 1e-06, %v11591_v9 }
0x5f05   :  { %16074 = vrcp.f32 %v11601_v63 }
0x5f12   :  { %v16075_v25 = vpop.eup %16074 }
0x5f13   :  { %v11605_v11 = vmul.f32 %v16075_v25, %v11599_v57 }
0x5f15   :  { %v11613_v59 = vadd.f32 %v14369_v61, %v11605_v11 }
0x5f17   :  { %15615 = vmatmul.mubr.msk.f32.vlgmr.msra.gmra.mxu0 %vm193_vm0, %v11613_v59 }
0x5f18   :  { %15629 = vmatpush3.xpose.msk.msra.mxu0 %vm351_vm6, %v17842_v46  ;;  %15630 = vmatprep.mubr.msk.f32.mxu0 %vm16211_vm5, %v16210_v44 }
0x5f19   :  { %15638 = vmatprep.subr.mxu0 %v16210_v44 }
0x5fd7   :  { %v15616_v58 = vpop.f32.mrf.mxu0 }
0x5fd8   :  { %v17861_v35 = vadd.f32 %v15616_v58, %v14375_v17 }
0x5fd9   :  { %v11699_v15 = vpop.f32.mrf.mxu0 }
0x5fda   :  { %v17863_v53 = vadd.f32 %v14375_v17, %v11699_v15 }
0x5fdc   :  { %11968 = vrot.lane.b32.xlu0 %v17863_v53, %s16214_s9  ;;  %15631 = vmatmul.mubr.msk.f32.vlgmr.msra.gmra.mxu0 %vm351_vm6, %v17863_v53 }
0x5fdd   :  { %15639 = vmatpush3.xpose.msk.msra.mxu0 %vm351_vm6, %v11971_v21  ;;  %15640 = vmatprep.mubr.msk.f32.mxu0 %vm16211_vm5, %v16210_v44 }
0x5fde   :  { %15648 = vmatprep.subr.mxu0 %v16210_v44 }
0x604e   :  { %v11969_v18 = vpop.permute.xlu0 %11968 }
0x604f   :  { %15641 = vmatmul.mubr.msk.f32.vlgmr.msra.gmra.mxu0 %vm351_vm6, %v11969_v18 }
0x6050   :  { %15650 = vmatprep.mubr.msk.f32.mxu0 %vm16211_vm5, %v16210_v44  ;;  %15649 = vmatpush3.msra.mxu0 %v17905_v60 }
0x6051   :  { %15658 = vmatprep.subr.mxu0 %v16210_v44 }
0x609c   :  { %v11875_v38 = vpop.f32.mrf.mxu0 }
0x609d   :  { %v11879_v27 = vmul.f32 0.35355338, %v11875_v38 }
0x609e   :  { %v15632_v2 = vpop.f32.mrf.mxu0 }
0x609f   :  { %v11880_v54 = vsel %vm7356_vm11, -1e+09, %v11879_v27  ;;  %v17941_v27 = vld [vmem:[%s18173_s11 + $0x30] sm:$0xff] }
0x60a0   :  { %v11881_v33 = vsel %vm351_vm6, %v11880_v54, -inf }
0x60a1   :  { %11882 = vmax.xlane.f32.xlu0 %v11881_v33 }
0x610f   :  { %v12042_v28 = vpop.f32.mrf.mxu0 }
0x6110   :  { %v12046_v42 = vmul.f32 0.35355338, %v12042_v28 }
0x6111   :  { %v15642_v19 = vpop.f32.mrf.mxu0 }
0x6112   :  { %v12047_v29 = vsel %vm7356_vm11, -1e+09, %v12046_v42 }
0x6113   :  { %v12048_v51 = vsel %vm351_vm6, %v12047_v29, -inf }
0x6114   :  { %12049 = vmax.xlane.f32.xlu1 %v12048_v51 }
0x6125   :  { %12059 = vrot.lane.b32.xlu1 %v17842_v46, %s16212_s0 }
0x6129   :  { %12281 = vrot.lane.b32.xlu1 %v17863_v53, %s16217_s22 }
0x612a   :  { %v11883_v26 = vpop.xlane.xlu0 %11882 }
0x612b   :  { %v11884_v12 = vsub.f32 %v11880_v54, %v11883_v26 }
0x612d   :  { %v11885_v30 = vmul.f32 1.442695, %v11884_v12 }
0x612f   :  { %16076 = vpow2.f32 %v11885_v30 }
0x613c   :  { %v16077_v0 = vpop.eup %16076 }
0x613d   :  { %v11887_v31 = vsel %vm351_vm6, %v16077_v0, 0.0 }
0x613e   :  { %11888 = vadd.xlane.f32.xlu0 %v11887_v31 }
0x619d   :  { %v12050_v14 = vpop.xlane.xlu1 %12049 }
0x619e   :  { %v12051_v20 = vsub.f32 %v12047_v29, %v12050_v14 }
0x61a0   :  { %v12052_v36 = vmul.f32 1.442695, %v12051_v20 }
0x61a1   :  { %v12060_v45 = vpop.permute.xlu1 %12059 }
0x61a2   :  { %16078 = vpow2.f32 %v12052_v36 }
0x61a5   :  { %v12282_v62 = vpop.permute.xlu1 %12281 }
0x61af   :  { %v16079_v16 = vpop.eup %16078 }
0x61b0   :  { %v12054_v22 = vsel %vm351_vm6, %v16079_v16, 0.0 }
0x61b1   :  { %12055 = vadd.xlane.f32.xlu0 %v12054_v22 }
0x61c7   :  { %11892 = vrot.lane.b32.xlu0 %v17842_v46, %s16213_s5  ;;  %v11889_v32 = vpop.xlane.xlu0 %11888 }
0x61c8   :  { %16080 = vrcp.f32 %v11889_v32 }
0x61cb   :  { %12283 = vrot.lane.b32.xlu0 %v17842_v46, %s16217_s22 }
0x61d5   :  { %v16081_v41 = vpop.eup %16080 }
0x61d6   :  { %v11891_v6 = vmul.f32 %v16081_v41, %v16077_v0 }
0x623a   :  { %v12056_v23 = vpop.xlane.xlu0 %12055 }
0x623b   :  { %16082 = vrcp.f32 %v12056_v23  ;;  %v17979_v23 = vld [vmem:[%s18173_s11 + $0x38] sm:$0xff] }
0x623e   :  { %v11893_v4 = vpop.permute.xlu0 %11892 }
0x623f   :  { %15634 = vmatpush3.msra.mxu1 %v11893_v4 }
0x6240   :  { %15636 = vmatmul.mubr.msk.f32.vlgmr.msra.gmra.mxu1 %vm351_vm6, %v11891_v6  ;;  %15643 = vmatprep.subr.mxu1 %v16210_v44 }
0x6241   :  { %15644 = vmatpush3.msra.mxu1 %v12060_v45  ;;  %15645 = vmatprep.mubr.msk.f32.mxu1 %vm16211_vm5, %v16210_v44 }
0x6242   :  { %15653 = vmatprep.subr.mxu1 %v16210_v44  ;;  %v12284_v48 = vpop.permute.xlu0 %12283 }
0x6248   :  { %v16083_v47 = vpop.eup %16082 }
0x6249   :  { %v12058_v56 = vmul.f32 %v16083_v47, %v16079_v16 }
0x624b   :  { %15646 = vmatmul.mubr.msk.f32.vlgmr.msra.gmra.mxu1 %vm351_vm6, %v12058_v56 }
0x624c   :  { %15655 = vmatprep.mubr.msk.f32.mxu1 %vm16211_vm5, %v16210_v44  ;;  %15654 = vmatpush3.msra.mxu1 %v17901_v50 }
0x624d   :  { %15663 = vmatprep.subr.mxu1 %v16210_v44 }
0x6300   :  { %v11964_v39 = vpop.f32.mrf.mxu1 }
0x6301   :  { %15656 = vmatmul.mubr.msk.f32.vlgmr.msra.gmra.mxu1 %vm351_vm6, %v11964_v39 }
0x6302   :  { %v15637_v61 = vpop.f32.mrf.mxu1  ;;  %15665 = vmatprep.mubr.msk.f32.mxu1 %vm16211_vm5, %v16210_v44 }
0x630b   :  { %v12131_v40 = vpop.f32.mrf.mxu1 }
0x630c   :  { %15651 = vmatmul.mubr.msk.f32.vlgmr.msra.gmra.mxu0 %vm351_vm6, %v12131_v40 }
0x630d   :  { %15659 = vmatpush3.xpose.msk.msra.mxu0 %vm351_vm6, %v12284_v48  ;;  %v15647_v1 = vpop.f32.mrf.mxu1  ;;  %15660 = vmatprep.mubr.msk.f32.mxu0 %vm16211_vm5, %v16210_v44 }
0x630e   :  { %15668 = vmatprep.subr.mxu0 %v16210_v44 }
0x6310   :  { %15661 = vmatmul.mubr.msk.f32.vlgmr.msra.gmra.mxu0 %vm351_vm6, %v12282_v62 }
0x6311   :  { %15670 = vmatprep.mubr.msk.f32.mxu0 %vm16211_vm5, %v16210_v44  ;;  %15669 = vmatpush3.msra.mxu0 %v17941_v27 }
0x6312   :  { %15678 = vmatprep.subr.mxu0 %v16210_v44 }
0x63c1   :  { %v12277_v43 = vpop.f32.mrf.mxu1 }
0x63c3   :  { %v15657_v3 = vpop.f32.mrf.mxu1 }
0x63cc   :  { %v12204_v5 = vpop.f32.mrf.mxu0 }
0x63cd   :  { %v12278_v10 = vadd.f32 %v12277_v43, %v12204_v5 }
0x63ce   :  { %v15652_v55 = vpop.f32.mrf.mxu0 }
0x63d0   :  { %v12355_v52 = vpop.f32.mrf.mxu0 }
0x63d1   :  { %v12359_v8 = vmul.f32 0.35355338, %v12355_v52 }
0x63d2   :  { %v15662_v49 = vpop.f32.mrf.mxu0 }
0x63d3   :  { %v12360_v9 = vsel %vm7356_vm11, -1e+09, %v12359_v8 }
0x63d4   :  { %v12361_v63 = vsel %vm351_vm6, %v12360_v9, -inf }
0x63d5   :  { %12362 = vmax.xlane.f32.xlu0 %v12361_v63 }
0x63eb   :  { %12372 = vrot.lane.b32.xlu0 %v17842_v46, %s16216_s18 }
0x63ef   :  { %12522 = vrot.lane.b32.xlu0 %v17863_v53, %s16220_s1 }
0x645e   :  { %v12363_v57 = vpop.xlane.xlu0 %12362 }
0x645f   :  { %v12364_v25 = vsub.f32 %v12360_v9, %v12363_v57 }
0x6461   :  { %v12365_v11 = vmul.f32 1.442695, %v12364_v25 }
0x6462   :  { %v12373_v59 = vpop.permute.xlu0 %12372 }
0x6463   :  { %16084 = vpow2.f32 %v12365_v11  ;;  %15664 = vmatpush3.msra.mxu1 %v12373_v59 }
0x6464   :  { %15673 = vmatprep.subr.mxu1 %v16210_v44 }
0x6466   :  { %v12523_v38 = vpop.permute.xlu0 %12522 }
0x6470   :  { %v16085_v17 = vpop.eup %16084 }
0x6471   :  { %v12367_v58 = vsel %vm351_vm6, %v16085_v17, 0.0 }
0x6472   :  { %12368 = vadd.xlane.f32.xlu1 %v12367_v58 }
0x6483   :  { %12524 = vrot.lane.b32.xlu1 %v17842_v46, %s16220_s1 }
0x64fb   :  { %v12369_v15 = vpop.xlane.xlu1 %12368 }
0x64fc   :  { %16086 = vrcp.f32 %v12369_v15 }
0x64ff   :  { %v12525_v18 = vpop.permute.xlu1 %12524 }
0x6509   :  { %v16087_v21 = vpop.eup %16086 }
0x650a   :  { %v12371_v53 = vmul.f32 %v16087_v21, %v16085_v17 }
0x650c   :  { %15666 = vmatmul.mubr.msk.f32.vlgmr.msra.gmra.mxu1 %vm351_vm6, %v12371_v53 }
0x650d   :  { %15674 = vmatpush3.xpose.msk.msra.mxu1 %vm351_vm6, %v12525_v18  ;;  %15675 = vmatprep.mubr.msk.f32.mxu1 %vm16211_vm5, %v16210_v44 }
0x650e   :  { %15683 = vmatprep.subr.mxu1 %v16210_v44 }
0x6510   :  { %15676 = vmatmul.mubr.msk.f32.vlgmr.msra.gmra.mxu1 %vm351_vm6, %v12523_v38 }
0x6511   :  { %15685 = vmatprep.mubr.msk.f32.mxu1 %vm16211_vm5, %v16210_v44  ;;  %15684 = vmatpush3.msra.mxu1 %v17979_v23 }
0x6512   :  { %15693 = vmatprep.subr.mxu1 %v16210_v44 }
0x65cc   :  { %v12444_v2 = vpop.f32.mrf.mxu1 }
0x65cd   :  { %15671 = vmatmul.mubr.msk.f32.vlgmr.msra.gmra.mxu0 %vm351_vm6, %v12444_v2 }
0x65ce   :  { %v15667_v54 = vpop.f32.mrf.mxu1  ;;  %15680 = vmatprep.mubr.msk.f32.mxu0 %vm16211_vm5, %v16210_v44 }
0x65d0   :  { %v12596_v33 = vpop.f32.mrf.mxu1 }
0x65d1   :  { %v12600_v28 = vmul.f32 0.35355338, %v12596_v33 }
0x65d2   :  { %v15677_v42 = vpop.f32.mrf.mxu1 }
0x65d3   :  { %v12601_v19 = vsel %vm7356_vm11, -1e+09, %v12600_v28 }
0x65d4   :  { %v12602_v29 = vsel %vm351_vm6, %v12601_v19, -inf }
0x65d5   :  { %12603 = vmax.xlane.f32.xlu1 %v12602_v29 }
0x65e6   :  { %12930 = vrot.lane.b32.xlu1 %v17837_v13, %s16214_s9 }
0x65ea   :  { %12928 = vrot.lane.b32.xlu1 %v17861_v35, %s16214_s9 }
0x665e   :  { %v12604_v51 = vpop.xlane.xlu1 %12603 }
0x665f   :  { %v12605_v26 = vsub.f32 %v12601_v19, %v12604_v51 }
0x6661   :  { %v12606_v12 = vmul.f32 1.442695, %v12605_v26 }
0x6662   :  { %v12931_v32 = vpop.permute.xlu1 %12930 }
0x6663   :  { %16088 = vpow2.f32 %v12606_v12 }
0x6670   :  { %v16089_v30 = vpop.eup %16088 }
0x6671   :  { %v12608_v0 = vsel %vm351_vm6, %v16089_v30, 0.0 }
0x6672   :  { %12609 = vadd.xlane.f32.xlu0 %v12608_v0 }
0x6688   :  { %12613 = vrot.lane.b32.xlu0 %v17842_v46, %s18181_s25  ;;  %v12929_v46 = vpop.permute.xlu1 %12928 }
0x668d   :  { %v12517_v7 = vpop.f32.mrf.mxu0 }
0x668e   :  { %v17958_v31 = vadd.f32 %v12517_v7, %v12278_v10 }
0x668f   :  { %v15672_v14 = vpop.f32.mrf.mxu0 }
0x66fb   :  { %v12610_v20 = vpop.xlane.xlu0 %12609 }
0x66fc   :  { %16090 = vrcp.f32 %v12610_v20 }
0x66ff   :  { %v12614_v36 = vpop.permute.xlu0 %12613 }
0x6700   :  { %15679 = vmatpush3.msra.mxu0 %v12614_v36 }
0x6701   :  { %15688 = vmatprep.subr.mxu0 %v16210_v44 }
0x6709   :  { %v16091_v16 = vpop.eup %16090 }
0x670a   :  { %v12612_v22 = vmul.f32 %v16091_v16, %v16089_v30 }
0x670c   :  { %15681 = vmatmul.mubr.msk.f32.vlgmr.msra.gmra.mxu0 %vm351_vm6, %v12612_v22 }
0x670d   :  { %15689 = vmatpush3.xpose.msk.msra.mxu0 %vm351_vm6, %v17837_v13  ;;  %15690 = vmatprep.mubr.msk.f32.mxu0 %vm16211_vm5, %v16210_v44 }
0x670e   :  { %15698 = vmatprep.subr.mxu0 %v16210_v44 }
0x6710   :  { %15691 = vmatmul.mubr.msk.f32.vlgmr.msra.gmra.mxu0 %vm351_vm6, %v17861_v35 }
0x6711   :  { %15699 = vmatpush3.xpose.msk.msra.mxu0 %vm351_vm6, %v12931_v32  ;;  %15700 = vmatprep.mubr.msk.f32.mxu0 %vm16211_vm5, %v16210_v44 }
0x6712   :  { %15708 = vmatprep.subr.mxu0 %v16210_v44 }
0x6714   :  { %15701 = vmatmul.mubr.msk.f32.vlgmr.msra.gmra.mxu0 %vm351_vm6, %v12929_v46 }
0x6715   :  { %15709 = vmatpush3.msra.mxu0 %v17905_v60  ;;  %15710 = vmatprep.mubr.msk.f32.mxu0 %vm16211_vm5, %v16210_v44 }
0x6716   :  { %15718 = vmatprep.subr.mxu0 %v16210_v44 }
0x67cc   :  { %v12685_v41 = vpop.f32.mrf.mxu0 }
0x67cd   :  { %15686 = vmatmul.mubr.msk.f32.vlgmr.msra.gmra.mxu1 %vm351_vm6, %v12685_v41 }
0x67ce   :  { %v15682_v6 = vpop.f32.mrf.mxu0  ;;  %15695 = vmatprep.mubr.msk.f32.mxu1 %vm16211_vm5, %v16210_v44 }
0x67d0   :  { %v12835_v4 = vpop.f32.mrf.mxu0 }
0x67d1   :  { %v12839_v45 = vmul.f32 0.35355338, %v12835_v4 }
0x67d2   :  { %v15692_v47 = vpop.f32.mrf.mxu0 }
0x67d3   :  { %v12840_v56 = vsel %vm8317_vm12, -1e+09, %v12839_v45  ;;  %v14423_v45 = vld [vmem:[%s18174_s15 + $0x1] ss:$0 sm:$0xff] }
0x67d4   :  { %v13002_v60 = vpop.f32.mrf.mxu0  ;;  %v12841_v39 = vsel %vm351_vm6, %v12840_v56, -inf }
0x67d5   :  { %v13006_v61 = vmul.f32 0.35355338, %v13002_v60  ;;  %12842 = vmax.xlane.f32.xlu0 %v12841_v39 }
0x67d6   :  { %v15702_v40 = vpop.f32.mrf.mxu0 }
0x67d7   :  { %v13007_v48 = vsel %vm8317_vm12, -1e+09, %v13006_v61 }
0x67d8   :  { %v13008_v1 = vsel %vm351_vm6, %v13007_v48, -inf }
0x67d9   :  { %13009 = vmax.xlane.f32.xlu1 %v13008_v1 }
0x67ea   :  { %12852 = vrot.lane.b32.xlu1 %v17837_v13, %s16213_s5 }
0x67ee   :  { %13243 = vrot.lane.b32.xlu1 %v17837_v13, %s16217_s22 }
0x67f2   :  { %13241 = vrot.lane.b32.xlu1 %v17861_v35, %s16217_s22 }
0x685e   :  { %v12843_v62 = vpop.xlane.xlu0 %12842 }
0x685f   :  { %v12844_v43 = vsub.f32 %v12840_v56, %v12843_v62 }
0x6861   :  { %v12845_v3 = vmul.f32 1.442695, %v12844_v43 }
0x6862   :  { %v13010_v5 = vpop.xlane.xlu1 %13009 }
0x6863   :  { %16092 = vpow2.f32 %v12845_v3  ;;  %v13011_v10 = vsub.f32 %v13007_v48, %v13010_v5 }
0x6865   :  { %v13012_v55 = vmul.f32 1.442695, %v13011_v10 }
0x6866   :  { %v12853_v52 = vpop.permute.xlu1 %12852 }
0x6867   :  { %16094 = vpow2.f32 %v13012_v55  ;;  %15694 = vmatpush3.msra.mxu1 %v12853_v52 }
0x6868   :  { %15703 = vmatprep.subr.mxu1 %v16210_v44 }
0x686a   :  { %v13244_v2 = vpop.permute.xlu1 %13243 }
0x6870   :  { %v16093_v8 = vpop.eup %16092 }
0x6871   :  { %v12847_v49 = vsel %vm351_vm6, %v16093_v8, 0.0 }
0x6872   :  { %12848 = vadd.xlane.f32.xlu0 %v12847_v49 }
0x6874   :  { %v16095_v9 = vpop.eup %16094 }
0x6875   :  { %v13014_v63 = vsel %vm351_vm6, %v16095_v9, 0.0 }
0x6876   :  { %13015 = vadd.xlane.f32.xlu0 %v13014_v63 }
0x688c   :  { %13019 = vrot.lane.b32.xlu0 %v17837_v13, %s16212_s0  ;;  %s16223_s0 = smov [#allocation5]  }
0x688d   :  { %v12758_v57 = vpop.f32.mrf.mxu1  ;;  %s14054_s5 = sshll.u32 %s16223_s0, 4  ;;  %s14055_s5 = int_to_ptr.vmem [resolvable:$true] %s14054_s5 }
0x688e   :  { %v18004_v25 = vadd.f32 %v12758_v57, %v17958_v31  ;;  %s16144_s9 = scalar_lea.vmem %s14055_s5, 256  ;;  %p16149_p6 = scmp.lt.s32.totalorder %s14055_s5, %s14055_s5 }
0x688f   :  { %v15687_v11 = vpop.f32.mrf.mxu1  ;;  %p16145_p5 = scmp.ne.s32.totalorder %s14055_s5, %s16144_s9  ;;  %p16150_p7 = scmp.lt.s32.totalorder %s16144_s9, %s16144_s9 }
0x6890   :  { %v13729_v56 = vadd.f32 %v14423_v45, %v18004_v25 }
0x6891   :  { %p16151_p8 = por %p16150_p7, %p16149_p6 }
0x6893   :  { %p16152_p9 = pnand %p16151_p8, %p16145_p5 }
0x68fb   :  { %v12849_v59 = vpop.xlane.xlu0 %12848 }
0x68fc   :  { %16096 = vrcp.f32 %v12849_v59 }
0x68ff   :  { %v13016_v17 = vpop.xlane.xlu0 %13015 }
0x6900   :  { %16098 = vrcp.f32 %v13016_v17 }
0x6903   :  { %v13020_v21 = vpop.permute.xlu0 %13019 }
0x6909   :  { %v16097_v58 = vpop.eup %16096 }
0x690a   :  { %v12851_v15 = vmul.f32 %v16097_v58, %v16093_v8 }
0x690c   :  { %15696 = vmatmul.mubr.msk.f32.vlgmr.msra.gmra.mxu1 %vm351_vm6, %v12851_v15 }
0x690d   :  { %v16099_v53 = vpop.eup %16098  ;;  %15704 = vmatpush3.msra.mxu1 %v13020_v21  ;;  %15705 = vmatprep.mubr.msk.f32.mxu1 %vm16211_vm5, %v16210_v44 }
0x690e   :  { %v13018_v18 = vmul.f32 %v16099_v53, %v16095_v9  ;;  %15713 = vmatprep.subr.mxu1 %v16210_v44 }
0x6910   :  { %15706 = vmatmul.mubr.msk.f32.vlgmr.msra.gmra.mxu1 %vm351_vm6, %v13018_v18 }
0x6911   :  { %15714 = vmatpush3.msra.mxu1 %v17901_v50  ;;  %15715 = vmatprep.mubr.msk.f32.mxu1 %vm16211_vm5, %v16210_v44  ;;  %v13242_v50 = vpop.permute.xlu1 %13241 }
0x6912   :  { %15723 = vmatprep.subr.mxu1 %v16210_v44 }
0x69cc   :  { %v12924_v38 = vpop.f32.mrf.mxu1 }
0x69cd   :  { %15716 = vmatmul.mubr.msk.f32.vlgmr.msra.gmra.mxu1 %vm351_vm6, %v12924_v38 }
0x69ce   :  { %v15697_v54 = vpop.f32.mrf.mxu1  ;;  %15725 = vmatprep.mubr.msk.f32.mxu1 %vm16211_vm5, %v16210_v44 }
0x69d0   :  { %v13091_v33 = vpop.f32.mrf.mxu1 }
0x69d1   :  { %15711 = vmatmul.mubr.msk.f32.vlgmr.msra.gmra.mxu0 %vm351_vm6, %v13091_v33 }
0x69d2   :  { %15719 = vmatpush3.xpose.msk.msra.mxu0 %vm351_vm6, %v13244_v2  ;;  %v15707_v28 = vpop.f32.mrf.mxu1  ;;  %15720 = vmatprep.mubr.msk.f32.mxu0 %vm16211_vm5, %v16210_v44 }
0x69d3   :  { %15728 = vmatprep.subr.mxu0 %v16210_v44 }
0x69d5   :  { %15721 = vmatmul.mubr.msk.f32.vlgmr.msra.gmra.mxu0 %vm351_vm6, %v13242_v50 }
0x69d6   :  { %15729 = vmatpush3.msra.mxu0 %v17941_v27  ;;  %15730 = vmatprep.mubr.msk.f32.mxu0 %vm16211_vm5, %v16210_v44 }
0x69d7   :  { %15738 = vmatprep.subr.mxu0 %v16210_v44 }
0x6a8d   :  { %v13237_v42 = vpop.f32.mrf.mxu1 }
0x6a8f   :  { %v15717_v19 = vpop.f32.mrf.mxu1 }
0x6a91   :  { %v13164_v29 = vpop.f32.mrf.mxu0 }
0x6a92   :  { %v13238_v51 = vadd.f32 %v13237_v42, %v13164_v29 }
0x6a93   :  { %v15712_v26 = vpop.f32.mrf.mxu0 }
0x6a95   :  { %v13315_v12 = vpop.f32.mrf.mxu0 }
0x6a96   :  { %v13319_v30 = vmul.f32 0.35355338, %v13315_v12 }
0x6a97   :  { %v15722_v0 = vpop.f32.mrf.mxu0 }
0x6a98   :  { %v13320_v7 = vsel %vm8317_vm12, -1e+09, %v13319_v30  ;;  %v14426_v30 = vld [vmem:[%s18175_s13 + $0x1] ss:$0 sm:$0xff] }
0x6a99   :  { %v13321_v31 = vsel %vm351_vm6, %v13320_v7, -inf }
0x6a9a   :  { %13322 = vmax.xlane.f32.xlu0 %v13321_v31  ;;  %v14427_v31 = vld [vmem:[%s18176_s14 + $0x1] ss:$0 sm:$0xff] }
0x6ab0   :  { %13332 = vrot.lane.b32.xlu0 %v17837_v13, %s16216_s18 }
0x6ab4   :  { %13482 = vrot.lane.b32.xlu0 %v17861_v35, %s16220_s1 }
0x6b23   :  { %v13323_v27 = vpop.xlane.xlu0 %13322 }
0x6b24   :  { %v13324_v14 = vsub.f32 %v13320_v7, %v13323_v27 }
0x6b26   :  { %v13325_v20 = vmul.f32 1.442695, %v13324_v14  ;;  %v14431_v14 = vld [vmem:[%s18177_s6 + $0x38] sm:$0xff] }
0x6b27   :  { %v13333_v36 = vpop.permute.xlu0 %13332 }
0x6b28   :  { %16100 = vpow2.f32 %v13325_v20  ;;  %15724 = vmatpush3.msra.mxu1 %v13333_v36  ;;  %v14430_v20 = vld [vmem:[%s18177_s6 + $0x30] sm:$0xff] }
0x6b29   :  { %15733 = vmatprep.subr.mxu1 %v16210_v44 }
0x6b2b   :  { %v13483_v6 = vpop.permute.xlu0 %13482 }
0x6b35   :  { %v16101_v16 = vpop.eup %16100 }
0x6b36   :  { %v13327_v22 = vsel %vm351_vm6, %v16101_v16, 0.0 }
0x6b37   :  { %13328 = vadd.xlane.f32.xlu1 %v13327_v22  ;;  %v14428_v22 = vld [vmem:[%s18177_s6 + $0x20] sm:$0xff] }
0x6b48   :  { %13484 = vrot.lane.b32.xlu1 %v17837_v13, %s16220_s1 }
0x6bc0   :  { %v13329_v32 = vpop.xlane.xlu1 %13328 }
0x6bc1   :  { %16102 = vrcp.f32 %v13329_v32  ;;  %v14440_v32 = vld [vmem:[%s18178_s10 + $0x78] sm:$0xff] }
0x6bc4   :  { %v13485_v41 = vpop.permute.xlu1 %13484 }
0x6bce   :  { %v16103_v46 = vpop.eup %16102 }
0x6bcf   :  { %v13331_v35 = vmul.f32 %v16103_v46, %v16101_v16  ;;  %v14429_v16 = vld [vmem:[%s18177_s6 + $0x28] sm:$0xff]  ;;  %v14439_v46 = vld [vmem:[%s18178_s10 + $0x70] sm:$0xff] }
0x6bd1   :  { %15726 = vmatmul.mubr.msk.f32.vlgmr.msra.gmra.mxu1 %vm351_vm6, %v13331_v35  ;;  %v14438_v35 = vld [vmem:[%s18178_s10 + $0x68] sm:$0xff] }
0x6bd2   :  { %15734 = vmatpush3.xpose.msk.msra.mxu1 %vm351_vm6, %v13485_v41  ;;  %15735 = vmatprep.mubr.msk.f32.mxu1 %vm16211_vm5, %v16210_v44  ;;  %v14437_v41 = vld [vmem:[%s18178_s10 + $0x60] sm:$0xff] }
0x6bd3   :  { %15743 = vmatprep.subr.mxu1 %v16210_v44 }
0x6bd5   :  { %15736 = vmatmul.mubr.msk.f32.vlgmr.msra.gmra.mxu1 %vm351_vm6, %v13483_v6 }
0x6bd6   :  { %15744 = vmatpush3.msra.mxu1 %v17979_v23  ;;  %15745 = vmatprep.mubr.msk.f32.mxu1 %vm16211_vm5, %v16210_v44  ;;  %v18056_v23 = vadd.f32 %v13729_v56, %v17809_v24 }
0x6bd7   :  { %15759 = vmatprep.subr.mxu1 %v14440_v32 }
0x6bd8   :  { %v13737_v1 = vsel %vm193_vm0, %v18056_v23, 0.0 }
0x6c91   :  { %v13404_v4 = vpop.f32.mrf.mxu1 }
0x6c92   :  { %15731 = vmatmul.mubr.msk.f32.vlgmr.msra.gmra.mxu0 %vm351_vm6, %v13404_v4 }
0x6c93   :  { %v15727_v47 = vpop.f32.mrf.mxu1  ;;  %15740 = vmatprep.mubr.msk.f32.mxu0 %vm16211_vm5, %v16210_v44 }
0x6c95   :  { %v13556_v60 = vpop.f32.mrf.mxu1 }
0x6c96   :  { %v13560_v39 = vmul.f32 0.35355338, %v13556_v60 }
0x6c97   :  { %v15737_v61 = vpop.f32.mrf.mxu1 }
0x6c98   :  { %v13561_v40 = vsel %vm8317_vm12, -1e+09, %v13560_v39 }
0x6c99   :  { %v13562_v48 = vsel %vm351_vm6, %v13561_v40, -inf }
0x6c9a   :  { %13563 = vmax.xlane.f32.xlu1 %v13562_v48 }
0x6c9e   :  { %13738 = vadd.xlane.f32.xlu1 %v13737_v1 }
0x6d23   :  { %v13564_v62 = vpop.xlane.xlu1 %13563 }
0x6d24   :  { %v13565_v44 = vsub.f32 %v13561_v40, %v13564_v62 }
0x6d26   :  { %v13566_v43 = vmul.f32 1.442695, %v13565_v44  ;;  %v14436_v44 = vld [vmem:[%s18178_s10 + $0x58] sm:$0xff] }
0x6d27   :  { %v13739_v57 = vpop.xlane.xlu1 %13738 }
0x6d28   :  { %16104 = vpow2.f32 %v13566_v43  ;;  %v13743_v25 = vmul.f32 0.03125, %v13739_v57  ;;  %v14435_v43 = vld [vmem:[%s18178_s10 + $0x50] sm:$0xff] }
0x6d2a   :  { %v13745_v17 = vsub.f32 %v18056_v23, %v13743_v25 }
0x6d2c   :  { %v13747_v53 = vmul.f32 %v13745_v17, %v13745_v17  ;;  %v13777_v0 = vmul.f32 %v14426_v30, %v13745_v17 }
0x6d2e   :  { %v13749_v18 = vsel %vm193_vm0, %v13747_v53, 0.0 }
0x6d35   :  { %v16105_v3 = vpop.eup %16104 }
0x6d36   :  { %v13568_v5 = vsel %vm351_vm6, %v16105_v3, 0.0 }
0x6d37   :  { %13569 = vadd.xlane.f32.xlu0 %v13568_v5  ;;  %v14433_v5 = vld [vmem:[%s18178_s10 + $0x40] sm:$0xff] }
0x6d4d   :  { %13573 = vrot.lane.b32.xlu0 %v17837_v13, %s18181_s25 }
0x6d52   :  { %v13477_v37 = vpop.f32.mrf.mxu0 }
0x6d53   :  { %v13481_v24 = vadd.f32 %v13477_v37, %v13238_v51  ;;  %v14442_v37 = vld [vmem:[%s18179_s2 + $0x1] ss:$0 sm:$0xff] }
0x6d54   :  { %v15732_v10 = vpop.f32.mrf.mxu0 }
0x6dc0   :  { %v13570_v55 = vpop.xlane.xlu0 %13569 }
0x6dc1   :  { %16106 = vrcp.f32 %v13570_v55 }
0x6dc4   :  { %v13574_v52 = vpop.permute.xlu0 %13573 }
0x6dc5   :  { %15739 = vmatpush3.msra.mxu0 %v13574_v52 }
0x6dc6   :  { %15748 = vmatprep.subr.mxu0 %v14431_v14 }
0x6dce   :  { %v16107_v8 = vpop.eup %16106 }
0x6dcf   :  { %v13572_v49 = vmul.f32 %v16107_v8, %v16105_v3  ;;  %v14434_v3 = vld [vmem:[%s18178_s10 + $0x48] sm:$0xff] }
0x6dd1   :  { %15741 = vmatmul.mubr.msk.f32.vlgmr.msra.gmra.mxu0 %vm351_vm6, %v13572_v49 }
0x6dd2   :  { %15749 = vmatpush3.msra.mxu0 %v14431_v14 }
0x6dd3   :  { %15750 = vmatprep.subr.mxu0 %v14430_v20 }
0x6dd4   :  { %15751 = vmatpush3.msra.mxu0 %v14430_v20 }
0x6dd5   :  { %15752 = vmatprep.subr.mxu0 %v14429_v16 }
0x6dd6   :  { %15753 = vmatpush3.msra.mxu0 %v14429_v16  ;;  %v14448_v16 = vld [vmem:[%s16429_s17] ss:$0 sm:$0xff] }
0x6dd7   :  { %15754 = vmatprep.subr.mxu0 %v14428_v22 }
0x6dd8   :  { %15755 = vmatpush3.msra.mxu0 %v14428_v22 }
0x6e91   :  { %v13645_v9 = vpop.f32.mrf.mxu0 }
0x6e92   :  { %15746 = vmatmul.mubr.msk.f32.vlgmr.msra.gmra.mxu1 %vm351_vm6, %v13645_v9  ;;  %v14445_v9 = vld [vmem:[%s18180_s26 + $0x1] ss:$0 sm:$0xff] }
0x6e93   :  { %v15742_v63 = vpop.f32.mrf.mxu0  ;;  %15760 = vmatpush3.msra.mxu1 %v14440_v32 }
0x6e94   :  { %15761 = vmatprep.subr.mxu1 %v14439_v46 }
0x6e95   :  { %15762 = vmatpush3.msra.mxu1 %v14439_v46  ;;  %v14449_v46 = vld [vmem:[#allocation2] ss:$0 sm:$0xff] }
0x6e96   :  { %15763 = vmatprep.subr.mxu1 %v14438_v35 }
0x6e97   :  { %15764 = vmatpush3.msra.mxu1 %v14438_v35 }
0x6e98   :  { %15765 = vmatprep.subr.mxu1 %v14437_v41 }
0x6e99   :  { %15766 = vmatpush3.msra.mxu1 %v14437_v41 }
0x6e9a   :  { %15767 = vmatprep.subr.mxu1 %v14436_v44 }
0x6e9b   :  { %15768 = vmatpush3.msra.mxu1 %v14436_v44 }
0x6e9c   :  { %15769 = vmatprep.subr.mxu1 %v14435_v43 }
0x6e9d   :  { %15770 = vmatpush3.msra.mxu1 %v14435_v43 }
0x6e9e   :  { %15771 = vmatprep.subr.mxu1 %v14434_v3 }
0x6e9f   :  { %15772 = vmatpush3.msra.mxu1 %v14434_v3 }
0x6ea0   :  { %15773 = vmatprep.subr.mxu1 %v14433_v5 }
0x6ea1   :  { %15774 = vmatpush3.msra.mxu1 %v14433_v5 }
0x6f52   :  { %v13718_v11 = vpop.f32.mrf.mxu1 }
0x6f53   :  { %v13722_v59 = vadd.f32 %v13718_v11, %v13481_v24 }
0x6f54   :  { %v15747_v13 = vpop.f32.mrf.mxu1 }
0x6f55   :  { %v13730_v58 = vadd.f32 %v14423_v45, %v13722_v59 }
0x6f57   :  { %v18068_v15 = vadd.f32 %v13730_v58, %v17832_v34 }
0x6f59   :  { %v13740_v21 = vsel %vm193_vm0, %v18068_v15, 0.0 }
0x6f5a   :  { %13741 = vadd.xlane.f32.xlu1 %v13740_v21 }
0x6f5e   :  { %13750 = vadd.xlane.f32.xlu1 %v13749_v18 }
0x6fe3   :  { %v13742_v38 = vpop.xlane.xlu1 %13741 }
0x6fe4   :  { %v13744_v2 = vmul.f32 0.03125, %v13742_v38 }
0x6fe6   :  { %v13746_v54 = vsub.f32 %v18068_v15, %v13744_v2 }
0x6fe7   :  { %v13751_v33 = vpop.xlane.xlu1 %13750 }
0x6fe8   :  { %v13755_v28 = vmul.f32 0.032258064, %v13751_v33  ;;  %v13748_v50 = vmul.f32 %v13746_v54, %v13746_v54  ;;  %v13778_v40 = vmul.f32 %v14426_v30, %v13746_v54 }
0x6fea   :  { %16108 = vrsqrt.f32 %v13755_v28  ;;  %v13752_v34 = vsel %vm193_vm0, %v13748_v50, 0.0  ;;  %vm13759_vm5 = vcmp.eq.f32.partialorder %v13755_v28, inf  ;;  %v13762_v29 = vand.u32 2147483648, %v13755_v28 }
0x6feb   :  { %13753 = vadd.xlane.f32.xlu1 %v13752_v34  ;;  %vm13761_vm6 = vcmp.eq.f32.partialorder %v13755_v28, 0.0 }
0x6ff7   :  { %v16109_v42 = vpop.eup %16108 }
0x6ff8   :  { %v13758_v19 = vmul.f32 %v16109_v42, %v13755_v28 }
0x6ffa   :  { %v13760_v51 = vsel %vm13759_vm5, %v13755_v28, %v13758_v19 }
0x6ffb   :  { %v13763_v26 = vsel %vm13761_vm6, %v13762_v29, %v13760_v51 }
0x6ffc   :  { %v13779_v12 = vadd.f32 1e-06, %v13763_v26 }
0x6ffe   :  { %16110 = vrcp.f32 %v13779_v12 }
0x700b   :  { %v16111_v7 = vpop.eup %16110 }
0x700c   :  { %v13783_v27 = vmul.f32 %v16111_v7, %v13777_v0 }
0x700e   :  { %v13791_v36 = vadd.f32 %v14427_v31, %v13783_v27 }
0x7010   :  { %15756 = vmatprep.mubr.msk.f32.mxu0 %vm193_vm0, %v13791_v36 }
0x7074   :  { %v13754_v6 = vpop.xlane.xlu1 %13753 }
0x7075   :  { %v13756_v4 = vmul.f32 0.032258064, %v13754_v6 }
0x7077   :  { %16112 = vrsqrt.f32 %v13756_v4  ;;  %vm13766_vm11 = vcmp.eq.f32.partialorder %v13756_v4, inf  ;;  %v13769_v56 = vand.u32 2147483648, %v13756_v4  ;;  %vm13768_vm12 = vcmp.eq.f32.partialorder %v13756_v4, 0.0 }
0x7084   :  { %v16113_v45 = vpop.eup %16112 }
0x7085   :  { %v13765_v47 = vmul.f32 %v16113_v45, %v13756_v4 }
0x7087   :  { %v13767_v60 = vsel %vm13766_vm11, %v13756_v4, %v13765_v47 }
0x7088   :  { %v13770_v39 = vsel %vm13768_vm12, %v13769_v56, %v13767_v60 }
0x7089   :  { %v13780_v61 = vadd.f32 1e-06, %v13770_v39 }
0x708b   :  { %16114 = vrcp.f32 %v13780_v61 }
0x7098   :  { %v16115_v48 = vpop.eup %16114 }
0x7099   :  { %v13784_v1 = vmul.f32 %v16115_v48, %v13778_v40 }
0x709b   :  { %v13792_v62 = vadd.f32 %v14427_v31, %v13784_v1 }
0x709d   :  { %15757 = vmatmul.mubr.msk.f32.vlgmr.msra.gmra.mxu0 %vm193_vm0, %v13792_v62 }
0x715d   :  { %v15758_v24 = vpop.f32.mrf.mxu0 }
0x715e   :  { %v13895_v10 = vadd.f32 %v15758_v24, %v14442_v37 }
0x715f   :  { %v13889_v55 = vpop.f32.mrf.mxu0 }
0x7160   :  { %v13890_v52 = vadd.f32 %v14442_v37, %v13889_v55  ;;  %v13899_v49 = vmax.f32 %v13895_v10, 0.0 }
0x7162   :  { %v13898_v8 = vmax.f32 %v13890_v52, 0.0 }
0x7164   :  { %15775 = vmatprep.mubr.msk.f32.mxu1 %vm2450_vm13, %v13898_v8 }
0x7165   :  { %15776 = vmatmul.mubr.msk.f32.vlgmr.msra.gmra.mxu1 %vm2450_vm13, %v13899_v49 }
0x7225   :  { %v15777_v63 = vpop.f32.mrf.mxu1 }
0x7226   :  { %v13984_v57 = vadd.f32 %v15777_v63, %v14445_v9 }
0x7227   :  { %v13978_v25 = vpop.f32.mrf.mxu1 }
0x7228   :  { %v13988_v11 = vadd.f32 %v13984_v57, %v18068_v15  ;;  %v13979_v59 = vadd.f32 %v14445_v9, %v13978_v25 }
0x722a   :  { %v13987_v13 = vadd.f32 %v13979_v59, %v18056_v23  ;;  %v13994_v17 = vsel %vm193_vm0, %v13988_v11, 0.0 }
0x722b   :  { %13995 = vadd.xlane.f32.xlu0 %v13994_v17 }
0x722c   :  { %v13991_v58 = vsel %vm193_vm0, %v13987_v13, 0.0 }
0x722d   :  { %13992 = vadd.xlane.f32.xlu1 %v13991_v58 }
0x72b4   :  { %v13996_v21 = vpop.xlane.xlu0 %13995 }
0x72b5   :  { %v13998_v53 = vmul.f32 0.03125, %v13996_v21 }
0x72b6   :  { %v13993_v18 = vpop.xlane.xlu1 %13992 }
0x72b7   :  { %v13997_v38 = vmul.f32 0.03125, %v13993_v18  ;;  %v14000_v2 = vsub.f32 %v13988_v11, %v13998_v53 }
0x72b9   :  { %v13999_v54 = vsub.f32 %v13987_v13, %v13997_v38  ;;  %v14002_v50 = vmul.f32 %v14000_v2, %v14000_v2  ;;  %v14032_v41 = vmul.f32 %v14448_v16, %v14000_v2 }
0x72bb   :  { %v14001_v33 = vmul.f32 %v13999_v54, %v13999_v54  ;;  %v14006_v15 = vsel %vm193_vm0, %v14002_v50, 0.0  ;;  %v14031_v22 = vmul.f32 %v14448_v16, %v13999_v54 }
0x72bd   :  { %v14003_v28 = vsel %vm193_vm0, %v14001_v33, 0.0 }
0x72be   :  { %14004 = vadd.xlane.f32.xlu1 %v14003_v28 }
0x72c2   :  { %14007 = vadd.xlane.f32.xlu1 %v14006_v15 }
0x7347   :  { %v14005_v23 = vpop.xlane.xlu1 %14004 }
0x7348   :  { %v14009_v34 = vmul.f32 0.032258064, %v14005_v23 }
0x734a   :  { %16116 = vrsqrt.f32 %v14009_v34  ;;  %vm14013_vm13 = vcmp.eq.f32.partialorder %v14009_v34, inf  ;;  %v14016_v26 = vand.u32 2147483648, %v14009_v34  ;;  %vm14015_vm3 = vcmp.eq.f32.partialorder %v14009_v34, 0.0 }
0x734b   :  { %v14008_v42 = vpop.xlane.xlu1 %14007 }
0x734c   :  { %v14010_v19 = vmul.f32 0.032258064, %v14008_v42 }
0x734e   :  { %16118 = vrsqrt.f32 %v14010_v19  ;;  %vm14020_vm4 = vcmp.eq.f32.partialorder %v14010_v19, inf  ;;  %v14023_v27 = vand.u32 2147483648, %v14010_v19  ;;  %vm14022_vm7 = vcmp.eq.f32.partialorder %v14010_v19, 0.0 }
0x7357   :  { %v16117_v29 = vpop.eup %16116 }
0x7358   :  { %v14012_v51 = vmul.f32 %v16117_v29, %v14009_v34 }
0x735a   :  { %v14014_v12 = vsel %vm14013_vm13, %v14009_v34, %v14012_v51 }
0x735b   :  { %v16119_v30 = vpop.eup %16118  ;;  %v14017_v0 = vsel %vm14015_vm3, %v14016_v26, %v14014_v12 }
0x735c   :  { %v14033_v7 = vadd.f32 1e-06, %v14017_v0  ;;  %v14019_v31 = vmul.f32 %v16119_v30, %v14010_v19 }
0x735e   :  { %16120 = vrcp.f32 %v14033_v7  ;;  %v14021_v14 = vsel %vm14020_vm4, %v14010_v19, %v14019_v31 }
0x735f   :  { %v14024_v20 = vsel %vm14022_vm7, %v14023_v27, %v14021_v14 }
0x7360   :  { %v14034_v36 = vadd.f32 1e-06, %v14024_v20 }
0x7362   :  { %16122 = vrcp.f32 %v14034_v36 }
0x736b   :  { %v16121_v32 = vpop.eup %16120 }
0x736c   :  { %v14037_v35 = vmul.f32 %v16121_v32, %v14031_v22 }
0x736e   :  { %v14045_v6 = vadd.f32 %v14449_v46, %v14037_v35 }
0x736f   :  { %v16123_v4 = vpop.eup %16122 }
0x7370   :  { %v14038_v45 = vmul.f32 %v16123_v4, %v14032_v41  ;;  %14047 = vst.msk [vmem:[#allocation5] sm:$0xff] %vm193_vm0, %v14045_v6 }
0x7372   :  { %v14046_v47 = vadd.f32 %v14449_v46, %v14038_v45 }
0x7374   :  { %14048 = vst.msk [vmem:[#allocation5 + $0x8] sm:$0xff] %vm193_vm0, %v14046_v47 }
0x7375   :  { %16155 = shalt.err (!%p16152_p9)
}
0x7376   :  { %s16224_s17 = smov 128   ;;  %s16225_s16 = smov 8  }
0x7377   :  { %14060 = dma.vmem_to_hbm [thread:$0]  %s14055_s5, 256, %s16437_s4, [#allocation4], %s16224_s17, %s16224_s17, %s16225_s16  }
0x7378   :  { %16166 = dma.done.wait [#allocation4], 256  }
0x7379   :  { %16167 = vsyncadd [#allocation4], 4294967040 }
0x737a   :  { %14064 = vsyncpa [#allocation3], 1 }
0x737b   :  { %14065 = vsyncpa [#allocation4], 1 }

</bundles_post_ra>
